<compile_context>
chip_gen: v7x
topology: tpu7x:2x2x1
jax: 0.10.0
libtpu: 0.0.40
codegen_flags: <defaults>
</compile_context>

<pallas_src>
import functools
import math

import jax
import jax.numpy as jnp
from jax.experimental import pallas as pl
from jax.experimental.pallas import tpu as pltpu

LANE = 128


def _round_up(x, m):
    return ((x + m - 1) // m) * m


def _vmem_limit_bytes():
    # Derive scoped-VMEM limit per generation instead of hard-coding 32 MiB.
    try:
        cap = int(pltpu.get_tpu_info().vmem_capacity_bytes)
        return int(min(cap * 3 // 4, 96 * 1024 * 1024))
    except Exception:  # interpret mode / older jax: safe fallback
        return 32 * 1024 * 1024


# ----------------------------- Pallas kernels -----------------------------

def _conv_kernel(x_ref, w_ref, b_ref, *rest, taps, Ho, Wo_eff, act, has_res,
                 ca, sa):
    """Direct conv: out = [ca*res + sa*] (sum_t patch_t @ W_t + bias).

    x_ref : (1, G, Hs, Ws, Cin_p) bf16  (G = stride*stride space-to-depth groups)
    w_ref : (T, Cin_p, bn) bf16         (pre-scaled taps)
    b_ref : (1, bn) f32
    r_ref : (1, M_eff, bn) bf16         (optional residual, carried layout)
    o_ref : (1, M_eff, bn) bf16
    xf_ref: (G, Hs, Ws, Cin_p) f32 VMEM scratch (relu'd, upcast input window)
    acc   : (M_eff, bn) f32 VMEM scratch
    """
    if has_res:
        r_ref, o_ref, xf_ref, acc_ref = rest
    else:
        o_ref, xf_ref, acc_ref = rest

    # One bulk bf16->f32 upcast (+ fused input ReLU) of the whole window.
    xv = x_ref[0].astype(jnp.float32)
    if act:
        xv = jnp.maximum(xv, 0.0)
    xf_ref[...] = xv

    m = Ho * Wo_eff
    cin = xf_ref.shape[-1]
    for t, (g, qi, qj) in enumerate(taps):
        # Unit-stride shifted window of the (space-to-depth'd) input.
        patch = xf_ref[g, qi:qi + Ho, qj:qj + Wo_eff, :]      # (Ho, Wo_eff, Cin_p)
        a = patch.reshape(m, cin).astype(jnp.bfloat16)        # aligned merge (Wo_eff % 8 == 0)
        contrib = jnp.dot(a, w_ref[t], preferred_element_type=jnp.float32)
        if t == 0:
            acc_ref[...] = contrib            # no zero-init pass needed
        else:
            acc_ref[...] += contrib

    out = acc_ref[...] + b_ref[...]
    if has_res:
        out = ca * r_ref[0].astype(jnp.float32) + sa * out
    o_ref[0] = out.astype(o_ref.dtype)


def _head_kernel(x_ref, w_ref, b_ref, o_ref, *, inv_hw):
    # (BB, HW, Cp) bf16 -> relu -> mean over HW -> (BB, Cp) @ (Cp, NCp) + bias
    x = jnp.maximum(x_ref[...].astype(jnp.float32), 0.0)
    pooled = jnp.sum(x, axis=1) * inv_hw
    o_ref[...] = jnp.dot(pooled, w_ref[...],
                         preferred_element_type=jnp.float32) + b_ref[...]


# ----------------------------- conv wrapper -----------------------------

def conv2d_pallas(x_flat, H, W, W_eff, wt, b, ksize, stride, padding,
                  act=False, residual=None, ca=1.0, sa=1.0):
    """Conv on a carried (N, H*W_eff, Cin_p) bf16 layout; returns same layout.

    wt: (K*K, Cin_p, Cout_p) bf16 pre-scaled by 1/sqrt(Cin*K*K); b: (1, Cout_p) f32.
    Returns (out_flat (N, Ho*Wo_eff, Cout_p) bf16, Ho, Wo, Wo_eff).
    """
    N = x_flat.shape[0]
    cin_p = x_flat.shape[-1]
    T, _, cout_p = wt.shape
    K, s = ksize, stride

    x = x_flat.reshape(N, H, W_eff, cin_p)
    if W_eff != W:
        x = x[:, :, :W, :]              # drop alignment-garbage columns

    Ho = (H + 2 * padding - K) // s + 1
    Wo = (W + 2 * padding - K) // s + 1
    Wo_eff = _round_up(Wo, 8)           # keep in-kernel (Ho,Wo_eff,C)->(M,C) merges tile-aligned
    Hp = _round_up(max(H + 2 * padding, (Ho - 1) * s + K), s)
    Wp = _round_up(max(W + 2 * padding, (Wo_eff - 1) * s + K), s)
    xp = jnp.pad(x, ((0, 0), (padding, Hp - H - padding),
                     (padding, Wp - W - padding), (0, 0)))

    if s > 1:
        # Space-to-depth: every tap of a strided conv becomes a contiguous window.
        Hs, Ws = Hp // s, Wp // s
        x5 = xp.reshape(N, Hs, s, Ws, s, cin_p).transpose(0, 2, 4, 1, 3, 5)
        x5 = x5.reshape(N, s * s, Hs, Ws, cin_p)
    else:
        Hs, Ws = Hp, Wp
        x5 = xp.reshape(N, 1, Hs, Ws, cin_p)
    G = x5.shape[1]

    taps = tuple(((ki % s) * s + (kj % s), ki // s, kj // s)
                 for ki in range(K) for kj in range(K))
    M_eff = Ho * Wo_eff

    bn = 256 if cout_p % 256 == 0 else 128      # full 256-wide MXU tiles when possible
    grid = (N, cout_p // bn)

    in_specs = [
        pl.BlockSpec((1, G, Hs, Ws, cin_p), lambda bi, j: (bi, 0, 0, 0, 0)),
        pl.BlockSpec((T, cin_p, bn), lambda bi, j: (0, 0, j)),
        pl.BlockSpec((1, bn), lambda bi, j: (0, j)),
    ]
    args = [x5, wt, b]

    has_res = residual is not None
    if has_res:
        assert residual.shape == (N, M_eff, cout_p), (residual.shape,
                                                      (N, M_eff, cout_p))
        in_specs.append(pl.BlockSpec((1, M_eff, bn), lambda bi, j: (bi, 0, j)))
        args.append(residual.astype(jnp.bfloat16))

    out_flat = pl.pallas_call(
        functools.partial(_conv_kernel, taps=taps, Ho=Ho, Wo_eff=Wo_eff,
                          act=act, has_res=has_res, ca=float(ca), sa=float(sa)),
        out_shape=jax.ShapeDtypeStruct((N, M_eff, cout_p), jnp.bfloat16),
        grid_spec=pltpu.PrefetchScalarGridSpec(
            num_scalar_prefetch=0,
            grid=grid,
            in_specs=in_specs,
            out_specs=pl.BlockSpec((1, M_eff, bn), lambda bi, j: (bi, 0, j)),
            scratch_shapes=[pltpu.VMEM((G, Hs, Ws, cin_p), jnp.float32),
                            pltpu.VMEM((M_eff, bn), jnp.float32)],
        ),
        compiler_params=pltpu.CompilerParams(
            dimension_semantics=("parallel", "parallel"),
            vmem_limit_bytes=_vmem_limit_bytes(),
        ),
    )(*args)
    return out_flat, Ho, Wo, Wo_eff


# ----------------------------- head wrapper -----------------------------

def head_pallas(x_flat, H, W, W_eff, wl, bl, num_classes):
    """relu -> spatial mean -> linear(weight already /h) + bias, bf16 input."""
    N, _, cp = x_flat.shape
    x = x_flat.reshape(N, H, W_eff, cp)
    if W_eff != W:
        x = x[:, :, :W, :]
    HW = H * W
    xh = x.reshape(N, HW, cp)

    BB = 8                               # batch rows per grid step (8-aligned store)
    Np = _round_up(N, BB)
    if Np != N:
        xh = jnp.pad(xh, ((0, Np - N), (0, 0), (0, 0)))
    ncp = wl.shape[1]

    out = pl.pallas_call(
        functools.partial(_head_kernel, inv_hw=1.0 / HW),
        out_shape=jax.ShapeDtypeStruct((Np, ncp), jnp.float32),
        grid_spec=pltpu.PrefetchScalarGridSpec(
            num_scalar_prefetch=0,
            grid=(Np // BB,),
            in_specs=[pl.BlockSpec((BB, HW, cp), lambda i: (i, 0, 0)),
                      pl.BlockSpec((cp, ncp), lambda i: (0, 0)),
                      pl.BlockSpec((1, ncp), lambda i: (0, 0))],
            out_specs=pl.BlockSpec((BB, ncp), lambda i: (i, 0)),
        ),
        compiler_params=pltpu.CompilerParams(
            dimension_semantics=("parallel",),
            vmem_limit_bytes=_vmem_limit_bytes(),
        ),
    )(xh, wl, bl)
    return out[:N, :num_classes]


# ----------------------------- parameter init -----------------------------

def _prep_conv(key, cin, cout, k):
    """Kernel-ready conv params: pre-scaled, pre-transposed, padded, bf16."""
    w = jax.random.normal(key, (cout, cin, k, k), jnp.float32)   # ~ torch.randn
    scale = 1.0 / math.sqrt(cin * k * k)                         # F.conv2d(x, w/sqrt(fan_in))
    cin_p, cout_p = _round_up(cin, LANE), _round_up(cout, LANE)
    wt = jnp.transpose(w, (2, 3, 1, 0)).reshape(k * k, cin, cout) * scale
    wt = jnp.pad(wt, ((0, 0), (0, cin_p - cin),
                      (0, cout_p - cout))).astype(jnp.bfloat16)
    return {"wt": wt, "b": jnp.zeros((1, cout_p), jnp.float32), "k": k}


def init_wide_resnet(key, d, depth, h, num_classes):
    assert depth % 6 == 4, "Wide-resnet depth should be 6n+4"
    n = (depth - 4) // 6
    stages = [16, 16 * h, 32 * h, 64 * h]
    keys = iter(jax.random.split(key, 4 + 9 * n + 8))

    params = {"conv1": _prep_conv(next(keys), d, stages[0], 3)}
    in_planes = stages[0]
    for li, (planes, stride) in enumerate(
            [(stages[1], 1), (stages[2], 2), (stages[3], 2)], start=1):
        blocks = []
        for s in [stride] + [1] * (n - 1):
            blk = {"conv1": _prep_conv(next(keys), in_planes, planes, 3),
                   "conv2": _prep_conv(next(keys), planes, planes, 3),
                   "stride": s}
            if s != 1 or in_planes != planes:
                blk["shortcut"] = _prep_conv(next(keys), in_planes, planes, 1)
            blocks.append(blk)
            in_planes = planes
        params[f"layer{li}"] = blocks

    C = stages[3]
    lw = jax.random.normal(next(keys), (num_classes, C), jnp.float32)
    cp, ncp = _round_up(C, LANE), _round_up(num_classes, LANE)
    # PyTorch: F.linear(out, linear / h, bias) with h = linear.size(1) = C.
    params["linear_wt"] = jnp.pad((lw / float(C)).T,
                                  ((0, cp - C), (0, ncp - num_classes))
                                  ).astype(jnp.float32)
    params["linear_b"] = jnp.zeros((1, ncp), jnp.float32)
    params["num_classes"] = num_classes
    return params


# ----------------------------- forward pass -----------------------------

def wide_resnet_forward(params, x_nchw, mix_angle=45.0):
    ang = mix_angle * math.pi / 180.0
    ca, sa = math.cos(ang), math.sin(ang)

    N, d, H, W = x_nchw.shape
    cp = _round_up(d, LANE)
    x = jnp.transpose(x_nchw, (0, 2, 3, 1)).astype(jnp.bfloat16)
    x = jnp.pad(x, ((0, 0), (0, 0), (0, 0), (0, cp - d)))
    state = (x.reshape(N, H * W, cp), H, W, W)   # (flat bf16, H, W, W_eff)

    def apply_conv(st, cparams, stride, padding, act=False, residual=None,
                   ca_=1.0, sa_=1.0):
        xf, h_, w_, w_eff = st
        out, ho, wo, wo_eff = conv2d_pallas(
            xf, h_, w_, w_eff, cparams["wt"], cparams["b"], cparams["k"],
            stride, padding, act=act, residual=residual, ca=ca_, sa=sa_)
        return (out, ho, wo, wo_eff)

    state = apply_conv(state, params["conv1"], 1, 1, act=False)

    for li in (1, 2, 3):
        for blk in params[f"layer{li}"]:
            s = blk["stride"]
            x_in = state
            h1 = apply_conv(x_in, blk["conv1"], 1, 1, act=True)
            if "shortcut" in blk:
                cut = apply_conv(x_in, blk["shortcut"], s, 0, act=False)
            else:
                cut = x_in                       # identity shortcut (same layout)
            state = apply_conv(h1, blk["conv2"], s, 1, act=True,
                               residual=cut[0], ca_=ca, sa_=sa)

    logits = head_pallas(state[0], state[1], state[2], state[3],
                         params["linear_wt"], params["linear_b"],
                         params["num_classes"])
    if params["num_classes"] == 1:
        logits = logits.reshape(-1)
    return logits


# ----------------------------- main -----------------------------

if __name__ == "__main__":
    key = jax.random.PRNGKey(0)
    kp, kx = jax.random.split(key)

    # Wide_ResNet(d=4, depth=10, h=1, act=relu, num_classes=10)
    d, depth, widen, num_classes = 4, 10, 1, 10
    params = init_wide_resnet(kp, d, depth, widen, num_classes)

    x = jax.random.normal(kx, (2, d, 16, 16), jnp.float32)  # NCHW like PyTorch

    fwd = jax.jit(lambda inp: wide_resnet_forward(params, inp))
    out = fwd(x)
    jax.block_until_ready(out)
    assert out.shape == (2, num_classes), out.shape
    print("KERNEL_OK")
</pallas_src>

<mosaic_0001>
module attributes {stable_mosaic.version = 11 : i64} {
  func.func @_conv_kernel(%arg0: i32, %arg1: i32, %arg2: memref<1x1x18x18x128xbf16, #tpu.memory_space<vmem>>, %arg3: memref<9x128x128xbf16, #tpu.memory_space<vmem>>, %arg4: memref<1x128xf32, #tpu.memory_space<vmem>>, %arg5: memref<1x256x128xbf16, #tpu.memory_space<vmem>>, %arg6: memref<1x18x18x128xf32, #tpu.memory_space<vmem>>, %arg7: memref<256x128xf32, #tpu.memory_space<vmem>>) attributes {dimension_semantics = [#tpu.dimension_semantics<parallel>, #tpu.dimension_semantics<parallel>], iteration_bounds = array<i64: 2, 1>, scalar_prefetch = 0 : i64, scratch_operands = 2 : i64, tpu.core_type = #tpu.core_type<tc>, window_params = [{transform_indices = @transform_0, window_bounds = array<i64: 1, 1, 18, 18, 128>}, {transform_indices = @transform_1, window_bounds = array<i64: 9, 128, 128>}, {transform_indices = @transform_2, window_bounds = array<i64: 1, 128>}, {transform_indices = @transform_3, window_bounds = array<i64: 1, 256, 128>}]} {
    %c0 = arith.constant 0 : index
    %c0_0 = arith.constant 0 : index
    %c0_1 = arith.constant 0 : index
    %c0_2 = arith.constant 0 : index
    %c0_3 = arith.constant 0 : index
    %0 = vector.load %arg2[%c0, %c0_0, %c0_1, %c0_2, %c0_3] : memref<1x1x18x18x128xbf16, #tpu.memory_space<vmem>>, vector<1x1x18x18x128xbf16>
    %1 = vector.shape_cast %0 : vector<1x1x18x18x128xbf16> to vector<1x18x18x128xbf16>
    %2 = arith.extf %1 : vector<1x18x18x128xbf16> to vector<1x18x18x128xf32>
    %c0_4 = arith.constant 0 : index
    %c0_5 = arith.constant 0 : index
    %c0_6 = arith.constant 0 : index
    %c0_7 = arith.constant 0 : index
    %3 = vector.load %arg6[%c0_4, %c0_5, %c0_6, %c0_7] : memref<1x18x18x128xf32, #tpu.memory_space<vmem>>, vector<1x18x18x128xf32>
    tpu.vector_store %arg6[%c0_4, %c0_5, %c0_6, %c0_7], %2 {strides = array<i32>} : memref<1x18x18x128xf32, #tpu.memory_space<vmem>>, vector<1x18x18x128xf32>,
    %c0_8 = arith.constant 0 : index
    %c0_9 = arith.constant 0 : index
    %c0_10 = arith.constant 0 : index
    %c0_11 = arith.constant 0 : index
    %4 = vector.load %arg6[%c0_8, %c0_9, %c0_10, %c0_11] : memref<1x18x18x128xf32, #tpu.memory_space<vmem>>, vector<1x16x16x128xf32>
    %5 = vector.shape_cast %4 : vector<1x16x16x128xf32> to vector<16x16x128xf32>
    %6 = vector.shape_cast %5 : vector<16x16x128xf32> to vector<256x128xf32>
    %7 = arith.truncf %6 : vector<256x128xf32> to vector<256x128xbf16>
    %c0_12 = arith.constant 0 : index
    %c0_13 = arith.constant 0 : index
    %c0_14 = arith.constant 0 : index
    %8 = vector.load %arg3[%c0_12, %c0_13, %c0_14] : memref<9x128x128xbf16, #tpu.memory_space<vmem>>, vector<1x128x128xbf16>
    %9 = vector.shape_cast %8 : vector<1x128x128xbf16> to vector<128x128xbf16>
    %cst = arith.constant dense<0.000000e+00> : vector<256x128xf32>
    %10 = tpu.matmul %7, %9, %cst {dimension_numbers = #tpu.dot_dimension_numbers<[1], [0], [0], [1], [0, 0, 1, 1], [], []>} : vector<256x128xbf16>, vector<128x128xbf16>, vector<256x128xf32> -> vector<256x128xf32>
    %c0_15 = arith.constant 0 : index
    %c0_16 = arith.constant 0 : index
    %11 = vector.load %arg7[%c0_15, %c0_16] : memref<256x128xf32, #tpu.memory_space<vmem>>, vector<256x128xf32>
    tpu.vector_store %arg7[%c0_15, %c0_16], %10 {strides = array<i32>} : memref<256x128xf32, #tpu.memory_space<vmem>>, vector<256x128xf32>,
    %c0_17 = arith.constant 0 : index
    %c0_18 = arith.constant 0 : index
    %c1 = arith.constant 1 : index
    %c0_19 = arith.constant 0 : index
    %12 = vector.load %arg6[%c0_17, %c0_18, %c1, %c0_19] : memref<1x18x18x128xf32, #tpu.memory_space<vmem>>, vector<1x16x16x128xf32>
    %13 = vector.shape_cast %12 : vector<1x16x16x128xf32> to vector<16x16x128xf32>
    %14 = vector.shape_cast %13 : vector<16x16x128xf32> to vector<256x128xf32>
    %15 = arith.truncf %14 : vector<256x128xf32> to vector<256x128xbf16>
    %c1_20 = arith.constant 1 : index
    %c0_21 = arith.constant 0 : index
    %c0_22 = arith.constant 0 : index
    %16 = vector.load %arg3[%c1_20, %c0_21, %c0_22] : memref<9x128x128xbf16, #tpu.memory_space<vmem>>, vector<1x128x128xbf16>
    %17 = vector.shape_cast %16 : vector<1x128x128xbf16> to vector<128x128xbf16>
    %cst_23 = arith.constant dense<0.000000e+00> : vector<256x128xf32>
    %18 = tpu.matmul %15, %17, %cst_23 {dimension_numbers = #tpu.dot_dimension_numbers<[1], [0], [0], [1], [0, 0, 1, 1], [], []>} : vector<256x128xbf16>, vector<128x128xbf16>, vector<256x128xf32> -> vector<256x128xf32>
    %c0_24 = arith.constant 0 : index
    %c0_25 = arith.constant 0 : index
    %19 = vector.load %arg7[%c0_24, %c0_25] : memref<256x128xf32, #tpu.memory_space<vmem>>, vector<256x128xf32>
    %20 = arith.addf %19, %18 : vector<256x128xf32>
    %c0_26 = arith.constant 0 : index
    %c0_27 = arith.constant 0 : index
    %21 = vector.load %arg7[%c0_26, %c0_27] : memref<256x128xf32, #tpu.memory_space<vmem>>, vector<256x128xf32>
    tpu.vector_store %arg7[%c0_26, %c0_27], %20 {strides = array<i32>} : memref<256x128xf32, #tpu.memory_space<vmem>>, vector<256x128xf32>,
    %c0_28 = arith.constant 0 : index
    %c0_29 = arith.constant 0 : index
    %c2 = arith.constant 2 : index
    %c0_30 = arith.constant 0 : index
    %22 = vector.load %arg6[%c0_28, %c0_29, %c2, %c0_30] : memref<1x18x18x128xf32, #tpu.memory_space<vmem>>, vector<1x16x16x128xf32>
    %23 = vector.shape_cast %22 : vector<1x16x16x128xf32> to vector<16x16x128xf32>
    %24 = vector.shape_cast %23 : vector<16x16x128xf32> to vector<256x128xf32>
    %25 = arith.truncf %24 : vector<256x128xf32> to vector<256x128xbf16>
    %c2_31 = arith.constant 2 : index
    %c0_32 = arith.constant 0 : index
    %c0_33 = arith.constant 0 : index
    %26 = vector.load %arg3[%c2_31, %c0_32, %c0_33] : memref<9x128x128xbf16, #tpu.memory_space<vmem>>, vector<1x128x128xbf16>
    %27 = vector.shape_cast %26 : vector<1x128x128xbf16> to vector<128x128xbf16>
    %cst_34 = arith.constant dense<0.000000e+00> : vector<256x128xf32>
    %28 = tpu.matmul %25, %27, %cst_34 {dimension_numbers = #tpu.dot_dimension_numbers<[1], [0], [0], [1], [0, 0, 1, 1], [], []>} : vector<256x128xbf16>, vector<128x128xbf16>, vector<256x128xf32> -> vector<256x128xf32>
    %c0_35 = arith.constant 0 : index
    %c0_36 = arith.constant 0 : index
    %29 = vector.load %arg7[%c0_35, %c0_36] : memref<256x128xf32, #tpu.memory_space<vmem>>, vector<256x128xf32>
    %30 = arith.addf %29, %28 : vector<256x128xf32>
    %c0_37 = arith.constant 0 : index
    %c0_38 = arith.constant 0 : index
    %31 = vector.load %arg7[%c0_37, %c0_38] : memref<256x128xf32, #tpu.memory_space<vmem>>, vector<256x128xf32>
    tpu.vector_store %arg7[%c0_37, %c0_38], %30 {strides = array<i32>} : memref<256x128xf32, #tpu.memory_space<vmem>>, vector<256x128xf32>,
    %c0_39 = arith.constant 0 : index
    %c1_40 = arith.constant 1 : index
    %c0_41 = arith.constant 0 : index
    %c0_42 = arith.constant 0 : index
    %32 = vector.load %arg6[%c0_39, %c1_40, %c0_41, %c0_42] : memref<1x18x18x128xf32, #tpu.memory_space<vmem>>, vector<1x16x16x128xf32>
    %33 = vector.shape_cast %32 : vector<1x16x16x128xf32> to vector<16x16x128xf32>
    %34 = vector.shape_cast %33 : vector<16x16x128xf32> to vector<256x128xf32>
    %35 = arith.truncf %34 : vector<256x128xf32> to vector<256x128xbf16>
    %c3 = arith.constant 3 : index
    %c0_43 = arith.constant 0 : index
    %c0_44 = arith.constant 0 : index
    %36 = vector.load %arg3[%c3, %c0_43, %c0_44] : memref<9x128x128xbf16, #tpu.memory_space<vmem>>, vector<1x128x128xbf16>
    %37 = vector.shape_cast %36 : vector<1x128x128xbf16> to vector<128x128xbf16>
    %cst_45 = arith.constant dense<0.000000e+00> : vector<256x128xf32>
    %38 = tpu.matmul %35, %37, %cst_45 {dimension_numbers = #tpu.dot_dimension_numbers<[1], [0], [0], [1], [0, 0, 1, 1], [], []>} : vector<256x128xbf16>, vector<128x128xbf16>, vector<256x128xf32> -> vector<256x128xf32>
    %c0_46 = arith.constant 0 : index
    %c0_47 = arith.constant 0 : index
    %39 = vector.load %arg7[%c0_46, %c0_47] : memref<256x128xf32, #tpu.memory_space<vmem>>, vector<256x128xf32>
    %40 = arith.addf %39, %38 : vector<256x128xf32>
    %c0_48 = arith.constant 0 : index
    %c0_49 = arith.constant 0 : index
    %41 = vector.load %arg7[%c0_48, %c0_49] : memref<256x128xf32, #tpu.memory_space<vmem>>, vector<256x128xf32>
    tpu.vector_store %arg7[%c0_48, %c0_49], %40 {strides = array<i32>} : memref<256x128xf32, #tpu.memory_space<vmem>>, vector<256x128xf32>,
    %c0_50 = arith.constant 0 : index
    %c1_51 = arith.constant 1 : index
    %c1_52 = arith.constant 1 : index
    %c0_53 = arith.constant 0 : index
    %42 = vector.load %arg6[%c0_50, %c1_51, %c1_52, %c0_53] : memref<1x18x18x128xf32, #tpu.memory_space<vmem>>, vector<1x16x16x128xf32>
    %43 = vector.shape_cast %42 : vector<1x16x16x128xf32> to vector<16x16x128xf32>
    %44 = vector.shape_cast %43 : vector<16x16x128xf32> to vector<256x128xf32>
    %45 = arith.truncf %44 : vector<256x128xf32> to vector<256x128xbf16>
    %c4 = arith.constant 4 : index
    %c0_54 = arith.constant 0 : index
    %c0_55 = arith.constant 0 : index
    %46 = vector.load %arg3[%c4, %c0_54, %c0_55] : memref<9x128x128xbf16, #tpu.memory_space<vmem>>, vector<1x128x128xbf16>
    %47 = vector.shape_cast %46 : vector<1x128x128xbf16> to vector<128x128xbf16>
    %cst_56 = arith.constant dense<0.000000e+00> : vector<256x128xf32>
    %48 = tpu.matmul %45, %47, %cst_56 {dimension_numbers = #tpu.dot_dimension_numbers<[1], [0], [0], [1], [0, 0, 1, 1], [], []>} : vector<256x128xbf16>, vector<128x128xbf16>, vector<256x128xf32> -> vector<256x128xf32>
    %c0_57 = arith.constant 0 : index
    %c0_58 = arith.constant 0 : index
    %49 = vector.load %arg7[%c0_57, %c0_58] : memref<256x128xf32, #tpu.memory_space<vmem>>, vector<256x128xf32>
    %50 = arith.addf %49, %48 : vector<256x128xf32>
    %c0_59 = arith.constant 0 : index
    %c0_60 = arith.constant 0 : index
    %51 = vector.load %arg7[%c0_59, %c0_60] : memref<256x128xf32, #tpu.memory_space<vmem>>, vector<256x128xf32>
    tpu.vector_store %arg7[%c0_59, %c0_60], %50 {strides = array<i32>} : memref<256x128xf32, #tpu.memory_space<vmem>>, vector<256x128xf32>,
    %c0_61 = arith.constant 0 : index
    %c1_62 = arith.constant 1 : index
    %c2_63 = arith.constant 2 : index
    %c0_64 = arith.constant 0 : index
    %52 = vector.load %arg6[%c0_61, %c1_62, %c2_63, %c0_64] : memref<1x18x18x128xf32, #tpu.memory_space<vmem>>, vector<1x16x16x128xf32>
    %53 = vector.shape_cast %52 : vector<1x16x16x128xf32> to vector<16x16x128xf32>
    %54 = vector.shape_cast %53 : vector<16x16x128xf32> to vector<256x128xf32>
    %55 = arith.truncf %54 : vector<256x128xf32> to vector<256x128xbf16>
    %c5 = arith.constant 5 : index
    %c0_65 = arith.constant 0 : index
    %c0_66 = arith.constant 0 : index
    %56 = vector.load %arg3[%c5, %c0_65, %c0_66] : memref<9x128x128xbf16, #tpu.memory_space<vmem>>, vector<1x128x128xbf16>
    %57 = vector.shape_cast %56 : vector<1x128x128xbf16> to vector<128x128xbf16>
    %cst_67 = arith.constant dense<0.000000e+00> : vector<256x128xf32>
    %58 = tpu.matmul %55, %57, %cst_67 {dimension_numbers = #tpu.dot_dimension_numbers<[1], [0], [0], [1], [0, 0, 1, 1], [], []>} : vector<256x128xbf16>, vector<128x128xbf16>, vector<256x128xf32> -> vector<256x128xf32>
    %c0_68 = arith.constant 0 : index
    %c0_69 = arith.constant 0 : index
    %59 = vector.load %arg7[%c0_68, %c0_69] : memref<256x128xf32, #tpu.memory_space<vmem>>, vector<256x128xf32>
    %60 = arith.addf %59, %58 : vector<256x128xf32>
    %c0_70 = arith.constant 0 : index
    %c0_71 = arith.constant 0 : index
    %61 = vector.load %arg7[%c0_70, %c0_71] : memref<256x128xf32, #tpu.memory_space<vmem>>, vector<256x128xf32>
    tpu.vector_store %arg7[%c0_70, %c0_71], %60 {strides = array<i32>} : memref<256x128xf32, #tpu.memory_space<vmem>>, vector<256x128xf32>,
    %c0_72 = arith.constant 0 : index
    %c2_73 = arith.constant 2 : index
    %c0_74 = arith.constant 0 : index
    %c0_75 = arith.constant 0 : index
    %62 = vector.load %arg6[%c0_72, %c2_73, %c0_74, %c0_75] : memref<1x18x18x128xf32, #tpu.memory_space<vmem>>, vector<1x16x16x128xf32>
    %63 = vector.shape_cast %62 : vector<1x16x16x128xf32> to vector<16x16x128xf32>
    %64 = vector.shape_cast %63 : vector<16x16x128xf32> to vector<256x128xf32>
    %65 = arith.truncf %64 : vector<256x128xf32> to vector<256x128xbf16>
    %c6 = arith.constant 6 : index
    %c0_76 = arith.constant 0 : index
    %c0_77 = arith.constant 0 : index
    %66 = vector.load %arg3[%c6, %c0_76, %c0_77] : memref<9x128x128xbf16, #tpu.memory_space<vmem>>, vector<1x128x128xbf16>
    %67 = vector.shape_cast %66 : vector<1x128x128xbf16> to vector<128x128xbf16>
    %cst_78 = arith.constant dense<0.000000e+00> : vector<256x128xf32>
    %68 = tpu.matmul %65, %67, %cst_78 {dimension_numbers = #tpu.dot_dimension_numbers<[1], [0], [0], [1], [0, 0, 1, 1], [], []>} : vector<256x128xbf16>, vector<128x128xbf16>, vector<256x128xf32> -> vector<256x128xf32>
    %c0_79 = arith.constant 0 : index
    %c0_80 = arith.constant 0 : index
    %69 = vector.load %arg7[%c0_79, %c0_80] : memref<256x128xf32, #tpu.memory_space<vmem>>, vector<256x128xf32>
    %70 = arith.addf %69, %68 : vector<256x128xf32>
    %c0_81 = arith.constant 0 : index
    %c0_82 = arith.constant 0 : index
    %71 = vector.load %arg7[%c0_81, %c0_82] : memref<256x128xf32, #tpu.memory_space<vmem>>, vector<256x128xf32>
    tpu.vector_store %arg7[%c0_81, %c0_82], %70 {strides = array<i32>} : memref<256x128xf32, #tpu.memory_space<vmem>>, vector<256x128xf32>,
    %c0_83 = arith.constant 0 : index
    %c2_84 = arith.constant 2 : index
    %c1_85 = arith.constant 1 : index
    %c0_86 = arith.constant 0 : index
    %72 = vector.load %arg6[%c0_83, %c2_84, %c1_85, %c0_86] : memref<1x18x18x128xf32, #tpu.memory_space<vmem>>, vector<1x16x16x128xf32>
    %73 = vector.shape_cast %72 : vector<1x16x16x128xf32> to vector<16x16x128xf32>
    %74 = vector.shape_cast %73 : vector<16x16x128xf32> to vector<256x128xf32>
    %75 = arith.truncf %74 : vector<256x128xf32> to vector<256x128xbf16>
    %c7 = arith.constant 7 : index
    %c0_87 = arith.constant 0 : index
    %c0_88 = arith.constant 0 : index
    %76 = vector.load %arg3[%c7, %c0_87, %c0_88] : memref<9x128x128xbf16, #tpu.memory_space<vmem>>, vector<1x128x128xbf16>
    %77 = vector.shape_cast %76 : vector<1x128x128xbf16> to vector<128x128xbf16>
    %cst_89 = arith.constant dense<0.000000e+00> : vector<256x128xf32>
    %78 = tpu.matmul %75, %77, %cst_89 {dimension_numbers = #tpu.dot_dimension_numbers<[1], [0], [0], [1], [0, 0, 1, 1], [], []>} : vector<256x128xbf16>, vector<128x128xbf16>, vector<256x128xf32> -> vector<256x128xf32>
    %c0_90 = arith.constant 0 : index
    %c0_91 = arith.constant 0 : index
    %79 = vector.load %arg7[%c0_90, %c0_91] : memref<256x128xf32, #tpu.memory_space<vmem>>, vector<256x128xf32>
    %80 = arith.addf %79, %78 : vector<256x128xf32>
    %c0_92 = arith.constant 0 : index
    %c0_93 = arith.constant 0 : index
    %81 = vector.load %arg7[%c0_92, %c0_93] : memref<256x128xf32, #tpu.memory_space<vmem>>, vector<256x128xf32>
    tpu.vector_store %arg7[%c0_92, %c0_93], %80 {strides = array<i32>} : memref<256x128xf32, #tpu.memory_space<vmem>>, vector<256x128xf32>,
    %c0_94 = arith.constant 0 : index
    %c2_95 = arith.constant 2 : index
    %c2_96 = arith.constant 2 : index
    %c0_97 = arith.constant 0 : index
    %82 = vector.load %arg6[%c0_94, %c2_95, %c2_96, %c0_97] : memref<1x18x18x128xf32, #tpu.memory_space<vmem>>, vector<1x16x16x128xf32>
    %83 = vector.shape_cast %82 : vector<1x16x16x128xf32> to vector<16x16x128xf32>
    %84 = vector.shape_cast %83 : vector<16x16x128xf32> to vector<256x128xf32>
    %85 = arith.truncf %84 : vector<256x128xf32> to vector<256x128xbf16>
    %c8 = arith.constant 8 : index
    %c0_98 = arith.constant 0 : index
    %c0_99 = arith.constant 0 : index
    %86 = vector.load %arg3[%c8, %c0_98, %c0_99] : memref<9x128x128xbf16, #tpu.memory_space<vmem>>, vector<1x128x128xbf16>
    %87 = vector.shape_cast %86 : vector<1x128x128xbf16> to vector<128x128xbf16>
    %cst_100 = arith.constant dense<0.000000e+00> : vector<256x128xf32>
    %88 = tpu.matmul %85, %87, %cst_100 {dimension_numbers = #tpu.dot_dimension_numbers<[1], [0], [0], [1], [0, 0, 1, 1], [], []>} : vector<256x128xbf16>, vector<128x128xbf16>, vector<256x128xf32> -> vector<256x128xf32>
    %c0_101 = arith.constant 0 : index
    %c0_102 = arith.constant 0 : index
    %89 = vector.load %arg7[%c0_101, %c0_102] : memref<256x128xf32, #tpu.memory_space<vmem>>, vector<256x128xf32>
    %90 = arith.addf %89, %88 : vector<256x128xf32>
    %c0_103 = arith.constant 0 : index
    %c0_104 = arith.constant 0 : index
    %91 = vector.load %arg7[%c0_103, %c0_104] : memref<256x128xf32, #tpu.memory_space<vmem>>, vector<256x128xf32>
    tpu.vector_store %arg7[%c0_103, %c0_104], %90 {strides = array<i32>} : memref<256x128xf32, #tpu.memory_space<vmem>>, vector<256x128xf32>,
    %c0_105 = arith.constant 0 : index
    %c0_106 = arith.constant 0 : index
    %92 = vector.load %arg7[%c0_105, %c0_106] : memref<256x128xf32, #tpu.memory_space<vmem>>, vector<256x128xf32>
    %c0_107 = arith.constant 0 : index
    %c0_108 = arith.constant 0 : index
    %93 = vector.load %arg4[%c0_107, %c0_108] : memref<1x128xf32, #tpu.memory_space<vmem>>, vector<1x128xf32>
    %94 = vector.broadcast %93 : vector<1x128xf32> to vector<256x128xf32>
    %95 = arith.addf %92, %94 : vector<256x128xf32>
    %96 = arith.truncf %95 : vector<256x128xf32> to vector<256x128xbf16>
    %c0_109 = arith.constant 0 : index
    %c0_110 = arith.constant 0 : index
    %c0_111 = arith.constant 0 : index
    %97 = vector.load %arg5[%c0_109, %c0_110, %c0_111] : memref<1x256x128xbf16, #tpu.memory_space<vmem>>, vector<1x256x128xbf16>
    %98 = vector.shape_cast %97 : vector<1x256x128xbf16> to vector<256x128xbf16>
    %99 = vector.shape_cast %96 : vector<256x128xbf16> to vector<1x256x128xbf16>
    tpu.vector_store %arg5[%c0_109, %c0_110, %c0_111], %99 {strides = array<i32>} : memref<1x256x128xbf16, #tpu.memory_space<vmem>>, vector<1x256x128xbf16>,
    return
  }
  func.func @transform_0(%arg0: i32, %arg1: i32) -> (i32, i32, i32, i32, i32) {
    %c0_i32 = arith.constant 0 : i32
    %c0_i32_0 = arith.constant 0 : i32
    %c0_i32_1 = arith.constant 0 : i32
    %c0_i32_2 = arith.constant 0 : i32
    %c0_i32_3 = arith.constant 0 : i32
    return %arg0, %c0_i32, %c0_i32_0, %c0_i32_1, %c0_i32_2 : i32, i32, i32, i32, i32
  }
  func.func @transform_1(%arg0: i32, %arg1: i32) -> (i32, i32, i32) {
    %c0_i32 = arith.constant 0 : i32
    %c0_i32_0 = arith.constant 0 : i32
    %c0_i32_1 = arith.constant 0 : i32
    return %c0_i32, %c0_i32_0, %arg1 : i32, i32, i32
  }
  func.func @transform_2(%arg0: i32, %arg1: i32) -> (i32, i32) {
    %c0_i32 = arith.constant 0 : i32
    %c0_i32_0 = arith.constant 0 : i32
    return %c0_i32, %arg1 : i32, i32
  }
  func.func @transform_3(%arg0: i32, %arg1: i32) -> (i32, i32, i32) {
    %c0_i32 = arith.constant 0 : i32
    %c0_i32_0 = arith.constant 0 : i32
    return %arg0, %c0_i32, %arg1 : i32, i32, i32
  }
}

module attributes {stable_mosaic.version = 11 : i64} {
  func.func @_conv_kernel(%arg0: i32, %arg1: i32, %arg2: memref<1x1x18x18x128xbf16, #tpu.memory_space<vmem>>, %arg3: memref<9x128x128xbf16, #tpu.memory_space<vmem>>, %arg4: memref<1x128xf32, #tpu.memory_space<vmem>>, %arg5: memref<1x256x128xbf16, #tpu.memory_space<vmem>>, %arg6: memref<1x18x18x128xf32, #tpu.memory_space<vmem>>, %arg7: memref<256x128xf32, #tpu.memory_space<vmem>>) attributes {dimension_semantics = [#tpu.dimension_semantics<parallel>, #tpu.dimension_semantics<parallel>], iteration_bounds = array<i64: 2, 1>, scalar_prefetch = 0 : i64, scratch_operands = 2 : i64, tpu.core_type = #tpu.core_type<tc>, window_params = [{transform_indices = @transform_0, window_bounds = array<i64: 1, 1, 18, 18, 128>}, {transform_indices = @transform_1, window_bounds = array<i64: 9, 128, 128>}, {transform_indices = @transform_2, window_bounds = array<i64: 1, 128>}, {transform_indices = @transform_3, window_bounds = array<i64: 1, 256, 128>}]} {
    %c0 = arith.constant 0 : index
    %c0_0 = arith.constant 0 : index
    %c0_1 = arith.constant 0 : index
    %c0_2 = arith.constant 0 : index
    %c0_3 = arith.constant 0 : index
    %0 = vector.load %arg2[%c0, %c0_0, %c0_1, %c0_2, %c0_3] : memref<1x1x18x18x128xbf16, #tpu.memory_space<vmem>>, vector<1x1x18x18x128xbf16>
    %1 = vector.shape_cast %0 : vector<1x1x18x18x128xbf16> to vector<1x18x18x128xbf16>
    %2 = arith.extf %1 : vector<1x18x18x128xbf16> to vector<1x18x18x128xf32>
    %cst = arith.constant 0.000000e+00 : f32
    %3 = vector.broadcast %cst : f32 to vector<1x18x18x128xf32>
    %4 = arith.maximumf %2, %3 : vector<1x18x18x128xf32>
    %c0_4 = arith.constant 0 : index
    %c0_5 = arith.constant 0 : index
    %c0_6 = arith.constant 0 : index
    %c0_7 = arith.constant 0 : index
    %5 = vector.load %arg6[%c0_4, %c0_5, %c0_6, %c0_7] : memref<1x18x18x128xf32, #tpu.memory_space<vmem>>, vector<1x18x18x128xf32>
    tpu.vector_store %arg6[%c0_4, %c0_5, %c0_6, %c0_7], %4 {strides = array<i32>} : memref<1x18x18x128xf32, #tpu.memory_space<vmem>>, vector<1x18x18x128xf32>,
    %c0_8 = arith.constant 0 : index
    %c0_9 = arith.constant 0 : index
    %c0_10 = arith.constant 0 : index
    %c0_11 = arith.constant 0 : index
    %6 = vector.load %arg6[%c0_8, %c0_9, %c0_10, %c0_11] : memref<1x18x18x128xf32, #tpu.memory_space<vmem>>, vector<1x16x16x128xf32>
    %7 = vector.shape_cast %6 : vector<1x16x16x128xf32> to vector<16x16x128xf32>
    %8 = vector.shape_cast %7 : vector<16x16x128xf32> to vector<256x128xf32>
    %9 = arith.truncf %8 : vector<256x128xf32> to vector<256x128xbf16>
    %c0_12 = arith.constant 0 : index
    %c0_13 = arith.constant 0 : index
    %c0_14 = arith.constant 0 : index
    %10 = vector.load %arg3[%c0_12, %c0_13, %c0_14] : memref<9x128x128xbf16, #tpu.memory_space<vmem>>, vector<1x128x128xbf16>
    %11 = vector.shape_cast %10 : vector<1x128x128xbf16> to vector<128x128xbf16>
    %cst_15 = arith.constant dense<0.000000e+00> : vector<256x128xf32>
    %12 = tpu.matmul %9, %11, %cst_15 {dimension_numbers = #tpu.dot_dimension_numbers<[1], [0], [0], [1], [0, 0, 1, 1], [], []>} : vector<256x128xbf16>, vector<128x128xbf16>, vector<256x128xf32> -> vector<256x128xf32>
    %c0_16 = arith.constant 0 : index
    %c0_17 = arith.constant 0 : index
    %13 = vector.load %arg7[%c0_16, %c0_17] : memref<256x128xf32, #tpu.memory_space<vmem>>, vector<256x128xf32>
    tpu.vector_store %arg7[%c0_16, %c0_17], %12 {strides = array<i32>} : memref<256x128xf32, #tpu.memory_space<vmem>>, vector<256x128xf32>,
    %c0_18 = arith.constant 0 : index
    %c0_19 = arith.constant 0 : index
    %c1 = arith.constant 1 : index
    %c0_20 = arith.constant 0 : index
    %14 = vector.load %arg6[%c0_18, %c0_19, %c1, %c0_20] : memref<1x18x18x128xf32, #tpu.memory_space<vmem>>, vector<1x16x16x128xf32>
    %15 = vector.shape_cast %14 : vector<1x16x16x128xf32> to vector<16x16x128xf32>
    %16 = vector.shape_cast %15 : vector<16x16x128xf32> to vector<256x128xf32>
    %17 = arith.truncf %16 : vector<256x128xf32> to vector<256x128xbf16>
    %c1_21 = arith.constant 1 : index
    %c0_22 = arith.constant 0 : index
    %c0_23 = arith.constant 0 : index
    %18 = vector.load %arg3[%c1_21, %c0_22, %c0_23] : memref<9x128x128xbf16, #tpu.memory_space<vmem>>, vector<1x128x128xbf16>
    %19 = vector.shape_cast %18 : vector<1x128x128xbf16> to vector<128x128xbf16>
    %cst_24 = arith.constant dense<0.000000e+00> : vector<256x128xf32>
    %20 = tpu.matmul %17, %19, %cst_24 {dimension_numbers = #tpu.dot_dimension_numbers<[1], [0], [0], [1], [0, 0, 1, 1], [], []>} : vector<256x128xbf16>, vector<128x128xbf16>, vector<256x128xf32> -> vector<256x128xf32>
    %c0_25 = arith.constant 0 : index
    %c0_26 = arith.constant 0 : index
    %21 = vector.load %arg7[%c0_25, %c0_26] : memref<256x128xf32, #tpu.memory_space<vmem>>, vector<256x128xf32>
    %22 = arith.addf %21, %20 : vector<256x128xf32>
    %c0_27 = arith.constant 0 : index
    %c0_28 = arith.constant 0 : index
    %23 = vector.load %arg7[%c0_27, %c0_28] : memref<256x128xf32, #tpu.memory_space<vmem>>, vector<256x128xf32>
    tpu.vector_store %arg7[%c0_27, %c0_28], %22 {strides = array<i32>} : memref<256x128xf32, #tpu.memory_space<vmem>>, vector<256x128xf32>,
    %c0_29 = arith.constant 0 : index
    %c0_30 = arith.constant 0 : index
    %c2 = arith.constant 2 : index
    %c0_31 = arith.constant 0 : index
    %24 = vector.load %arg6[%c0_29, %c0_30, %c2, %c0_31] : memref<1x18x18x128xf32, #tpu.memory_space<vmem>>, vector<1x16x16x128xf32>
    %25 = vector.shape_cast %24 : vector<1x16x16x128xf32> to vector<16x16x128xf32>
    %26 = vector.shape_cast %25 : vector<16x16x128xf32> to vector<256x128xf32>
    %27 = arith.truncf %26 : vector<256x128xf32> to vector<256x128xbf16>
    %c2_32 = arith.constant 2 : index
    %c0_33 = arith.constant 0 : index
    %c0_34 = arith.constant 0 : index
    %28 = vector.load %arg3[%c2_32, %c0_33, %c0_34] : memref<9x128x128xbf16, #tpu.memory_space<vmem>>, vector<1x128x128xbf16>
    %29 = vector.shape_cast %28 : vector<1x128x128xbf16> to vector<128x128xbf16>
    %cst_35 = arith.constant dense<0.000000e+00> : vector<256x128xf32>
    %30 = tpu.matmul %27, %29, %cst_35 {dimension_numbers = #tpu.dot_dimension_numbers<[1], [0], [0], [1], [0, 0, 1, 1], [], []>} : vector<256x128xbf16>, vector<128x128xbf16>, vector<256x128xf32> -> vector<256x128xf32>
    %c0_36 = arith.constant 0 : index
    %c0_37 = arith.constant 0 : index
    %31 = vector.load %arg7[%c0_36, %c0_37] : memref<256x128xf32, #tpu.memory_space<vmem>>, vector<256x128xf32>
    %32 = arith.addf %31, %30 : vector<256x128xf32>
    %c0_38 = arith.constant 0 : index
    %c0_39 = arith.constant 0 : index
    %33 = vector.load %arg7[%c0_38, %c0_39] : memref<256x128xf32, #tpu.memory_space<vmem>>, vector<256x128xf32>
    tpu.vector_store %arg7[%c0_38, %c0_39], %32 {strides = array<i32>} : memref<256x128xf32, #tpu.memory_space<vmem>>, vector<256x128xf32>,
    %c0_40 = arith.constant 0 : index
    %c1_41 = arith.constant 1 : index
    %c0_42 = arith.constant 0 : index
    %c0_43 = arith.constant 0 : index
    %34 = vector.load %arg6[%c0_40, %c1_41, %c0_42, %c0_43] : memref<1x18x18x128xf32, #tpu.memory_space<vmem>>, vector<1x16x16x128xf32>
    %35 = vector.shape_cast %34 : vector<1x16x16x128xf32> to vector<16x16x128xf32>
    %36 = vector.shape_cast %35 : vector<16x16x128xf32> to vector<256x128xf32>
    %37 = arith.truncf %36 : vector<256x128xf32> to vector<256x128xbf16>
    %c3 = arith.constant 3 : index
    %c0_44 = arith.constant 0 : index
    %c0_45 = arith.constant 0 : index
    %38 = vector.load %arg3[%c3, %c0_44, %c0_45] : memref<9x128x128xbf16, #tpu.memory_space<vmem>>, vector<1x128x128xbf16>
    %39 = vector.shape_cast %38 : vector<1x128x128xbf16> to vector<128x128xbf16>
    %cst_46 = arith.constant dense<0.000000e+00> : vector<256x128xf32>
    %40 = tpu.matmul %37, %39, %cst_46 {dimension_numbers = #tpu.dot_dimension_numbers<[1], [0], [0], [1], [0, 0, 1, 1], [], []>} : vector<256x128xbf16>, vector<128x128xbf16>, vector<256x128xf32> -> vector<256x128xf32>
    %c0_47 = arith.constant 0 : index
    %c0_48 = arith.constant 0 : index
    %41 = vector.load %arg7[%c0_47, %c0_48] : memref<256x128xf32, #tpu.memory_space<vmem>>, vector<256x128xf32>
    %42 = arith.addf %41, %40 : vector<256x128xf32>
    %c0_49 = arith.constant 0 : index
    %c0_50 = arith.constant 0 : index
    %43 = vector.load %arg7[%c0_49, %c0_50] : memref<256x128xf32, #tpu.memory_space<vmem>>, vector<256x128xf32>
    tpu.vector_store %arg7[%c0_49, %c0_50], %42 {strides = array<i32>} : memref<256x128xf32, #tpu.memory_space<vmem>>, vector<256x128xf32>,
    %c0_51 = arith.constant 0 : index
    %c1_52 = arith.constant 1 : index
    %c1_53 = arith.constant 1 : index
    %c0_54 = arith.constant 0 : index
    %44 = vector.load %arg6[%c0_51, %c1_52, %c1_53, %c0_54] : memref<1x18x18x128xf32, #tpu.memory_space<vmem>>, vector<1x16x16x128xf32>
    %45 = vector.shape_cast %44 : vector<1x16x16x128xf32> to vector<16x16x128xf32>
    %46 = vector.shape_cast %45 : vector<16x16x128xf32> to vector<256x128xf32>
    %47 = arith.truncf %46 : vector<256x128xf32> to vector<256x128xbf16>
    %c4 = arith.constant 4 : index
    %c0_55 = arith.constant 0 : index
    %c0_56 = arith.constant 0 : index
    %48 = vector.load %arg3[%c4, %c0_55, %c0_56] : memref<9x128x128xbf16, #tpu.memory_space<vmem>>, vector<1x128x128xbf16>
    %49 = vector.shape_cast %48 : vector<1x128x128xbf16> to vector<128x128xbf16>
    %cst_57 = arith.constant dense<0.000000e+00> : vector<256x128xf32>
    %50 = tpu.matmul %47, %49, %cst_57 {dimension_numbers = #tpu.dot_dimension_numbers<[1], [0], [0], [1], [0, 0, 1, 1], [], []>} : vector<256x128xbf16>, vector<128x128xbf16>, vector<256x128xf32> -> vector<256x128xf32>
    %c0_58 = arith.constant 0 : index
    %c0_59 = arith.constant 0 : index
    %51 = vector.load %arg7[%c0_58, %c0_59] : memref<256x128xf32, #tpu.memory_space<vmem>>, vector<256x128xf32>
    %52 = arith.addf %51, %50 : vector<256x128xf32>
    %c0_60 = arith.constant 0 : index
    %c0_61 = arith.constant 0 : index
    %53 = vector.load %arg7[%c0_60, %c0_61] : memref<256x128xf32, #tpu.memory_space<vmem>>, vector<256x128xf32>
    tpu.vector_store %arg7[%c0_60, %c0_61], %52 {strides = array<i32>} : memref<256x128xf32, #tpu.memory_space<vmem>>, vector<256x128xf32>,
    %c0_62 = arith.constant 0 : index
    %c1_63 = arith.constant 1 : index
    %c2_64 = arith.constant 2 : index
    %c0_65 = arith.constant 0 : index
    %54 = vector.load %arg6[%c0_62, %c1_63, %c2_64, %c0_65] : memref<1x18x18x128xf32, #tpu.memory_space<vmem>>, vector<1x16x16x128xf32>
    %55 = vector.shape_cast %54 : vector<1x16x16x128xf32> to vector<16x16x128xf32>
    %56 = vector.shape_cast %55 : vector<16x16x128xf32> to vector<256x128xf32>
    %57 = arith.truncf %56 : vector<256x128xf32> to vector<256x128xbf16>
    %c5 = arith.constant 5 : index
    %c0_66 = arith.constant 0 : index
    %c0_67 = arith.constant 0 : index
    %58 = vector.load %arg3[%c5, %c0_66, %c0_67] : memref<9x128x128xbf16, #tpu.memory_space<vmem>>, vector<1x128x128xbf16>
    %59 = vector.shape_cast %58 : vector<1x128x128xbf16> to vector<128x128xbf16>
    %cst_68 = arith.constant dense<0.000000e+00> : vector<256x128xf32>
    %60 = tpu.matmul %57, %59, %cst_68 {dimension_numbers = #tpu.dot_dimension_numbers<[1], [0], [0], [1], [0, 0, 1, 1], [], []>} : vector<256x128xbf16>, vector<128x128xbf16>, vector<256x128xf32> -> vector<256x128xf32>
    %c0_69 = arith.constant 0 : index
    %c0_70 = arith.constant 0 : index
    %61 = vector.load %arg7[%c0_69, %c0_70] : memref<256x128xf32, #tpu.memory_space<vmem>>, vector<256x128xf32>
    %62 = arith.addf %61, %60 : vector<256x128xf32>
    %c0_71 = arith.constant 0 : index
    %c0_72 = arith.constant 0 : index
    %63 = vector.load %arg7[%c0_71, %c0_72] : memref<256x128xf32, #tpu.memory_space<vmem>>, vector<256x128xf32>
    tpu.vector_store %arg7[%c0_71, %c0_72], %62 {strides = array<i32>} : memref<256x128xf32, #tpu.memory_space<vmem>>, vector<256x128xf32>,
    %c0_73 = arith.constant 0 : index
    %c2_74 = arith.constant 2 : index
    %c0_75 = arith.constant 0 : index
    %c0_76 = arith.constant 0 : index
    %64 = vector.load %arg6[%c0_73, %c2_74, %c0_75, %c0_76] : memref<1x18x18x128xf32, #tpu.memory_space<vmem>>, vector<1x16x16x128xf32>
    %65 = vector.shape_cast %64 : vector<1x16x16x128xf32> to vector<16x16x128xf32>
    %66 = vector.shape_cast %65 : vector<16x16x128xf32> to vector<256x128xf32>
    %67 = arith.truncf %66 : vector<256x128xf32> to vector<256x128xbf16>
    %c6 = arith.constant 6 : index
    %c0_77 = arith.constant 0 : index
    %c0_78 = arith.constant 0 : index
    %68 = vector.load %arg3[%c6, %c0_77, %c0_78] : memref<9x128x128xbf16, #tpu.memory_space<vmem>>, vector<1x128x128xbf16>
    %69 = vector.shape_cast %68 : vector<1x128x128xbf16> to vector<128x128xbf16>
    %cst_79 = arith.constant dense<0.000000e+00> : vector<256x128xf32>
    %70 = tpu.matmul %67, %69, %cst_79 {dimension_numbers = #tpu.dot_dimension_numbers<[1], [0], [0], [1], [0, 0, 1, 1], [], []>} : vector<256x128xbf16>, vector<128x128xbf16>, vector<256x128xf32> -> vector<256x128xf32>
    %c0_80 = arith.constant 0 : index
    %c0_81 = arith.constant 0 : index
    %71 = vector.load %arg7[%c0_80, %c0_81] : memref<256x128xf32, #tpu.memory_space<vmem>>, vector<256x128xf32>
    %72 = arith.addf %71, %70 : vector<256x128xf32>
    %c0_82 = arith.constant 0 : index
    %c0_83 = arith.constant 0 : index
    %73 = vector.load %arg7[%c0_82, %c0_83] : memref<256x128xf32, #tpu.memory_space<vmem>>, vector<256x128xf32>
    tpu.vector_store %arg7[%c0_82, %c0_83], %72 {strides = array<i32>} : memref<256x128xf32, #tpu.memory_space<vmem>>, vector<256x128xf32>,
    %c0_84 = arith.constant 0 : index
    %c2_85 = arith.constant 2 : index
    %c1_86 = arith.constant 1 : index
    %c0_87 = arith.constant 0 : index
    %74 = vector.load %arg6[%c0_84, %c2_85, %c1_86, %c0_87] : memref<1x18x18x128xf32, #tpu.memory_space<vmem>>, vector<1x16x16x128xf32>
    %75 = vector.shape_cast %74 : vector<1x16x16x128xf32> to vector<16x16x128xf32>
    %76 = vector.shape_cast %75 : vector<16x16x128xf32> to vector<256x128xf32>
    %77 = arith.truncf %76 : vector<256x128xf32> to vector<256x128xbf16>
    %c7 = arith.constant 7 : index
    %c0_88 = arith.constant 0 : index
    %c0_89 = arith.constant 0 : index
    %78 = vector.load %arg3[%c7, %c0_88, %c0_89] : memref<9x128x128xbf16, #tpu.memory_space<vmem>>, vector<1x128x128xbf16>
    %79 = vector.shape_cast %78 : vector<1x128x128xbf16> to vector<128x128xbf16>
    %cst_90 = arith.constant dense<0.000000e+00> : vector<256x128xf32>
    %80 = tpu.matmul %77, %79, %cst_90 {dimension_numbers = #tpu.dot_dimension_numbers<[1], [0], [0], [1], [0, 0, 1, 1], [], []>} : vector<256x128xbf16>, vector<128x128xbf16>, vector<256x128xf32> -> vector<256x128xf32>
    %c0_91 = arith.constant 0 : index
    %c0_92 = arith.constant 0 : index
    %81 = vector.load %arg7[%c0_91, %c0_92] : memref<256x128xf32, #tpu.memory_space<vmem>>, vector<256x128xf32>
    %82 = arith.addf %81, %80 : vector<256x128xf32>
    %c0_93 = arith.constant 0 : index
    %c0_94 = arith.constant 0 : index
    %83 = vector.load %arg7[%c0_93, %c0_94] : memref<256x128xf32, #tpu.memory_space<vmem>>, vector<256x128xf32>
    tpu.vector_store %arg7[%c0_93, %c0_94], %82 {strides = array<i32>} : memref<256x128xf32, #tpu.memory_space<vmem>>, vector<256x128xf32>,
    %c0_95 = arith.constant 0 : index
    %c2_96 = arith.constant 2 : index
    %c2_97 = arith.constant 2 : index
    %c0_98 = arith.constant 0 : index
    %84 = vector.load %arg6[%c0_95, %c2_96, %c2_97, %c0_98] : memref<1x18x18x128xf32, #tpu.memory_space<vmem>>, vector<1x16x16x128xf32>
    %85 = vector.shape_cast %84 : vector<1x16x16x128xf32> to vector<16x16x128xf32>
    %86 = vector.shape_cast %85 : vector<16x16x128xf32> to vector<256x128xf32>
    %87 = arith.truncf %86 : vector<256x128xf32> to vector<256x128xbf16>
    %c8 = arith.constant 8 : index
    %c0_99 = arith.constant 0 : index
    %c0_100 = arith.constant 0 : index
    %88 = vector.load %arg3[%c8, %c0_99, %c0_100] : memref<9x128x128xbf16, #tpu.memory_space<vmem>>, vector<1x128x128xbf16>
    %89 = vector.shape_cast %88 : vector<1x128x128xbf16> to vector<128x128xbf16>
    %cst_101 = arith.constant dense<0.000000e+00> : vector<256x128xf32>
    %90 = tpu.matmul %87, %89, %cst_101 {dimension_numbers = #tpu.dot_dimension_numbers<[1], [0], [0], [1], [0, 0, 1, 1], [], []>} : vector<256x128xbf16>, vector<128x128xbf16>, vector<256x128xf32> -> vector<256x128xf32>
    %c0_102 = arith.constant 0 : index
    %c0_103 = arith.constant 0 : index
    %91 = vector.load %arg7[%c0_102, %c0_103] : memref<256x128xf32, #tpu.memory_space<vmem>>, vector<256x128xf32>
    %92 = arith.addf %91, %90 : vector<256x128xf32>
    %c0_104 = arith.constant 0 : index
    %c0_105 = arith.constant 0 : index
    %93 = vector.load %arg7[%c0_104, %c0_105] : memref<256x128xf32, #tpu.memory_space<vmem>>, vector<256x128xf32>
    tpu.vector_store %arg7[%c0_104, %c0_105], %92 {strides = array<i32>} : memref<256x128xf32, #tpu.memory_space<vmem>>, vector<256x128xf32>,
    %c0_106 = arith.constant 0 : index
    %c0_107 = arith.constant 0 : index
    %94 = vector.load %arg7[%c0_106, %c0_107] : memref<256x128xf32, #tpu.memory_space<vmem>>, vector<256x128xf32>
    %c0_108 = arith.constant 0 : index
    %c0_109 = arith.constant 0 : index
    %95 = vector.load %arg4[%c0_108, %c0_109] : memref<1x128xf32, #tpu.memory_space<vmem>>, vector<1x128xf32>
    %96 = vector.broadcast %95 : vector<1x128xf32> to vector<256x128xf32>
    %97 = arith.addf %94, %96 : vector<256x128xf32>
    %98 = arith.truncf %97 : vector<256x128xf32> to vector<256x128xbf16>
    %c0_110 = arith.constant 0 : index
    %c0_111 = arith.constant 0 : index
    %c0_112 = arith.constant 0 : index
    %99 = vector.load %arg5[%c0_110, %c0_111, %c0_112] : memref<1x256x128xbf16, #tpu.memory_space<vmem>>, vector<1x256x128xbf16>
    %100 = vector.shape_cast %99 : vector<1x256x128xbf16> to vector<256x128xbf16>
    %101 = vector.shape_cast %98 : vector<256x128xbf16> to vector<1x256x128xbf16>
    tpu.vector_store %arg5[%c0_110, %c0_111, %c0_112], %101 {strides = array<i32>} : memref<1x256x128xbf16, #tpu.memory_space<vmem>>, vector<1x256x128xbf16>,
    return
  }
  func.func @transform_0(%arg0: i32, %arg1: i32) -> (i32, i32, i32, i32, i32) {
    %c0_i32 = arith.constant 0 : i32
    %c0_i32_0 = arith.constant 0 : i32
    %c0_i32_1 = arith.constant 0 : i32
    %c0_i32_2 = arith.constant 0 : i32
    %c0_i32_3 = arith.constant 0 : i32
    return %arg0, %c0_i32, %c0_i32_0, %c0_i32_1, %c0_i32_2 : i32, i32, i32, i32, i32
  }
  func.func @transform_1(%arg0: i32, %arg1: i32) -> (i32, i32, i32) {
    %c0_i32 = arith.constant 0 : i32
    %c0_i32_0 = arith.constant 0 : i32
    %c0_i32_1 = arith.constant 0 : i32
    return %c0_i32, %c0_i32_0, %arg1 : i32, i32, i32
  }
  func.func @transform_2(%arg0: i32, %arg1: i32) -> (i32, i32) {
    %c0_i32 = arith.constant 0 : i32
    %c0_i32_0 = arith.constant 0 : i32
    return %c0_i32, %arg1 : i32, i32
  }
  func.func @transform_3(%arg0: i32, %arg1: i32) -> (i32, i32, i32) {
    %c0_i32 = arith.constant 0 : i32
    %c0_i32_0 = arith.constant 0 : i32
    return %arg0, %c0_i32, %arg1 : i32, i32, i32
  }
}

module attributes {stable_mosaic.version = 11 : i64} {
  func.func @_conv_kernel(%arg0: i32, %arg1: i32, %arg2: memref<1x1x18x18x128xbf16, #tpu.memory_space<vmem>>, %arg3: memref<9x128x128xbf16, #tpu.memory_space<vmem>>, %arg4: memref<1x128xf32, #tpu.memory_space<vmem>>, %arg5: memref<1x256x128xbf16, #tpu.memory_space<vmem>>, %arg6: memref<1x256x128xbf16, #tpu.memory_space<vmem>>, %arg7: memref<1x18x18x128xf32, #tpu.memory_space<vmem>>, %arg8: memref<256x128xf32, #tpu.memory_space<vmem>>) attributes {dimension_semantics = [#tpu.dimension_semantics<parallel>, #tpu.dimension_semantics<parallel>], iteration_bounds = array<i64: 2, 1>, scalar_prefetch = 0 : i64, scratch_operands = 2 : i64, tpu.core_type = #tpu.core_type<tc>, window_params = [{transform_indices = @transform_0, window_bounds = array<i64: 1, 1, 18, 18, 128>}, {transform_indices = @transform_1, window_bounds = array<i64: 9, 128, 128>}, {transform_indices = @transform_2, window_bounds = array<i64: 1, 128>}, {transform_indices = @transform_3, window_bounds = array<i64: 1, 256, 128>}, {transform_indices = @transform_4, window_bounds = array<i64: 1, 256, 128>}]} {
    %c0 = arith.constant 0 : index
    %c0_0 = arith.constant 0 : index
    %c0_1 = arith.constant 0 : index
    %c0_2 = arith.constant 0 : index
    %c0_3 = arith.constant 0 : index
    %0 = vector.load %arg2[%c0, %c0_0, %c0_1, %c0_2, %c0_3] : memref<1x1x18x18x128xbf16, #tpu.memory_space<vmem>>, vector<1x1x18x18x128xbf16>
    %1 = vector.shape_cast %0 : vector<1x1x18x18x128xbf16> to vector<1x18x18x128xbf16>
    %2 = arith.extf %1 : vector<1x18x18x128xbf16> to vector<1x18x18x128xf32>
    %cst = arith.constant 0.000000e+00 : f32
    %3 = vector.broadcast %cst : f32 to vector<1x18x18x128xf32>
    %4 = arith.maximumf %2, %3 : vector<1x18x18x128xf32>
    %c0_4 = arith.constant 0 : index
    %c0_5 = arith.constant 0 : index
    %c0_6 = arith.constant 0 : index
    %c0_7 = arith.constant 0 : index
    %5 = vector.load %arg7[%c0_4, %c0_5, %c0_6, %c0_7] : memref<1x18x18x128xf32, #tpu.memory_space<vmem>>, vector<1x18x18x128xf32>
    tpu.vector_store %arg7[%c0_4, %c0_5, %c0_6, %c0_7], %4 {strides = array<i32>} : memref<1x18x18x128xf32, #tpu.memory_space<vmem>>, vector<1x18x18x128xf32>,
    %c0_8 = arith.constant 0 : index
    %c0_9 = arith.constant 0 : index
    %c0_10 = arith.constant 0 : index
    %c0_11 = arith.constant 0 : index
    %6 = vector.load %arg7[%c0_8, %c0_9, %c0_10, %c0_11] : memref<1x18x18x128xf32, #tpu.memory_space<vmem>>, vector<1x16x16x128xf32>
    %7 = vector.shape_cast %6 : vector<1x16x16x128xf32> to vector<16x16x128xf32>
    %8 = vector.shape_cast %7 : vector<16x16x128xf32> to vector<256x128xf32>
    %9 = arith.truncf %8 : vector<256x128xf32> to vector<256x128xbf16>
    %c0_12 = arith.constant 0 : index
    %c0_13 = arith.constant 0 : index
    %c0_14 = arith.constant 0 : index
    %10 = vector.load %arg3[%c0_12, %c0_13, %c0_14] : memref<9x128x128xbf16, #tpu.memory_space<vmem>>, vector<1x128x128xbf16>
    %11 = vector.shape_cast %10 : vector<1x128x128xbf16> to vector<128x128xbf16>
    %cst_15 = arith.constant dense<0.000000e+00> : vector<256x128xf32>
    %12 = tpu.matmul %9, %11, %cst_15 {dimension_numbers = #tpu.dot_dimension_numbers<[1], [0], [0], [1], [0, 0, 1, 1], [], []>} : vector<256x128xbf16>, vector<128x128xbf16>, vector<256x128xf32> -> vector<256x128xf32>
    %c0_16 = arith.constant 0 : index
    %c0_17 = arith.constant 0 : index
    %13 = vector.load %arg8[%c0_16, %c0_17] : memref<256x128xf32, #tpu.memory_space<vmem>>, vector<256x128xf32>
    tpu.vector_store %arg8[%c0_16, %c0_17], %12 {strides = array<i32>} : memref<256x128xf32, #tpu.memory_space<vmem>>, vector<256x128xf32>,
    %c0_18 = arith.constant 0 : index
    %c0_19 = arith.constant 0 : index
    %c1 = arith.constant 1 : index
    %c0_20 = arith.constant 0 : index
    %14 = vector.load %arg7[%c0_18, %c0_19, %c1, %c0_20] : memref<1x18x18x128xf32, #tpu.memory_space<vmem>>, vector<1x16x16x128xf32>
    %15 = vector.shape_cast %14 : vector<1x16x16x128xf32> to vector<16x16x128xf32>
    %16 = vector.shape_cast %15 : vector<16x16x128xf32> to vector<256x128xf32>
    %17 = arith.truncf %16 : vector<256x128xf32> to vector<256x128xbf16>
    %c1_21 = arith.constant 1 : index
    %c0_22 = arith.constant 0 : index
    %c0_23 = arith.constant 0 : index
    %18 = vector.load %arg3[%c1_21, %c0_22, %c0_23] : memref<9x128x128xbf16, #tpu.memory_space<vmem>>, vector<1x128x128xbf16>
    %19 = vector.shape_cast %18 : vector<1x128x128xbf16> to vector<128x128xbf16>
    %cst_24 = arith.constant dense<0.000000e+00> : vector<256x128xf32>
    %20 = tpu.matmul %17, %19, %cst_24 {dimension_numbers = #tpu.dot_dimension_numbers<[1], [0], [0], [1], [0, 0, 1, 1], [], []>} : vector<256x128xbf16>, vector<128x128xbf16>, vector<256x128xf32> -> vector<256x128xf32>
    %c0_25 = arith.constant 0 : index
    %c0_26 = arith.constant 0 : index
    %21 = vector.load %arg8[%c0_25, %c0_26] : memref<256x128xf32, #tpu.memory_space<vmem>>, vector<256x128xf32>
    %22 = arith.addf %21, %20 : vector<256x128xf32>
    %c0_27 = arith.constant 0 : index
    %c0_28 = arith.constant 0 : index
    %23 = vector.load %arg8[%c0_27, %c0_28] : memref<256x128xf32, #tpu.memory_space<vmem>>, vector<256x128xf32>
    tpu.vector_store %arg8[%c0_27, %c0_28], %22 {strides = array<i32>} : memref<256x128xf32, #tpu.memory_space<vmem>>, vector<256x128xf32>,
    %c0_29 = arith.constant 0 : index
    %c0_30 = arith.constant 0 : index
    %c2 = arith.constant 2 : index
    %c0_31 = arith.constant 0 : index
    %24 = vector.load %arg7[%c0_29, %c0_30, %c2, %c0_31] : memref<1x18x18x128xf32, #tpu.memory_space<vmem>>, vector<1x16x16x128xf32>
    %25 = vector.shape_cast %24 : vector<1x16x16x128xf32> to vector<16x16x128xf32>
    %26 = vector.shape_cast %25 : vector<16x16x128xf32> to vector<256x128xf32>
    %27 = arith.truncf %26 : vector<256x128xf32> to vector<256x128xbf16>
    %c2_32 = arith.constant 2 : index
    %c0_33 = arith.constant 0 : index
    %c0_34 = arith.constant 0 : index
    %28 = vector.load %arg3[%c2_32, %c0_33, %c0_34] : memref<9x128x128xbf16, #tpu.memory_space<vmem>>, vector<1x128x128xbf16>
    %29 = vector.shape_cast %28 : vector<1x128x128xbf16> to vector<128x128xbf16>
    %cst_35 = arith.constant dense<0.000000e+00> : vector<256x128xf32>
    %30 = tpu.matmul %27, %29, %cst_35 {dimension_numbers = #tpu.dot_dimension_numbers<[1], [0], [0], [1], [0, 0, 1, 1], [], []>} : vector<256x128xbf16>, vector<128x128xbf16>, vector<256x128xf32> -> vector<256x128xf32>
    %c0_36 = arith.constant 0 : index
    %c0_37 = arith.constant 0 : index
    %31 = vector.load %arg8[%c0_36, %c0_37] : memref<256x128xf32, #tpu.memory_space<vmem>>, vector<256x128xf32>
    %32 = arith.addf %31, %30 : vector<256x128xf32>
    %c0_38 = arith.constant 0 : index
    %c0_39 = arith.constant 0 : index
    %33 = vector.load %arg8[%c0_38, %c0_39] : memref<256x128xf32, #tpu.memory_space<vmem>>, vector<256x128xf32>
    tpu.vector_store %arg8[%c0_38, %c0_39], %32 {strides = array<i32>} : memref<256x128xf32, #tpu.memory_space<vmem>>, vector<256x128xf32>,
    %c0_40 = arith.constant 0 : index
    %c1_41 = arith.constant 1 : index
    %c0_42 = arith.constant 0 : index
    %c0_43 = arith.constant 0 : index
    %34 = vector.load %arg7[%c0_40, %c1_41, %c0_42, %c0_43] : memref<1x18x18x128xf32, #tpu.memory_space<vmem>>, vector<1x16x16x128xf32>
    %35 = vector.shape_cast %34 : vector<1x16x16x128xf32> to vector<16x16x128xf32>
    %36 = vector.shape_cast %35 : vector<16x16x128xf32> to vector<256x128xf32>
    %37 = arith.truncf %36 : vector<256x128xf32> to vector<256x128xbf16>
    %c3 = arith.constant 3 : index
    %c0_44 = arith.constant 0 : index
    %c0_45 = arith.constant 0 : index
    %38 = vector.load %arg3[%c3, %c0_44, %c0_45] : memref<9x128x128xbf16, #tpu.memory_space<vmem>>, vector<1x128x128xbf16>
    %39 = vector.shape_cast %38 : vector<1x128x128xbf16> to vector<128x128xbf16>
    %cst_46 = arith.constant dense<0.000000e+00> : vector<256x128xf32>
    %40 = tpu.matmul %37, %39, %cst_46 {dimension_numbers = #tpu.dot_dimension_numbers<[1], [0], [0], [1], [0, 0, 1, 1], [], []>} : vector<256x128xbf16>, vector<128x128xbf16>, vector<256x128xf32> -> vector<256x128xf32>
    %c0_47 = arith.constant 0 : index
    %c0_48 = arith.constant 0 : index
    %41 = vector.load %arg8[%c0_47, %c0_48] : memref<256x128xf32, #tpu.memory_space<vmem>>, vector<256x128xf32>
    %42 = arith.addf %41, %40 : vector<256x128xf32>
    %c0_49 = arith.constant 0 : index
    %c0_50 = arith.constant 0 : index
    %43 = vector.load %arg8[%c0_49, %c0_50] : memref<256x128xf32, #tpu.memory_space<vmem>>, vector<256x128xf32>
    tpu.vector_store %arg8[%c0_49, %c0_50], %42 {strides = array<i32>} : memref<256x128xf32, #tpu.memory_space<vmem>>, vector<256x128xf32>,
    %c0_51 = arith.constant 0 : index
    %c1_52 = arith.constant 1 : index
    %c1_53 = arith.constant 1 : index
    %c0_54 = arith.constant 0 : index
    %44 = vector.load %arg7[%c0_51, %c1_52, %c1_53, %c0_54] : memref<1x18x18x128xf32, #tpu.memory_space<vmem>>, vector<1x16x16x128xf32>
    %45 = vector.shape_cast %44 : vector<1x16x16x128xf32> to vector<16x16x128xf32>
    %46 = vector.shape_cast %45 : vector<16x16x128xf32> to vector<256x128xf32>
    %47 = arith.truncf %46 : vector<256x128xf32> to vector<256x128xbf16>
    %c4 = arith.constant 4 : index
    %c0_55 = arith.constant 0 : index
    %c0_56 = arith.constant 0 : index
    %48 = vector.load %arg3[%c4, %c0_55, %c0_56] : memref<9x128x128xbf16, #tpu.memory_space<vmem>>, vector<1x128x128xbf16>
    %49 = vector.shape_cast %48 : vector<1x128x128xbf16> to vector<128x128xbf16>
    %cst_57 = arith.constant dense<0.000000e+00> : vector<256x128xf32>
    %50 = tpu.matmul %47, %49, %cst_57 {dimension_numbers = #tpu.dot_dimension_numbers<[1], [0], [0], [1], [0, 0, 1, 1], [], []>} : vector<256x128xbf16>, vector<128x128xbf16>, vector<256x128xf32> -> vector<256x128xf32>
    %c0_58 = arith.constant 0 : index
    %c0_59 = arith.constant 0 : index
    %51 = vector.load %arg8[%c0_58, %c0_59] : memref<256x128xf32, #tpu.memory_space<vmem>>, vector<256x128xf32>
    %52 = arith.addf %51, %50 : vector<256x128xf32>
    %c0_60 = arith.constant 0 : index
    %c0_61 = arith.constant 0 : index
    %53 = vector.load %arg8[%c0_60, %c0_61] : memref<256x128xf32, #tpu.memory_space<vmem>>, vector<256x128xf32>
    tpu.vector_store %arg8[%c0_60, %c0_61], %52 {strides = array<i32>} : memref<256x128xf32, #tpu.memory_space<vmem>>, vector<256x128xf32>,
    %c0_62 = arith.constant 0 : index
    %c1_63 = arith.constant 1 : index
    %c2_64 = arith.constant 2 : index
    %c0_65 = arith.constant 0 : index
    %54 = vector.load %arg7[%c0_62, %c1_63, %c2_64, %c0_65] : memref<1x18x18x128xf32, #tpu.memory_space<vmem>>, vector<1x16x16x128xf32>
    %55 = vector.shape_cast %54 : vector<1x16x16x128xf32> to vector<16x16x128xf32>
    %56 = vector.shape_cast %55 : vector<16x16x128xf32> to vector<256x128xf32>
    %57 = arith.truncf %56 : vector<256x128xf32> to vector<256x128xbf16>
    %c5 = arith.constant 5 : index
    %c0_66 = arith.constant 0 : index
    %c0_67 = arith.constant 0 : index
    %58 = vector.load %arg3[%c5, %c0_66, %c0_67] : memref<9x128x128xbf16, #tpu.memory_space<vmem>>, vector<1x128x128xbf16>
    %59 = vector.shape_cast %58 : vector<1x128x128xbf16> to vector<128x128xbf16>
    %cst_68 = arith.constant dense<0.000000e+00> : vector<256x128xf32>
    %60 = tpu.matmul %57, %59, %cst_68 {dimension_numbers = #tpu.dot_dimension_numbers<[1], [0], [0], [1], [0, 0, 1, 1], [], []>} : vector<256x128xbf16>, vector<128x128xbf16>, vector<256x128xf32> -> vector<256x128xf32>
    %c0_69 = arith.constant 0 : index
    %c0_70 = arith.constant 0 : index
    %61 = vector.load %arg8[%c0_69, %c0_70] : memref<256x128xf32, #tpu.memory_space<vmem>>, vector<256x128xf32>
    %62 = arith.addf %61, %60 : vector<256x128xf32>
    %c0_71 = arith.constant 0 : index
    %c0_72 = arith.constant 0 : index
    %63 = vector.load %arg8[%c0_71, %c0_72] : memref<256x128xf32, #tpu.memory_space<vmem>>, vector<256x128xf32>
    tpu.vector_store %arg8[%c0_71, %c0_72], %62 {strides = array<i32>} : memref<256x128xf32, #tpu.memory_space<vmem>>, vector<256x128xf32>,
    %c0_73 = arith.constant 0 : index
    %c2_74 = arith.constant 2 : index
    %c0_75 = arith.constant 0 : index
    %c0_76 = arith.constant 0 : index
    %64 = vector.load %arg7[%c0_73, %c2_74, %c0_75, %c0_76] : memref<1x18x18x128xf32, #tpu.memory_space<vmem>>, vector<1x16x16x128xf32>
    %65 = vector.shape_cast %64 : vector<1x16x16x128xf32> to vector<16x16x128xf32>
    %66 = vector.shape_cast %65 : vector<16x16x128xf32> to vector<256x128xf32>
    %67 = arith.truncf %66 : vector<256x128xf32> to vector<256x128xbf16>
    %c6 = arith.constant 6 : index
    %c0_77 = arith.constant 0 : index
    %c0_78 = arith.constant 0 : index
    %68 = vector.load %arg3[%c6, %c0_77, %c0_78] : memref<9x128x128xbf16, #tpu.memory_space<vmem>>, vector<1x128x128xbf16>
    %69 = vector.shape_cast %68 : vector<1x128x128xbf16> to vector<128x128xbf16>
    %cst_79 = arith.constant dense<0.000000e+00> : vector<256x128xf32>
    %70 = tpu.matmul %67, %69, %cst_79 {dimension_numbers = #tpu.dot_dimension_numbers<[1], [0], [0], [1], [0, 0, 1, 1], [], []>} : vector<256x128xbf16>, vector<128x128xbf16>, vector<256x128xf32> -> vector<256x128xf32>
    %c0_80 = arith.constant 0 : index
    %c0_81 = arith.constant 0 : index
    %71 = vector.load %arg8[%c0_80, %c0_81] : memref<256x128xf32, #tpu.memory_space<vmem>>, vector<256x128xf32>
    %72 = arith.addf %71, %70 : vector<256x128xf32>
    %c0_82 = arith.constant 0 : index
    %c0_83 = arith.constant 0 : index
    %73 = vector.load %arg8[%c0_82, %c0_83] : memref<256x128xf32, #tpu.memory_space<vmem>>, vector<256x128xf32>
    tpu.vector_store %arg8[%c0_82, %c0_83], %72 {strides = array<i32>} : memref<256x128xf32, #tpu.memory_space<vmem>>, vector<256x128xf32>,
    %c0_84 = arith.constant 0 : index
    %c2_85 = arith.constant 2 : index
    %c1_86 = arith.constant 1 : index
    %c0_87 = arith.constant 0 : index
    %74 = vector.load %arg7[%c0_84, %c2_85, %c1_86, %c0_87] : memref<1x18x18x128xf32, #tpu.memory_space<vmem>>, vector<1x16x16x128xf32>
    %75 = vector.shape_cast %74 : vector<1x16x16x128xf32> to vector<16x16x128xf32>
    %76 = vector.shape_cast %75 : vector<16x16x128xf32> to vector<256x128xf32>
    %77 = arith.truncf %76 : vector<256x128xf32> to vector<256x128xbf16>
    %c7 = arith.constant 7 : index
    %c0_88 = arith.constant 0 : index
    %c0_89 = arith.constant 0 : index
    %78 = vector.load %arg3[%c7, %c0_88, %c0_89] : memref<9x128x128xbf16, #tpu.memory_space<vmem>>, vector<1x128x128xbf16>
    %79 = vector.shape_cast %78 : vector<1x128x128xbf16> to vector<128x128xbf16>
    %cst_90 = arith.constant dense<0.000000e+00> : vector<256x128xf32>
    %80 = tpu.matmul %77, %79, %cst_90 {dimension_numbers = #tpu.dot_dimension_numbers<[1], [0], [0], [1], [0, 0, 1, 1], [], []>} : vector<256x128xbf16>, vector<128x128xbf16>, vector<256x128xf32> -> vector<256x128xf32>
    %c0_91 = arith.constant 0 : index
    %c0_92 = arith.constant 0 : index
    %81 = vector.load %arg8[%c0_91, %c0_92] : memref<256x128xf32, #tpu.memory_space<vmem>>, vector<256x128xf32>
    %82 = arith.addf %81, %80 : vector<256x128xf32>
    %c0_93 = arith.constant 0 : index
    %c0_94 = arith.constant 0 : index
    %83 = vector.load %arg8[%c0_93, %c0_94] : memref<256x128xf32, #tpu.memory_space<vmem>>, vector<256x128xf32>
    tpu.vector_store %arg8[%c0_93, %c0_94], %82 {strides = array<i32>} : memref<256x128xf32, #tpu.memory_space<vmem>>, vector<256x128xf32>,
    %c0_95 = arith.constant 0 : index
    %c2_96 = arith.constant 2 : index
    %c2_97 = arith.constant 2 : index
    %c0_98 = arith.constant 0 : index
    %84 = vector.load %arg7[%c0_95, %c2_96, %c2_97, %c0_98] : memref<1x18x18x128xf32, #tpu.memory_space<vmem>>, vector<1x16x16x128xf32>
    %85 = vector.shape_cast %84 : vector<1x16x16x128xf32> to vector<16x16x128xf32>
    %86 = vector.shape_cast %85 : vector<16x16x128xf32> to vector<256x128xf32>
    %87 = arith.truncf %86 : vector<256x128xf32> to vector<256x128xbf16>
    %c8 = arith.constant 8 : index
    %c0_99 = arith.constant 0 : index
    %c0_100 = arith.constant 0 : index
    %88 = vector.load %arg3[%c8, %c0_99, %c0_100] : memref<9x128x128xbf16, #tpu.memory_space<vmem>>, vector<1x128x128xbf16>
    %89 = vector.shape_cast %88 : vector<1x128x128xbf16> to vector<128x128xbf16>
    %cst_101 = arith.constant dense<0.000000e+00> : vector<256x128xf32>
    %90 = tpu.matmul %87, %89, %cst_101 {dimension_numbers = #tpu.dot_dimension_numbers<[1], [0], [0], [1], [0, 0, 1, 1], [], []>} : vector<256x128xbf16>, vector<128x128xbf16>, vector<256x128xf32> -> vector<256x128xf32>
    %c0_102 = arith.constant 0 : index
    %c0_103 = arith.constant 0 : index
    %91 = vector.load %arg8[%c0_102, %c0_103] : memref<256x128xf32, #tpu.memory_space<vmem>>, vector<256x128xf32>
    %92 = arith.addf %91, %90 : vector<256x128xf32>
    %c0_104 = arith.constant 0 : index
    %c0_105 = arith.constant 0 : index
    %93 = vector.load %arg8[%c0_104, %c0_105] : memref<256x128xf32, #tpu.memory_space<vmem>>, vector<256x128xf32>
    tpu.vector_store %arg8[%c0_104, %c0_105], %92 {strides = array<i32>} : memref<256x128xf32, #tpu.memory_space<vmem>>, vector<256x128xf32>,
    %c0_106 = arith.constant 0 : index
    %c0_107 = arith.constant 0 : index
    %94 = vector.load %arg8[%c0_106, %c0_107] : memref<256x128xf32, #tpu.memory_space<vmem>>, vector<256x128xf32>
    %c0_108 = arith.constant 0 : index
    %c0_109 = arith.constant 0 : index
    %95 = vector.load %arg4[%c0_108, %c0_109] : memref<1x128xf32, #tpu.memory_space<vmem>>, vector<1x128xf32>
    %96 = vector.broadcast %95 : vector<1x128xf32> to vector<256x128xf32>
    %97 = arith.addf %94, %96 : vector<256x128xf32>
    %c0_110 = arith.constant 0 : index
    %c0_111 = arith.constant 0 : index
    %c0_112 = arith.constant 0 : index
    %98 = vector.load %arg5[%c0_110, %c0_111, %c0_112] : memref<1x256x128xbf16, #tpu.memory_space<vmem>>, vector<1x256x128xbf16>
    %99 = vector.shape_cast %98 : vector<1x256x128xbf16> to vector<256x128xbf16>
    %100 = arith.extf %99 : vector<256x128xbf16> to vector<256x128xf32>
    %cst_113 = arith.constant 0.707106769 : f32
    %101 = vector.broadcast %cst_113 : f32 to vector<256x128xf32>
    %102 = arith.mulf %101, %100 : vector<256x128xf32>
    %cst_114 = arith.constant 0.707106769 : f32
    %103 = vector.broadcast %cst_114 : f32 to vector<256x128xf32>
    %104 = arith.mulf %103, %97 : vector<256x128xf32>
    %105 = arith.addf %102, %104 : vector<256x128xf32>
    %106 = arith.truncf %105 : vector<256x128xf32> to vector<256x128xbf16>
    %c0_115 = arith.constant 0 : index
    %c0_116 = arith.constant 0 : index
    %c0_117 = arith.constant 0 : index
    %107 = vector.load %arg6[%c0_115, %c0_116, %c0_117] : memref<1x256x128xbf16, #tpu.memory_space<vmem>>, vector<1x256x128xbf16>
    %108 = vector.shape_cast %107 : vector<1x256x128xbf16> to vector<256x128xbf16>
    %109 = vector.shape_cast %106 : vector<256x128xbf16> to vector<1x256x128xbf16>
    tpu.vector_store %arg6[%c0_115, %c0_116, %c0_117], %109 {strides = array<i32>} : memref<1x256x128xbf16, #tpu.memory_space<vmem>>, vector<1x256x128xbf16>,
    return
  }
  func.func @transform_0(%arg0: i32, %arg1: i32) -> (i32, i32, i32, i32, i32) {
    %c0_i32 = arith.constant 0 : i32
    %c0_i32_0 = arith.constant 0 : i32
    %c0_i32_1 = arith.constant 0 : i32
    %c0_i32_2 = arith.constant 0 : i32
    %c0_i32_3 = arith.constant 0 : i32
    return %arg0, %c0_i32, %c0_i32_0, %c0_i32_1, %c0_i32_2 : i32, i32, i32, i32, i32
  }
  func.func @transform_1(%arg0: i32, %arg1: i32) -> (i32, i32, i32) {
    %c0_i32 = arith.constant 0 : i32
    %c0_i32_0 = arith.constant 0 : i32
    %c0_i32_1 = arith.constant 0 : i32
    return %c0_i32, %c0_i32_0, %arg1 : i32, i32, i32
  }
  func.func @transform_2(%arg0: i32, %arg1: i32) -> (i32, i32) {
    %c0_i32 = arith.constant 0 : i32
    %c0_i32_0 = arith.constant 0 : i32
    return %c0_i32, %arg1 : i32, i32
  }
  func.func @transform_3(%arg0: i32, %arg1: i32) -> (i32, i32, i32) {
    %c0_i32 = arith.constant 0 : i32
    %c0_i32_0 = arith.constant 0 : i32
    return %arg0, %c0_i32, %arg1 : i32, i32, i32
  }
  func.func @transform_4(%arg0: i32, %arg1: i32) -> (i32, i32, i32) {
    %c0_i32 = arith.constant 0 : i32
    %c0_i32_0 = arith.constant 0 : i32
    return %arg0, %c0_i32, %arg1 : i32, i32, i32
  }
}

module attributes {stable_mosaic.version = 11 : i64} {
  func.func @_conv_kernel(%arg0: i32, %arg1: i32, %arg2: memref<1x4x8x8x128xbf16, #tpu.memory_space<vmem>>, %arg3: memref<1x128x128xbf16, #tpu.memory_space<vmem>>, %arg4: memref<1x128xf32, #tpu.memory_space<vmem>>, %arg5: memref<1x64x128xbf16, #tpu.memory_space<vmem>>, %arg6: memref<4x8x8x128xf32, #tpu.memory_space<vmem>>, %arg7: memref<64x128xf32, #tpu.memory_space<vmem>>) attributes {dimension_semantics = [#tpu.dimension_semantics<parallel>, #tpu.dimension_semantics<parallel>], iteration_bounds = array<i64: 2, 1>, scalar_prefetch = 0 : i64, scratch_operands = 2 : i64, tpu.core_type = #tpu.core_type<tc>, window_params = [{transform_indices = @transform_0, window_bounds = array<i64: 1, 4, 8, 8, 128>}, {transform_indices = @transform_1, window_bounds = array<i64: 1, 128, 128>}, {transform_indices = @transform_2, window_bounds = array<i64: 1, 128>}, {transform_indices = @transform_3, window_bounds = array<i64: 1, 64, 128>}]} {
    %c0 = arith.constant 0 : index
    %c0_0 = arith.constant 0 : index
    %c0_1 = arith.constant 0 : index
    %c0_2 = arith.constant 0 : index
    %c0_3 = arith.constant 0 : index
    %0 = vector.load %arg2[%c0, %c0_0, %c0_1, %c0_2, %c0_3] : memref<1x4x8x8x128xbf16, #tpu.memory_space<vmem>>, vector<1x4x8x8x128xbf16>
    %1 = vector.shape_cast %0 : vector<1x4x8x8x128xbf16> to vector<4x8x8x128xbf16>
    %2 = arith.extf %1 : vector<4x8x8x128xbf16> to vector<4x8x8x128xf32>
    %c0_4 = arith.constant 0 : index
    %c0_5 = arith.constant 0 : index
    %c0_6 = arith.constant 0 : index
    %c0_7 = arith.constant 0 : index
    %3 = vector.load %arg6[%c0_4, %c0_5, %c0_6, %c0_7] : memref<4x8x8x128xf32, #tpu.memory_space<vmem>>, vector<4x8x8x128xf32>
    tpu.vector_store %arg6[%c0_4, %c0_5, %c0_6, %c0_7], %2 {strides = array<i32>} : memref<4x8x8x128xf32, #tpu.memory_space<vmem>>, vector<4x8x8x128xf32>,
    %c0_8 = arith.constant 0 : index
    %c0_9 = arith.constant 0 : index
    %c0_10 = arith.constant 0 : index
    %c0_11 = arith.constant 0 : index
    %4 = vector.load %arg6[%c0_8, %c0_9, %c0_10, %c0_11] : memref<4x8x8x128xf32, #tpu.memory_space<vmem>>, vector<1x8x8x128xf32>
    %5 = vector.shape_cast %4 : vector<1x8x8x128xf32> to vector<8x8x128xf32>
    %6 = vector.shape_cast %5 : vector<8x8x128xf32> to vector<64x128xf32>
    %7 = arith.truncf %6 : vector<64x128xf32> to vector<64x128xbf16>
    %c0_12 = arith.constant 0 : index
    %c0_13 = arith.constant 0 : index
    %c0_14 = arith.constant 0 : index
    %8 = vector.load %arg3[%c0_12, %c0_13, %c0_14] : memref<1x128x128xbf16, #tpu.memory_space<vmem>>, vector<1x128x128xbf16>
    %9 = vector.shape_cast %8 : vector<1x128x128xbf16> to vector<128x128xbf16>
    %cst = arith.constant dense<0.000000e+00> : vector<64x128xf32>
    %10 = tpu.matmul %7, %9, %cst {dimension_numbers = #tpu.dot_dimension_numbers<[1], [0], [0], [1], [0, 0, 1, 1], [], []>} : vector<64x128xbf16>, vector<128x128xbf16>, vector<64x128xf32> -> vector<64x128xf32>
    %c0_15 = arith.constant 0 : index
    %c0_16 = arith.constant 0 : index
    %11 = vector.load %arg7[%c0_15, %c0_16] : memref<64x128xf32, #tpu.memory_space<vmem>>, vector<64x128xf32>
    tpu.vector_store %arg7[%c0_15, %c0_16], %10 {strides = array<i32>} : memref<64x128xf32, #tpu.memory_space<vmem>>, vector<64x128xf32>,
    %c0_17 = arith.constant 0 : index
    %c0_18 = arith.constant 0 : index
    %12 = vector.load %arg7[%c0_17, %c0_18] : memref<64x128xf32, #tpu.memory_space<vmem>>, vector<64x128xf32>
    %c0_19 = arith.constant 0 : index
    %c0_20 = arith.constant 0 : index
    %13 = vector.load %arg4[%c0_19, %c0_20] : memref<1x128xf32, #tpu.memory_space<vmem>>, vector<1x128xf32>
    %14 = vector.broadcast %13 : vector<1x128xf32> to vector<64x128xf32>
    %15 = arith.addf %12, %14 : vector<64x128xf32>
    %16 = arith.truncf %15 : vector<64x128xf32> to vector<64x128xbf16>
    %c0_21 = arith.constant 0 : index
    %c0_22 = arith.constant 0 : index
    %c0_23 = arith.constant 0 : index
    %17 = vector.load %arg5[%c0_21, %c0_22, %c0_23] : memref<1x64x128xbf16, #tpu.memory_space<vmem>>, vector<1x64x128xbf16>
    %18 = vector.shape_cast %17 : vector<1x64x128xbf16> to vector<64x128xbf16>
    %19 = vector.shape_cast %16 : vector<64x128xbf16> to vector<1x64x128xbf16>
    tpu.vector_store %arg5[%c0_21, %c0_22, %c0_23], %19 {strides = array<i32>} : memref<1x64x128xbf16, #tpu.memory_space<vmem>>, vector<1x64x128xbf16>,
    return
  }
  func.func @transform_0(%arg0: i32, %arg1: i32) -> (i32, i32, i32, i32, i32) {
    %c0_i32 = arith.constant 0 : i32
    %c0_i32_0 = arith.constant 0 : i32
    %c0_i32_1 = arith.constant 0 : i32
    %c0_i32_2 = arith.constant 0 : i32
    %c0_i32_3 = arith.constant 0 : i32
    return %arg0, %c0_i32, %c0_i32_0, %c0_i32_1, %c0_i32_2 : i32, i32, i32, i32, i32
  }
  func.func @transform_1(%arg0: i32, %arg1: i32) -> (i32, i32, i32) {
    %c0_i32 = arith.constant 0 : i32
    %c0_i32_0 = arith.constant 0 : i32
    %c0_i32_1 = arith.constant 0 : i32
    return %c0_i32, %c0_i32_0, %arg1 : i32, i32, i32
  }
  func.func @transform_2(%arg0: i32, %arg1: i32) -> (i32, i32) {
    %c0_i32 = arith.constant 0 : i32
    %c0_i32_0 = arith.constant 0 : i32
    return %c0_i32, %arg1 : i32, i32
  }
  func.func @transform_3(%arg0: i32, %arg1: i32) -> (i32, i32, i32) {
    %c0_i32 = arith.constant 0 : i32
    %c0_i32_0 = arith.constant 0 : i32
    return %arg0, %c0_i32, %arg1 : i32, i32, i32
  }
}

module attributes {stable_mosaic.version = 11 : i64} {
  func.func @_conv_kernel(%arg0: i32, %arg1: i32, %arg2: memref<1x4x9x9x128xbf16, #tpu.memory_space<vmem>>, %arg3: memref<9x128x128xbf16, #tpu.memory_space<vmem>>, %arg4: memref<1x128xf32, #tpu.memory_space<vmem>>, %arg5: memref<1x64x128xbf16, #tpu.memory_space<vmem>>, %arg6: memref<1x64x128xbf16, #tpu.memory_space<vmem>>, %arg7: memref<4x9x9x128xf32, #tpu.memory_space<vmem>>, %arg8: memref<64x128xf32, #tpu.memory_space<vmem>>) attributes {dimension_semantics = [#tpu.dimension_semantics<parallel>, #tpu.dimension_semantics<parallel>], iteration_bounds = array<i64: 2, 1>, scalar_prefetch = 0 : i64, scratch_operands = 2 : i64, tpu.core_type = #tpu.core_type<tc>, window_params = [{transform_indices = @transform_0, window_bounds = array<i64: 1, 4, 9, 9, 128>}, {transform_indices = @transform_1, window_bounds = array<i64: 9, 128, 128>}, {transform_indices = @transform_2, window_bounds = array<i64: 1, 128>}, {transform_indices = @transform_3, window_bounds = array<i64: 1, 64, 128>}, {transform_indices = @transform_4, window_bounds = array<i64: 1, 64, 128>}]} {
    %c0 = arith.constant 0 : index
    %c0_0 = arith.constant 0 : index
    %c0_1 = arith.constant 0 : index
    %c0_2 = arith.constant 0 : index
    %c0_3 = arith.constant 0 : index
    %0 = vector.load %arg2[%c0, %c0_0, %c0_1, %c0_2, %c0_3] : memref<1x4x9x9x128xbf16, #tpu.memory_space<vmem>>, vector<1x4x9x9x128xbf16>
    %1 = vector.shape_cast %0 : vector<1x4x9x9x128xbf16> to vector<4x9x9x128xbf16>
    %2 = arith.extf %1 : vector<4x9x9x128xbf16> to vector<4x9x9x128xf32>
    %cst = arith.constant 0.000000e+00 : f32
    %3 = vector.broadcast %cst : f32 to vector<4x9x9x128xf32>
    %4 = arith.maximumf %2, %3 : vector<4x9x9x128xf32>
    %c0_4 = arith.constant 0 : index
    %c0_5 = arith.constant 0 : index
    %c0_6 = arith.constant 0 : index
    %c0_7 = arith.constant 0 : index
    %5 = vector.load %arg7[%c0_4, %c0_5, %c0_6, %c0_7] : memref<4x9x9x128xf32, #tpu.memory_space<vmem>>, vector<4x9x9x128xf32>
    tpu.vector_store %arg7[%c0_4, %c0_5, %c0_6, %c0_7], %4 {strides = array<i32>} : memref<4x9x9x128xf32, #tpu.memory_space<vmem>>, vector<4x9x9x128xf32>,
    %c0_8 = arith.constant 0 : index
    %c0_9 = arith.constant 0 : index
    %c0_10 = arith.constant 0 : index
    %c0_11 = arith.constant 0 : index
    %6 = vector.load %arg7[%c0_8, %c0_9, %c0_10, %c0_11] : memref<4x9x9x128xf32, #tpu.memory_space<vmem>>, vector<1x8x8x128xf32>
    %7 = vector.shape_cast %6 : vector<1x8x8x128xf32> to vector<8x8x128xf32>
    %8 = vector.shape_cast %7 : vector<8x8x128xf32> to vector<64x128xf32>
    %9 = arith.truncf %8 : vector<64x128xf32> to vector<64x128xbf16>
    %c0_12 = arith.constant 0 : index
    %c0_13 = arith.constant 0 : index
    %c0_14 = arith.constant 0 : index
    %10 = vector.load %arg3[%c0_12, %c0_13, %c0_14] : memref<9x128x128xbf16, #tpu.memory_space<vmem>>, vector<1x128x128xbf16>
    %11 = vector.shape_cast %10 : vector<1x128x128xbf16> to vector<128x128xbf16>
    %cst_15 = arith.constant dense<0.000000e+00> : vector<64x128xf32>
    %12 = tpu.matmul %9, %11, %cst_15 {dimension_numbers = #tpu.dot_dimension_numbers<[1], [0], [0], [1], [0, 0, 1, 1], [], []>} : vector<64x128xbf16>, vector<128x128xbf16>, vector<64x128xf32> -> vector<64x128xf32>
    %c0_16 = arith.constant 0 : index
    %c0_17 = arith.constant 0 : index
    %13 = vector.load %arg8[%c0_16, %c0_17] : memref<64x128xf32, #tpu.memory_space<vmem>>, vector<64x128xf32>
    tpu.vector_store %arg8[%c0_16, %c0_17], %12 {strides = array<i32>} : memref<64x128xf32, #tpu.memory_space<vmem>>, vector<64x128xf32>,
    %c1 = arith.constant 1 : index
    %c0_18 = arith.constant 0 : index
    %c0_19 = arith.constant 0 : index
    %c0_20 = arith.constant 0 : index
    %14 = vector.load %arg7[%c1, %c0_18, %c0_19, %c0_20] : memref<4x9x9x128xf32, #tpu.memory_space<vmem>>, vector<1x8x8x128xf32>
    %15 = vector.shape_cast %14 : vector<1x8x8x128xf32> to vector<8x8x128xf32>
    %16 = vector.shape_cast %15 : vector<8x8x128xf32> to vector<64x128xf32>
    %17 = arith.truncf %16 : vector<64x128xf32> to vector<64x128xbf16>
    %c1_21 = arith.constant 1 : index
    %c0_22 = arith.constant 0 : index
    %c0_23 = arith.constant 0 : index
    %18 = vector.load %arg3[%c1_21, %c0_22, %c0_23] : memref<9x128x128xbf16, #tpu.memory_space<vmem>>, vector<1x128x128xbf16>
    %19 = vector.shape_cast %18 : vector<1x128x128xbf16> to vector<128x128xbf16>
    %cst_24 = arith.constant dense<0.000000e+00> : vector<64x128xf32>
    %20 = tpu.matmul %17, %19, %cst_24 {dimension_numbers = #tpu.dot_dimension_numbers<[1], [0], [0], [1], [0, 0, 1, 1], [], []>} : vector<64x128xbf16>, vector<128x128xbf16>, vector<64x128xf32> -> vector<64x128xf32>
    %c0_25 = arith.constant 0 : index
    %c0_26 = arith.constant 0 : index
    %21 = vector.load %arg8[%c0_25, %c0_26] : memref<64x128xf32, #tpu.memory_space<vmem>>, vector<64x128xf32>
    %22 = arith.addf %21, %20 : vector<64x128xf32>
    %c0_27 = arith.constant 0 : index
    %c0_28 = arith.constant 0 : index
    %23 = vector.load %arg8[%c0_27, %c0_28] : memref<64x128xf32, #tpu.memory_space<vmem>>, vector<64x128xf32>
    tpu.vector_store %arg8[%c0_27, %c0_28], %22 {strides = array<i32>} : memref<64x128xf32, #tpu.memory_space<vmem>>, vector<64x128xf32>,
    %c0_29 = arith.constant 0 : index
    %c0_30 = arith.constant 0 : index
    %c1_31 = arith.constant 1 : index
    %c0_32 = arith.constant 0 : index
    %24 = vector.load %arg7[%c0_29, %c0_30, %c1_31, %c0_32] : memref<4x9x9x128xf32, #tpu.memory_space<vmem>>, vector<1x8x8x128xf32>
    %25 = vector.shape_cast %24 : vector<1x8x8x128xf32> to vector<8x8x128xf32>
    %26 = vector.shape_cast %25 : vector<8x8x128xf32> to vector<64x128xf32>
    %27 = arith.truncf %26 : vector<64x128xf32> to vector<64x128xbf16>
    %c2 = arith.constant 2 : index
    %c0_33 = arith.constant 0 : index
    %c0_34 = arith.constant 0 : index
    %28 = vector.load %arg3[%c2, %c0_33, %c0_34] : memref<9x128x128xbf16, #tpu.memory_space<vmem>>, vector<1x128x128xbf16>
    %29 = vector.shape_cast %28 : vector<1x128x128xbf16> to vector<128x128xbf16>
    %cst_35 = arith.constant dense<0.000000e+00> : vector<64x128xf32>
    %30 = tpu.matmul %27, %29, %cst_35 {dimension_numbers = #tpu.dot_dimension_numbers<[1], [0], [0], [1], [0, 0, 1, 1], [], []>} : vector<64x128xbf16>, vector<128x128xbf16>, vector<64x128xf32> -> vector<64x128xf32>
    %c0_36 = arith.constant 0 : index
    %c0_37 = arith.constant 0 : index
    %31 = vector.load %arg8[%c0_36, %c0_37] : memref<64x128xf32, #tpu.memory_space<vmem>>, vector<64x128xf32>
    %32 = arith.addf %31, %30 : vector<64x128xf32>
    %c0_38 = arith.constant 0 : index
    %c0_39 = arith.constant 0 : index
    %33 = vector.load %arg8[%c0_38, %c0_39] : memref<64x128xf32, #tpu.memory_space<vmem>>, vector<64x128xf32>
    tpu.vector_store %arg8[%c0_38, %c0_39], %32 {strides = array<i32>} : memref<64x128xf32, #tpu.memory_space<vmem>>, vector<64x128xf32>,
    %c2_40 = arith.constant 2 : index
    %c0_41 = arith.constant 0 : index
    %c0_42 = arith.constant 0 : index
    %c0_43 = arith.constant 0 : index
    %34 = vector.load %arg7[%c2_40, %c0_41, %c0_42, %c0_43] : memref<4x9x9x128xf32, #tpu.memory_space<vmem>>, vector<1x8x8x128xf32>
    %35 = vector.shape_cast %34 : vector<1x8x8x128xf32> to vector<8x8x128xf32>
    %36 = vector.shape_cast %35 : vector<8x8x128xf32> to vector<64x128xf32>
    %37 = arith.truncf %36 : vector<64x128xf32> to vector<64x128xbf16>
    %c3 = arith.constant 3 : index
    %c0_44 = arith.constant 0 : index
    %c0_45 = arith.constant 0 : index
    %38 = vector.load %arg3[%c3, %c0_44, %c0_45] : memref<9x128x128xbf16, #tpu.memory_space<vmem>>, vector<1x128x128xbf16>
    %39 = vector.shape_cast %38 : vector<1x128x128xbf16> to vector<128x128xbf16>
    %cst_46 = arith.constant dense<0.000000e+00> : vector<64x128xf32>
    %40 = tpu.matmul %37, %39, %cst_46 {dimension_numbers = #tpu.dot_dimension_numbers<[1], [0], [0], [1], [0, 0, 1, 1], [], []>} : vector<64x128xbf16>, vector<128x128xbf16>, vector<64x128xf32> -> vector<64x128xf32>
    %c0_47 = arith.constant 0 : index
    %c0_48 = arith.constant 0 : index
    %41 = vector.load %arg8[%c0_47, %c0_48] : memref<64x128xf32, #tpu.memory_space<vmem>>, vector<64x128xf32>
    %42 = arith.addf %41, %40 : vector<64x128xf32>
    %c0_49 = arith.constant 0 : index
    %c0_50 = arith.constant 0 : index
    %43 = vector.load %arg8[%c0_49, %c0_50] : memref<64x128xf32, #tpu.memory_space<vmem>>, vector<64x128xf32>
    tpu.vector_store %arg8[%c0_49, %c0_50], %42 {strides = array<i32>} : memref<64x128xf32, #tpu.memory_space<vmem>>, vector<64x128xf32>,
    %c3_51 = arith.constant 3 : index
    %c0_52 = arith.constant 0 : index
    %c0_53 = arith.constant 0 : index
    %c0_54 = arith.constant 0 : index
    %44 = vector.load %arg7[%c3_51, %c0_52, %c0_53, %c0_54] : memref<4x9x9x128xf32, #tpu.memory_space<vmem>>, vector<1x8x8x128xf32>
    %45 = vector.shape_cast %44 : vector<1x8x8x128xf32> to vector<8x8x128xf32>
    %46 = vector.shape_cast %45 : vector<8x8x128xf32> to vector<64x128xf32>
    %47 = arith.truncf %46 : vector<64x128xf32> to vector<64x128xbf16>
    %c4 = arith.constant 4 : index
    %c0_55 = arith.constant 0 : index
    %c0_56 = arith.constant 0 : index
    %48 = vector.load %arg3[%c4, %c0_55, %c0_56] : memref<9x128x128xbf16, #tpu.memory_space<vmem>>, vector<1x128x128xbf16>
    %49 = vector.shape_cast %48 : vector<1x128x128xbf16> to vector<128x128xbf16>
    %cst_57 = arith.constant dense<0.000000e+00> : vector<64x128xf32>
    %50 = tpu.matmul %47, %49, %cst_57 {dimension_numbers = #tpu.dot_dimension_numbers<[1], [0], [0], [1], [0, 0, 1, 1], [], []>} : vector<64x128xbf16>, vector<128x128xbf16>, vector<64x128xf32> -> vector<64x128xf32>
    %c0_58 = arith.constant 0 : index
    %c0_59 = arith.constant 0 : index
    %51 = vector.load %arg8[%c0_58, %c0_59] : memref<64x128xf32, #tpu.memory_space<vmem>>, vector<64x128xf32>
    %52 = arith.addf %51, %50 : vector<64x128xf32>
    %c0_60 = arith.constant 0 : index
    %c0_61 = arith.constant 0 : index
    %53 = vector.load %arg8[%c0_60, %c0_61] : memref<64x128xf32, #tpu.memory_space<vmem>>, vector<64x128xf32>
    tpu.vector_store %arg8[%c0_60, %c0_61], %52 {strides = array<i32>} : memref<64x128xf32, #tpu.memory_space<vmem>>, vector<64x128xf32>,
    %c2_62 = arith.constant 2 : index
    %c0_63 = arith.constant 0 : index
    %c1_64 = arith.constant 1 : index
    %c0_65 = arith.constant 0 : index
    %54 = vector.load %arg7[%c2_62, %c0_63, %c1_64, %c0_65] : memref<4x9x9x128xf32, #tpu.memory_space<vmem>>, vector<1x8x8x128xf32>
    %55 = vector.shape_cast %54 : vector<1x8x8x128xf32> to vector<8x8x128xf32>
    %56 = vector.shape_cast %55 : vector<8x8x128xf32> to vector<64x128xf32>
    %57 = arith.truncf %56 : vector<64x128xf32> to vector<64x128xbf16>
    %c5 = arith.constant 5 : index
    %c0_66 = arith.constant 0 : index
    %c0_67 = arith.constant 0 : index
    %58 = vector.load %arg3[%c5, %c0_66, %c0_67] : memref<9x128x128xbf16, #tpu.memory_space<vmem>>, vector<1x128x128xbf16>
    %59 = vector.shape_cast %58 : vector<1x128x128xbf16> to vector<128x128xbf16>
    %cst_68 = arith.constant dense<0.000000e+00> : vector<64x128xf32>
    %60 = tpu.matmul %57, %59, %cst_68 {dimension_numbers = #tpu.dot_dimension_numbers<[1], [0], [0], [1], [0, 0, 1, 1], [], []>} : vector<64x128xbf16>, vector<128x128xbf16>, vector<64x128xf32> -> vector<64x128xf32>
    %c0_69 = arith.constant 0 : index
    %c0_70 = arith.constant 0 : index
    %61 = vector.load %arg8[%c0_69, %c0_70] : memref<64x128xf32, #tpu.memory_space<vmem>>, vector<64x128xf32>
    %62 = arith.addf %61, %60 : vector<64x128xf32>
    %c0_71 = arith.constant 0 : index
    %c0_72 = arith.constant 0 : index
    %63 = vector.load %arg8[%c0_71, %c0_72] : memref<64x128xf32, #tpu.memory_space<vmem>>, vector<64x128xf32>
    tpu.vector_store %arg8[%c0_71, %c0_72], %62 {strides = array<i32>} : memref<64x128xf32, #tpu.memory_space<vmem>>, vector<64x128xf32>,
    %c0_73 = arith.constant 0 : index
    %c1_74 = arith.constant 1 : index
    %c0_75 = arith.constant 0 : index
    %c0_76 = arith.constant 0 : index
    %64 = vector.load %arg7[%c0_73, %c1_74, %c0_75, %c0_76] : memref<4x9x9x128xf32, #tpu.memory_space<vmem>>, vector<1x8x8x128xf32>
    %65 = vector.shape_cast %64 : vector<1x8x8x128xf32> to vector<8x8x128xf32>
    %66 = vector.shape_cast %65 : vector<8x8x128xf32> to vector<64x128xf32>
    %67 = arith.truncf %66 : vector<64x128xf32> to vector<64x128xbf16>
    %c6 = arith.constant 6 : index
    %c0_77 = arith.constant 0 : index
    %c0_78 = arith.constant 0 : index
    %68 = vector.load %arg3[%c6, %c0_77, %c0_78] : memref<9x128x128xbf16, #tpu.memory_space<vmem>>, vector<1x128x128xbf16>
    %69 = vector.shape_cast %68 : vector<1x128x128xbf16> to vector<128x128xbf16>
    %cst_79 = arith.constant dense<0.000000e+00> : vector<64x128xf32>
    %70 = tpu.matmul %67, %69, %cst_79 {dimension_numbers = #tpu.dot_dimension_numbers<[1], [0], [0], [1], [0, 0, 1, 1], [], []>} : vector<64x128xbf16>, vector<128x128xbf16>, vector<64x128xf32> -> vector<64x128xf32>
    %c0_80 = arith.constant 0 : index
    %c0_81 = arith.constant 0 : index
    %71 = vector.load %arg8[%c0_80, %c0_81] : memref<64x128xf32, #tpu.memory_space<vmem>>, vector<64x128xf32>
    %72 = arith.addf %71, %70 : vector<64x128xf32>
    %c0_82 = arith.constant 0 : index
    %c0_83 = arith.constant 0 : index
    %73 = vector.load %arg8[%c0_82, %c0_83] : memref<64x128xf32, #tpu.memory_space<vmem>>, vector<64x128xf32>
    tpu.vector_store %arg8[%c0_82, %c0_83], %72 {strides = array<i32>} : memref<64x128xf32, #tpu.memory_space<vmem>>, vector<64x128xf32>,
    %c1_84 = arith.constant 1 : index
    %c1_85 = arith.constant 1 : index
    %c0_86 = arith.constant 0 : index
    %c0_87 = arith.constant 0 : index
    %74 = vector.load %arg7[%c1_84, %c1_85, %c0_86, %c0_87] : memref<4x9x9x128xf32, #tpu.memory_space<vmem>>, vector<1x8x8x128xf32>
    %75 = vector.shape_cast %74 : vector<1x8x8x128xf32> to vector<8x8x128xf32>
    %76 = vector.shape_cast %75 : vector<8x8x128xf32> to vector<64x128xf32>
    %77 = arith.truncf %76 : vector<64x128xf32> to vector<64x128xbf16>
    %c7 = arith.constant 7 : index
    %c0_88 = arith.constant 0 : index
    %c0_89 = arith.constant 0 : index
    %78 = vector.load %arg3[%c7, %c0_88, %c0_89] : memref<9x128x128xbf16, #tpu.memory_space<vmem>>, vector<1x128x128xbf16>
    %79 = vector.shape_cast %78 : vector<1x128x128xbf16> to vector<128x128xbf16>
    %cst_90 = arith.constant dense<0.000000e+00> : vector<64x128xf32>
    %80 = tpu.matmul %77, %79, %cst_90 {dimension_numbers = #tpu.dot_dimension_numbers<[1], [0], [0], [1], [0, 0, 1, 1], [], []>} : vector<64x128xbf16>, vector<128x128xbf16>, vector<64x128xf32> -> vector<64x128xf32>
    %c0_91 = arith.constant 0 : index
    %c0_92 = arith.constant 0 : index
    %81 = vector.load %arg8[%c0_91, %c0_92] : memref<64x128xf32, #tpu.memory_space<vmem>>, vector<64x128xf32>
    %82 = arith.addf %81, %80 : vector<64x128xf32>
    %c0_93 = arith.constant 0 : index
    %c0_94 = arith.constant 0 : index
    %83 = vector.load %arg8[%c0_93, %c0_94] : memref<64x128xf32, #tpu.memory_space<vmem>>, vector<64x128xf32>
    tpu.vector_store %arg8[%c0_93, %c0_94], %82 {strides = array<i32>} : memref<64x128xf32, #tpu.memory_space<vmem>>, vector<64x128xf32>,
    %c0_95 = arith.constant 0 : index
    %c1_96 = arith.constant 1 : index
    %c1_97 = arith.constant 1 : index
    %c0_98 = arith.constant 0 : index
    %84 = vector.load %arg7[%c0_95, %c1_96, %c1_97, %c0_98] : memref<4x9x9x128xf32, #tpu.memory_space<vmem>>, vector<1x8x8x128xf32>
    %85 = vector.shape_cast %84 : vector<1x8x8x128xf32> to vector<8x8x128xf32>
    %86 = vector.shape_cast %85 : vector<8x8x128xf32> to vector<64x128xf32>
    %87 = arith.truncf %86 : vector<64x128xf32> to vector<64x128xbf16>
    %c8 = arith.constant 8 : index
    %c0_99 = arith.constant 0 : index
    %c0_100 = arith.constant 0 : index
    %88 = vector.load %arg3[%c8, %c0_99, %c0_100] : memref<9x128x128xbf16, #tpu.memory_space<vmem>>, vector<1x128x128xbf16>
    %89 = vector.shape_cast %88 : vector<1x128x128xbf16> to vector<128x128xbf16>
    %cst_101 = arith.constant dense<0.000000e+00> : vector<64x128xf32>
    %90 = tpu.matmul %87, %89, %cst_101 {dimension_numbers = #tpu.dot_dimension_numbers<[1], [0], [0], [1], [0, 0, 1, 1], [], []>} : vector<64x128xbf16>, vector<128x128xbf16>, vector<64x128xf32> -> vector<64x128xf32>
    %c0_102 = arith.constant 0 : index
    %c0_103 = arith.constant 0 : index
    %91 = vector.load %arg8[%c0_102, %c0_103] : memref<64x128xf32, #tpu.memory_space<vmem>>, vector<64x128xf32>
    %92 = arith.addf %91, %90 : vector<64x128xf32>
    %c0_104 = arith.constant 0 : index
    %c0_105 = arith.constant 0 : index
    %93 = vector.load %arg8[%c0_104, %c0_105] : memref<64x128xf32, #tpu.memory_space<vmem>>, vector<64x128xf32>
    tpu.vector_store %arg8[%c0_104, %c0_105], %92 {strides = array<i32>} : memref<64x128xf32, #tpu.memory_space<vmem>>, vector<64x128xf32>,
    %c0_106 = arith.constant 0 : index
    %c0_107 = arith.constant 0 : index
    %94 = vector.load %arg8[%c0_106, %c0_107] : memref<64x128xf32, #tpu.memory_space<vmem>>, vector<64x128xf32>
    %c0_108 = arith.constant 0 : index
    %c0_109 = arith.constant 0 : index
    %95 = vector.load %arg4[%c0_108, %c0_109] : memref<1x128xf32, #tpu.memory_space<vmem>>, vector<1x128xf32>
    %96 = vector.broadcast %95 : vector<1x128xf32> to vector<64x128xf32>
    %97 = arith.addf %94, %96 : vector<64x128xf32>
    %c0_110 = arith.constant 0 : index
    %c0_111 = arith.constant 0 : index
    %c0_112 = arith.constant 0 : index
    %98 = vector.load %arg5[%c0_110, %c0_111, %c0_112] : memref<1x64x128xbf16, #tpu.memory_space<vmem>>, vector<1x64x128xbf16>
    %99 = vector.shape_cast %98 : vector<1x64x128xbf16> to vector<64x128xbf16>
    %100 = arith.extf %99 : vector<64x128xbf16> to vector<64x128xf32>
    %cst_113 = arith.constant 0.707106769 : f32
    %101 = vector.broadcast %cst_113 : f32 to vector<64x128xf32>
    %102 = arith.mulf %101, %100 : vector<64x128xf32>
    %cst_114 = arith.constant 0.707106769 : f32
    %103 = vector.broadcast %cst_114 : f32 to vector<64x128xf32>
    %104 = arith.mulf %103, %97 : vector<64x128xf32>
    %105 = arith.addf %102, %104 : vector<64x128xf32>
    %106 = arith.truncf %105 : vector<64x128xf32> to vector<64x128xbf16>
    %c0_115 = arith.constant 0 : index
    %c0_116 = arith.constant 0 : index
    %c0_117 = arith.constant 0 : index
    %107 = vector.load %arg6[%c0_115, %c0_116, %c0_117] : memref<1x64x128xbf16, #tpu.memory_space<vmem>>, vector<1x64x128xbf16>
    %108 = vector.shape_cast %107 : vector<1x64x128xbf16> to vector<64x128xbf16>
    %109 = vector.shape_cast %106 : vector<64x128xbf16> to vector<1x64x128xbf16>
    tpu.vector_store %arg6[%c0_115, %c0_116, %c0_117], %109 {strides = array<i32>} : memref<1x64x128xbf16, #tpu.memory_space<vmem>>, vector<1x64x128xbf16>,
    return
  }
  func.func @transform_0(%arg0: i32, %arg1: i32) -> (i32, i32, i32, i32, i32) {
    %c0_i32 = arith.constant 0 : i32
    %c0_i32_0 = arith.constant 0 : i32
    %c0_i32_1 = arith.constant 0 : i32
    %c0_i32_2 = arith.constant 0 : i32
    %c0_i32_3 = arith.constant 0 : i32
    return %arg0, %c0_i32, %c0_i32_0, %c0_i32_1, %c0_i32_2 : i32, i32, i32, i32, i32
  }
  func.func @transform_1(%arg0: i32, %arg1: i32) -> (i32, i32, i32) {
    %c0_i32 = arith.constant 0 : i32
    %c0_i32_0 = arith.constant 0 : i32
    %c0_i32_1 = arith.constant 0 : i32
    return %c0_i32, %c0_i32_0, %arg1 : i32, i32, i32
  }
  func.func @transform_2(%arg0: i32, %arg1: i32) -> (i32, i32) {
    %c0_i32 = arith.constant 0 : i32
    %c0_i32_0 = arith.constant 0 : i32
    return %c0_i32, %arg1 : i32, i32
  }
  func.func @transform_3(%arg0: i32, %arg1: i32) -> (i32, i32, i32) {
    %c0_i32 = arith.constant 0 : i32
    %c0_i32_0 = arith.constant 0 : i32
    return %arg0, %c0_i32, %arg1 : i32, i32, i32
  }
  func.func @transform_4(%arg0: i32, %arg1: i32) -> (i32, i32, i32) {
    %c0_i32 = arith.constant 0 : i32
    %c0_i32_0 = arith.constant 0 : i32
    return %arg0, %c0_i32, %arg1 : i32, i32, i32
  }
}

module attributes {stable_mosaic.version = 11 : i64} {
  func.func @_conv_kernel(%arg0: i32, %arg1: i32, %arg2: memref<1x4x4x8x128xbf16, #tpu.memory_space<vmem>>, %arg3: memref<1x128x128xbf16, #tpu.memory_space<vmem>>, %arg4: memref<1x128xf32, #tpu.memory_space<vmem>>, %arg5: memref<1x32x128xbf16, #tpu.memory_space<vmem>>, %arg6: memref<4x4x8x128xf32, #tpu.memory_space<vmem>>, %arg7: memref<32x128xf32, #tpu.memory_space<vmem>>) attributes {dimension_semantics = [#tpu.dimension_semantics<parallel>, #tpu.dimension_semantics<parallel>], iteration_bounds = array<i64: 2, 1>, scalar_prefetch = 0 : i64, scratch_operands = 2 : i64, tpu.core_type = #tpu.core_type<tc>, window_params = [{transform_indices = @transform_0, window_bounds = array<i64: 1, 4, 4, 8, 128>}, {transform_indices = @transform_1, window_bounds = array<i64: 1, 128, 128>}, {transform_indices = @transform_2, window_bounds = array<i64: 1, 128>}, {transform_indices = @transform_3, window_bounds = array<i64: 1, 32, 128>}]} {
    %c0 = arith.constant 0 : index
    %c0_0 = arith.constant 0 : index
    %c0_1 = arith.constant 0 : index
    %c0_2 = arith.constant 0 : index
    %c0_3 = arith.constant 0 : index
    %0 = vector.load %arg2[%c0, %c0_0, %c0_1, %c0_2, %c0_3] : memref<1x4x4x8x128xbf16, #tpu.memory_space<vmem>>, vector<1x4x4x8x128xbf16>
    %1 = vector.shape_cast %0 : vector<1x4x4x8x128xbf16> to vector<4x4x8x128xbf16>
    %2 = arith.extf %1 : vector<4x4x8x128xbf16> to vector<4x4x8x128xf32>
    %c0_4 = arith.constant 0 : index
    %c0_5 = arith.constant 0 : index
    %c0_6 = arith.constant 0 : index
    %c0_7 = arith.constant 0 : index
    %3 = vector.load %arg6[%c0_4, %c0_5, %c0_6, %c0_7] : memref<4x4x8x128xf32, #tpu.memory_space<vmem>>, vector<4x4x8x128xf32>
    tpu.vector_store %arg6[%c0_4, %c0_5, %c0_6, %c0_7], %2 {strides = array<i32>} : memref<4x4x8x128xf32, #tpu.memory_space<vmem>>, vector<4x4x8x128xf32>,
    %c0_8 = arith.constant 0 : index
    %c0_9 = arith.constant 0 : index
    %c0_10 = arith.constant 0 : index
    %c0_11 = arith.constant 0 : index
    %4 = vector.load %arg6[%c0_8, %c0_9, %c0_10, %c0_11] : memref<4x4x8x128xf32, #tpu.memory_space<vmem>>, vector<1x4x8x128xf32>
    %5 = vector.shape_cast %4 : vector<1x4x8x128xf32> to vector<4x8x128xf32>
    %6 = vector.shape_cast %5 : vector<4x8x128xf32> to vector<32x128xf32>
    %7 = arith.truncf %6 : vector<32x128xf32> to vector<32x128xbf16>
    %c0_12 = arith.constant 0 : index
    %c0_13 = arith.constant 0 : index
    %c0_14 = arith.constant 0 : index
    %8 = vector.load %arg3[%c0_12, %c0_13, %c0_14] : memref<1x128x128xbf16, #tpu.memory_space<vmem>>, vector<1x128x128xbf16>
    %9 = vector.shape_cast %8 : vector<1x128x128xbf16> to vector<128x128xbf16>
    %cst = arith.constant dense<0.000000e+00> : vector<32x128xf32>
    %10 = tpu.matmul %7, %9, %cst {dimension_numbers = #tpu.dot_dimension_numbers<[1], [0], [0], [1], [0, 0, 1, 1], [], []>} : vector<32x128xbf16>, vector<128x128xbf16>, vector<32x128xf32> -> vector<32x128xf32>
    %c0_15 = arith.constant 0 : index
    %c0_16 = arith.constant 0 : index
    %11 = vector.load %arg7[%c0_15, %c0_16] : memref<32x128xf32, #tpu.memory_space<vmem>>, vector<32x128xf32>
    tpu.vector_store %arg7[%c0_15, %c0_16], %10 {strides = array<i32>} : memref<32x128xf32, #tpu.memory_space<vmem>>, vector<32x128xf32>,
    %c0_17 = arith.constant 0 : index
    %c0_18 = arith.constant 0 : index
    %12 = vector.load %arg7[%c0_17, %c0_18] : memref<32x128xf32, #tpu.memory_space<vmem>>, vector<32x128xf32>
    %c0_19 = arith.constant 0 : index
    %c0_20 = arith.constant 0 : index
    %13 = vector.load %arg4[%c0_19, %c0_20] : memref<1x128xf32, #tpu.memory_space<vmem>>, vector<1x128xf32>
    %14 = vector.broadcast %13 : vector<1x128xf32> to vector<32x128xf32>
    %15 = arith.addf %12, %14 : vector<32x128xf32>
    %16 = arith.truncf %15 : vector<32x128xf32> to vector<32x128xbf16>
    %c0_21 = arith.constant 0 : index
    %c0_22 = arith.constant 0 : index
    %c0_23 = arith.constant 0 : index
    %17 = vector.load %arg5[%c0_21, %c0_22, %c0_23] : memref<1x32x128xbf16, #tpu.memory_space<vmem>>, vector<1x32x128xbf16>
    %18 = vector.shape_cast %17 : vector<1x32x128xbf16> to vector<32x128xbf16>
    %19 = vector.shape_cast %16 : vector<32x128xbf16> to vector<1x32x128xbf16>
    tpu.vector_store %arg5[%c0_21, %c0_22, %c0_23], %19 {strides = array<i32>} : memref<1x32x128xbf16, #tpu.memory_space<vmem>>, vector<1x32x128xbf16>,
    return
  }
  func.func @transform_0(%arg0: i32, %arg1: i32) -> (i32, i32, i32, i32, i32) {
    %c0_i32 = arith.constant 0 : i32
    %c0_i32_0 = arith.constant 0 : i32
    %c0_i32_1 = arith.constant 0 : i32
    %c0_i32_2 = arith.constant 0 : i32
    %c0_i32_3 = arith.constant 0 : i32
    return %arg0, %c0_i32, %c0_i32_0, %c0_i32_1, %c0_i32_2 : i32, i32, i32, i32, i32
  }
  func.func @transform_1(%arg0: i32, %arg1: i32) -> (i32, i32, i32) {
    %c0_i32 = arith.constant 0 : i32
    %c0_i32_0 = arith.constant 0 : i32
    %c0_i32_1 = arith.constant 0 : i32
    return %c0_i32, %c0_i32_0, %arg1 : i32, i32, i32
  }
  func.func @transform_2(%arg0: i32, %arg1: i32) -> (i32, i32) {
    %c0_i32 = arith.constant 0 : i32
    %c0_i32_0 = arith.constant 0 : i32
    return %c0_i32, %arg1 : i32, i32
  }
  func.func @transform_3(%arg0: i32, %arg1: i32) -> (i32, i32, i32) {
    %c0_i32 = arith.constant 0 : i32
    %c0_i32_0 = arith.constant 0 : i32
    return %arg0, %c0_i32, %arg1 : i32, i32, i32
  }
}

module attributes {stable_mosaic.version = 11 : i64} {
  func.func @_conv_kernel(%arg0: i32, %arg1: i32, %arg2: memref<1x1x10x10x128xbf16, #tpu.memory_space<vmem>>, %arg3: memref<9x128x128xbf16, #tpu.memory_space<vmem>>, %arg4: memref<1x128xf32, #tpu.memory_space<vmem>>, %arg5: memref<1x64x128xbf16, #tpu.memory_space<vmem>>, %arg6: memref<1x10x10x128xf32, #tpu.memory_space<vmem>>, %arg7: memref<64x128xf32, #tpu.memory_space<vmem>>) attributes {dimension_semantics = [#tpu.dimension_semantics<parallel>, #tpu.dimension_semantics<parallel>], iteration_bounds = array<i64: 2, 1>, scalar_prefetch = 0 : i64, scratch_operands = 2 : i64, tpu.core_type = #tpu.core_type<tc>, window_params = [{transform_indices = @transform_0, window_bounds = array<i64: 1, 1, 10, 10, 128>}, {transform_indices = @transform_1, window_bounds = array<i64: 9, 128, 128>}, {transform_indices = @transform_2, window_bounds = array<i64: 1, 128>}, {transform_indices = @transform_3, window_bounds = array<i64: 1, 64, 128>}]} {
    %c0 = arith.constant 0 : index
    %c0_0 = arith.constant 0 : index
    %c0_1 = arith.constant 0 : index
    %c0_2 = arith.constant 0 : index
    %c0_3 = arith.constant 0 : index
    %0 = vector.load %arg2[%c0, %c0_0, %c0_1, %c0_2, %c0_3] : memref<1x1x10x10x128xbf16, #tpu.memory_space<vmem>>, vector<1x1x10x10x128xbf16>
    %1 = vector.shape_cast %0 : vector<1x1x10x10x128xbf16> to vector<1x10x10x128xbf16>
    %2 = arith.extf %1 : vector<1x10x10x128xbf16> to vector<1x10x10x128xf32>
    %cst = arith.constant 0.000000e+00 : f32
    %3 = vector.broadcast %cst : f32 to vector<1x10x10x128xf32>
    %4 = arith.maximumf %2, %3 : vector<1x10x10x128xf32>
    %c0_4 = arith.constant 0 : index
    %c0_5 = arith.constant 0 : index
    %c0_6 = arith.constant 0 : index
    %c0_7 = arith.constant 0 : index
    %5 = vector.load %arg6[%c0_4, %c0_5, %c0_6, %c0_7] : memref<1x10x10x128xf32, #tpu.memory_space<vmem>>, vector<1x10x10x128xf32>
    tpu.vector_store %arg6[%c0_4, %c0_5, %c0_6, %c0_7], %4 {strides = array<i32>} : memref<1x10x10x128xf32, #tpu.memory_space<vmem>>, vector<1x10x10x128xf32>,
    %c0_8 = arith.constant 0 : index
    %c0_9 = arith.constant 0 : index
    %c0_10 = arith.constant 0 : index
    %c0_11 = arith.constant 0 : index
    %6 = vector.load %arg6[%c0_8, %c0_9, %c0_10, %c0_11] : memref<1x10x10x128xf32, #tpu.memory_space<vmem>>, vector<1x8x8x128xf32>
    %7 = vector.shape_cast %6 : vector<1x8x8x128xf32> to vector<8x8x128xf32>
    %8 = vector.shape_cast %7 : vector<8x8x128xf32> to vector<64x128xf32>
    %9 = arith.truncf %8 : vector<64x128xf32> to vector<64x128xbf16>
    %c0_12 = arith.constant 0 : index
    %c0_13 = arith.constant 0 : index
    %c0_14 = arith.constant 0 : index
    %10 = vector.load %arg3[%c0_12, %c0_13, %c0_14] : memref<9x128x128xbf16, #tpu.memory_space<vmem>>, vector<1x128x128xbf16>
    %11 = vector.shape_cast %10 : vector<1x128x128xbf16> to vector<128x128xbf16>
    %cst_15 = arith.constant dense<0.000000e+00> : vector<64x128xf32>
    %12 = tpu.matmul %9, %11, %cst_15 {dimension_numbers = #tpu.dot_dimension_numbers<[1], [0], [0], [1], [0, 0, 1, 1], [], []>} : vector<64x128xbf16>, vector<128x128xbf16>, vector<64x128xf32> -> vector<64x128xf32>
    %c0_16 = arith.constant 0 : index
    %c0_17 = arith.constant 0 : index
    %13 = vector.load %arg7[%c0_16, %c0_17] : memref<64x128xf32, #tpu.memory_space<vmem>>, vector<64x128xf32>
    tpu.vector_store %arg7[%c0_16, %c0_17], %12 {strides = array<i32>} : memref<64x128xf32, #tpu.memory_space<vmem>>, vector<64x128xf32>,
    %c0_18 = arith.constant 0 : index
    %c0_19 = arith.constant 0 : index
    %c1 = arith.constant 1 : index
    %c0_20 = arith.constant 0 : index
    %14 = vector.load %arg6[%c0_18, %c0_19, %c1, %c0_20] : memref<1x10x10x128xf32, #tpu.memory_space<vmem>>, vector<1x8x8x128xf32>
    %15 = vector.shape_cast %14 : vector<1x8x8x128xf32> to vector<8x8x128xf32>
    %16 = vector.shape_cast %15 : vector<8x8x128xf32> to vector<64x128xf32>
    %17 = arith.truncf %16 : vector<64x128xf32> to vector<64x128xbf16>
    %c1_21 = arith.constant 1 : index
    %c0_22 = arith.constant 0 : index
    %c0_23 = arith.constant 0 : index
    %18 = vector.load %arg3[%c1_21, %c0_22, %c0_23] : memref<9x128x128xbf16, #tpu.memory_space<vmem>>, vector<1x128x128xbf16>
    %19 = vector.shape_cast %18 : vector<1x128x128xbf16> to vector<128x128xbf16>
    %cst_24 = arith.constant dense<0.000000e+00> : vector<64x128xf32>
    %20 = tpu.matmul %17, %19, %cst_24 {dimension_numbers = #tpu.dot_dimension_numbers<[1], [0], [0], [1], [0, 0, 1, 1], [], []>} : vector<64x128xbf16>, vector<128x128xbf16>, vector<64x128xf32> -> vector<64x128xf32>
    %c0_25 = arith.constant 0 : index
    %c0_26 = arith.constant 0 : index
    %21 = vector.load %arg7[%c0_25, %c0_26] : memref<64x128xf32, #tpu.memory_space<vmem>>, vector<64x128xf32>
    %22 = arith.addf %21, %20 : vector<64x128xf32>
    %c0_27 = arith.constant 0 : index
    %c0_28 = arith.constant 0 : index
    %23 = vector.load %arg7[%c0_27, %c0_28] : memref<64x128xf32, #tpu.memory_space<vmem>>, vector<64x128xf32>
    tpu.vector_store %arg7[%c0_27, %c0_28], %22 {strides = array<i32>} : memref<64x128xf32, #tpu.memory_space<vmem>>, vector<64x128xf32>,
    %c0_29 = arith.constant 0 : index
    %c0_30 = arith.constant 0 : index
    %c2 = arith.constant 2 : index
    %c0_31 = arith.constant 0 : index
    %24 = vector.load %arg6[%c0_29, %c0_30, %c2, %c0_31] : memref<1x10x10x128xf32, #tpu.memory_space<vmem>>, vector<1x8x8x128xf32>
    %25 = vector.shape_cast %24 : vector<1x8x8x128xf32> to vector<8x8x128xf32>
    %26 = vector.shape_cast %25 : vector<8x8x128xf32> to vector<64x128xf32>
    %27 = arith.truncf %26 : vector<64x128xf32> to vector<64x128xbf16>
    %c2_32 = arith.constant 2 : index
    %c0_33 = arith.constant 0 : index
    %c0_34 = arith.constant 0 : index
    %28 = vector.load %arg3[%c2_32, %c0_33, %c0_34] : memref<9x128x128xbf16, #tpu.memory_space<vmem>>, vector<1x128x128xbf16>
    %29 = vector.shape_cast %28 : vector<1x128x128xbf16> to vector<128x128xbf16>
    %cst_35 = arith.constant dense<0.000000e+00> : vector<64x128xf32>
    %30 = tpu.matmul %27, %29, %cst_35 {dimension_numbers = #tpu.dot_dimension_numbers<[1], [0], [0], [1], [0, 0, 1, 1], [], []>} : vector<64x128xbf16>, vector<128x128xbf16>, vector<64x128xf32> -> vector<64x128xf32>
    %c0_36 = arith.constant 0 : index
    %c0_37 = arith.constant 0 : index
    %31 = vector.load %arg7[%c0_36, %c0_37] : memref<64x128xf32, #tpu.memory_space<vmem>>, vector<64x128xf32>
    %32 = arith.addf %31, %30 : vector<64x128xf32>
    %c0_38 = arith.constant 0 : index
    %c0_39 = arith.constant 0 : index
    %33 = vector.load %arg7[%c0_38, %c0_39] : memref<64x128xf32, #tpu.memory_space<vmem>>, vector<64x128xf32>
    tpu.vector_store %arg7[%c0_38, %c0_39], %32 {strides = array<i32>} : memref<64x128xf32, #tpu.memory_space<vmem>>, vector<64x128xf32>,
    %c0_40 = arith.constant 0 : index
    %c1_41 = arith.constant 1 : index
    %c0_42 = arith.constant 0 : index
    %c0_43 = arith.constant 0 : index
    %34 = vector.load %arg6[%c0_40, %c1_41, %c0_42, %c0_43] : memref<1x10x10x128xf32, #tpu.memory_space<vmem>>, vector<1x8x8x128xf32>
    %35 = vector.shape_cast %34 : vector<1x8x8x128xf32> to vector<8x8x128xf32>
    %36 = vector.shape_cast %35 : vector<8x8x128xf32> to vector<64x128xf32>
    %37 = arith.truncf %36 : vector<64x128xf32> to vector<64x128xbf16>
    %c3 = arith.constant 3 : index
    %c0_44 = arith.constant 0 : index
    %c0_45 = arith.constant 0 : index
    %38 = vector.load %arg3[%c3, %c0_44, %c0_45] : memref<9x128x128xbf16, #tpu.memory_space<vmem>>, vector<1x128x128xbf16>
    %39 = vector.shape_cast %38 : vector<1x128x128xbf16> to vector<128x128xbf16>
    %cst_46 = arith.constant dense<0.000000e+00> : vector<64x128xf32>
    %40 = tpu.matmul %37, %39, %cst_46 {dimension_numbers = #tpu.dot_dimension_numbers<[1], [0], [0], [1], [0, 0, 1, 1], [], []>} : vector<64x128xbf16>, vector<128x128xbf16>, vector<64x128xf32> -> vector<64x128xf32>
    %c0_47 = arith.constant 0 : index
    %c0_48 = arith.constant 0 : index
    %41 = vector.load %arg7[%c0_47, %c0_48] : memref<64x128xf32, #tpu.memory_space<vmem>>, vector<64x128xf32>
    %42 = arith.addf %41, %40 : vector<64x128xf32>
    %c0_49 = arith.constant 0 : index
    %c0_50 = arith.constant 0 : index
    %43 = vector.load %arg7[%c0_49, %c0_50] : memref<64x128xf32, #tpu.memory_space<vmem>>, vector<64x128xf32>
    tpu.vector_store %arg7[%c0_49, %c0_50], %42 {strides = array<i32>} : memref<64x128xf32, #tpu.memory_space<vmem>>, vector<64x128xf32>,
    %c0_51 = arith.constant 0 : index
    %c1_52 = arith.constant 1 : index
    %c1_53 = arith.constant 1 : index
    %c0_54 = arith.constant 0 : index
    %44 = vector.load %arg6[%c0_51, %c1_52, %c1_53, %c0_54] : memref<1x10x10x128xf32, #tpu.memory_space<vmem>>, vector<1x8x8x128xf32>
    %45 = vector.shape_cast %44 : vector<1x8x8x128xf32> to vector<8x8x128xf32>
    %46 = vector.shape_cast %45 : vector<8x8x128xf32> to vector<64x128xf32>
    %47 = arith.truncf %46 : vector<64x128xf32> to vector<64x128xbf16>
    %c4 = arith.constant 4 : index
    %c0_55 = arith.constant 0 : index
    %c0_56 = arith.constant 0 : index
    %48 = vector.load %arg3[%c4, %c0_55, %c0_56] : memref<9x128x128xbf16, #tpu.memory_space<vmem>>, vector<1x128x128xbf16>
    %49 = vector.shape_cast %48 : vector<1x128x128xbf16> to vector<128x128xbf16>
    %cst_57 = arith.constant dense<0.000000e+00> : vector<64x128xf32>
    %50 = tpu.matmul %47, %49, %cst_57 {dimension_numbers = #tpu.dot_dimension_numbers<[1], [0], [0], [1], [0, 0, 1, 1], [], []>} : vector<64x128xbf16>, vector<128x128xbf16>, vector<64x128xf32> -> vector<64x128xf32>
    %c0_58 = arith.constant 0 : index
    %c0_59 = arith.constant 0 : index
    %51 = vector.load %arg7[%c0_58, %c0_59] : memref<64x128xf32, #tpu.memory_space<vmem>>, vector<64x128xf32>
    %52 = arith.addf %51, %50 : vector<64x128xf32>
    %c0_60 = arith.constant 0 : index
    %c0_61 = arith.constant 0 : index
    %53 = vector.load %arg7[%c0_60, %c0_61] : memref<64x128xf32, #tpu.memory_space<vmem>>, vector<64x128xf32>
    tpu.vector_store %arg7[%c0_60, %c0_61], %52 {strides = array<i32>} : memref<64x128xf32, #tpu.memory_space<vmem>>, vector<64x128xf32>,
    %c0_62 = arith.constant 0 : index
    %c1_63 = arith.constant 1 : index
    %c2_64 = arith.constant 2 : index
    %c0_65 = arith.constant 0 : index
    %54 = vector.load %arg6[%c0_62, %c1_63, %c2_64, %c0_65] : memref<1x10x10x128xf32, #tpu.memory_space<vmem>>, vector<1x8x8x128xf32>
    %55 = vector.shape_cast %54 : vector<1x8x8x128xf32> to vector<8x8x128xf32>
    %56 = vector.shape_cast %55 : vector<8x8x128xf32> to vector<64x128xf32>
    %57 = arith.truncf %56 : vector<64x128xf32> to vector<64x128xbf16>
    %c5 = arith.constant 5 : index
    %c0_66 = arith.constant 0 : index
    %c0_67 = arith.constant 0 : index
    %58 = vector.load %arg3[%c5, %c0_66, %c0_67] : memref<9x128x128xbf16, #tpu.memory_space<vmem>>, vector<1x128x128xbf16>
    %59 = vector.shape_cast %58 : vector<1x128x128xbf16> to vector<128x128xbf16>
    %cst_68 = arith.constant dense<0.000000e+00> : vector<64x128xf32>
    %60 = tpu.matmul %57, %59, %cst_68 {dimension_numbers = #tpu.dot_dimension_numbers<[1], [0], [0], [1], [0, 0, 1, 1], [], []>} : vector<64x128xbf16>, vector<128x128xbf16>, vector<64x128xf32> -> vector<64x128xf32>
    %c0_69 = arith.constant 0 : index
    %c0_70 = arith.constant 0 : index
    %61 = vector.load %arg7[%c0_69, %c0_70] : memref<64x128xf32, #tpu.memory_space<vmem>>, vector<64x128xf32>
    %62 = arith.addf %61, %60 : vector<64x128xf32>
    %c0_71 = arith.constant 0 : index
    %c0_72 = arith.constant 0 : index
    %63 = vector.load %arg7[%c0_71, %c0_72] : memref<64x128xf32, #tpu.memory_space<vmem>>, vector<64x128xf32>
    tpu.vector_store %arg7[%c0_71, %c0_72], %62 {strides = array<i32>} : memref<64x128xf32, #tpu.memory_space<vmem>>, vector<64x128xf32>,
    %c0_73 = arith.constant 0 : index
    %c2_74 = arith.constant 2 : index
    %c0_75 = arith.constant 0 : index
    %c0_76 = arith.constant 0 : index
    %64 = vector.load %arg6[%c0_73, %c2_74, %c0_75, %c0_76] : memref<1x10x10x128xf32, #tpu.memory_space<vmem>>, vector<1x8x8x128xf32>
    %65 = vector.shape_cast %64 : vector<1x8x8x128xf32> to vector<8x8x128xf32>
    %66 = vector.shape_cast %65 : vector<8x8x128xf32> to vector<64x128xf32>
    %67 = arith.truncf %66 : vector<64x128xf32> to vector<64x128xbf16>
    %c6 = arith.constant 6 : index
    %c0_77 = arith.constant 0 : index
    %c0_78 = arith.constant 0 : index
    %68 = vector.load %arg3[%c6, %c0_77, %c0_78] : memref<9x128x128xbf16, #tpu.memory_space<vmem>>, vector<1x128x128xbf16>
    %69 = vector.shape_cast %68 : vector<1x128x128xbf16> to vector<128x128xbf16>
    %cst_79 = arith.constant dense<0.000000e+00> : vector<64x128xf32>
    %70 = tpu.matmul %67, %69, %cst_79 {dimension_numbers = #tpu.dot_dimension_numbers<[1], [0], [0], [1], [0, 0, 1, 1], [], []>} : vector<64x128xbf16>, vector<128x128xbf16>, vector<64x128xf32> -> vector<64x128xf32>
    %c0_80 = arith.constant 0 : index
    %c0_81 = arith.constant 0 : index
    %71 = vector.load %arg7[%c0_80, %c0_81] : memref<64x128xf32, #tpu.memory_space<vmem>>, vector<64x128xf32>
    %72 = arith.addf %71, %70 : vector<64x128xf32>
    %c0_82 = arith.constant 0 : index
    %c0_83 = arith.constant 0 : index
    %73 = vector.load %arg7[%c0_82, %c0_83] : memref<64x128xf32, #tpu.memory_space<vmem>>, vector<64x128xf32>
    tpu.vector_store %arg7[%c0_82, %c0_83], %72 {strides = array<i32>} : memref<64x128xf32, #tpu.memory_space<vmem>>, vector<64x128xf32>,
    %c0_84 = arith.constant 0 : index
    %c2_85 = arith.constant 2 : index
    %c1_86 = arith.constant 1 : index
    %c0_87 = arith.constant 0 : index
    %74 = vector.load %arg6[%c0_84, %c2_85, %c1_86, %c0_87] : memref<1x10x10x128xf32, #tpu.memory_space<vmem>>, vector<1x8x8x128xf32>
    %75 = vector.shape_cast %74 : vector<1x8x8x128xf32> to vector<8x8x128xf32>
    %76 = vector.shape_cast %75 : vector<8x8x128xf32> to vector<64x128xf32>
    %77 = arith.truncf %76 : vector<64x128xf32> to vector<64x128xbf16>
    %c7 = arith.constant 7 : index
    %c0_88 = arith.constant 0 : index
    %c0_89 = arith.constant 0 : index
    %78 = vector.load %arg3[%c7, %c0_88, %c0_89] : memref<9x128x128xbf16, #tpu.memory_space<vmem>>, vector<1x128x128xbf16>
    %79 = vector.shape_cast %78 : vector<1x128x128xbf16> to vector<128x128xbf16>
    %cst_90 = arith.constant dense<0.000000e+00> : vector<64x128xf32>
    %80 = tpu.matmul %77, %79, %cst_90 {dimension_numbers = #tpu.dot_dimension_numbers<[1], [0], [0], [1], [0, 0, 1, 1], [], []>} : vector<64x128xbf16>, vector<128x128xbf16>, vector<64x128xf32> -> vector<64x128xf32>
    %c0_91 = arith.constant 0 : index
    %c0_92 = arith.constant 0 : index
    %81 = vector.load %arg7[%c0_91, %c0_92] : memref<64x128xf32, #tpu.memory_space<vmem>>, vector<64x128xf32>
    %82 = arith.addf %81, %80 : vector<64x128xf32>
    %c0_93 = arith.constant 0 : index
    %c0_94 = arith.constant 0 : index
    %83 = vector.load %arg7[%c0_93, %c0_94] : memref<64x128xf32, #tpu.memory_space<vmem>>, vector<64x128xf32>
    tpu.vector_store %arg7[%c0_93, %c0_94], %82 {strides = array<i32>} : memref<64x128xf32, #tpu.memory_space<vmem>>, vector<64x128xf32>,
    %c0_95 = arith.constant 0 : index
    %c2_96 = arith.constant 2 : index
    %c2_97 = arith.constant 2 : index
    %c0_98 = arith.constant 0 : index
    %84 = vector.load %arg6[%c0_95, %c2_96, %c2_97, %c0_98] : memref<1x10x10x128xf32, #tpu.memory_space<vmem>>, vector<1x8x8x128xf32>
    %85 = vector.shape_cast %84 : vector<1x8x8x128xf32> to vector<8x8x128xf32>
    %86 = vector.shape_cast %85 : vector<8x8x128xf32> to vector<64x128xf32>
    %87 = arith.truncf %86 : vector<64x128xf32> to vector<64x128xbf16>
    %c8 = arith.constant 8 : index
    %c0_99 = arith.constant 0 : index
    %c0_100 = arith.constant 0 : index
    %88 = vector.load %arg3[%c8, %c0_99, %c0_100] : memref<9x128x128xbf16, #tpu.memory_space<vmem>>, vector<1x128x128xbf16>
    %89 = vector.shape_cast %88 : vector<1x128x128xbf16> to vector<128x128xbf16>
    %cst_101 = arith.constant dense<0.000000e+00> : vector<64x128xf32>
    %90 = tpu.matmul %87, %89, %cst_101 {dimension_numbers = #tpu.dot_dimension_numbers<[1], [0], [0], [1], [0, 0, 1, 1], [], []>} : vector<64x128xbf16>, vector<128x128xbf16>, vector<64x128xf32> -> vector<64x128xf32>
    %c0_102 = arith.constant 0 : index
    %c0_103 = arith.constant 0 : index
    %91 = vector.load %arg7[%c0_102, %c0_103] : memref<64x128xf32, #tpu.memory_space<vmem>>, vector<64x128xf32>
    %92 = arith.addf %91, %90 : vector<64x128xf32>
    %c0_104 = arith.constant 0 : index
    %c0_105 = arith.constant 0 : index
    %93 = vector.load %arg7[%c0_104, %c0_105] : memref<64x128xf32, #tpu.memory_space<vmem>>, vector<64x128xf32>
    tpu.vector_store %arg7[%c0_104, %c0_105], %92 {strides = array<i32>} : memref<64x128xf32, #tpu.memory_space<vmem>>, vector<64x128xf32>,
    %c0_106 = arith.constant 0 : index
    %c0_107 = arith.constant 0 : index
    %94 = vector.load %arg7[%c0_106, %c0_107] : memref<64x128xf32, #tpu.memory_space<vmem>>, vector<64x128xf32>
    %c0_108 = arith.constant 0 : index
    %c0_109 = arith.constant 0 : index
    %95 = vector.load %arg4[%c0_108, %c0_109] : memref<1x128xf32, #tpu.memory_space<vmem>>, vector<1x128xf32>
    %96 = vector.broadcast %95 : vector<1x128xf32> to vector<64x128xf32>
    %97 = arith.addf %94, %96 : vector<64x128xf32>
    %98 = arith.truncf %97 : vector<64x128xf32> to vector<64x128xbf16>
    %c0_110 = arith.constant 0 : index
    %c0_111 = arith.constant 0 : index
    %c0_112 = arith.constant 0 : index
    %99 = vector.load %arg5[%c0_110, %c0_111, %c0_112] : memref<1x64x128xbf16, #tpu.memory_space<vmem>>, vector<1x64x128xbf16>
    %100 = vector.shape_cast %99 : vector<1x64x128xbf16> to vector<64x128xbf16>
    %101 = vector.shape_cast %98 : vector<64x128xbf16> to vector<1x64x128xbf16>
    tpu.vector_store %arg5[%c0_110, %c0_111, %c0_112], %101 {strides = array<i32>} : memref<1x64x128xbf16, #tpu.memory_space<vmem>>, vector<1x64x128xbf16>,
    return
  }
  func.func @transform_0(%arg0: i32, %arg1: i32) -> (i32, i32, i32, i32, i32) {
    %c0_i32 = arith.constant 0 : i32
    %c0_i32_0 = arith.constant 0 : i32
    %c0_i32_1 = arith.constant 0 : i32
    %c0_i32_2 = arith.constant 0 : i32
    %c0_i32_3 = arith.constant 0 : i32
    return %arg0, %c0_i32, %c0_i32_0, %c0_i32_1, %c0_i32_2 : i32, i32, i32, i32, i32
  }
  func.func @transform_1(%arg0: i32, %arg1: i32) -> (i32, i32, i32) {
    %c0_i32 = arith.constant 0 : i32
    %c0_i32_0 = arith.constant 0 : i32
    %c0_i32_1 = arith.constant 0 : i32
    return %c0_i32, %c0_i32_0, %arg1 : i32, i32, i32
  }
  func.func @transform_2(%arg0: i32, %arg1: i32) -> (i32, i32) {
    %c0_i32 = arith.constant 0 : i32
    %c0_i32_0 = arith.constant 0 : i32
    return %c0_i32, %arg1 : i32, i32
  }
  func.func @transform_3(%arg0: i32, %arg1: i32) -> (i32, i32, i32) {
    %c0_i32 = arith.constant 0 : i32
    %c0_i32_0 = arith.constant 0 : i32
    return %arg0, %c0_i32, %arg1 : i32, i32, i32
  }
}

module attributes {stable_mosaic.version = 11 : i64} {
  func.func @_conv_kernel(%arg0: i32, %arg1: i32, %arg2: memref<1x4x5x9x128xbf16, #tpu.memory_space<vmem>>, %arg3: memref<9x128x128xbf16, #tpu.memory_space<vmem>>, %arg4: memref<1x128xf32, #tpu.memory_space<vmem>>, %arg5: memref<1x32x128xbf16, #tpu.memory_space<vmem>>, %arg6: memref<1x32x128xbf16, #tpu.memory_space<vmem>>, %arg7: memref<4x5x9x128xf32, #tpu.memory_space<vmem>>, %arg8: memref<32x128xf32, #tpu.memory_space<vmem>>) attributes {dimension_semantics = [#tpu.dimension_semantics<parallel>, #tpu.dimension_semantics<parallel>], iteration_bounds = array<i64: 2, 1>, scalar_prefetch = 0 : i64, scratch_operands = 2 : i64, tpu.core_type = #tpu.core_type<tc>, window_params = [{transform_indices = @transform_0, window_bounds = array<i64: 1, 4, 5, 9, 128>}, {transform_indices = @transform_1, window_bounds = array<i64: 9, 128, 128>}, {transform_indices = @transform_2, window_bounds = array<i64: 1, 128>}, {transform_indices = @transform_3, window_bounds = array<i64: 1, 32, 128>}, {transform_indices = @transform_4, window_bounds = array<i64: 1, 32, 128>}]} {
    %c0 = arith.constant 0 : index
    %c0_0 = arith.constant 0 : index
    %c0_1 = arith.constant 0 : index
    %c0_2 = arith.constant 0 : index
    %c0_3 = arith.constant 0 : index
    %0 = vector.load %arg2[%c0, %c0_0, %c0_1, %c0_2, %c0_3] : memref<1x4x5x9x128xbf16, #tpu.memory_space<vmem>>, vector<1x4x5x9x128xbf16>
    %1 = vector.shape_cast %0 : vector<1x4x5x9x128xbf16> to vector<4x5x9x128xbf16>
    %2 = arith.extf %1 : vector<4x5x9x128xbf16> to vector<4x5x9x128xf32>
    %cst = arith.constant 0.000000e+00 : f32
    %3 = vector.broadcast %cst : f32 to vector<4x5x9x128xf32>
    %4 = arith.maximumf %2, %3 : vector<4x5x9x128xf32>
    %c0_4 = arith.constant 0 : index
    %c0_5 = arith.constant 0 : index
    %c0_6 = arith.constant 0 : index
    %c0_7 = arith.constant 0 : index
    %5 = vector.load %arg7[%c0_4, %c0_5, %c0_6, %c0_7] : memref<4x5x9x128xf32, #tpu.memory_space<vmem>>, vector<4x5x9x128xf32>
    tpu.vector_store %arg7[%c0_4, %c0_5, %c0_6, %c0_7], %4 {strides = array<i32>} : memref<4x5x9x128xf32, #tpu.memory_space<vmem>>, vector<4x5x9x128xf32>,
    %c0_8 = arith.constant 0 : index
    %c0_9 = arith.constant 0 : index
    %c0_10 = arith.constant 0 : index
    %c0_11 = arith.constant 0 : index
    %6 = vector.load %arg7[%c0_8, %c0_9, %c0_10, %c0_11] : memref<4x5x9x128xf32, #tpu.memory_space<vmem>>, vector<1x4x8x128xf32>
    %7 = vector.shape_cast %6 : vector<1x4x8x128xf32> to vector<4x8x128xf32>
    %8 = vector.shape_cast %7 : vector<4x8x128xf32> to vector<32x128xf32>
    %9 = arith.truncf %8 : vector<32x128xf32> to vector<32x128xbf16>
    %c0_12 = arith.constant 0 : index
    %c0_13 = arith.constant 0 : index
    %c0_14 = arith.constant 0 : index
    %10 = vector.load %arg3[%c0_12, %c0_13, %c0_14] : memref<9x128x128xbf16, #tpu.memory_space<vmem>>, vector<1x128x128xbf16>
    %11 = vector.shape_cast %10 : vector<1x128x128xbf16> to vector<128x128xbf16>
    %cst_15 = arith.constant dense<0.000000e+00> : vector<32x128xf32>
    %12 = tpu.matmul %9, %11, %cst_15 {dimension_numbers = #tpu.dot_dimension_numbers<[1], [0], [0], [1], [0, 0, 1, 1], [], []>} : vector<32x128xbf16>, vector<128x128xbf16>, vector<32x128xf32> -> vector<32x128xf32>
    %c0_16 = arith.constant 0 : index
    %c0_17 = arith.constant 0 : index
    %13 = vector.load %arg8[%c0_16, %c0_17] : memref<32x128xf32, #tpu.memory_space<vmem>>, vector<32x128xf32>
    tpu.vector_store %arg8[%c0_16, %c0_17], %12 {strides = array<i32>} : memref<32x128xf32, #tpu.memory_space<vmem>>, vector<32x128xf32>,
    %c1 = arith.constant 1 : index
    %c0_18 = arith.constant 0 : index
    %c0_19 = arith.constant 0 : index
    %c0_20 = arith.constant 0 : index
    %14 = vector.load %arg7[%c1, %c0_18, %c0_19, %c0_20] : memref<4x5x9x128xf32, #tpu.memory_space<vmem>>, vector<1x4x8x128xf32>
    %15 = vector.shape_cast %14 : vector<1x4x8x128xf32> to vector<4x8x128xf32>
    %16 = vector.shape_cast %15 : vector<4x8x128xf32> to vector<32x128xf32>
    %17 = arith.truncf %16 : vector<32x128xf32> to vector<32x128xbf16>
    %c1_21 = arith.constant 1 : index
    %c0_22 = arith.constant 0 : index
    %c0_23 = arith.constant 0 : index
    %18 = vector.load %arg3[%c1_21, %c0_22, %c0_23] : memref<9x128x128xbf16, #tpu.memory_space<vmem>>, vector<1x128x128xbf16>
    %19 = vector.shape_cast %18 : vector<1x128x128xbf16> to vector<128x128xbf16>
    %cst_24 = arith.constant dense<0.000000e+00> : vector<32x128xf32>
    %20 = tpu.matmul %17, %19, %cst_24 {dimension_numbers = #tpu.dot_dimension_numbers<[1], [0], [0], [1], [0, 0, 1, 1], [], []>} : vector<32x128xbf16>, vector<128x128xbf16>, vector<32x128xf32> -> vector<32x128xf32>
    %c0_25 = arith.constant 0 : index
    %c0_26 = arith.constant 0 : index
    %21 = vector.load %arg8[%c0_25, %c0_26] : memref<32x128xf32, #tpu.memory_space<vmem>>, vector<32x128xf32>
    %22 = arith.addf %21, %20 : vector<32x128xf32>
    %c0_27 = arith.constant 0 : index
    %c0_28 = arith.constant 0 : index
    %23 = vector.load %arg8[%c0_27, %c0_28] : memref<32x128xf32, #tpu.memory_space<vmem>>, vector<32x128xf32>
    tpu.vector_store %arg8[%c0_27, %c0_28], %22 {strides = array<i32>} : memref<32x128xf32, #tpu.memory_space<vmem>>, vector<32x128xf32>,
    %c0_29 = arith.constant 0 : index
    %c0_30 = arith.constant 0 : index
    %c1_31 = arith.constant 1 : index
    %c0_32 = arith.constant 0 : index
    %24 = vector.load %arg7[%c0_29, %c0_30, %c1_31, %c0_32] : memref<4x5x9x128xf32, #tpu.memory_space<vmem>>, vector<1x4x8x128xf32>
    %25 = vector.shape_cast %24 : vector<1x4x8x128xf32> to vector<4x8x128xf32>
    %26 = vector.shape_cast %25 : vector<4x8x128xf32> to vector<32x128xf32>
    %27 = arith.truncf %26 : vector<32x128xf32> to vector<32x128xbf16>
    %c2 = arith.constant 2 : index
    %c0_33 = arith.constant 0 : index
    %c0_34 = arith.constant 0 : index
    %28 = vector.load %arg3[%c2, %c0_33, %c0_34] : memref<9x128x128xbf16, #tpu.memory_space<vmem>>, vector<1x128x128xbf16>
    %29 = vector.shape_cast %28 : vector<1x128x128xbf16> to vector<128x128xbf16>
    %cst_35 = arith.constant dense<0.000000e+00> : vector<32x128xf32>
    %30 = tpu.matmul %27, %29, %cst_35 {dimension_numbers = #tpu.dot_dimension_numbers<[1], [0], [0], [1], [0, 0, 1, 1], [], []>} : vector<32x128xbf16>, vector<128x128xbf16>, vector<32x128xf32> -> vector<32x128xf32>
    %c0_36 = arith.constant 0 : index
    %c0_37 = arith.constant 0 : index
    %31 = vector.load %arg8[%c0_36, %c0_37] : memref<32x128xf32, #tpu.memory_space<vmem>>, vector<32x128xf32>
    %32 = arith.addf %31, %30 : vector<32x128xf32>
    %c0_38 = arith.constant 0 : index
    %c0_39 = arith.constant 0 : index
    %33 = vector.load %arg8[%c0_38, %c0_39] : memref<32x128xf32, #tpu.memory_space<vmem>>, vector<32x128xf32>
    tpu.vector_store %arg8[%c0_38, %c0_39], %32 {strides = array<i32>} : memref<32x128xf32, #tpu.memory_space<vmem>>, vector<32x128xf32>,
    %c2_40 = arith.constant 2 : index
    %c0_41 = arith.constant 0 : index
    %c0_42 = arith.constant 0 : index
    %c0_43 = arith.constant 0 : index
    %34 = vector.load %arg7[%c2_40, %c0_41, %c0_42, %c0_43] : memref<4x5x9x128xf32, #tpu.memory_space<vmem>>, vector<1x4x8x128xf32>
    %35 = vector.shape_cast %34 : vector<1x4x8x128xf32> to vector<4x8x128xf32>
    %36 = vector.shape_cast %35 : vector<4x8x128xf32> to vector<32x128xf32>
    %37 = arith.truncf %36 : vector<32x128xf32> to vector<32x128xbf16>
    %c3 = arith.constant 3 : index
    %c0_44 = arith.constant 0 : index
    %c0_45 = arith.constant 0 : index
    %38 = vector.load %arg3[%c3, %c0_44, %c0_45] : memref<9x128x128xbf16, #tpu.memory_space<vmem>>, vector<1x128x128xbf16>
    %39 = vector.shape_cast %38 : vector<1x128x128xbf16> to vector<128x128xbf16>
    %cst_46 = arith.constant dense<0.000000e+00> : vector<32x128xf32>
    %40 = tpu.matmul %37, %39, %cst_46 {dimension_numbers = #tpu.dot_dimension_numbers<[1], [0], [0], [1], [0, 0, 1, 1], [], []>} : vector<32x128xbf16>, vector<128x128xbf16>, vector<32x128xf32> -> vector<32x128xf32>
    %c0_47 = arith.constant 0 : index
    %c0_48 = arith.constant 0 : index
    %41 = vector.load %arg8[%c0_47, %c0_48] : memref<32x128xf32, #tpu.memory_space<vmem>>, vector<32x128xf32>
    %42 = arith.addf %41, %40 : vector<32x128xf32>
    %c0_49 = arith.constant 0 : index
    %c0_50 = arith.constant 0 : index
    %43 = vector.load %arg8[%c0_49, %c0_50] : memref<32x128xf32, #tpu.memory_space<vmem>>, vector<32x128xf32>
    tpu.vector_store %arg8[%c0_49, %c0_50], %42 {strides = array<i32>} : memref<32x128xf32, #tpu.memory_space<vmem>>, vector<32x128xf32>,
    %c3_51 = arith.constant 3 : index
    %c0_52 = arith.constant 0 : index
    %c0_53 = arith.constant 0 : index
    %c0_54 = arith.constant 0 : index
    %44 = vector.load %arg7[%c3_51, %c0_52, %c0_53, %c0_54] : memref<4x5x9x128xf32, #tpu.memory_space<vmem>>, vector<1x4x8x128xf32>
    %45 = vector.shape_cast %44 : vector<1x4x8x128xf32> to vector<4x8x128xf32>
    %46 = vector.shape_cast %45 : vector<4x8x128xf32> to vector<32x128xf32>
    %47 = arith.truncf %46 : vector<32x128xf32> to vector<32x128xbf16>
    %c4 = arith.constant 4 : index
    %c0_55 = arith.constant 0 : index
    %c0_56 = arith.constant 0 : index
    %48 = vector.load %arg3[%c4, %c0_55, %c0_56] : memref<9x128x128xbf16, #tpu.memory_space<vmem>>, vector<1x128x128xbf16>
    %49 = vector.shape_cast %48 : vector<1x128x128xbf16> to vector<128x128xbf16>
    %cst_57 = arith.constant dense<0.000000e+00> : vector<32x128xf32>
    %50 = tpu.matmul %47, %49, %cst_57 {dimension_numbers = #tpu.dot_dimension_numbers<[1], [0], [0], [1], [0, 0, 1, 1], [], []>} : vector<32x128xbf16>, vector<128x128xbf16>, vector<32x128xf32> -> vector<32x128xf32>
    %c0_58 = arith.constant 0 : index
    %c0_59 = arith.constant 0 : index
    %51 = vector.load %arg8[%c0_58, %c0_59] : memref<32x128xf32, #tpu.memory_space<vmem>>, vector<32x128xf32>
    %52 = arith.addf %51, %50 : vector<32x128xf32>
    %c0_60 = arith.constant 0 : index
    %c0_61 = arith.constant 0 : index
    %53 = vector.load %arg8[%c0_60, %c0_61] : memref<32x128xf32, #tpu.memory_space<vmem>>, vector<32x128xf32>
    tpu.vector_store %arg8[%c0_60, %c0_61], %52 {strides = array<i32>} : memref<32x128xf32, #tpu.memory_space<vmem>>, vector<32x128xf32>,
    %c2_62 = arith.constant 2 : index
    %c0_63 = arith.constant 0 : index
    %c1_64 = arith.constant 1 : index
    %c0_65 = arith.constant 0 : index
    %54 = vector.load %arg7[%c2_62, %c0_63, %c1_64, %c0_65] : memref<4x5x9x128xf32, #tpu.memory_space<vmem>>, vector<1x4x8x128xf32>
    %55 = vector.shape_cast %54 : vector<1x4x8x128xf32> to vector<4x8x128xf32>
    %56 = vector.shape_cast %55 : vector<4x8x128xf32> to vector<32x128xf32>
    %57 = arith.truncf %56 : vector<32x128xf32> to vector<32x128xbf16>
    %c5 = arith.constant 5 : index
    %c0_66 = arith.constant 0 : index
    %c0_67 = arith.constant 0 : index
    %58 = vector.load %arg3[%c5, %c0_66, %c0_67] : memref<9x128x128xbf16, #tpu.memory_space<vmem>>, vector<1x128x128xbf16>
    %59 = vector.shape_cast %58 : vector<1x128x128xbf16> to vector<128x128xbf16>
    %cst_68 = arith.constant dense<0.000000e+00> : vector<32x128xf32>
    %60 = tpu.matmul %57, %59, %cst_68 {dimension_numbers = #tpu.dot_dimension_numbers<[1], [0], [0], [1], [0, 0, 1, 1], [], []>} : vector<32x128xbf16>, vector<128x128xbf16>, vector<32x128xf32> -> vector<32x128xf32>
    %c0_69 = arith.constant 0 : index
    %c0_70 = arith.constant 0 : index
    %61 = vector.load %arg8[%c0_69, %c0_70] : memref<32x128xf32, #tpu.memory_space<vmem>>, vector<32x128xf32>
    %62 = arith.addf %61, %60 : vector<32x128xf32>
    %c0_71 = arith.constant 0 : index
    %c0_72 = arith.constant 0 : index
    %63 = vector.load %arg8[%c0_71, %c0_72] : memref<32x128xf32, #tpu.memory_space<vmem>>, vector<32x128xf32>
    tpu.vector_store %arg8[%c0_71, %c0_72], %62 {strides = array<i32>} : memref<32x128xf32, #tpu.memory_space<vmem>>, vector<32x128xf32>,
    %c0_73 = arith.constant 0 : index
    %c1_74 = arith.constant 1 : index
    %c0_75 = arith.constant 0 : index
    %c0_76 = arith.constant 0 : index
    %64 = vector.load %arg7[%c0_73, %c1_74, %c0_75, %c0_76] : memref<4x5x9x128xf32, #tpu.memory_space<vmem>>, vector<1x4x8x128xf32>
    %65 = vector.shape_cast %64 : vector<1x4x8x128xf32> to vector<4x8x128xf32>
    %66 = vector.shape_cast %65 : vector<4x8x128xf32> to vector<32x128xf32>
    %67 = arith.truncf %66 : vector<32x128xf32> to vector<32x128xbf16>
    %c6 = arith.constant 6 : index
    %c0_77 = arith.constant 0 : index
    %c0_78 = arith.constant 0 : index
    %68 = vector.load %arg3[%c6, %c0_77, %c0_78] : memref<9x128x128xbf16, #tpu.memory_space<vmem>>, vector<1x128x128xbf16>
    %69 = vector.shape_cast %68 : vector<1x128x128xbf16> to vector<128x128xbf16>
    %cst_79 = arith.constant dense<0.000000e+00> : vector<32x128xf32>
    %70 = tpu.matmul %67, %69, %cst_79 {dimension_numbers = #tpu.dot_dimension_numbers<[1], [0], [0], [1], [0, 0, 1, 1], [], []>} : vector<32x128xbf16>, vector<128x128xbf16>, vector<32x128xf32> -> vector<32x128xf32>
    %c0_80 = arith.constant 0 : index
    %c0_81 = arith.constant 0 : index
    %71 = vector.load %arg8[%c0_80, %c0_81] : memref<32x128xf32, #tpu.memory_space<vmem>>, vector<32x128xf32>
    %72 = arith.addf %71, %70 : vector<32x128xf32>
    %c0_82 = arith.constant 0 : index
    %c0_83 = arith.constant 0 : index
    %73 = vector.load %arg8[%c0_82, %c0_83] : memref<32x128xf32, #tpu.memory_space<vmem>>, vector<32x128xf32>
    tpu.vector_store %arg8[%c0_82, %c0_83], %72 {strides = array<i32>} : memref<32x128xf32, #tpu.memory_space<vmem>>, vector<32x128xf32>,
    %c1_84 = arith.constant 1 : index
    %c1_85 = arith.constant 1 : index
    %c0_86 = arith.constant 0 : index
    %c0_87 = arith.constant 0 : index
    %74 = vector.load %arg7[%c1_84, %c1_85, %c0_86, %c0_87] : memref<4x5x9x128xf32, #tpu.memory_space<vmem>>, vector<1x4x8x128xf32>
    %75 = vector.shape_cast %74 : vector<1x4x8x128xf32> to vector<4x8x128xf32>
    %76 = vector.shape_cast %75 : vector<4x8x128xf32> to vector<32x128xf32>
    %77 = arith.truncf %76 : vector<32x128xf32> to vector<32x128xbf16>
    %c7 = arith.constant 7 : index
    %c0_88 = arith.constant 0 : index
    %c0_89 = arith.constant 0 : index
    %78 = vector.load %arg3[%c7, %c0_88, %c0_89] : memref<9x128x128xbf16, #tpu.memory_space<vmem>>, vector<1x128x128xbf16>
    %79 = vector.shape_cast %78 : vector<1x128x128xbf16> to vector<128x128xbf16>
    %cst_90 = arith.constant dense<0.000000e+00> : vector<32x128xf32>
    %80 = tpu.matmul %77, %79, %cst_90 {dimension_numbers = #tpu.dot_dimension_numbers<[1], [0], [0], [1], [0, 0, 1, 1], [], []>} : vector<32x128xbf16>, vector<128x128xbf16>, vector<32x128xf32> -> vector<32x128xf32>
    %c0_91 = arith.constant 0 : index
    %c0_92 = arith.constant 0 : index
    %81 = vector.load %arg8[%c0_91, %c0_92] : memref<32x128xf32, #tpu.memory_space<vmem>>, vector<32x128xf32>
    %82 = arith.addf %81, %80 : vector<32x128xf32>
    %c0_93 = arith.constant 0 : index
    %c0_94 = arith.constant 0 : index
    %83 = vector.load %arg8[%c0_93, %c0_94] : memref<32x128xf32, #tpu.memory_space<vmem>>, vector<32x128xf32>
    tpu.vector_store %arg8[%c0_93, %c0_94], %82 {strides = array<i32>} : memref<32x128xf32, #tpu.memory_space<vmem>>, vector<32x128xf32>,
    %c0_95 = arith.constant 0 : index
    %c1_96 = arith.constant 1 : index
    %c1_97 = arith.constant 1 : index
    %c0_98 = arith.constant 0 : index
    %84 = vector.load %arg7[%c0_95, %c1_96, %c1_97, %c0_98] : memref<4x5x9x128xf32, #tpu.memory_space<vmem>>, vector<1x4x8x128xf32>
    %85 = vector.shape_cast %84 : vector<1x4x8x128xf32> to vector<4x8x128xf32>
    %86 = vector.shape_cast %85 : vector<4x8x128xf32> to vector<32x128xf32>
    %87 = arith.truncf %86 : vector<32x128xf32> to vector<32x128xbf16>
    %c8 = arith.constant 8 : index
    %c0_99 = arith.constant 0 : index
    %c0_100 = arith.constant 0 : index
    %88 = vector.load %arg3[%c8, %c0_99, %c0_100] : memref<9x128x128xbf16, #tpu.memory_space<vmem>>, vector<1x128x128xbf16>
    %89 = vector.shape_cast %88 : vector<1x128x128xbf16> to vector<128x128xbf16>
    %cst_101 = arith.constant dense<0.000000e+00> : vector<32x128xf32>
    %90 = tpu.matmul %87, %89, %cst_101 {dimension_numbers = #tpu.dot_dimension_numbers<[1], [0], [0], [1], [0, 0, 1, 1], [], []>} : vector<32x128xbf16>, vector<128x128xbf16>, vector<32x128xf32> -> vector<32x128xf32>
    %c0_102 = arith.constant 0 : index
    %c0_103 = arith.constant 0 : index
    %91 = vector.load %arg8[%c0_102, %c0_103] : memref<32x128xf32, #tpu.memory_space<vmem>>, vector<32x128xf32>
    %92 = arith.addf %91, %90 : vector<32x128xf32>
    %c0_104 = arith.constant 0 : index
    %c0_105 = arith.constant 0 : index
    %93 = vector.load %arg8[%c0_104, %c0_105] : memref<32x128xf32, #tpu.memory_space<vmem>>, vector<32x128xf32>
    tpu.vector_store %arg8[%c0_104, %c0_105], %92 {strides = array<i32>} : memref<32x128xf32, #tpu.memory_space<vmem>>, vector<32x128xf32>,
    %c0_106 = arith.constant 0 : index
    %c0_107 = arith.constant 0 : index
    %94 = vector.load %arg8[%c0_106, %c0_107] : memref<32x128xf32, #tpu.memory_space<vmem>>, vector<32x128xf32>
    %c0_108 = arith.constant 0 : index
    %c0_109 = arith.constant 0 : index
    %95 = vector.load %arg4[%c0_108, %c0_109] : memref<1x128xf32, #tpu.memory_space<vmem>>, vector<1x128xf32>
    %96 = vector.broadcast %95 : vector<1x128xf32> to vector<32x128xf32>
    %97 = arith.addf %94, %96 : vector<32x128xf32>
    %c0_110 = arith.constant 0 : index
    %c0_111 = arith.constant 0 : index
    %c0_112 = arith.constant 0 : index
    %98 = vector.load %arg5[%c0_110, %c0_111, %c0_112] : memref<1x32x128xbf16, #tpu.memory_space<vmem>>, vector<1x32x128xbf16>
    %99 = vector.shape_cast %98 : vector<1x32x128xbf16> to vector<32x128xbf16>
    %100 = arith.extf %99 : vector<32x128xbf16> to vector<32x128xf32>
    %cst_113 = arith.constant 0.707106769 : f32
    %101 = vector.broadcast %cst_113 : f32 to vector<32x128xf32>
    %102 = arith.mulf %101, %100 : vector<32x128xf32>
    %cst_114 = arith.constant 0.707106769 : f32
    %103 = vector.broadcast %cst_114 : f32 to vector<32x128xf32>
    %104 = arith.mulf %103, %97 : vector<32x128xf32>
    %105 = arith.addf %102, %104 : vector<32x128xf32>
    %106 = arith.truncf %105 : vector<32x128xf32> to vector<32x128xbf16>
    %c0_115 = arith.constant 0 : index
    %c0_116 = arith.constant 0 : index
    %c0_117 = arith.constant 0 : index
    %107 = vector.load %arg6[%c0_115, %c0_116, %c0_117] : memref<1x32x128xbf16, #tpu.memory_space<vmem>>, vector<1x32x128xbf16>
    %108 = vector.shape_cast %107 : vector<1x32x128xbf16> to vector<32x128xbf16>
    %109 = vector.shape_cast %106 : vector<32x128xbf16> to vector<1x32x128xbf16>
    tpu.vector_store %arg6[%c0_115, %c0_116, %c0_117], %109 {strides = array<i32>} : memref<1x32x128xbf16, #tpu.memory_space<vmem>>, vector<1x32x128xbf16>,
    return
  }
  func.func @transform_0(%arg0: i32, %arg1: i32) -> (i32, i32, i32, i32, i32) {
    %c0_i32 = arith.constant 0 : i32
    %c0_i32_0 = arith.constant 0 : i32
    %c0_i32_1 = arith.constant 0 : i32
    %c0_i32_2 = arith.constant 0 : i32
    %c0_i32_3 = arith.constant 0 : i32
    return %arg0, %c0_i32, %c0_i32_0, %c0_i32_1, %c0_i32_2 : i32, i32, i32, i32, i32
  }
  func.func @transform_1(%arg0: i32, %arg1: i32) -> (i32, i32, i32) {
    %c0_i32 = arith.constant 0 : i32
    %c0_i32_0 = arith.constant 0 : i32
    %c0_i32_1 = arith.constant 0 : i32
    return %c0_i32, %c0_i32_0, %arg1 : i32, i32, i32
  }
  func.func @transform_2(%arg0: i32, %arg1: i32) -> (i32, i32) {
    %c0_i32 = arith.constant 0 : i32
    %c0_i32_0 = arith.constant 0 : i32
    return %c0_i32, %arg1 : i32, i32
  }
  func.func @transform_3(%arg0: i32, %arg1: i32) -> (i32, i32, i32) {
    %c0_i32 = arith.constant 0 : i32
    %c0_i32_0 = arith.constant 0 : i32
    return %arg0, %c0_i32, %arg1 : i32, i32, i32
  }
  func.func @transform_4(%arg0: i32, %arg1: i32) -> (i32, i32, i32) {
    %c0_i32 = arith.constant 0 : i32
    %c0_i32_0 = arith.constant 0 : i32
    return %arg0, %c0_i32, %arg1 : i32, i32, i32
  }
}

module attributes {stable_mosaic.version = 11 : i64} {
  func.func @_head_kernel(%arg0: i32, %arg1: memref<8x16x128xbf16, #tpu.memory_space<vmem>>, %arg2: memref<128x128xf32, #tpu.memory_space<vmem>>, %arg3: memref<1x128xf32, #tpu.memory_space<vmem>>, %arg4: memref<8x128xf32, #tpu.memory_space<vmem>>) attributes {dimension_semantics = [#tpu.dimension_semantics<parallel>], iteration_bounds = array<i64: 1>, scalar_prefetch = 0 : i64, scratch_operands = 0 : i64, tpu.core_type = #tpu.core_type<tc>, window_params = [{transform_indices = @transform_0, window_bounds = array<i64: 8, 16, 128>}, {pipeline_mode = #tpu.pipeline_mode<synchronous>, transform_indices = @transform_1, window_bounds = array<i64: 128, 128>}, {pipeline_mode = #tpu.pipeline_mode<synchronous>, transform_indices = @transform_2, window_bounds = array<i64: 1, 128>}, {transform_indices = @transform_3, window_bounds = array<i64: 8, 128>}]} {
    %c0 = arith.constant 0 : index
    %c0_0 = arith.constant 0 : index
    %c0_1 = arith.constant 0 : index
    %0 = vector.load %arg1[%c0, %c0_0, %c0_1] : memref<8x16x128xbf16, #tpu.memory_space<vmem>>, vector<8x16x128xbf16>
    %1 = arith.extf %0 : vector<8x16x128xbf16> to vector<8x16x128xf32>
    %cst = arith.constant 0.000000e+00 : f32
    %2 = vector.broadcast %cst : f32 to vector<8x16x128xf32>
    %3 = arith.maximumf %1, %2 : vector<8x16x128xf32>
    %cst_2 = arith.constant dense<0.000000e+00> : vector<8x128xf32>
    %4 = vector.multi_reduction <add>, %3, %cst_2 [1] : vector<8x16x128xf32> to vector<8x128xf32>
    %cst_3 = arith.constant 6.250000e-02 : f32
    %5 = vector.broadcast %cst_3 : f32 to vector<8x128xf32>
    %6 = arith.mulf %4, %5 : vector<8x128xf32>
    %c0_4 = arith.constant 0 : index
    %c0_5 = arith.constant 0 : index
    %7 = vector.load %arg2[%c0_4, %c0_5] : memref<128x128xf32, #tpu.memory_space<vmem>>, vector<128x128xf32>
    %cst_6 = arith.constant dense<0.000000e+00> : vector<8x128xf32>
    %8 = tpu.matmul %6, %7, %cst_6 {dimension_numbers = #tpu.dot_dimension_numbers<[1], [0], [0], [1], [0, 0, 1, 1], [], []>} : vector<8x128xf32>, vector<128x128xf32>, vector<8x128xf32> -> vector<8x128xf32>
    %c0_7 = arith.constant 0 : index
    %c0_8 = arith.constant 0 : index
    %9 = vector.load %arg3[%c0_7, %c0_8] : memref<1x128xf32, #tpu.memory_space<vmem>>, vector<1x128xf32>
    %10 = vector.broadcast %9 : vector<1x128xf32> to vector<8x128xf32>
    %11 = arith.addf %8, %10 : vector<8x128xf32>
    %c0_9 = arith.constant 0 : index
    %c0_10 = arith.constant 0 : index
    %12 = vector.load %arg4[%c0_9, %c0_10] : memref<8x128xf32, #tpu.memory_space<vmem>>, vector<8x128xf32>
    tpu.vector_store %arg4[%c0_9, %c0_10], %11 {strides = array<i32>} : memref<8x128xf32, #tpu.memory_space<vmem>>, vector<8x128xf32>,
    return
  }
  func.func @transform_0(%arg0: i32) -> (i32, i32, i32) {
    %c0_i32 = arith.constant 0 : i32
    %c0_i32_0 = arith.constant 0 : i32
    %c0_i32_1 = arith.constant 0 : i32
    return %arg0, %c0_i32, %c0_i32_0 : i32, i32, i32
  }
  func.func @transform_1(%arg0: i32) -> (i32, i32) {
    %c0_i32 = arith.constant 0 : i32
    %c0_i32_0 = arith.constant 0 : i32
    %c0_i32_1 = arith.constant 0 : i32
    return %c0_i32, %c0_i32_0 : i32, i32
  }
  func.func @transform_2(%arg0: i32) -> (i32, i32) {
    %c0_i32 = arith.constant 0 : i32
    %c0_i32_0 = arith.constant 0 : i32
    %c0_i32_1 = arith.constant 0 : i32
    return %c0_i32, %c0_i32_0 : i32, i32
  }
  func.func @transform_3(%arg0: i32) -> (i32, i32) {
    %c0_i32 = arith.constant 0 : i32
    %c0_i32_0 = arith.constant 0 : i32
    return %arg0, %c0_i32 : i32, i32
  }
}

</mosaic_0001>

<bundles_post_ra>
// kernel: _lambda_.14
= control target key start
LH: loop header
LB: loop body
LE: loop exit
PB: predicated region body
PF: predicated region fallthrough
CT: control target
= control target key end

     0   :  { %s906_s12 = smov 0   ;;  %s908_s13 = smov 0   ;;  %s976_s0 = inlined_call_operand.vmem [shape: bf16[2,4,8,8,128], index: 0, kind: input, shape index: {}]   ;;  %s977_s1 = inlined_call_operand.vmem [shape: bf16[1,128,128], index: 1, kind: input, shape index: {}]   ;;  %s978_s2 = inlined_call_operand.vmem [shape: f32[1,128], index: 2, kind: input, shape index: {}]   ;;  %s979_s3 = inlined_call_operand.vmem [shape: bf16[2,64,128], index: 3, kind: output, shape index: {}]  }
   0x1   :  { %s910_s14 = smov 0  }
   0x2 LB: > { %s25_s15 = sadd.s32 1, %s880_s13  ;;  %p642_p0 = scmp.ge.s32.totalorder %s884_s14, 1  ;;  %s884_s14 = sphi %s910_s14, %s13_s14   ;;  %s880_s13 = sphi %s908_s13, %s981_s13   ;;  %s876_s12 = sphi %s906_s12, %s980_s12  }
   0x3   : > { %p27_p1 = scmp.ge.s32.totalorder %s25_s15, 2  ;;  %p168_p2 = scmp.lt.s32.totalorder %s884_s14, 3 }
   0x5   : > { %s983_s15 = smov (%p27_p1, %s25_s15), 0  ;;  %p169_p3 = pnand %p642_p0, %p168_p2 }
   0x6   : > { %v854_v0 = vld [vmem:[%s977_s1] sm:$0xff] (!%p169_p3)   ;;  %p202_p4 = scmp.lt.s32.totalorder (!%p169_p3), %s876_s12, 1  ;;  %v855_v1 = vld [vmem:[%s977_s1 + $0x8] sm:$0xff] (!%p169_p3)   ;;  %v856_v2 = vld [vmem:[%s977_s1 + $0x10] sm:$0xff] (!%p169_p3)  }
   0x7   : > { %172 = sbr.rel (%p169_p3) target bundleno = 259 (0x103), region = 32  ;;  %790 = vmatprep.subr.bf16.mxu0 (!%p169_p3), %v854_v0  ;;  %814 = vmatprep.subr.bf16.mxu1 (!%p169_p3), %v854_v0  ;;  %v857_v3 = vld [vmem:[%s977_s1 + $0x18] sm:$0xff] (!%p169_p3)   ;;  %v858_v6 = vld [vmem:[%s977_s1 + $0x20] sm:$0xff] (!%p169_p3)   ;;  %v859_v7 = vld [vmem:[%s977_s1 + $0x28] sm:$0xff] (!%p169_p3)  }
   0x8   : > { %791 = vmatpush3.bf16.msra.mxu0 (!%p169_p3), %v854_v0  ;;  %822 = vmatpush3.bf16.msra.mxu1 (!%p169_p3), %v854_v0  ;;  %v860_v8 = vld [vmem:[%s977_s1 + $0x30] sm:$0xff] (!%p169_p3)   ;;  %v861_v9 = vld [vmem:[%s977_s1 + $0x38] sm:$0xff] (!%p169_p3)   ;;  %v655_v13 = vld [vmem:[%s978_s2] ss:$0 sm:$0xff] (!%p169_p3) }
   0x9   : > { %792 = vmatprep.subr.bf16.mxu0 (!%p169_p3), %v855_v1  ;;  %815 = vmatprep.subr.bf16.mxu1 (!%p169_p3), %v855_v1 }
   0xc   : > { %793 = vmatpush3.bf16.msra.mxu0 (!%p169_p3), %v855_v1  ;;  %823 = vmatpush3.bf16.msra.mxu1 (!%p169_p3), %v855_v1 }
   0xd   : > { %794 = vmatprep.subr.bf16.mxu0 (!%p169_p3), %v856_v2  ;;  %816 = vmatprep.subr.bf16.mxu1 (!%p169_p3), %v856_v2 }
   0xe   : > { %s985_s12 = smov (!%p202_p4, %s876_s12), 1 }
   0xf   : > { %s666_s22 = sshll.u32 %s985_s12, 7  ;;  %s667_s11 = sshll.u32 %s985_s12, 5 }
  0x10   : > { %s939_s25 = scalar_lea.vmem %s976_s0, %s666_s22  ;;  %795 = vmatpush3.bf16.msra.mxu0 %v856_v2  ;;  %824 = vmatpush3.bf16.msra.mxu1 %v856_v2  ;;  %s221_s18 = scalar_lea.vmem %s979_s3, %s667_s11 }
  0x11   : > { %v677_v4 = vld [vmem:[%s939_s25] sm:$0xff]   ;;  %v761_v5 = vld [vmem:[%s939_s25 + $0x10] sm:$0xff]   ;;  %796 = vmatprep.subr.bf16.mxu0 %v857_v3  ;;  %817 = vmatprep.subr.bf16.mxu1 %v857_v3  ;;  %v760_v10 = vld [vmem:[%s939_s25 + $0x8] sm:$0xff]  }
  0x12   : > { %806 = vmatprep.mubr.bf16.mxu0 %v677_v4  ;;  %810 = vmatprep.mubr.bf16.mxu1 %v761_v5  ;;  %v762_v11 = vld [vmem:[%s939_s25 + $0x18] sm:$0xff]  }
  0x14   : > { %797 = vmatpush3.bf16.msra.mxu0 %v857_v3  ;;  %825 = vmatpush3.bf16.msra.mxu1 %v857_v3 }
  0x15   : > { %798 = vmatprep.subr.bf16.mxu0 %v858_v6  ;;  %818 = vmatprep.subr.bf16.mxu1 %v858_v6 }
  0x18   : > { %799 = vmatpush3.bf16.msra.mxu0 %v858_v6  ;;  %826 = vmatpush3.bf16.msra.mxu1 %v858_v6 }
  0x19   : > { %800 = vmatprep.subr.bf16.mxu0 %v859_v7  ;;  %819 = vmatprep.subr.bf16.mxu1 %v859_v7 }
  0x1c   : > { %801 = vmatpush3.bf16.msra.mxu0 %v859_v7  ;;  %827 = vmatpush3.bf16.msra.mxu1 %v859_v7 }
  0x1d   : > { %802 = vmatprep.subr.bf16.mxu0 %v860_v8  ;;  %820 = vmatprep.subr.bf16.mxu1 %v860_v8 }
  0x20   : > { %803 = vmatpush3.bf16.msra.mxu0 %v860_v8  ;;  %828 = vmatpush3.bf16.msra.mxu1 %v860_v8 }
  0x21   : > { %804 = vmatprep.subr.bf16.mxu0 %v861_v9  ;;  %821 = vmatprep.subr.bf16.mxu1 %v861_v9 }
  0x24   : > { %805 = vmatpush3.bf16.msra.mxu0 %v861_v9  ;;  %829 = vmatpush3.bf16.msra.mxu1 %v861_v9 }
  0x27   : > { %807 = vmatmul.mubr.bf16.vlgmr.msra.gmra.mrb[0].mxu0 %v760_v10  ;;  %811 = vmatmul.mubr.bf16.vlgmr.msra.gmra.mrb[0].mxu1 %v762_v11 }
  0xfa   : > { %v808_v12 = vpop.f32.mrb[0].mxu0  ;;  %v812_v14 = vpop.f32.mrb[0].mxu1 }
  0xfb   : > { %v429_v15 = vpop.f32.mrb[1].mxu0  ;;  %v445_v16 = vpop.f32.mrb[1].mxu1  ;;  %v485_v19 = vadd.f32 %v808_v12, %v655_v13  ;;  %v489_v20 = vadd.f32 %v812_v14, %v655_v13 }
  0xfc   : > { %v809_v17 = vpop.f32.mrb[2].mxu0  ;;  %v813_v18 = vpop.f32.mrb[2].mxu1  ;;  %v483_v25 = vadd.f32 %v655_v13, %v429_v15  ;;  %v487_v26 = vadd.f32 %v655_v13, %v445_v16 }
  0xfd   : > { %v486_v21 = vadd.f32 %v809_v17, %v655_v13  ;;  %v490_v22 = vadd.f32 %v813_v18, %v655_v13  ;;  %v432_v23 = vpop.f32.mrb[3].mxu0  ;;  %v448_v24 = vpop.f32.mrb[3].mxu1 }
  0xfe   : > { %v484_v27 = vadd.f32 %v655_v13, %v432_v23  ;;  %v488_v28 = vadd.f32 %v655_v13, %v448_v24 }
  0xff   : > { %v748_v29 = vpack.c.bf16 %v486_v21, %v485_v19  ;;  %v758_v30 = vpack.c.bf16 %v490_v22, %v489_v20 }
 0x100   : > { %v743_v31 = vpack.c.bf16 %v484_v27, %v483_v25  ;;  %v753_v32 = vpack.c.bf16 %v488_v28, %v487_v26 }
 0x101   : > { %775 = vst [vmem:[%s221_s18 + $0x8] sm:$0xff] %v748_v29   ;;  %777 = vst [vmem:[%s221_s18 + $0x18] sm:$0xff] %v758_v30  }
 0x102   : > { %744 = vst [vmem:[%s221_s18] sm:$0xff] %v743_v31   ;;  %776 = vst [vmem:[%s221_s18 + $0x10] sm:$0xff] %v753_v32  }
 0x103 PF: > { %s13_s14 = sadd.s32 1, %s884_s14   ;;  %s980_s12 = smov %s880_s13 }
 0x104   : > { %p10_p5 = scmp.ge.s32.totalorder %s13_s14, 4   ;;  %s981_s13 = smov %s983_s15 }
 0x106   :  { %12 = sbr.rel (!%p10_p5) target bundleno = 2 (0x2), region = 68 }

// kernel: _lambda_.12
= control target key start
LH: loop header
LB: loop body
LE: loop exit
PB: predicated region body
PF: predicated region fallthrough
CT: control target
= control target key end

     0   :  { %s5851_s15 = smov 0   ;;  %s5853_s16 = smov 0   ;;  %s6604_s0 = inlined_call_operand.vmem [shape: bf16[2,1,18,18,128], index: 0, kind: input, shape index: {}]   ;;  %s6605_s1 = inlined_call_operand.vmem [shape: bf16[9,128,128], index: 1, kind: input, shape index: {}]   ;;  %s6606_s2 = inlined_call_operand.vmem [shape: f32[1,128], index: 2, kind: input, shape index: {}]   ;;  %s6607_s3 = inlined_call_operand.vmem [shape: bf16[2,256,128], index: 3, kind: input, shape index: {}]   ;;  %s6608_s4 = inlined_call_operand.vmem [shape: bf16[2,256,128], index: 4, kind: output, shape index: {}]  }
   0x1   :  { %s5855_s17 = smov 0  }
   0x2 LB: > { %s26_s18 = sadd.s32 1, %s5820_s16  ;;  %p4284_p0 = scmp.ge.s32.totalorder %s5824_s17, 1  ;;  %s5824_s17 = sphi %s5855_s17, %s14_s17   ;;  %s5820_s16 = sphi %s5853_s16, %s6610_s16   ;;  %s5816_s15 = sphi %s5851_s15, %s6609_s15  }
   0x3   : > { %p28_p1 = scmp.ge.s32.totalorder %s26_s18, 2  ;;  %p208_p2 = scmp.lt.s32.totalorder %s5824_s17, 3 }
   0x5   : > { %s6612_s18 = smov (%p28_p1, %s26_s18), 0  ;;  %p209_p3 = pnand %p4284_p0, %p208_p2 }
   0x6   : > { %v5722_v0 = vld [vmem:[%s6605_s1] sm:$0xff] (!%p209_p3)   ;;  %p252_p4 = scmp.lt.s32.totalorder (!%p209_p3), %s5816_s15, 1  ;;  %v5724_v2 = vld [vmem:[%s6605_s1 + $0x8] sm:$0xff] (!%p209_p3)   ;;  %v5726_v4 = vld [vmem:[%s6605_s1 + $0x10] sm:$0xff] (!%p209_p3)  }
   0x7   : > { %212 = sbr.rel (%p209_p3) target bundleno = 546 (0x222), region = 36  ;;  %v5723_v1 = vld [vmem:[%s6605_s1 + $0x100] sm:$0xff] (!%p209_p3)   ;;  %4993 = vmatprep.subr.bf16.mxu1 (!%p209_p3), %v5722_v0  ;;  %v5725_v3 = vld [vmem:[%s6605_s1 + $0x108] sm:$0xff] (!%p209_p3)   ;;  %v5727_v5 = vld [vmem:[%s6605_s1 + $0x110] sm:$0xff] (!%p209_p3)  }
   0x8   : > { %5185 = vmatprep.subr.bf16.mxu0 (!%p209_p3), %v5723_v1  ;;  %4994 = vmatpush3.bf16.msra.mxu1 (!%p209_p3), %v5722_v0  ;;  %v5728_v6 = vld [vmem:[%s6605_s1 + $0x18] sm:$0xff] (!%p209_p3)   ;;  %v5730_v8 = vld [vmem:[%s6605_s1 + $0x20] sm:$0xff] (!%p209_p3)   ;;  %v5732_v10 = vld [vmem:[%s6605_s1 + $0x28] sm:$0xff] (!%p209_p3)  }
   0x9   : > { %5186 = vmatpush3.bf16.msra.mxu0 (!%p209_p3), %v5723_v1  ;;  %4995 = vmatprep.subr.bf16.mxu1 (!%p209_p3), %v5724_v2  ;;  %v5729_v7 = vld [vmem:[%s6605_s1 + $0x118] sm:$0xff] (!%p209_p3)   ;;  %v5731_v9 = vld [vmem:[%s6605_s1 + $0x120] sm:$0xff] (!%p209_p3)   ;;  %v5733_v14 = vld [vmem:[%s6605_s1 + $0x128] sm:$0xff] (!%p209_p3)  }
   0xa   : > { %5187 = vmatprep.subr.bf16.mxu0 (!%p209_p3), %v5725_v3  ;;  %v5734_v26 = vld [vmem:[%s6605_s1 + $0x30] sm:$0xff] (!%p209_p3)   ;;  %v5736_v35 = vld [vmem:[%s6605_s1 + $0x38] sm:$0xff] (!%p209_p3)   ;;  %v5738_v55 = vld [vmem:[%s6605_s1 + $0x40] sm:$0xff] (!%p209_p3)  }
   0xb   : > { %v5735_v31 = vld [vmem:[%s6605_s1 + $0x130] sm:$0xff] (!%p209_p3)   ;;  %v5737_v44 = vld [vmem:[%s6605_s1 + $0x138] sm:$0xff] (!%p209_p3)   ;;  %v5739_v0 = vld [vmem:[%s6605_s1 + $0x140] sm:$0xff] (!%p209_p3)  }
   0xc   : > { %4996 = vmatpush3.bf16.msra.mxu1 (!%p209_p3), %v5724_v2 }
   0xd   : > { %5188 = vmatpush3.bf16.msra.mxu0 (!%p209_p3), %v5725_v3  ;;  %4997 = vmatprep.subr.bf16.mxu1 (!%p209_p3), %v5726_v4 }
   0xe   : > { %s6614_s15 = smov (!%p252_p4, %s5816_s15), 1  ;;  %5189 = vmatprep.subr.bf16.mxu0 %v5727_v5 }
   0xf   : > { %s5697_s9 = smul.u32 216, %s6614_s15  ;;  %s4525_s6 = sshll.u32 %s6614_s15, 7 }
  0x10   : > { %4998 = vmatpush3.bf16.msra.mxu1 %v5726_v4  ;;  %s6529_s13 = scalar_lea.vmem %s6608_s4, %s4525_s6 }
  0x11   : > { %5190 = vmatpush3.bf16.msra.mxu0 %v5727_v5  ;;  %4999 = vmatprep.subr.bf16.mxu1 %v5728_v6  ;;  %s5905_s20 = scalar_lea.vmem %s6604_s0, %s5697_s9  ;;  %s6509_s9 = scalar_lea.vmem %s6607_s3, %s4525_s6 }
  0x12   : > { %5191 = vmatprep.subr.bf16.mxu0 %v5729_v7  ;;  %v4560_v11 = vld [vmem:[%s5905_s20] sm:$0xff]   ;;  %v284_v12 = vld [vmem:[%s5905_s20 + $0xc] sm:$0xff]   ;;  %v286_v13 = vld [vmem:[%s5905_s20 + $0x14] sm:$0x1] }
  0x13   : > { %v4561_v15 = vunpack.c.l.bf16 %v4560_v11  ;;  %v4562_v16 = vunpack.c.h.bf16 %v4560_v11  ;;  %v338_v17 = vunpack.c.l.bf16 %v284_v12  ;;  %v339_v18 = vunpack.c.h.bf16 %v284_v12  ;;  %v4739_v20 = vld [vmem:[%s5905_s20 + $0x18] sm:$0xff]   ;;  %v289_v21 = vld [vmem:[%s5905_s20 + $0x20] sm:$0x1]  ;;  %v290_v33 = vld [vmem:[%s5905_s20 + $0x24] sm:$0xff]  }
  0x14   : > { %5000 = vmatpush3.bf16.msra.mxu1 %v5728_v6  ;;  %v340_v19 = vunpack.c.l.bf16 %v286_v13  ;;  %v4565_v28 = vunpack.c.l.bf16 %v4739_v20  ;;  %v4566_v29 = vunpack.c.h.bf16 %v4739_v20  ;;  %v343_v30 = vunpack.c.l.bf16 %v289_v21  ;;  %v292_v34 = vld [vmem:[%s5905_s20 + $0x2c] sm:$0x1]  ;;  %v4740_v42 = vld [vmem:[%s5905_s20 + $0x30] sm:$0xff]   ;;  %v295_v43 = vld [vmem:[%s5905_s20 + $0x38] sm:$0x1] }
  0x15   : > { %5192 = vmatpush3.bf16.msra.mxu0 %v5729_v7  ;;  %5001 = vmatprep.subr.bf16.mxu1 %v5730_v8  ;;  %v389_v22 = vmax.f32 %v4561_v15, 0.0  ;;  %v390_v23 = vmax.f32 %v4562_v16, 0.0  ;;  %v5918_v24 = vmax.f32 %v338_v17, 0.0  ;;  %v5920_v25 = vmax.f32 %v339_v18, 0.0  ;;  %v296_v53 = vld [vmem:[%s5905_s20 + $0x3c] sm:$0xff]   ;;  %v4741_v61 = vld [vmem:[%s5905_s20 + $0x48] sm:$0xff]  }
  0x16   : > { %5193 = vmatprep.subr.bf16.mxu0 %v5731_v9  ;;  %v394_v27 = vmax.f32 %v340_v19, 0.0  ;;  %v5935_v36 = vmax.f32 %v4565_v28, 0.0  ;;  %v5937_v37 = vmax.f32 %v4566_v29, 0.0  ;;  %v397_v38 = vmax.f32 %v343_v30, 0.0  ;;  %v298_v54 = vld [vmem:[%s5905_s20 + $0x44] sm:$0x1] }
  0x17   : > { %443 = vst [vmem:[#allocation2] sm:$0xff] %v389_v22  ;;  %444 = vst [vmem:[#allocation2 + $0x8] sm:$0xff] %v390_v23  ;;  %v529_v32 = vpack.c.bf16 %v390_v23, %v389_v22  ;;  %v344_v39 = vunpack.c.l.bf16 %v290_v33  ;;  %v345_v40 = vunpack.c.h.bf16 %v290_v33  ;;  %v346_v41 = vunpack.c.l.bf16 %v292_v34  ;;  %v301_v62 = vld [vmem:[%s5905_s20 + $0x50] sm:$0x1]  ;;  %v5740_v11 = vld [vmem:[%s6605_s1 + $0x148] sm:$0xff]  }
  0x18   : > { %5002 = vmatpush3.bf16.msra.mxu1 %v5730_v8  ;;  %446 = vst [vmem:[#allocation2 + $0x18] sm:$0xff] %v5918_v24  ;;  %447 = vst [vmem:[#allocation2 + $0x20] sm:$0xff] %v5920_v25  ;;  %v4569_v46 = vunpack.c.l.bf16 %v4740_v42  ;;  %v4570_v47 = vunpack.c.h.bf16 %v4740_v42  ;;  %v349_v50 = vunpack.c.l.bf16 %v295_v43  ;;  %v350_v57 = vunpack.c.l.bf16 %v296_v53  ;;  %v302_v17 = vld [vmem:[%s5905_s20 + $0x54] sm:$0xff]   ;;  %v304_v18 = vld [vmem:[%s5905_s20 + $0x5c] sm:$0x1] }
  0x19   : > { %5194 = vmatpush3.bf16.msra.mxu0 %v5731_v9  ;;  %5003 = vmatprep.subr.bf16.mxu1 %v5732_v10  ;;  %448 = vst [vmem:[#allocation2 + $0x28] sm:$0x3] %v394_v27  ;;  %449 = vst [vmem:[#allocation2 + $0x30] sm:$0xff] %v5935_v36  ;;  %v5946_v45 = vmax.f32 %v344_v39, 0.0  ;;  %v5948_v48 = vmax.f32 %v345_v40, 0.0  ;;  %v400_v49 = vmax.f32 %v346_v41, 0.0  ;;  %v351_v58 = vunpack.c.h.bf16 %v296_v53 }
  0x1a   : > { %5195 = vmatprep.subr.bf16.mxu0 %v5733_v14  ;;  %5009 = vmatprep.mubr.bf16.mxu1 %v529_v32  ;;  %450 = vst [vmem:[#allocation2 + $0x38] sm:$0xff] %v5937_v37  ;;  %451 = vst [vmem:[#allocation2 + $0x40] sm:$0x3] %v397_v38  ;;  %v5951_v51 = vmax.f32 %v4569_v46, 0.0  ;;  %v5953_v52 = vmax.f32 %v4570_v47, 0.0  ;;  %v403_v56 = vmax.f32 %v349_v50, 0.0  ;;  %v352_v60 = vunpack.c.l.bf16 %v298_v54 }
  0x1b   : > { %452 = vst [vmem:[#allocation2 + $0x48] sm:$0xff] %v5946_v45  ;;  %453 = vst [vmem:[#allocation2 + $0x50] sm:$0xff] %v5948_v48  ;;  %v5968_v1 = vmax.f32 %v350_v57, 0.0  ;;  %v5970_v2 = vmax.f32 %v351_v58, 0.0  ;;  %v4573_v3 = vunpack.c.l.bf16 %v4741_v61  ;;  %v4574_v4 = vunpack.c.h.bf16 %v4741_v61  ;;  %v5741_v19 = vld [vmem:[%s6605_s1 + $0x48] sm:$0xff]   ;;  %v4742_v23 = vld [vmem:[%s5905_s20 + $0x60] sm:$0xff]  }
  0x1c   : > { %5004 = vmatpush3.bf16.msra.mxu1 %v5732_v10  ;;  %454 = vst [vmem:[#allocation2 + $0x58] sm:$0x3] %v400_v49  ;;  %455 = vst [vmem:[#allocation2 + $0x60] sm:$0xff] %v5951_v51  ;;  %v530_v6 = vpack.c.bf16 %v5920_v25, %v5918_v24  ;;  %v406_v7 = vmax.f32 %v352_v60, 0.0  ;;  %v355_v8 = vunpack.c.l.bf16 %v301_v62  ;;  %v5990_v15 = vpack.c.bf16 %v5937_v37, %v5935_v36  ;;  %v307_v28 = vld [vmem:[%s5905_s20 + $0x68] sm:$0x1] }
  0x1d   : > { %5196 = vmatpush3.bf16.msra.mxu0 %v5733_v14  ;;  %5005 = vmatprep.subr.bf16.mxu1 %v5734_v26  ;;  %456 = vst [vmem:[#allocation2 + $0x68] sm:$0xff] %v5953_v52  ;;  %457 = vst [vmem:[#allocation2 + $0x70] sm:$0x3] %v403_v56  ;;  %v5981_v12 = vmax.f32 %v4573_v3, 0.0  ;;  %v5983_v13 = vmax.f32 %v4574_v4, 0.0  ;;  %v356_v20 = vunpack.c.l.bf16 %v302_v17  ;;  %v357_v21 = vunpack.c.h.bf16 %v302_v17  ;;  %v5744_v30 = vld [vmem:[%s6605_s1 + $0x50] sm:$0xff]  }
  0x1e   : > { %5197 = vmatprep.subr.bf16.mxu0 %v5735_v31  ;;  %458 = vst [vmem:[#allocation2 + $0x78] sm:$0xff] %v5968_v1  ;;  %459 = vst [vmem:[#allocation2 + $0x80] sm:$0xff] %v5970_v2  ;;  %v409_v16 = vmax.f32 %v355_v8, 0.0  ;;  %v358_v22 = vunpack.c.l.bf16 %v304_v18  ;;  %v4578_v27 = vunpack.c.h.bf16 %v4742_v23  ;;  %v361_v36 = vunpack.c.l.bf16 %v307_v28  ;;  %v5742_v39 = vld [vmem:[%s6605_s1 + $0x150] sm:$0xff]   ;;  %v5743_v50 = vld [vmem:[%s6605_s1 + $0x158] sm:$0xff]  }
  0x1f   : > { %v1913_v59 = vld [vmem:[#allocation2 + $0x19] sm:$0xff]  ;;  %460 = vst [vmem:[#allocation2 + $0x88] sm:$0x3] %v406_v7  ;;  %461 = vst [vmem:[#allocation2 + $0x90] sm:$0xff] %v5981_v12  ;;  %v6009_v32 = vmax.f32 %v357_v21, 0.0  ;;  %v6024_v40 = vpack.c.bf16 %v5948_v48, %v5946_v45  ;;  %v308_v47 = vld [vmem:[%s5905_s20 + $0x6c] sm:$0xff]   ;;  %v6059_v61 = vpack.c.bf16 %v5970_v2, %v5968_v1  ;;  %v6073_v1 = vpack.c.bf16 %v5983_v13, %v5981_v12 }
  0x20   : > { %5006 = vmatpush3.bf16.msra.mxu1 %v5734_v26  ;;  %v1914_v63 = vld [vmem:[#allocation2 + $0x21] sm:$0xff]  ;;  %462 = vst [vmem:[#allocation2 + $0x98] sm:$0xff] %v5983_v13  ;;  %463 = vst [vmem:[#allocation2 + $0xa0] sm:$0x3] %v409_v16  ;;  %v4577_v26 = vunpack.c.l.bf16 %v4742_v23  ;;  %v412_v33 = vmax.f32 %v358_v22, 0.0  ;;  %v6014_v38 = vmax.f32 %v4578_v27, 0.0  ;;  %v362_v48 = vunpack.c.l.bf16 %v308_v47 }
  0x21   : > { %5198 = vmatpush3.bf16.msra.mxu0 %v5735_v31  ;;  %5007 = vmatprep.subr.bf16.mxu1 %v5736_v35  ;;  %v5972_v5 = vpack.c.bf16 %v1914_v63, %v1913_v59  ;;  %v1915_v9 = vld [vmem:[#allocation2 + $0x31] sm:$0xff]  ;;  %v1916_v10 = vld [vmem:[#allocation2 + $0x39] sm:$0xff]  ;;  %v6007_v31 = vmax.f32 %v356_v20, 0.0  ;;  %465 = vst [vmem:[#allocation2 + $0xb0] sm:$0xff] %v6009_v32  ;;  %v415_v42 = vmax.f32 %v361_v36, 0.0  ;;  %v363_v49 = vunpack.c.h.bf16 %v308_v47  ;;  %v314_v63 = vld [vmem:[%s5905_s20 + $0x84] sm:$0xff]  }
  0x22   : > { %5199 = vmatprep.subr.bf16.mxu0 %v5737_v44  ;;  %v5986_v14 = vpack.c.bf16 %v1916_v10, %v1915_v9  ;;  %v1917_v24 = vld [vmem:[#allocation2 + $0x49] sm:$0xff]  ;;  %v6012_v37 = vmax.f32 %v4577_v26, 0.0  ;;  %466 = vst [vmem:[#allocation2 + $0xb8] sm:$0x3] %v412_v33  ;;  %468 = vst [vmem:[#allocation2 + $0xc8] sm:$0xff] %v6014_v38  ;;  %v5745_v54 = vld [vmem:[%s6605_s1 + $0x160] sm:$0xff]   ;;  %v369_v7 = vunpack.c.h.bf16 %v314_v63 }
  0x23   : > { %5201 = vmatprep.mubr.bf16.mxu0 %v5972_v5  ;;  %v1918_v25 = vld [vmem:[#allocation2 + $0x51] sm:$0xff]  ;;  %464 = vst [vmem:[#allocation2 + $0xa8] sm:$0xff] %v6007_v31  ;;  %469 = vst [vmem:[#allocation2 + $0xd0] sm:$0x3] %v415_v42  ;;  %v6046_v53 = vmax.f32 %v363_v49, 0.0  ;;  %v5746_v16 = vld [vmem:[%s6605_s1 + $0x168] sm:$0xff]  }
  0x24   : > { %5008 = vmatpush3.bf16.msra.mxu1 %v5736_v35  ;;  %v6002_v29 = vpack.c.bf16 %v1918_v25, %v1917_v24  ;;  %v1919_v34 = vld [vmem:[#allocation2 + $0x61] sm:$0xff]  ;;  %v1920_v35 = vld [vmem:[#allocation2 + $0x69] sm:$0xff]  ;;  %467 = vst [vmem:[#allocation2 + $0xc0] sm:$0xff] %v6012_v37  ;;  %v6081_v10 = vmax.f32 %v369_v7, 0.0  ;;  %v326_v36 = vld [vmem:[%s5905_s20 + $0xb4] sm:$0xff]  }
  0x25   : > { %5200 = vmatpush3.bf16.msra.mxu0 %v5737_v44  ;;  %5041 = vmatprep.subr.bf16.mxu1 %v5738_v55  ;;  %v1921_v41 = vld [vmem:[#allocation2 + $0x79] sm:$0xff]  ;;  %v6028_v43 = vpack.c.bf16 %v1920_v35, %v1919_v34  ;;  %v6032_v44 = vpack.c.bf16 %v5953_v52, %v5951_v51  ;;  %v6044_v52 = vmax.f32 %v362_v48, 0.0  ;;  %471 = vst [vmem:[#allocation2 + $0xe0] sm:$0xff] %v6046_v53  ;;  %v5752_v18 = vld [vmem:[%s6605_s1 + $0x68] sm:$0xff]   ;;  %v5748_v22 = vld [vmem:[%s6605_s1 + $0x170] sm:$0xff]   ;;  %v380_v42 = vunpack.c.l.bf16 %v326_v36 }
  0x26   : > { %5233 = vmatprep.subr.bf16.mxu0 %v5739_v0  ;;  %v1922_v46 = vld [vmem:[#allocation2 + $0x81] sm:$0xff]  ;;  %v5747_v51 = vld [vmem:[%s6605_s1 + $0x58] sm:$0xff]   ;;  %477 = vst [vmem:[#allocation2 + $0x110] sm:$0xff] %v6081_v10  ;;  %v6125_v48 = vpack.c.bf16 %v6014_v38, %v6012_v37  ;;  %v310_v38 = vld [vmem:[%s5905_s20 + $0x74] sm:$0x1] }
  0x27   : > { %5010 = vmatmul.mubr.bf16.vlgmr.msra.gmra.mrb[0].mxu1 %v530_v6  ;;  %v6035_v45 = vpack.c.bf16 %v1922_v46, %v1921_v41  ;;  %v1923_v56 = vld [vmem:[#allocation2 + $0x91] sm:$0xff]  ;;  %v1924_v57 = vld [vmem:[#allocation2 + $0x99] sm:$0xff]  ;;  %470 = vst [vmem:[#allocation2 + $0xd8] sm:$0xff] %v6044_v52  ;;  %v368_v6 = vunpack.c.l.bf16 %v314_v63  ;;  %v4745_v28 = vld [vmem:[%s5905_s20 + $0xa8] sm:$0xff]   ;;  %v381_v46 = vunpack.c.h.bf16 %v326_v36 }
  0x28   : > { %5202 = vmatmul.mubr.bf16.vlgmr.msra.gmra.mrb[0].mxu0 %v5986_v14  ;;  %5042 = vmatpush3.bf16.msra.mxu1 %v5738_v55  ;;  %v4743_v55 = vld [vmem:[%s5905_s20 + $0x78] sm:$0xff]   ;;  %v6069_v8 = vpack.c.bf16 %v1924_v57, %v1923_v56  ;;  %v2284_v33 = vld [vmem:[#allocation2 + $0x22] sm:$0xff]  ;;  %v4589_v34 = vunpack.c.l.bf16 %v4745_v28  ;;  %v4590_v35 = vunpack.c.h.bf16 %v4745_v28  ;;  %v5754_v41 = vld [vmem:[%s6605_s1 + $0x70] sm:$0xff]  }
  0x29   : > { %5234 = vmatpush3.bf16.msra.mxu0 %v5739_v0  ;;  %5013 = vmatprep.mubr.bf16.mxu1 %v5990_v15  ;;  %v4581_v59 = vunpack.c.l.bf16 %v4743_v55  ;;  %v4582_v60 = vunpack.c.h.bf16 %v4743_v55  ;;  %v1926_v62 = vld [vmem:[#allocation2 + $0xb1] sm:$0xff]  ;;  %v5750_v0 = vld [vmem:[%s6605_s1 + $0x60] sm:$0xff]   ;;  %v6079_v9 = vmax.f32 %v368_v6, 0.0  ;;  %v283_v37 = vld [vmem:[%s5905_s20 + $0x8] sm:$0x1] }
  0x2a   : > { %5235 = vmatprep.subr.bf16.mxu0 %v5740_v11  ;;  %5205 = vmatprep.mubr.bf16.mxu0 %v6002_v29  ;;  %v1925_v58 = vld [vmem:[#allocation2 + $0xa9] sm:$0xff]  ;;  %v320_v17 = vld [vmem:[%s5905_s20 + $0x9c] sm:$0xff]   ;;  %v2285_v55 = vld [vmem:[#allocation2 + $0x32] sm:$0xff] }
  0x2b   : > { %5043 = vmatprep.subr.bf16.mxu1 %v5741_v19  ;;  %v6065_v3 = vmax.f32 %v4581_v59, 0.0  ;;  %v6067_v4 = vmax.f32 %v4582_v60, 0.0  ;;  %v6075_v2 = vpack.c.bf16 %v1926_v62, %v1925_v58  ;;  %476 = vst [vmem:[#allocation2 + $0x108] sm:$0xff] %v6079_v9  ;;  %v375_v20 = vunpack.c.h.bf16 %v320_v17  ;;  %v1927_v21 = vld [vmem:[#allocation2 + $0xc1] sm:$0xff]  ;;  %v1928_v25 = vld [vmem:[#allocation2 + $0xc9] sm:$0xff]  ;;  %v5756_v57 = vld [vmem:[%s6605_s1 + $0x78] sm:$0xff]  }
  0x2c   : > { %5044 = vmatpush3.bf16.msra.mxu1 %v5741_v19  ;;  %v374_v19 = vunpack.c.l.bf16 %v320_v17  ;;  %v6121_v47 = vpack.c.bf16 %v1928_v25, %v1927_v21  ;;  %v2286_v56 = vld [vmem:[#allocation2 + $0x3a] sm:$0xff]  ;;  %v337_v58 = vunpack.c.l.bf16 %v283_v37  ;;  %v364_v59 = vunpack.c.l.bf16 %v310_v38  ;;  %v2287_v63 = vld [vmem:[#allocation2 + $0x4a] sm:$0xff]  ;;  %v322_v25 = vld [vmem:[%s5905_s20 + $0xa4] sm:$0x1] }
  0x2d   : > { %5236 = vmatpush3.bf16.msra.mxu0 %v5740_v11  ;;  %5045 = vmatprep.subr.bf16.mxu1 %v5744_v30  ;;  %473 = vst [vmem:[#allocation2 + $0xf0] sm:$0xff] %v6065_v3  ;;  %474 = vst [vmem:[#allocation2 + $0xf8] sm:$0xff] %v6067_v4  ;;  %v4744_v11 = vld [vmem:[%s5905_s20 + $0x90] sm:$0xff]   ;;  %v6106_v27 = vmax.f32 %v375_v20, 0.0  ;;  %v5751_v60 = vld [vmem:[%s6605_s1 + $0x180] sm:$0xff]   ;;  %v6168_v20 = vpack.c.bf16 %v2286_v56, %v2285_v55  ;;  %v6172_v21 = vpack.c.bf16 %v6067_v4, %v6065_v3 }
  0x2e   : > { %5237 = vmatprep.subr.bf16.mxu0 %v5742_v39  ;;  %v4585_v12 = vunpack.c.l.bf16 %v4744_v11  ;;  %v4586_v13 = vunpack.c.h.bf16 %v4744_v11  ;;  %v6104_v26 = vmax.f32 %v374_v19, 0.0  ;;  %v313_v62 = vld [vmem:[%s5905_s20 + $0x80] sm:$0x1]  ;;  %v391_v6 = vmax.f32 %v337_v58, 0.0  ;;  %v319_v19 = vld [vmem:[%s5905_s20 + $0x98] sm:$0x1] }
  0x2f   : > { %5014 = vmatmul.mubr.bf16.gmra.mrb[4].mxu1 %v6024_v40  ;;  %483 = vst [vmem:[#allocation2 + $0x140] sm:$0xff] %v6106_v27  ;;  %v418_v7 = vmax.f32 %v364_v59, 0.0  ;;  %v367_v11 = vunpack.c.l.bf16 %v313_v62  ;;  %v5753_v28 = vld [vmem:[%s6605_s1 + $0x188] sm:$0xff]   ;;  %v5755_v38 = vld [vmem:[%s6605_s1 + $0x190] sm:$0xff]   ;;  %v4746_v55 = vld [vmem:[%s5905_s20 + $0xc0] sm:$0xff]   ;;  %v6193_v56 = vpack.c.bf16 %v6081_v10, %v6079_v9 }
  0x30   : > { %5206 = vmatmul.mubr.bf16.gmra.mrb[4].mxu0 %v6028_v43  ;;  %5017 = vmatprep.mubr.bf16.mxu1 %v6032_v44  ;;  %v6099_v23 = vmax.f32 %v4585_v12, 0.0  ;;  %v6101_v24 = vmax.f32 %v4586_v13, 0.0  ;;  %482 = vst [vmem:[#allocation2 + $0x138] sm:$0xff] %v6104_v26  ;;  %v6160_v12 = vpack.c.bf16 %v6046_v53, %v6044_v52  ;;  %445 = vst [vmem:[#allocation2 + $0x10] sm:$0x3] %v391_v6  ;;  %v6165_v13 = vld [vmem:[%s6605_s1 + $0x80] sm:$0xff]   ;;  %v373_v52 = vunpack.c.l.bf16 %v319_v19 }
  0x31   : > { %5238 = vmatpush3.bf16.msra.mxu0 %v5742_v39  ;;  %5209 = vmatprep.mubr.bf16.mxu0 %v6035_v45  ;;  %v6114_v39 = vpack.c.bf16 %v6009_v32, %v6007_v31  ;;  %v6127_v31 = vmax.f32 %v4589_v34, 0.0  ;;  %v6129_v32 = vmax.f32 %v4590_v35, 0.0  ;;  %472 = vst [vmem:[#allocation2 + $0xe8] sm:$0x3] %v418_v7  ;;  %v421_v17 = vmax.f32 %v367_v11, 0.0  ;;  %v2289_v4 = vld [vmem:[#allocation2 + $0x62] sm:$0xff] }
  0x32   : > { %5239 = vmatprep.subr.bf16.mxu0 %v5743_v50  ;;  %5046 = vmatpush3.bf16.msra.mxu1 %v5744_v30  ;;  %v2283_v30 = vld [vmem:[#allocation2 + $0x1a] sm:$0xff]  ;;  %479 = vst [vmem:[#allocation2 + $0x120] sm:$0xff] %v6099_v23  ;;  %480 = vst [vmem:[#allocation2 + $0x128] sm:$0xff] %v6101_v24  ;;  %v325_v34 = vld [vmem:[%s5905_s20 + $0xb0] sm:$0x1]  ;;  %v4593_v58 = vunpack.c.l.bf16 %v4746_v55  ;;  %v6200_v62 = vpack.c.bf16 %v6101_v24, %v6099_v23 }
  0x33   : > { %5047 = vmatprep.subr.bf16.mxu1 %v5747_v51  ;;  %v6131_v49 = vpack.c.bf16 %v2284_v33, %v2283_v30  ;;  %485 = vst [vmem:[#allocation2 + $0x150] sm:$0xff] %v6127_v31  ;;  %486 = vst [vmem:[#allocation2 + $0x158] sm:$0xff] %v6129_v32  ;;  %v427_v30 = vmax.f32 %v373_v52, 0.0  ;;  %v376_v33 = vunpack.c.l.bf16 %v322_v25  ;;  %v379_v3 = vunpack.c.l.bf16 %v325_v34  ;;  %v2290_v35 = vld [vmem:[#allocation2 + $0x6a] sm:$0xff]  ;;  %v2292_v37 = vld [vmem:[#allocation2 + $0x82] sm:$0xff] }
  0x34   : > { %475 = vst [vmem:[#allocation2 + $0x100] sm:$0x3] %v421_v17  ;;  %v331_v59 = vld [vmem:[%s5905_s20 + $0xc8] sm:$0x1]  ;;  %v437_v7 = vmax.f32 %v4593_v58, 0.0  ;;  %v5757_v9 = vld [vmem:[%s6605_s1 + $0x198] sm:$0xff]   ;;  %v6218_v52 = vpack.c.bf16 %v6106_v27, %v6104_v26  ;;  %v6224_v25 = vpack.c.bf16 %v6129_v32, %v6127_v31 }
  0x35   : > { %5240 = vmatpush3.bf16.msra.mxu0 %v5743_v50  ;;  %v6133_v50 = vmax.f32 %v380_v42, 0.0  ;;  %481 = vst [vmem:[#allocation2 + $0x130] sm:$0x3] %v427_v30  ;;  %v430_v36 = vmax.f32 %v376_v33, 0.0  ;;  %v2291_v42 = vld [vmem:[#allocation2 + $0x7a] sm:$0xff]  ;;  %v2293_v23 = vld [vmem:[#allocation2 + $0x92] sm:$0xff] }
  0x36   : > { %5241 = vmatprep.subr.bf16.mxu0 %v5745_v54  ;;  %5048 = vmatpush3.bf16.msra.mxu1 %v5747_v51  ;;  %v6135_v51 = vmax.f32 %v381_v46, 0.0  ;;  %v433_v46 = vmax.f32 %v379_v3, 0.0  ;;  %v6202_v6 = vpack.c.bf16 %v2292_v37, %v2291_v42  ;;  %491 = vst [vmem:[#allocation2 + $0x180] sm:$0xff] %v437_v7  ;;  %v2295_v17 = vld [vmem:[#allocation2 + $0xaa] sm:$0xff]  ;;  %v5759_v19 = vld [vmem:[%s6605_s1 + $0x1a0] sm:$0xff]   ;;  %v5765_v42 = vld [vmem:[%s6605_s1 + $0x1b8] sm:$0xff]  }
  0x37   : > { %5018 = vmatmul.mubr.bf16.gmra.mrb[8].mxu1 %v6059_v61  ;;  %5049 = vmatprep.subr.bf16.mxu1 %v5750_v0  ;;  %488 = vst [vmem:[#allocation2 + $0x168] sm:$0xff] %v6133_v50  ;;  %484 = vst [vmem:[#allocation2 + $0x148] sm:$0x3] %v430_v36  ;;  %v5761_v30 = vld [vmem:[%s6605_s1 + $0x1a8] sm:$0xff]   ;;  %v2299_v34 = vld [vmem:[#allocation2 + $0xda] sm:$0xff] }
  0x38   : > { %5210 = vmatmul.mubr.bf16.gmra.mrb[8].mxu0 %v6069_v8  ;;  %5021 = vmatprep.mubr.bf16.mxu1 %v6073_v1  ;;  %489 = vst [vmem:[#allocation2 + $0x170] sm:$0xff] %v6135_v51  ;;  %487 = vst [vmem:[#allocation2 + $0x160] sm:$0x3] %v433_v46  ;;  %v2297_v33 = vld [vmem:[#allocation2 + $0xc2] sm:$0xff]  ;;  %v2298_v26 = vld [vmem:[#allocation2 + $0xca] sm:$0xff] }
  0x39   : > { %5242 = vmatpush3.bf16.msra.mxu0 %v5745_v54  ;;  %5213 = vmatprep.mubr.bf16.mxu0 %v6075_v2  ;;  %v5749_v54 = vld [vmem:[%s6605_s1 + $0x178] sm:$0xff]   ;;  %v802_v27 = vld [vmem:[#allocation2 + $0x1] sm:$0xff]  ;;  %v803_v31 = vld [vmem:[#allocation2 + $0x9] sm:$0xff] }
  0x3a   : > { %5243 = vmatprep.subr.bf16.mxu0 %v5746_v16  ;;  %5050 = vmatpush3.bf16.msra.mxu1 %v5750_v0  ;;  %v2288_v0 = vld [vmem:[#allocation2 + $0x52] sm:$0xff]  ;;  %v2300_v3 = vld [vmem:[#allocation2 + $0xe2] sm:$0xff]  ;;  %v834_v36 = vpack.c.bf16 %v803_v31, %v802_v27 }
  0x3b   : > { %5051 = vmatprep.subr.bf16.mxu1 %v5752_v18  ;;  %v6174_v53 = vpack.c.bf16 %v2288_v0, %v2287_v63  ;;  %v4594_v63 = vunpack.c.h.bf16 %v4746_v55  ;;  %v385_v0 = vunpack.c.l.bf16 %v331_v59  ;;  %v5763_v32 = vld [vmem:[%s6605_s1 + $0x1b0] sm:$0xff]   ;;  %v6255_v37 = vld [vmem:[%s6605_s1 + $0x1c0] sm:$0xff]  }
  0x3c   : > { %v2301_v46 = vld [vmem:[#allocation2 + $0xf2] sm:$0xff] }
  0x3d   : > { %5244 = vmatpush3.bf16.msra.mxu0 %v5746_v16  ;;  %v316_v16 = vld [vmem:[%s5905_s20 + $0x8c] sm:$0x1]  ;;  %v438_v10 = vmax.f32 %v4594_v63, 0.0  ;;  %v439_v11 = vmax.f32 %v385_v0, 0.0 }
  0x3e   : > { %5245 = vmatprep.subr.bf16.mxu0 %v5748_v22  ;;  %5052 = vmatpush3.bf16.msra.mxu1 %v5752_v18  ;;  %v370_v18 = vunpack.c.l.bf16 %v316_v16  ;;  %v2294_v16 = vld [vmem:[#allocation2 + $0x9a] sm:$0xff]  ;;  %v5760_v63 = vld [vmem:[%s6605_s1 + $0x88] sm:$0xff]  }
  0x3f   : > { %5022 = vmatmul.mubr.bf16.gmra.mrb[12].mxu1 %v6114_v39  ;;  %5053 = vmatprep.subr.bf16.mxu1 %v5754_v41  ;;  %492 = vst [vmem:[#allocation2 + $0x188] sm:$0xff] %v438_v10  ;;  %493 = vst [vmem:[#allocation2 + $0x190] sm:$0x3] %v439_v11  ;;  %v6210_v24 = vpack.c.bf16 %v438_v10, %v437_v7  ;;  %v2307_v10 = vld [vmem:[#allocation2 + $0x13a] sm:$0xff] }
  0x40   : > { %5214 = vmatmul.mubr.bf16.gmra.mrb[12].mxu0 %v6121_v47  ;;  %5025 = vmatprep.mubr.bf16.mxu1 %v6125_v48 }
  0x41   : > { %5246 = vmatpush3.bf16.msra.mxu0 %v5748_v22  ;;  %5249 = vmatprep.mubr.bf16.mxu0 %v6131_v49  ;;  %v424_v22 = vmax.f32 %v370_v18, 0.0  ;;  %v2296_v18 = vld [vmem:[#allocation2 + $0xb2] sm:$0xff] }
  0x42   : > { %5247 = vmatprep.subr.bf16.mxu0 %v5749_v54  ;;  %5054 = vmatpush3.bf16.msra.mxu1 %v5754_v41  ;;  %v328_v41 = vld [vmem:[%s5905_s20 + $0xbc] sm:$0x1] }
  0x43   : > { %5055 = vmatprep.subr.bf16.mxu1 %v5756_v57  ;;  %478 = vst [vmem:[#allocation2 + $0x118] sm:$0x3] %v424_v22  ;;  %v6220_v22 = vpack.c.bf16 %v2294_v16, %v2293_v23  ;;  %v2306_v23 = vld [vmem:[#allocation2 + $0x12a] sm:$0xff] }
  0x45   : > { %5248 = vmatpush3.bf16.msra.mxu0 %v5749_v54  ;;  %v382_v54 = vunpack.c.l.bf16 %v328_v41  ;;  %v6244_v41 = vpack.c.bf16 %v2300_v3, %v2299_v34  ;;  %v334_v3 = vld [vmem:[%s5905_s20 + $0xd4] sm:$0x1] }
  0x46   : > { %5281 = vmatprep.subr.bf16.mxu0 %v5751_v60  ;;  %5056 = vmatpush3.bf16.msra.mxu1 %v5756_v57  ;;  %v2313_v34 = vld [vmem:[#allocation2 + $0x182] sm:$0xff]  ;;  %v2314_v31 = vld [vmem:[#allocation2 + $0x18a] sm:$0xff] }
  0x47   : > { %5026 = vmatmul.mubr.bf16.gmra.mrb[16].mxu1 %v6160_v12  ;;  %5089 = vmatprep.subr.bf16.mxu1 %v6165_v13  ;;  %v436_v57 = vmax.f32 %v382_v54, 0.0 }
  0x48   : > { %5250 = vmatmul.mubr.bf16.vlgmr.msra.gmra.mrb[0].mxu0 %v6168_v20  ;;  %5029 = vmatprep.mubr.bf16.mxu1 %v6172_v21 }
  0x49   : > { %5282 = vmatpush3.bf16.msra.mxu0 %v5751_v60  ;;  %5253 = vmatprep.mubr.bf16.mxu0 %v6174_v53  ;;  %v6196_v60 = vpack.c.bf16 %v2290_v35, %v2289_v4  ;;  %490 = vst [vmem:[#allocation2 + $0x178] sm:$0x3] %v436_v57  ;;  %v6240_v4 = vpack.c.bf16 %v6135_v51, %v6133_v50  ;;  %v2302_v50 = vld [vmem:[#allocation2 + $0xfa] sm:$0xff]  ;;  %v2303_v51 = vld [vmem:[#allocation2 + $0x10a] sm:$0xff] }
  0x4a   : > { %5283 = vmatprep.subr.bf16.mxu0 %v5753_v28  ;;  %v6242_v35 = vpack.c.bf16 %v2298_v26, %v2297_v33  ;;  %v2304_v54 = vld [vmem:[#allocation2 + $0x112] sm:$0xff]  ;;  %v6258_v55 = vpack.c.bf16 %v2302_v50, %v2301_v46  ;;  %v5766_v26 = vld [vmem:[%s6605_s1 + $0xa0] sm:$0xff]  }
  0x4b   : > { %v6260_v59 = vpack.c.bf16 %v2304_v54, %v2303_v51  ;;  %v821_v50 = vld [vmem:[#allocation2 + $0xe1] sm:$0xff]  ;;  %v822_v51 = vld [vmem:[#allocation2 + $0xf1] sm:$0xff]  ;;  %v823_v54 = vld [vmem:[#allocation2 + $0xf9] sm:$0xff] }
  0x4d   : > { %5284 = vmatpush3.bf16.msra.mxu0 %v5753_v28  ;;  %v6226_v28 = vpack.c.bf16 %v2296_v18, %v2295_v17  ;;  %v5764_v18 = vld [vmem:[%s6605_s1 + $0x98] sm:$0xff]  }
  0x4e   : > { %5285 = vmatprep.subr.bf16.mxu0 %v5755_v38 }
  0x4f   : > { %5030 = vmatmul.mubr.bf16.gmra.mrb[20].mxu1 %v6193_v56 }
  0x50   : > { %5254 = vmatmul.mubr.bf16.gmra.mrb[4].mxu0 %v6196_v60  ;;  %5033 = vmatprep.mubr.bf16.mxu1 %v6200_v62  ;;  %v2312_v33 = vld [vmem:[#allocation2 + $0x172] sm:$0xff] }
  0x51   : > { %5257 = vmatprep.mubr.bf16.mxu0 %v6202_v6  ;;  %5286 = vmatpush3.bf16.msra.mxu0 %v5755_v38  ;;  %v332_v38 = vld [vmem:[%s5905_s20 + $0xcc] sm:$0xff]  }
  0x52   : > { %5287 = vmatprep.subr.bf16.mxu0 %v5757_v9  ;;  %v386_v57 = vunpack.c.l.bf16 %v332_v38  ;;  %v387_v58 = vunpack.c.h.bf16 %v332_v38  ;;  %v6320_v38 = vld [vmem:[%s6605_s1 + $0xc0] sm:$0xff]  }
  0x54   : > { %v6266_v0 = vmax.f32 %v386_v57, 0.0  ;;  %v6268_v7 = vmax.f32 %v387_v58, 0.0  ;;  %v825_v58 = vld [vmem:[#allocation2 + $0x111] sm:$0xff] }
  0x55   : > { %5288 = vmatpush3.bf16.msra.mxu0 %v5757_v9  ;;  %v2305_v9 = vld [vmem:[#allocation2 + $0x122] sm:$0xff] }
  0x56   : > { %5289 = vmatprep.subr.bf16.mxu0 %v5759_v19  ;;  %494 = vst [vmem:[#allocation2 + $0x198] sm:$0xff] %v6266_v0  ;;  %495 = vst [vmem:[#allocation2 + $0x1a0] sm:$0xff] %v6268_v7  ;;  %v2701_v11 = vpack.c.bf16 %v6268_v7, %v6266_v0  ;;  %v6282_v16 = vpack.c.bf16 %v2306_v23, %v2305_v9  ;;  %v827_v9 = vld [vmem:[#allocation2 + $0x129] sm:$0xff]  ;;  %v5794_v0 = vld [vmem:[%s6605_s1 + $0x100] sm:$0xff]  }
  0x57   : > { %5034 = vmatmul.mubr.bf16.gmra.mrb[24].mxu1 %v6218_v52  ;;  %v3031_v7 = vld [vmem:[#allocation2 + $0x81] sm:$0xff] }
  0x58   : > { %5258 = vmatmul.mubr.bf16.gmra.mrb[8].mxu0 %v6220_v22  ;;  %5037 = vmatprep.mubr.bf16.mxu1 %v6224_v25 }
  0x59   : > { %5261 = vmatprep.mubr.bf16.mxu0 %v6226_v28  ;;  %5290 = vmatpush3.bf16.msra.mxu0 %v5759_v19  ;;  %v2310_v19 = vld [vmem:[#allocation2 + $0x15a] sm:$0xff] }
  0x5a   : > { %5291 = vmatprep.subr.bf16.mxu0 %v5761_v30 }
  0x5d   : > { %5292 = vmatpush3.bf16.msra.mxu0 %v5761_v30  ;;  %v2311_v30 = vld [vmem:[#allocation2 + $0x16a] sm:$0xff] }
  0x5e   : > { %5293 = vmatprep.subr.bf16.mxu0 %v5763_v32 }
  0x5f   : > { %5038 = vmatmul.mubr.bf16.gmra.mrb[28].mxu1 %v6240_v4 }
  0x60   : > { %5262 = vmatmul.mubr.bf16.gmra.mrb[12].mxu0 %v6242_v35  ;;  %5057 = vmatprep.mubr.bf16.mxu1 %v834_v36  ;;  %v388_v36 = vunpack.c.l.bf16 %v334_v3  ;;  %v5776_v3 = vld [vmem:[%s6605_s1 + $0xc8] sm:$0xff]  }
  0x61   : > { %5265 = vmatprep.mubr.bf16.mxu0 %v6244_v41  ;;  %5294 = vmatpush3.bf16.msra.mxu0 %v5763_v32  ;;  %v5770_v32 = vld [vmem:[%s6605_s1 + $0xb0] sm:$0xff]  }
  0x62   : > { %5295 = vmatprep.subr.bf16.mxu0 %v5765_v42  ;;  %v442_v46 = vmax.f32 %v388_v36, 0.0 }
  0x64   : > { %496 = vst [vmem:[#allocation2 + $0x1a8] sm:$0x3] %v442_v46  ;;  %v3033_v46 = vld [vmem:[#allocation2 + $0x99] sm:$0xff] }
  0x65   : > { %5296 = vmatpush3.bf16.msra.mxu0 %v5765_v42  ;;  %v2330_v42 = vpack.c.bf16 %v2314_v31, %v2313_v34  ;;  %v5779_v34 = vld [vmem:[%s6605_s1 + $0x1f0] sm:$0xff]  }
  0x66   : > { %5329 = vmatprep.subr.bf16.mxu0 %v6255_v37 }
  0x67   : > { %5058 = vmatmul.mubr.bf16.vlgmr.msra.gmra.mrb[0].mxu1 %v5972_v5  ;;  %v5762_v5 = vld [vmem:[%s6605_s1 + $0x90] sm:$0xff]  }
  0x68   : > { %5266 = vmatmul.mubr.bf16.gmra.mrb[16].mxu0 %v6258_v55  ;;  %5090 = vmatpush3.bf16.msra.mxu1 %v6165_v13  ;;  %v2308_v13 = vld [vmem:[#allocation2 + $0x142] sm:$0xff] }
  0x69   : > { %5061 = vmatprep.mubr.bf16.mxu1 %v5986_v14  ;;  %5269 = vmatprep.mubr.bf16.mxu0 %v6260_v59  ;;  %v6284_v17 = vpack.c.bf16 %v2308_v13, %v2307_v10  ;;  %v2309_v14 = vld [vmem:[#allocation2 + $0x152] sm:$0xff] }
  0x6a   : > { %5091 = vmatprep.subr.bf16.mxu1 %v5760_v63  ;;  %v6296_v27 = vpack.c.bf16 %v2310_v19, %v2309_v14  ;;  %v5771_v10 = vld [vmem:[%s6605_s1 + $0x1d0] sm:$0xff]   ;;  %v5775_v14 = vld [vmem:[%s6605_s1 + $0x1e0] sm:$0xff]  }
  0x6b   : > { %v830_v13 = vld [vmem:[#allocation2 + $0x151] sm:$0xff] }
  0x6c   : > { %5092 = vmatpush3.bf16.msra.mxu1 %v5760_v63  ;;  %v826_v63 = vld [vmem:[#allocation2 + $0x121] sm:$0xff] }
  0x6d   : > { %5093 = vmatprep.subr.bf16.mxu1 %v5762_v5 }
  0x6f   : > { %5062 = vmatmul.mubr.bf16.gmra.mrb[4].mxu1 %v6002_v29  ;;  %v6298_v29 = vpack.c.bf16 %v2312_v33, %v2311_v30  ;;  %v833_v33 = vld [vmem:[#allocation2 + $0x171] sm:$0xff] }
  0x70   : > { %5270 = vmatmul.mubr.bf16.gmra.mrb[20].mxu0 %v6282_v16  ;;  %5065 = vmatprep.mubr.bf16.mxu1 %v6028_v43  ;;  %v5768_v43 = vld [vmem:[%s6605_s1 + $0xa8] sm:$0xff]  }
  0x71   : > { %5273 = vmatprep.mubr.bf16.mxu0 %v6284_v17  ;;  %5094 = vmatpush3.bf16.msra.mxu1 %v5762_v5  ;;  %v6340_v5 = vpack.c.bf16 %v827_v9, %v826_v63  ;;  %v1544_v63 = vld [vmem:[#allocation2 + $0x20] sm:$0xff]  ;;  %v5792_v9 = vld [vmem:[%s6605_s1 + $0x230] sm:$0xff]  }
  0x72   : > { %5095 = vmatprep.subr.bf16.mxu1 %v5764_v18 }
  0x75   : > { %5096 = vmatpush3.bf16.msra.mxu1 %v5764_v18  ;;  %v831_v18 = vld [vmem:[#allocation2 + $0x159] sm:$0xff] }
  0x76   : > { %5097 = vmatprep.subr.bf16.mxu1 %v5766_v26  ;;  %v6354_v30 = vpack.c.bf16 %v831_v18, %v830_v13 }
  0x77   : > { %5066 = vmatmul.mubr.bf16.gmra.mrb[8].mxu1 %v6035_v45  ;;  %v5772_v45 = vld [vmem:[%s6605_s1 + $0xb8] sm:$0xff]  }
  0x78   : > { %5274 = vmatmul.mubr.bf16.gmra.mrb[24].mxu0 %v6296_v27  ;;  %5069 = vmatprep.mubr.bf16.mxu1 %v6069_v8  ;;  %v820_v8 = vld [vmem:[#allocation2 + $0xd9] sm:$0xff] }
  0x79   : > { %5277 = vmatprep.mubr.bf16.mxu0 %v6298_v29  ;;  %5098 = vmatpush3.bf16.msra.mxu1 %v5766_v26  ;;  %v6322_v57 = vpack.c.bf16 %v821_v50, %v820_v8  ;;  %v1172_v26 = vld [vmem:[#allocation2 + $0x2] sm:$0xff] }
  0x7a   : > { %5099 = vmatprep.subr.bf16.mxu1 %v5768_v43 }
  0x7d   : > { %5100 = vmatpush3.bf16.msra.mxu1 %v5768_v43  ;;  %v1173_v43 = vld [vmem:[#allocation2 + $0xa] sm:$0xff] }
  0x7e   : > { %5101 = vmatprep.subr.bf16.mxu1 %v5770_v32 }
  0x7f   : > { %5070 = vmatmul.mubr.bf16.gmra.mrb[12].mxu1 %v6075_v2  ;;  %v6324_v2 = vpack.c.bf16 %v823_v54, %v822_v51  ;;  %v3035_v51 = vld [vmem:[#allocation2 + $0xb1] sm:$0xff]  ;;  %v3036_v54 = vld [vmem:[#allocation2 + $0xc1] sm:$0xff] }
  0x80   : > { %5278 = vmatmul.mubr.bf16.gmra.mrb[28].mxu0 %v2330_v42  ;;  %5073 = vmatprep.mubr.bf16.mxu1 %v6121_v47  ;;  %v5769_v47 = vld [vmem:[%s6605_s1 + $0x1c8] sm:$0xff]  }
  0x81   : > { %5297 = vmatprep.mubr.bf16.mxu0 %v5990_v15  ;;  %5102 = vmatpush3.bf16.msra.mxu1 %v5770_v32  ;;  %v824_v15 = vld [vmem:[#allocation2 + $0x109] sm:$0xff]  ;;  %v1204_v32 = vpack.c.bf16 %v1173_v43, %v1172_v26 }
  0x82   : > { %5103 = vmatprep.subr.bf16.mxu1 %v5772_v45  ;;  %v6338_v23 = vpack.c.bf16 %v825_v58, %v824_v15 }
  0x85   : > { %5104 = vmatpush3.bf16.msra.mxu1 %v5772_v45  ;;  %v5787_v45 = vld [vmem:[%s6605_s1 + $0x210] sm:$0xff]  }
  0x86   : > { %5137 = vmatprep.subr.bf16.mxu1 %v6320_v38 }
  0x87   : > { %5074 = vmatmul.mubr.bf16.gmra.mrb[16].mxu1 %v6322_v57 }
  0x88   : > { %5298 = vmatmul.mubr.bf16.vlgmr.msra.gmra.mrb[0].mxu0 %v6024_v40  ;;  %5077 = vmatprep.mubr.bf16.mxu1 %v6324_v2  ;;  %v5773_v40 = vld [vmem:[%s6605_s1 + $0x1d8] sm:$0xff]  }
  0x89   : > { %5330 = vmatpush3.bf16.msra.mxu0 %v6255_v37  ;;  %5301 = vmatprep.mubr.bf16.mxu0 %v6032_v44  ;;  %v828_v44 = vld [vmem:[#allocation2 + $0x139] sm:$0xff]  ;;  %v829_v37 = vld [vmem:[#allocation2 + $0x141] sm:$0xff] }
  0x8a   : > { %5331 = vmatprep.subr.bf16.mxu0 %v5769_v47  ;;  %v6352_v19 = vpack.c.bf16 %v829_v37, %v828_v44  ;;  %v1547_v44 = vld [vmem:[#allocation2 + $0x48] sm:$0xff]  ;;  %v1548_v37 = vld [vmem:[#allocation2 + $0x50] sm:$0xff] }
  0x8b   : > { %v1577_v18 = vpack.c.bf16 %v1548_v37, %v1547_v44  ;;  %v3402_v44 = vld [vmem:[#allocation2 + $0x92] sm:$0xff]  ;;  %v3403_v37 = vld [vmem:[#allocation2 + $0x9a] sm:$0xff] }
  0x8d   : > { %5332 = vmatpush3.bf16.msra.mxu0 %v5769_v47  ;;  %v5790_v47 = vld [vmem:[%s6605_s1 + $0x220] sm:$0xff]  }
  0x8e   : > { %5333 = vmatprep.subr.bf16.mxu0 %v5771_v10 }
  0x8f   : > { %5078 = vmatmul.mubr.bf16.gmra.mrb[20].mxu1 %v6338_v23 }
  0x90   : > { %5302 = vmatmul.mubr.bf16.gmra.mrb[4].mxu0 %v6059_v61  ;;  %5081 = vmatprep.mubr.bf16.mxu1 %v6340_v5  ;;  %v5777_v61 = vld [vmem:[%s6605_s1 + $0x1e8] sm:$0xff]  }
  0x91   : > { %5305 = vmatprep.mubr.bf16.mxu0 %v6073_v1  ;;  %5334 = vmatpush3.bf16.msra.mxu0 %v5771_v10  ;;  %v832_v1 = vld [vmem:[#allocation2 + $0x169] sm:$0xff] }
  0x92   : > { %5335 = vmatprep.subr.bf16.mxu0 %v5773_v40  ;;  %v6366_v31 = vpack.c.bf16 %v833_v33, %v832_v1  ;;  %v1552_v1 = vld [vmem:[#allocation2 + $0x80] sm:$0xff]  ;;  %v5795_v33 = vld [vmem:[%s6605_s1 + $0x108] sm:$0xff]  }
  0x95   : > { %5336 = vmatpush3.bf16.msra.mxu0 %v5773_v40  ;;  %v5793_v40 = vld [vmem:[%s6605_s1 + $0x238] sm:$0xff]  }
  0x96   : > { %5337 = vmatprep.subr.bf16.mxu0 %v5775_v14 }
  0x97   : > { %5082 = vmatmul.mubr.bf16.gmra.mrb[24].mxu1 %v6352_v19 }
  0x98   : > { %5306 = vmatmul.mubr.bf16.gmra.mrb[8].mxu0 %v6114_v39  ;;  %5085 = vmatprep.mubr.bf16.mxu1 %v6354_v30  ;;  %v5781_v39 = vld [vmem:[%s6605_s1 + $0x1f8] sm:$0xff]  }
  0x99   : > { %5309 = vmatprep.mubr.bf16.mxu0 %v6125_v48  ;;  %5338 = vmatpush3.bf16.msra.mxu0 %v5775_v14  ;;  %v5783_v48 = vld [vmem:[%s6605_s1 + $0x200] sm:$0xff]  }
  0x9a   : > { %5339 = vmatprep.subr.bf16.mxu0 %v5777_v61  ;;  %v1549_v14 = vld [vmem:[#allocation2 + $0x60] sm:$0xff] }
  0x9d   : > { %5340 = vmatpush3.bf16.msra.mxu0 %v5777_v61  ;;  %v1551_v61 = vld [vmem:[#allocation2 + $0x78] sm:$0xff] }
  0x9e   : > { %5341 = vmatprep.subr.bf16.mxu0 %v5779_v34  ;;  %v1579_v43 = vpack.c.bf16 %v1552_v1, %v1551_v61  ;;  %v1569_v61 = vld [vmem:[#allocation2 + $0x150] sm:$0xff]  ;;  %v1570_v1 = vld [vmem:[#allocation2 + $0x158] sm:$0xff] }
  0x9f   : > { %5086 = vmatmul.mubr.bf16.gmra.mrb[28].mxu1 %v6366_v31 }
  0xa0   : > { %5310 = vmatmul.mubr.bf16.gmra.mrb[12].mxu0 %v6160_v12  ;;  %5105 = vmatprep.mubr.bf16.mxu1 %v1204_v32  ;;  %v5778_v12 = vld [vmem:[%s6605_s1 + $0xd0] sm:$0xff]  }
  0xa1   : > { %5313 = vmatprep.mubr.bf16.mxu0 %v6172_v21  ;;  %5342 = vmatpush3.bf16.msra.mxu0 %v5779_v34  ;;  %v5780_v21 = vld [vmem:[%s6605_s1 + $0xd8] sm:$0xff]   ;;  %v5796_v34 = vld [vmem:[%s6605_s1 + $0x110] sm:$0xff]  }
  0xa2   : > { %5343 = vmatprep.subr.bf16.mxu0 %v5781_v39  ;;  %v1553_v32 = vld [vmem:[#allocation2 + $0x90] sm:$0xff] }
  0xa5   : > { %5344 = vmatpush3.bf16.msra.mxu0 %v5781_v39  ;;  %v1554_v39 = vld [vmem:[#allocation2 + $0x98] sm:$0xff] }
  0xa6   : > { %5377 = vmatprep.subr.bf16.mxu0 %v5783_v48 }
  0xa7   : > { %5106 = vmatmul.mubr.bf16.vlgmr.msra.gmra.mrb[0].mxu1 %v6131_v49  ;;  %v5782_v49 = vld [vmem:[%s6605_s1 + $0xe0] sm:$0xff]  }
  0xa8   : > { %5314 = vmatmul.mubr.bf16.gmra.mrb[16].mxu0 %v6193_v56  ;;  %5138 = vmatpush3.bf16.msra.mxu1 %v6320_v38  ;;  %v3025_v56 = vld [vmem:[#allocation2 + $0x39] sm:$0xff]  ;;  %v3037_v38 = vld [vmem:[#allocation2 + $0xc9] sm:$0xff] }
  0xa9   : > { %5109 = vmatprep.mubr.bf16.mxu1 %v6168_v20  ;;  %5317 = vmatprep.mubr.bf16.mxu0 %v6200_v62  ;;  %v5784_v20 = vld [vmem:[%s6605_s1 + $0xe8] sm:$0xff]   ;;  %v3062_v58 = vpack.c.bf16 %v3037_v38, %v3036_v54 }
  0xaa   : > { %5139 = vmatprep.subr.bf16.mxu1 %v5776_v3  ;;  %v3398_v54 = vld [vmem:[#allocation2 + $0x62] sm:$0xff]  ;;  %v3399_v38 = vld [vmem:[#allocation2 + $0x6a] sm:$0xff] }
  0xac   : > { %5140 = vmatpush3.bf16.msra.mxu1 %v5776_v3  ;;  %v1556_v3 = vld [vmem:[#allocation2 + $0xb0] sm:$0xff] }
  0xad   : > { %5141 = vmatprep.subr.bf16.mxu1 %v5778_v12 }
  0xaf   : > { %5110 = vmatmul.mubr.bf16.gmra.mrb[4].mxu1 %v6174_v53  ;;  %v3024_v53 = vld [vmem:[#allocation2 + $0x31] sm:$0xff] }
  0xb0   : > { %5318 = vmatmul.mubr.bf16.gmra.mrb[20].mxu0 %v6218_v52  ;;  %5113 = vmatprep.mubr.bf16.mxu1 %v6196_v60  ;;  %v5786_v60 = vld [vmem:[%s6605_s1 + $0xf0] sm:$0xff]   ;;  %v3056_v62 = vpack.c.bf16 %v3025_v56, %v3024_v53 }
  0xb1   : > { %5321 = vmatprep.mubr.bf16.mxu0 %v6224_v25  ;;  %5142 = vmatpush3.bf16.msra.mxu1 %v5778_v12  ;;  %v3026_v52 = vld [vmem:[#allocation2 + $0x49] sm:$0xff]  ;;  %v3028_v25 = vld [vmem:[#allocation2 + $0x61] sm:$0xff] }
  0xb2   : > { %5143 = vmatprep.subr.bf16.mxu1 %v5780_v21  ;;  %v3052_v12 = vld [vmem:[#allocation2 + $0x181] sm:$0xff] }
  0xb5   : > { %5144 = vmatpush3.bf16.msra.mxu1 %v5780_v21  ;;  %v3053_v21 = vld [vmem:[#allocation2 + $0x189] sm:$0xff] }
  0xb6   : > { %5145 = vmatprep.subr.bf16.mxu1 %v5782_v49  ;;  %v6462_v56 = vpack.c.bf16 %v3053_v21, %v3052_v12 }
  0xb7   : > { %5114 = vmatmul.mubr.bf16.gmra.mrb[8].mxu1 %v6202_v6  ;;  %v5788_v6 = vld [vmem:[%s6605_s1 + $0xf8] sm:$0xff]  }
  0xb8   : > { %5322 = vmatmul.mubr.bf16.gmra.mrb[24].mxu0 %v6240_v4  ;;  %5117 = vmatprep.mubr.bf16.mxu1 %v6220_v22  ;;  %v3027_v22 = vld [vmem:[#allocation2 + $0x51] sm:$0xff]  ;;  %v3029_v4 = vld [vmem:[#allocation2 + $0x69] sm:$0xff] }
  0xb9   : > { %5325 = vmatprep.mubr.bf16.mxu0 %v6210_v24  ;;  %5146 = vmatpush3.bf16.msra.mxu1 %v5782_v49  ;;  %v3057_v36 = vpack.c.bf16 %v3027_v22, %v3026_v52  ;;  %v3058_v42 = vpack.c.bf16 %v3029_v4, %v3028_v25  ;;  %v5797_v49 = vld [vmem:[%s6605_s1 + $0x118] sm:$0xff]   ;;  %v3055_v22 = vld [vmem:[#allocation2 + $0x1a1] sm:$0xff] }
  0xba   : > { %5147 = vmatprep.subr.bf16.mxu1 %v5784_v20  ;;  %v3054_v52 = vld [vmem:[#allocation2 + $0x199] sm:$0xff] }
  0xbb   : > { %v1559_v25 = vld [vmem:[#allocation2 + $0xd8] sm:$0xff]  ;;  %v1560_v4 = vld [vmem:[#allocation2 + $0xe0] sm:$0xff] }
  0xbd   : > { %5148 = vmatpush3.bf16.msra.mxu1 %v5784_v20  ;;  %v1580_v20 = vpack.c.bf16 %v1554_v39, %v1553_v32  ;;  %v3406_v32 = vld [vmem:[#allocation2 + $0xc2] sm:$0xff]  ;;  %v3407_v39 = vld [vmem:[#allocation2 + $0xca] sm:$0xff] }
  0xbe   : > { %5149 = vmatprep.subr.bf16.mxu1 %v5786_v60  ;;  %v3432_v21 = vpack.c.bf16 %v3407_v39, %v3406_v32 }
  0xbf   : > { %5118 = vmatmul.mubr.bf16.gmra.mrb[12].mxu1 %v6226_v28  ;;  %v5785_v28 = vld [vmem:[%s6605_s1 + $0x208] sm:$0xff]  }
  0xc0   : > { %5326 = vmatmul.mubr.bf16.gmra.mrb[28].mxu0 %v2701_v11  ;;  %5121 = vmatprep.mubr.bf16.mxu1 %v6242_v35  ;;  %v3030_v35 = vld [vmem:[#allocation2 + $0x79] sm:$0xff]  ;;  %v3032_v11 = vld [vmem:[#allocation2 + $0x91] sm:$0xff] }
  0xc1   : > { %5345 = vmatprep.mubr.bf16.mxu0 %v3056_v62  ;;  %5150 = vmatpush3.bf16.msra.mxu1 %v5786_v60  ;;  %v3059_v8 = vpack.c.bf16 %v3031_v7, %v3030_v35  ;;  %v3060_v50 = vpack.c.bf16 %v3033_v46, %v3032_v11  ;;  %v5798_v60 = vld [vmem:[%s6605_s1 + $0x120] sm:$0xff]   ;;  %v3071_v35 = vpack.c.bf16 %v3055_v22, %v3054_v52  ;;  %v5800_v46 = vld [vmem:[%s6605_s1 + $0x130] sm:$0xff]  }
  0xc2   : > { %5151 = vmatprep.subr.bf16.mxu1 %v5788_v6  ;;  %v1557_v62 = vld [vmem:[#allocation2 + $0xc0] sm:$0xff]  ;;  %v1583_v7 = vpack.c.bf16 %v1560_v4, %v1559_v25  ;;  %v3412_v52 = vld [vmem:[#allocation2 + $0x10a] sm:$0xff]  ;;  %v3413_v22 = vld [vmem:[#allocation2 + $0x112] sm:$0xff] }
  0xc3   : > { %v3414_v25 = vld [vmem:[#allocation2 + $0x122] sm:$0xff]  ;;  %v3415_v4 = vld [vmem:[#allocation2 + $0x12a] sm:$0xff] }
  0xc5   : > { %5152 = vmatpush3.bf16.msra.mxu1 %v5788_v6  ;;  %v1558_v6 = vld [vmem:[#allocation2 + $0xc8] sm:$0xff] }
  0xc6   : > { %5425 = vmatprep.subr.bf16.mxu1 %v5794_v0 }
  0xc7   : > { %5122 = vmatmul.mubr.bf16.gmra.mrb[16].mxu1 %v6244_v41  ;;  %v5789_v41 = vld [vmem:[%s6605_s1 + $0x218] sm:$0xff]  }
  0xc8   : > { %5346 = vmatmul.mubr.bf16.vlgmr.msra.gmra.mrb[0].mxu0 %v3057_v36  ;;  %5125 = vmatprep.mubr.bf16.mxu1 %v6258_v55  ;;  %v3034_v55 = vld [vmem:[#allocation2 + $0xa9] sm:$0xff]  ;;  %v3394_v36 = vld [vmem:[#allocation2 + $0x32] sm:$0xff] }
  0xc9   : > { %5378 = vmatpush3.bf16.msra.mxu0 %v5783_v48  ;;  %5349 = vmatprep.mubr.bf16.mxu0 %v3058_v42  ;;  %v3061_v15 = vpack.c.bf16 %v3035_v51, %v3034_v55  ;;  %v1555_v48 = vld [vmem:[#allocation2 + $0xa8] sm:$0xff]  ;;  %v3395_v42 = vld [vmem:[#allocation2 + $0x3a] sm:$0xff]  ;;  %v1564_v51 = vld [vmem:[#allocation2 + $0x110] sm:$0xff] }
  0xca   : > { %5379 = vmatprep.subr.bf16.mxu0 %v5785_v28  ;;  %v1581_v53 = vpack.c.bf16 %v1556_v3, %v1555_v48  ;;  %v3426_v11 = vpack.c.bf16 %v3395_v42, %v3394_v36  ;;  %v1563_v55 = vld [vmem:[#allocation2 + $0x108] sm:$0xff]  ;;  %v1588_v48 = vpack.c.bf16 %v1570_v1, %v1569_v61  ;;  %v3435_v36 = vpack.c.bf16 %v3413_v22, %v3412_v52 }
  0xcb   : > { %v3436_v42 = vpack.c.bf16 %v3415_v4, %v3414_v25 }
  0xcd   : > { %5380 = vmatpush3.bf16.msra.mxu0 %v5785_v28  ;;  %v5799_v28 = vld [vmem:[%s6605_s1 + $0x128] sm:$0xff]  }
  0xce   : > { %5381 = vmatprep.subr.bf16.mxu0 %v5787_v45 }
  0xcf   : > { %5126 = vmatmul.mubr.bf16.gmra.mrb[20].mxu1 %v6260_v59  ;;  %v5791_v59 = vld [vmem:[%s6605_s1 + $0x228] sm:$0xff]  }
  0xd0   : > { %5350 = vmatmul.mubr.bf16.gmra.mrb[4].mxu0 %v3059_v8  ;;  %5129 = vmatprep.mubr.bf16.mxu1 %v6282_v16  ;;  %v1543_v16 = vld [vmem:[#allocation2 + $0x18] sm:$0xff] }
  0xd1   : > { %5353 = vmatprep.mubr.bf16.mxu0 %v3060_v50  ;;  %5382 = vmatpush3.bf16.msra.mxu0 %v5787_v45  ;;  %v1575_v10 = vpack.c.bf16 %v1544_v63, %v1543_v16  ;;  %v1561_v45 = vld [vmem:[#allocation2 + $0xf0] sm:$0xff]  ;;  %v1562_v8 = vld [vmem:[#allocation2 + $0xf8] sm:$0xff]  ;;  %v3428_v16 = vpack.c.bf16 %v3399_v38, %v3398_v54  ;;  %v1565_v63 = vld [vmem:[#allocation2 + $0x120] sm:$0xff] }
  0xd2   : > { %5383 = vmatprep.subr.bf16.mxu0 %v5789_v41  ;;  %v3396_v50 = vld [vmem:[#allocation2 + $0x4a] sm:$0xff] }
  0xd5   : > { %5384 = vmatpush3.bf16.msra.mxu0 %v5789_v41  ;;  %v3397_v41 = vld [vmem:[#allocation2 + $0x52] sm:$0xff] }
  0xd6   : > { %5385 = vmatprep.subr.bf16.mxu0 %v5790_v47 }
  0xd7   : > { %5130 = vmatmul.mubr.bf16.gmra.mrb[24].mxu1 %v6284_v17  ;;  %v1545_v17 = vld [vmem:[#allocation2 + $0x30] sm:$0xff] }
  0xd8   : > { %5354 = vmatmul.mubr.bf16.gmra.mrb[8].mxu0 %v3061_v15  ;;  %5133 = vmatprep.mubr.bf16.mxu1 %v6296_v27  ;;  %v1546_v27 = vld [vmem:[#allocation2 + $0x38] sm:$0xff]  ;;  %v1584_v15 = vpack.c.bf16 %v1562_v8, %v1561_v45  ;;  %v3422_v45 = vld [vmem:[#allocation2 + $0x182] sm:$0xff] }
  0xd9   : > { %5357 = vmatprep.mubr.bf16.mxu0 %v3062_v58  ;;  %5386 = vmatpush3.bf16.msra.mxu0 %v5790_v47  ;;  %v1576_v13 = vpack.c.bf16 %v1546_v27, %v1545_v17  ;;  %v5801_v47 = vld [vmem:[%s6605_s1 + $0x138] sm:$0xff]   ;;  %v3427_v58 = vpack.c.bf16 %v3397_v41, %v3396_v50  ;;  %v1568_v27 = vld [vmem:[#allocation2 + $0x140] sm:$0xff] }
  0xda   : > { %5387 = vmatprep.subr.bf16.mxu0 %v5791_v59  ;;  %v1567_v17 = vld [vmem:[#allocation2 + $0x138] sm:$0xff]  ;;  %v3425_v41 = vld [vmem:[#allocation2 + $0x1a2] sm:$0xff] }
  0xdd   : > { %5388 = vmatpush3.bf16.msra.mxu0 %v5791_v59  ;;  %v1585_v59 = vpack.c.bf16 %v1564_v51, %v1563_v55 }
  0xde   : > { %5389 = vmatprep.subr.bf16.mxu0 %v5792_v9 }
  0xdf   : > { %5134 = vmatmul.mubr.bf16.gmra.mrb[28].mxu1 %v6298_v29  ;;  %v1550_v29 = vld [vmem:[#allocation2 + $0x68] sm:$0xff] }
  0xe0   : > { %5358 = vmatmul.mubr.bf16.gmra.mrb[12].mxu0 %v6322_v57  ;;  %5153 = vmatprep.mubr.bf16.mxu1 %v1575_v10  ;;  %v1578_v26 = vpack.c.bf16 %v1550_v29, %v1549_v14  ;;  %v3400_v10 = vld [vmem:[#allocation2 + $0x7a] sm:$0xff]  ;;  %v1587_v14 = vpack.c.bf16 %v1568_v27, %v1567_v17  ;;  %v3430_v29 = vpack.c.bf16 %v3403_v37, %v3402_v44 }
  0xe1   : > { %5361 = vmatprep.mubr.bf16.mxu0 %v6324_v2  ;;  %5390 = vmatpush3.bf16.msra.mxu0 %v5792_v9  ;;  %v1566_v9 = vld [vmem:[#allocation2 + $0x128] sm:$0xff]  ;;  %v4596_v17 = vld [vmem:[%s6509_s9] sm:$0xff]  }
  0xe2   : > { %5391 = vmatprep.subr.bf16.mxu0 %v5793_v40  ;;  %v6516_v44 = vld [vmem:[%s6606_s2] ss:$0 sm:$0xff]  ;;  %v4597_v61 = vunpack.c.l.bf16 %v4596_v17 }
  0xe5   : > { %5392 = vmatpush3.bf16.msra.mxu0 %v5793_v40  ;;  %v3401_v40 = vld [vmem:[#allocation2 + $0x82] sm:$0xff] }
  0xe7   : > { %5154 = vmatmul.mubr.bf16.vlgmr.msra.gmra.mrb[0].mxu1 %v1576_v13  ;;  %v1586_v13 = vpack.c.bf16 %v1566_v9, %v1565_v63 }
  0xe8   : > { %5362 = vmatmul.mubr.bf16.gmra.mrb[16].mxu0 %v6338_v23  ;;  %5433 = vmatpush3.bf16.msra.mxu1 %v5794_v0  ;;  %v1582_v0 = vpack.c.bf16 %v1558_v6, %v1557_v62 }
  0xe9   : > { %5157 = vmatprep.mubr.bf16.mxu1 %v1577_v18  ;;  %5365 = vmatprep.mubr.bf16.mxu0 %v6340_v5  ;;  %v3429_v18 = vpack.c.bf16 %v3401_v40, %v3400_v10  ;;  %v4747_v40 = vld [vmem:[%s6509_s9 + $0x8] sm:$0xff]  }
  0xea   : > { %5426 = vmatprep.subr.bf16.mxu1 %v5795_v33  ;;  %v4601_v37 = vunpack.c.l.bf16 %v4747_v40 }
  0xec   : > { %5434 = vmatpush3.bf16.msra.mxu1 %v5795_v33  ;;  %v3404_v33 = vld [vmem:[#allocation2 + $0xaa] sm:$0xff]  ;;  %v3901_v32 = vmul.f32 0.70710677, %v4601_v37 }
  0xed   : > { %5427 = vmatprep.subr.bf16.mxu1 %v5796_v34 }
  0xef   : > { %5158 = vmatmul.mubr.bf16.gmra.mrb[4].mxu1 %v1578_v26  ;;  %v3405_v26 = vld [vmem:[#allocation2 + $0xb2] sm:$0xff] }
  0xf0   : > { %5366 = vmatmul.mubr.bf16.gmra.mrb[20].mxu0 %v6352_v19  ;;  %5161 = vmatprep.mubr.bf16.mxu1 %v1579_v43  ;;  %v1571_v43 = vld [vmem:[#allocation2 + $0x168] sm:$0xff]  ;;  %v3431_v3 = vpack.c.bf16 %v3405_v26, %v3404_v33  ;;  %v4598_v33 = vunpack.c.h.bf16 %v4596_v17 }
  0xf1   : > { %5369 = vmatprep.mubr.bf16.mxu0 %v6354_v30  ;;  %5435 = vmatpush3.bf16.msra.mxu1 %v5796_v34  ;;  %v1572_v34 = vld [vmem:[#allocation2 + $0x170] sm:$0xff] }
  0xf2   : > { %5428 = vmatprep.subr.bf16.mxu1 %v5797_v49  ;;  %v1589_v12 = vpack.c.bf16 %v1572_v34, %v1571_v43 }
  0xf5   : > { %5436 = vmatpush3.bf16.msra.mxu1 %v5797_v49  ;;  %v3408_v49 = vld [vmem:[#allocation2 + $0xda] sm:$0xff] }
  0xf6   : > { %5429 = vmatprep.subr.bf16.mxu1 %v5798_v60 }
  0xf7   : > { %5162 = vmatmul.mubr.bf16.gmra.mrb[8].mxu1 %v1580_v20  ;;  %v3409_v20 = vld [vmem:[#allocation2 + $0xe2] sm:$0xff] }
  0xf8   : > { %5370 = vmatmul.mubr.bf16.gmra.mrb[24].mxu0 %v6366_v31  ;;  %5165 = vmatprep.mubr.bf16.mxu1 %v1581_v53  ;;  %v3410_v53 = vld [vmem:[#allocation2 + $0xf2] sm:$0xff]  ;;  %v3433_v62 = vpack.c.bf16 %v3409_v20, %v3408_v49 }
  0xf9   : > { %5373 = vmatprep.mubr.bf16.mxu0 %v6462_v56  ;;  %5437 = vmatpush3.bf16.msra.mxu1 %v5798_v60  ;;  %v3411_v60 = vld [vmem:[#allocation2 + $0xfa] sm:$0xff]  ;;  %v4748_v20 = vld [vmem:[%s6509_s9 + $0x10] sm:$0xff]  }
  0xfa   : > { %5430 = vmatprep.subr.bf16.mxu1 %v5799_v28  ;;  %v3434_v6 = vpack.c.bf16 %v3411_v60, %v3410_v53  ;;  %v4749_v49 = vld [vmem:[%s6509_s9 + $0x18] sm:$0xff]   ;;  %v3899_v53 = vmul.f32 0.70710677, %v4597_v61 }
  0xfb   : > { %v4609_v4 = vunpack.c.l.bf16 %v4749_v49 }
  0xfd   : > { %5438 = vmatpush3.bf16.msra.mxu1 %v5799_v28  ;;  %v3416_v28 = vld [vmem:[#allocation2 + $0x13a] sm:$0xff] }
  0xfe   : > { %5431 = vmatprep.subr.bf16.mxu1 %v5800_v46 }
  0xff   : > { %5166 = vmatmul.mubr.bf16.gmra.mrb[12].mxu1 %v1582_v0  ;;  %v3417_v0 = vld [vmem:[#allocation2 + $0x142] sm:$0xff] }
 0x100   : > { %5374 = vmatmul.mubr.bf16.gmra.mrb[28].mxu0 %v3071_v35  ;;  %5169 = vmatprep.mubr.bf16.mxu1 %v1583_v7  ;;  %v3418_v35 = vld [vmem:[#allocation2 + $0x152] sm:$0xff]  ;;  %v3437_v7 = vpack.c.bf16 %v3417_v0, %v3416_v28 }
 0x101   : > { %5393 = vmatprep.mubr.bf16.mxu0 %v3426_v11  ;;  %5439 = vmatpush3.bf16.msra.mxu1 %v5800_v46  ;;  %v3421_v46 = vld [vmem:[#allocation2 + $0x172] sm:$0xff] }
 0x102   : > { %5432 = vmatprep.subr.bf16.mxu1 %v5801_v47 }
 0x105   : > { %5440 = vmatpush3.bf16.msra.mxu1 %v5801_v47 }
 0x107   : > { %5170 = vmatmul.mubr.bf16.gmra.mrb[16].mxu1 %v1584_v15 }
 0x108   : > { %5394 = vmatmul.mubr.bf16.vlgmr.msra.gmra.mrb[0].mxu0 %v3427_v58  ;;  %5173 = vmatprep.mubr.bf16.mxu1 %v1585_v59 }
 0x109   : > { %5397 = vmatprep.mubr.bf16.mxu0 %v3428_v16 }
 0x10f   : > { %5174 = vmatmul.mubr.bf16.gmra.mrb[20].mxu1 %v1586_v13 }
 0x110   : > { %5398 = vmatmul.mubr.bf16.gmra.mrb[4].mxu0 %v3429_v18  ;;  %5177 = vmatprep.mubr.bf16.mxu1 %v1587_v14  ;;  %v4602_v14 = vunpack.c.h.bf16 %v4747_v40  ;;  %v4750_v40 = vld [vmem:[%s6509_s9 + $0x20] sm:$0xff]  }
 0x111   : > { %5401 = vmatprep.mubr.bf16.mxu0 %v3430_v29  ;;  %v4613_v61 = vunpack.c.l.bf16 %v4750_v40 }
 0x117   : > { %5178 = vmatmul.mubr.bf16.gmra.mrb[24].mxu1 %v1588_v48 }
 0x118   : > { %5402 = vmatmul.mubr.bf16.gmra.mrb[8].mxu0 %v3431_v3  ;;  %5181 = vmatprep.mubr.bf16.mxu1 %v1589_v12 }
 0x119   : > { %5405 = vmatprep.mubr.bf16.mxu0 %v3432_v21  ;;  %v3902_v21 = vmul.f32 0.70710677, %v4602_v14 }
 0x11f   : > { %5182 = vmatmul.mubr.bf16.gmra.mrb[28].mxu1 %v6210_v24  ;;  %v3419_v24 = vld [vmem:[#allocation2 + $0x15a] sm:$0xff] }
 0x120   : > { %5406 = vmatmul.mubr.bf16.gmra.mrb[12].mxu0 %v3433_v62  ;;  %5217 = vmatprep.mubr.bf16.mxu1 %v6322_v57  ;;  %v3438_v11 = vpack.c.bf16 %v3419_v24, %v3418_v35  ;;  %v3420_v57 = vld [vmem:[#allocation2 + $0x16a] sm:$0xff]  ;;  %v4610_v24 = vunpack.c.h.bf16 %v4749_v49 }
 0x121   : > { %5409 = vmatprep.mubr.bf16.mxu0 %v3434_v6  ;;  %v3439_v8 = vpack.c.bf16 %v3421_v46, %v3420_v57  ;;  %v3900_v6 = vmul.f32 0.70710677, %v4598_v33 }
 0x127   : > { %5218 = vmatmul.mubr.bf16.vlgmr.msra.gmra.mrb[16].mxu1 %v6324_v2  ;;  %v3423_v2 = vld [vmem:[#allocation2 + $0x18a] sm:$0xff] }
 0x128   : > { %5410 = vmatmul.mubr.bf16.gmra.mrb[16].mxu0 %v3435_v36  ;;  %5221 = vmatprep.mubr.bf16.mxu1 %v6338_v23  ;;  %v3440_v50 = vpack.c.bf16 %v3423_v2, %v3422_v45  ;;  %v3424_v23 = vld [vmem:[#allocation2 + $0x19a] sm:$0xff]  ;;  %v4605_v36 = vunpack.c.l.bf16 %v4748_v20  ;;  %v4606_v45 = vunpack.c.h.bf16 %v4748_v20 }
 0x129   : > { %5413 = vmatprep.mubr.bf16.mxu0 %v3436_v42  ;;  %v3441_v55 = vpack.c.bf16 %v3425_v41, %v3424_v23 }
 0x12a   : > { %v3903_v17 = vmul.f32 0.70710677, %v4605_v36 }
 0x12f   : > { %5222 = vmatmul.mubr.bf16.gmra.mrb[20].mxu1 %v6340_v5 }
 0x130   : > { %5414 = vmatmul.mubr.bf16.gmra.mrb[20].mxu0 %v3437_v7  ;;  %5225 = vmatprep.mubr.bf16.mxu1 %v6352_v19 }
 0x131   : > { %5417 = vmatprep.mubr.bf16.mxu0 %v3438_v11 }
 0x137   : > { %5226 = vmatmul.mubr.bf16.gmra.mrb[24].mxu1 %v6354_v30 }
 0x138   : > { %5418 = vmatmul.mubr.bf16.gmra.mrb[24].mxu0 %v3439_v8  ;;  %5229 = vmatprep.mubr.bf16.mxu1 %v6366_v31 }
 0x139   : > { %5421 = vmatprep.mubr.bf16.mxu0 %v3440_v50 }
 0x13f   : > { %5230 = vmatmul.mubr.bf16.gmra.mrb[28].mxu1 %v6462_v56 }
 0x140   : > { %5422 = vmatmul.mubr.bf16.gmra.mrb[28].mxu0 %v3441_v55  ;;  %v3905_v55 = vmul.f32 0.70710677, %v4609_v4  ;;  %v3907_v4 = vmul.f32 0.70710677, %v4613_v61 }
 0x1ba   : > { %v5155_v5 = vpop.f32.mrb[0].mxu1 }
 0x1bb   : > { %v1690_v19 = vpop.f32.mrb[1].mxu1 }
 0x1bc   : > { %v5156_v51 = vpop.f32.mrb[2].mxu1 }
 0x1bd   : > { %v1693_v54 = vpop.f32.mrb[3].mxu1 }
 0x1c2   : > { %v5159_v38 = vpop.f32.mrb[4].mxu1 }
 0x1c3   : > { %v1706_v47 = vpop.f32.mrb[5].mxu1 }
 0x1c4   : > { %v5160_v15 = vpop.f32.mrb[6].mxu1 }
 0x1c5   : > { %v1709_v30 = vpop.f32.mrb[7].mxu1 }
 0x1ca   : > { %v6487_v58 = vpop.f32.mrb[8].mxu1 }
 0x1cb   : > { %v6489_v31 = vpop.f32.mrb[9].mxu1 }
 0x1cc   : > { %v6491_v59 = vpop.f32.mrb[10].mxu1 }
 0x1cd   : > { %v6493_v16 = vpop.f32.mrb[11].mxu1 }
 0x1d2   : > { %v6495_v63 = vpop.f32.mrb[12].mxu1 }
 0x1d3   : > { %v6498_v56 = vpop.f32.mrb[13].mxu1 }
 0x1d4   : > { %v6500_v9 = vpop.f32.mrb[14].mxu1 }
 0x1d5   : > { %v6502_v10 = vpop.f32.mrb[15].mxu1 }
 0x1db   : > { %v5395_v27 = vpop.f32.mrb[0].mxu0 }
 0x1dc   : > { %v5441_v13 = vadd.f32 %v5395_v27, %v5155_v5  ;;  %v3541_v18 = vpop.f32.mrb[1].mxu0 }
 0x1dd   : > { %v5442_v29 = vadd.f32 %v3541_v18, %v1690_v19  ;;  %v5396_v1 = vpop.f32.mrb[2].mxu0 }
 0x1de   : > { %v3805_v26 = vadd.f32 %v5441_v13, %v6516_v44  ;;  %v5443_v43 = vadd.f32 %v5396_v1, %v5156_v51  ;;  %v3544_v34 = vpop.f32.mrb[3].mxu0  ;;  %v3904_v13 = vmul.f32 0.70710677, %v4606_v45 }
 0x1df   : > { %v3803_v39 = vadd.f32 %v5442_v29, %v6516_v44  ;;  %v5444_v48 = vadd.f32 %v3544_v34, %v1693_v54 }
 0x1e0   : > { %v3933_v3 = vmul.f32 0.70710677, %v3805_v26  ;;  %v3806_v12 = vadd.f32 %v5443_v43, %v6516_v44 }
 0x1e1   : > { %v3931_v60 = vmul.f32 0.70710677, %v3803_v39  ;;  %v3804_v62 = vadd.f32 %v5444_v48, %v6516_v44 }
 0x1e2   : > { %v3934_v52 = vmul.f32 0.70710677, %v3806_v12  ;;  %v3965_v42 = vadd.f32 %v3933_v3, %v3901_v32  ;;  %v4614_v3 = vunpack.c.h.bf16 %v4750_v40 }
 0x1e3   : > { %v3932_v22 = vmul.f32 0.70710677, %v3804_v62  ;;  %v5399_v25 = vpop.f32.mrb[4].mxu0  ;;  %v3963_v7 = vadd.f32 %v3931_v60, %v3899_v53 }
 0x1e4   : > { %v3966_v28 = vadd.f32 %v3934_v52, %v3902_v21  ;;  %v5445_v0 = vadd.f32 %v5399_v25, %v5159_v38  ;;  %v3557_v35 = vpop.f32.mrb[5].mxu0  ;;  %v3906_v38 = vmul.f32 0.70710677, %v4610_v24  ;;  %v4752_v25 = vld [vmem:[%s6509_s9 + $0x30] sm:$0xff]  }
 0x1e5   : > { %v3964_v11 = vadd.f32 %v3932_v22, %v3900_v6  ;;  %v5446_v57 = vadd.f32 %v3557_v35, %v1706_v47  ;;  %v5400_v46 = vpop.f32.mrb[6].mxu0  ;;  %v4751_v47 = vld [vmem:[%s6509_s9 + $0x28] sm:$0xff]   ;;  %v4753_v22 = vld [vmem:[%s6509_s9 + $0x38] sm:$0xff]  }
 0x1e6   : > { %v4667_v2 = vpack.c.bf16 %v3966_v28, %v3965_v42  ;;  %v3809_v8 = vadd.f32 %v5445_v0, %v6516_v44  ;;  %v5447_v50 = vadd.f32 %v5400_v46, %v5160_v15  ;;  %v3560_v23 = vpop.f32.mrb[7].mxu0  ;;  %v4617_v29 = vunpack.c.l.bf16 %v4751_v47 }
 0x1e7   : > { %v4662_v41 = vpack.c.bf16 %v3964_v11, %v3963_v7  ;;  %v3807_v5 = vadd.f32 %v5446_v57, %v6516_v44  ;;  %v5448_v19 = vadd.f32 %v3560_v23, %v1709_v30  ;;  %v4618_v43 = vunpack.c.h.bf16 %v4751_v47 }
 0x1e8   : > { %4762 = vst [vmem:[%s6529_s13 + $0x8] sm:$0xff] %v4667_v2   ;;  %v3937_v51 = vmul.f32 0.70710677, %v3809_v8  ;;  %v3810_v54 = vadd.f32 %v5447_v50, %v6516_v44  ;;  %v4625_v24 = vunpack.c.l.bf16 %v4753_v22  ;;  %v4621_v7 = vunpack.c.l.bf16 %v4752_v25 }
 0x1e9   : > { %4663 = vst [vmem:[%s6529_s13] sm:$0xff] %v4662_v41   ;;  %v3935_v27 = vmul.f32 0.70710677, %v3807_v5  ;;  %v3808_v37 = vadd.f32 %v5448_v19, %v6516_v44  ;;  %v3910_v52 = vmul.f32 0.70710677, %v4618_v43  ;;  %v4626_v45 = vunpack.c.h.bf16 %v4753_v22 }
 0x1ea   : > { %v3938_v15 = vmul.f32 0.70710677, %v3810_v54  ;;  %v3969_v1 = vadd.f32 %v3937_v51, %v3905_v55  ;;  %v4622_v41 = vunpack.c.h.bf16 %v4752_v25 }
 0x1eb   : > { %v3936_v18 = vmul.f32 0.70710677, %v3808_v37  ;;  %v5403_v14 = vpop.f32.mrb[8].mxu0  ;;  %v3967_v34 = vadd.f32 %v3935_v27, %v3903_v17  ;;  %v3914_v17 = vmul.f32 0.70710677, %v4626_v45  ;;  %v4755_v27 = vld [vmem:[%s6509_s9 + $0x48] sm:$0xff]  }
 0x1ec   : > { %v3970_v30 = vadd.f32 %v3938_v15, %v3906_v38  ;;  %v5449_v33 = vadd.f32 %v5403_v14, %v6487_v58  ;;  %v3573_v26 = vpop.f32.mrb[9].mxu0  ;;  %v3909_v58 = vmul.f32 0.70710677, %v4617_v29  ;;  %v4754_v37 = vld [vmem:[%s6509_s9 + $0x40] sm:$0xff]  }
 0x1ed   : > { %v3968_v32 = vadd.f32 %v3936_v18, %v3904_v13  ;;  %v5450_v39 = vadd.f32 %v3573_v26, %v6489_v31  ;;  %v5404_v48 = vpop.f32.mrb[10].mxu0  ;;  %v3911_v13 = vmul.f32 0.70710677, %v4621_v7 }
 0x1ee   : > { %v4677_v12 = vpack.c.bf16 %v3970_v30, %v3969_v1  ;;  %v3813_v21 = vadd.f32 %v5449_v33, %v6516_v44  ;;  %v5451_v49 = vadd.f32 %v5404_v48, %v6491_v59  ;;  %v3576_v20 = vpop.f32.mrb[11].mxu0  ;;  %v3908_v59 = vmul.f32 0.70710677, %v4614_v3 }
 0x1ef   : > { %v4672_v53 = vpack.c.bf16 %v3968_v32, %v3967_v34  ;;  %v3811_v60 = vadd.f32 %v5450_v39, %v6516_v44  ;;  %v5452_v62 = vadd.f32 %v3576_v20, %v6493_v16  ;;  %v4633_v30 = vunpack.c.l.bf16 %v4755_v27 }
 0x1f0   : > { %4764 = vst [vmem:[%s6529_s13 + $0x18] sm:$0xff] %v4677_v12   ;;  %v3941_v6 = vmul.f32 0.70710677, %v3813_v21  ;;  %v3814_v31 = vadd.f32 %v5451_v49, %v6516_v44  ;;  %v4634_v48 = vunpack.c.h.bf16 %v4755_v27 }
 0x1f1   : > { %4763 = vst [vmem:[%s6529_s13 + $0x10] sm:$0xff] %v4672_v53   ;;  %v3939_v36 = vmul.f32 0.70710677, %v3811_v60  ;;  %v3812_v42 = vadd.f32 %v5452_v62, %v6516_v44  ;;  %v4630_v53 = vunpack.c.h.bf16 %v4754_v37 }
 0x1f2   : > { %v3942_v28 = vmul.f32 0.70710677, %v3814_v31  ;;  %v3973_v11 = vadd.f32 %v3941_v6, %v3909_v58 }
 0x1f3   : > { %v3940_v0 = vmul.f32 0.70710677, %v3812_v42  ;;  %v5407_v35 = vpop.f32.mrb[12].mxu0  ;;  %v3971_v2 = vadd.f32 %v3939_v36, %v3907_v4  ;;  %v3918_v42 = vmul.f32 0.70710677, %v4634_v48 }
 0x1f4   : > { %v3974_v16 = vadd.f32 %v3942_v28, %v3910_v52  ;;  %v5453_v57 = vadd.f32 %v5407_v35, %v6495_v63  ;;  %v3589_v46 = vpop.f32.mrb[13].mxu0  ;;  %v3913_v63 = vmul.f32 0.70710677, %v4625_v24  ;;  %v3917_v52 = vmul.f32 0.70710677, %v4633_v30  ;;  %v4756_v28 = vld [vmem:[%s6509_s9 + $0x50] sm:$0xff]  }
 0x1f5   : > { %v3972_v8 = vadd.f32 %v3940_v0, %v3908_v59  ;;  %v5454_v50 = vadd.f32 %v3589_v46, %v6498_v56  ;;  %v5408_v23 = vpop.f32.mrb[14].mxu0  ;;  %v4757_v59 = vld [vmem:[%s6509_s9 + $0x58] sm:$0xff]   ;;  %v3916_v7 = vmul.f32 0.70710677, %v4630_v53  ;;  %v4758_v30 = vld [vmem:[%s6509_s9 + $0x60] sm:$0xff]  }
 0x1f6   : > { %v4687_v55 = vpack.c.bf16 %v3974_v16, %v3973_v11  ;;  %v3817_v5 = vadd.f32 %v5453_v57, %v6516_v44  ;;  %v5455_v19 = vadd.f32 %v5408_v23, %v6500_v9  ;;  %v3592_v51 = vpop.f32.mrb[15].mxu0  ;;  %v3912_v9 = vmul.f32 0.70710677, %v4622_v41 }
 0x1f7   : > { %v4682_v54 = vpack.c.bf16 %v3972_v8, %v3971_v2  ;;  %v3815_v38 = vadd.f32 %v5454_v50, %v6516_v44  ;;  %v5456_v47 = vadd.f32 %v3592_v51, %v6502_v10  ;;  %v4629_v10 = vunpack.c.l.bf16 %v4754_v37 }
 0x1f8   : > { %4766 = vst [vmem:[%s6529_s13 + $0x28] sm:$0xff] %v4687_v55   ;;  %v3945_v40 = vmul.f32 0.70710677, %v3817_v5  ;;  %v3818_v56 = vadd.f32 %v5455_v19, %v6516_v44  ;;  %v4641_v45 = vunpack.c.l.bf16 %v4757_v59  ;;  %v4637_v8 = vunpack.c.l.bf16 %v4756_v28 }
 0x1f9   : > { %4765 = vst [vmem:[%s6529_s13 + $0x20] sm:$0xff] %v4682_v54   ;;  %v3943_v15 = vmul.f32 0.70710677, %v3815_v38  ;;  %v3816_v18 = vadd.f32 %v5456_v47, %v6516_v44  ;;  %v3915_v0 = vmul.f32 0.70710677, %v4629_v10  ;;  %v4642_v19 = vunpack.c.h.bf16 %v4757_v59 }
 0x1fa   : > { %v3946_v14 = vmul.f32 0.70710677, %v3818_v56  ;;  %v5219_v29 = vpop.f32.mrb[16].mxu1  ;;  %v3977_v26 = vadd.f32 %v3945_v40, %v3913_v63  ;;  %v4638_v40 = vunpack.c.h.bf16 %v4756_v28 }
 0x1fb   : > { %v3944_v61 = vmul.f32 0.70710677, %v3816_v18  ;;  %v5411_v1 = vpop.f32.mrb[16].mxu0  ;;  %v2124_v33 = vpop.f32.mrb[17].mxu1  ;;  %v3975_v3 = vadd.f32 %v3943_v15, %v3911_v13  ;;  %v3921_v15 = vmul.f32 0.70710677, %v4641_v45 }
 0x1fc   : > { %v3978_v43 = vadd.f32 %v3946_v14, %v3914_v17  ;;  %v5457_v34 = vadd.f32 %v5411_v1, %v5219_v29  ;;  %v3605_v32 = vpop.f32.mrb[17].mxu0  ;;  %v5220_v39 = vpop.f32.mrb[18].mxu1  ;;  %v4759_v1 = vld [vmem:[%s6509_s9 + $0x68] sm:$0xff]   ;;  %v4760_v45 = vld [vmem:[%s6509_s9 + $0x70] sm:$0xff]  }
 0x1fd   : > { %v3976_v12 = vadd.f32 %v3944_v61, %v3912_v9  ;;  %v5458_v21 = vadd.f32 %v3605_v32, %v2124_v33  ;;  %v5412_v49 = vpop.f32.mrb[18].mxu0  ;;  %v2127_v20 = vpop.f32.mrb[19].mxu1  ;;  %v3922_v61 = vmul.f32 0.70710677, %v4642_v19  ;;  %v3919_v33 = vmul.f32 0.70710677, %v4637_v8 }
 0x1fe   : > { %v4697_v58 = vpack.c.bf16 %v3978_v43, %v3977_v26  ;;  %v3821_v60 = vadd.f32 %v5457_v34, %v6516_v44  ;;  %v5459_v62 = vadd.f32 %v5412_v49, %v5220_v39  ;;  %v3608_v6 = vpop.f32.mrb[19].mxu0  ;;  %v3920_v43 = vmul.f32 0.70710677, %v4638_v40 }
 0x1ff   : > { %v4692_v31 = vpack.c.bf16 %v3976_v12, %v3975_v3  ;;  %v3819_v22 = vadd.f32 %v5458_v21, %v6516_v44  ;;  %v5460_v25 = vadd.f32 %v3608_v6, %v2127_v20  ;;  %v4649_v3 = vunpack.c.l.bf16 %v4759_v1 }
 0x200   : > { %4768 = vst [vmem:[%s6529_s13 + $0x38] sm:$0xff] %v4697_v58   ;;  %v3949_v4 = vmul.f32 0.70710677, %v3821_v60  ;;  %v3822_v36 = vadd.f32 %v5459_v62, %v6516_v44  ;;  %v4645_v21 = vunpack.c.l.bf16 %v4758_v30  ;;  %v4650_v62 = vunpack.c.h.bf16 %v4759_v1 }
 0x201   : > { %4767 = vst [vmem:[%s6529_s13 + $0x30] sm:$0xff] %v4692_v31   ;;  %v3947_v35 = vmul.f32 0.70710677, %v3819_v22  ;;  %v3820_v24 = vadd.f32 %v5460_v25, %v6516_v44 }
 0x202   : > { %v3950_v11 = vmul.f32 0.70710677, %v3822_v36  ;;  %v5223_v16 = vpop.f32.mrb[20].mxu1  ;;  %v3981_v50 = vadd.f32 %v3949_v4, %v3917_v52  ;;  %v4646_v4 = vunpack.c.h.bf16 %v4758_v30 }
 0x203   : > { %v3948_v57 = vmul.f32 0.70710677, %v3820_v24  ;;  %v5415_v46 = vpop.f32.mrb[20].mxu0  ;;  %v2140_v2 = vpop.f32.mrb[21].mxu1  ;;  %v3979_v51 = vadd.f32 %v3947_v35, %v3915_v0  ;;  %v3925_v35 = vmul.f32 0.70710677, %v4649_v3 }
 0x204   : > { %v3982_v23 = vadd.f32 %v3950_v11, %v3918_v42  ;;  %v5461_v41 = vadd.f32 %v5415_v46, %v5223_v16  ;;  %v3621_v55 = vpop.f32.mrb[21].mxu0  ;;  %v5224_v5 = vpop.f32.mrb[22].mxu1  ;;  %v4761_v46 = vld [vmem:[%s6509_s9 + $0x78] sm:$0xff]  }
 0x205   : > { %v3980_v54 = vadd.f32 %v3948_v57, %v3916_v7  ;;  %v5462_v63 = vadd.f32 %v3621_v55, %v2140_v2  ;;  %v5416_v38 = vpop.f32.mrb[22].mxu0  ;;  %v2143_v47 = vpop.f32.mrb[23].mxu1  ;;  %v3926_v57 = vmul.f32 0.70710677, %v4650_v62  ;;  %v3923_v2 = vmul.f32 0.70710677, %v4645_v21 }
 0x206   : > { %v4707_v56 = vpack.c.bf16 %v3982_v23, %v3981_v50  ;;  %v3825_v17 = vadd.f32 %v5461_v41, %v6516_v44  ;;  %v5463_v27 = vadd.f32 %v5416_v38, %v5224_v5  ;;  %v3624_v37 = vpop.f32.mrb[23].mxu0  ;;  %v3924_v23 = vmul.f32 0.70710677, %v4646_v4 }
 0x207   : > { %v4702_v13 = vpack.c.bf16 %v3980_v54, %v3979_v51  ;;  %v3823_v18 = vadd.f32 %v5462_v63, %v6516_v44  ;;  %v5464_v9 = vadd.f32 %v3624_v37, %v2143_v47  ;;  %v4657_v51 = vunpack.c.l.bf16 %v4761_v46 }
 0x208   : > { %4770 = vst [vmem:[%s6529_s13 + $0x48] sm:$0xff] %v4707_v56   ;;  %v3953_v14 = vmul.f32 0.70710677, %v3825_v17  ;;  %v3826_v29 = vadd.f32 %v5463_v27, %v6516_v44  ;;  %v4653_v63 = vunpack.c.l.bf16 %v4760_v45  ;;  %v4658_v27 = vunpack.c.h.bf16 %v4761_v46 }
 0x209   : > { %4769 = vst [vmem:[%s6529_s13 + $0x40] sm:$0xff] %v4702_v13   ;;  %v3951_v10 = vmul.f32 0.70710677, %v3823_v18  ;;  %v3824_v26 = vadd.f32 %v5464_v9, %v6516_v44 }
 0x20a   : > { %v3954_v34 = vmul.f32 0.70710677, %v3826_v29  ;;  %v5227_v32 = vpop.f32.mrb[24].mxu1  ;;  %v3985_v49 = vadd.f32 %v3953_v14, %v3921_v15  ;;  %v4654_v14 = vunpack.c.h.bf16 %v4760_v45 }
 0x20b   : > { %v3952_v39 = vmul.f32 0.70710677, %v3824_v26  ;;  %v5419_v48 = vpop.f32.mrb[24].mxu0  ;;  %v2156_v12 = vpop.f32.mrb[25].mxu1  ;;  %v3983_v6 = vadd.f32 %v3951_v10, %v3919_v33 }
 0x20c   : > { %v3986_v20 = vadd.f32 %v3954_v34, %v3922_v61  ;;  %v5465_v53 = vadd.f32 %v5419_v48, %v5227_v32  ;;  %v3637_v58 = vpop.f32.mrb[25].mxu0  ;;  %v5228_v60 = vpop.f32.mrb[26].mxu1  ;;  %v3927_v48 = vmul.f32 0.70710677, %v4653_v63  ;;  %v3928_v21 = vmul.f32 0.70710677, %v4654_v14 }
 0x20d   : > { %v3984_v31 = vadd.f32 %v3952_v39, %v3920_v43  ;;  %v5466_v52 = vadd.f32 %v3637_v58, %v2156_v12  ;;  %v5420_v22 = vpop.f32.mrb[26].mxu0  ;;  %v2159_v25 = vpop.f32.mrb[27].mxu1  ;;  %v3929_v43 = vmul.f32 0.70710677, %v4657_v51  ;;  %v3930_v39 = vmul.f32 0.70710677, %v4658_v27 }
 0x20e   : > { %v4717_v36 = vpack.c.bf16 %v3986_v20, %v3985_v49  ;;  %v3829_v42 = vadd.f32 %v5465_v53, %v6516_v44  ;;  %v5467_v59 = vadd.f32 %v5420_v22, %v5228_v60  ;;  %v3640_v28 = vpop.f32.mrb[27].mxu0 }
 0x20f   : > { %v4712_v0 = vpack.c.bf16 %v3984_v31, %v3983_v6  ;;  %v3827_v24 = vadd.f32 %v5466_v52, %v6516_v44  ;;  %v5468_v7 = vadd.f32 %v3640_v28, %v2159_v25 }
 0x210   : > { %4772 = vst [vmem:[%s6529_s13 + $0x58] sm:$0xff] %v4717_v36   ;;  %v3957_v11 = vmul.f32 0.70710677, %v3829_v42  ;;  %v3830_v16 = vadd.f32 %v5467_v59, %v6516_v44 }
 0x211   : > { %4771 = vst [vmem:[%s6529_s13 + $0x50] sm:$0xff] %v4712_v0   ;;  %v3955_v8 = vmul.f32 0.70710677, %v3827_v24  ;;  %v3828_v50 = vadd.f32 %v5468_v7, %v6516_v44 }
 0x212   : > { %v3958_v41 = vmul.f32 0.70710677, %v3830_v16  ;;  %v5231_v55 = vpop.f32.mrb[28].mxu1  ;;  %v3989_v38 = vadd.f32 %v3957_v11, %v3925_v35 }
 0x213   : > { %v3956_v5 = vmul.f32 0.70710677, %v3828_v50  ;;  %v5423_v19 = vpop.f32.mrb[28].mxu0  ;;  %v2172_v54 = vpop.f32.mrb[29].mxu1  ;;  %v3987_v37 = vadd.f32 %v3955_v8, %v3923_v2 }
 0x214   : > { %v3990_v47 = vadd.f32 %v3958_v41, %v3926_v57  ;;  %v5469_v40 = vadd.f32 %v5423_v19, %v5231_v55  ;;  %v3653_v56 = vpop.f32.mrb[29].mxu0  ;;  %v5232_v17 = vpop.f32.mrb[30].mxu1 }
 0x215   : > { %v3988_v13 = vadd.f32 %v3956_v5, %v3924_v23  ;;  %v5470_v15 = vadd.f32 %v3653_v56, %v2172_v54  ;;  %v5424_v18 = vpop.f32.mrb[30].mxu0  ;;  %v2175_v9 = vpop.f32.mrb[31].mxu1 }
 0x216   : > { %v4727_v29 = vpack.c.bf16 %v3990_v47, %v3989_v38  ;;  %v3833_v61 = vadd.f32 %v5469_v40, %v6516_v44  ;;  %v5471_v1 = vadd.f32 %v5424_v18, %v5232_v17  ;;  %v3656_v30 = vpop.f32.mrb[31].mxu0 }
 0x217   : > { %v4722_v33 = vpack.c.bf16 %v3988_v13, %v3987_v37  ;;  %v3831_v10 = vadd.f32 %v5470_v15, %v6516_v44  ;;  %v5472_v26 = vadd.f32 %v3656_v30, %v2175_v9 }
 0x218   : > { %4774 = vst [vmem:[%s6529_s13 + $0x68] sm:$0xff] %v4727_v29   ;;  %v3961_v34 = vmul.f32 0.70710677, %v3833_v61  ;;  %v3834_v32 = vadd.f32 %v5471_v1, %v6516_v44 }
 0x219   : > { %4773 = vst [vmem:[%s6529_s13 + $0x60] sm:$0xff] %v4722_v33   ;;  %v3959_v3 = vmul.f32 0.70710677, %v3831_v10  ;;  %v3832_v12 = vadd.f32 %v5472_v26, %v6516_v44 }
 0x21a   : > { %v3962_v49 = vmul.f32 0.70710677, %v3834_v32  ;;  %v3993_v53 = vadd.f32 %v3961_v34, %v3929_v43 }
 0x21b   : > { %v3960_v20 = vmul.f32 0.70710677, %v3832_v12  ;;  %v3991_v60 = vadd.f32 %v3959_v3, %v3927_v48 }
 0x21c   : > { %v3994_v58 = vadd.f32 %v3962_v49, %v3930_v39 }
 0x21d   : > { %v3992_v62 = vadd.f32 %v3960_v20, %v3928_v21 }
 0x21e   : > { %v4737_v6 = vpack.c.bf16 %v3994_v58, %v3993_v53 }
 0x21f   : > { %v4732_v31 = vpack.c.bf16 %v3992_v62, %v3991_v60 }
 0x220   : > { %4776 = vst [vmem:[%s6529_s13 + $0x78] sm:$0xff] %v4737_v6  }
 0x221   : > { %4775 = vst [vmem:[%s6529_s13 + $0x70] sm:$0xff] %v4732_v31  }
 0x222 PF: > { %s14_s17 = sadd.s32 1, %s5824_s17   ;;  %s6609_s15 = smov %s5820_s16 }
 0x223   : > { %p11_p5 = scmp.ge.s32.totalorder %s14_s17, 4   ;;  %s6610_s16 = smov %s6612_s18 }
 0x225   :  { %13 = sbr.rel (!%p11_p5) target bundleno = 2 (0x2), region = 85 }

// kernel: _lambda_.10
= control target key start
LH: loop header
LB: loop body
LE: loop exit
PB: predicated region body
PF: predicated region fallthrough
CT: control target
= control target key end

     0   :  { %s5483_s12 = smov 0   ;;  %s5485_s13 = smov 0   ;;  %s6089_s0 = inlined_call_operand.vmem [shape: bf16[2,1,18,18,128], index: 0, kind: input, shape index: {}]   ;;  %s6090_s1 = inlined_call_operand.vmem [shape: bf16[9,128,128], index: 1, kind: input, shape index: {}]   ;;  %s6091_s2 = inlined_call_operand.vmem [shape: f32[1,128], index: 2, kind: input, shape index: {}]   ;;  %s6092_s3 = inlined_call_operand.vmem [shape: bf16[2,256,128], index: 3, kind: output, shape index: {}]  }
   0x1   :  { %s5487_s14 = smov 0  }
   0x2 LB: > { %s25_s15 = sadd.s32 1, %s5457_s13  ;;  %p3994_p0 = scmp.ge.s32.totalorder %s5461_s14, 1  ;;  %s5461_s14 = sphi %s5487_s14, %s13_s14   ;;  %s5457_s13 = sphi %s5485_s13, %s6094_s13   ;;  %s5453_s12 = sphi %s5483_s12, %s6093_s12  }
   0x3   : > { %p27_p1 = scmp.ge.s32.totalorder %s25_s15, 2  ;;  %p168_p2 = scmp.lt.s32.totalorder %s5461_s14, 3 }
   0x5   : > { %s6096_s15 = smov (%p27_p1, %s25_s15), 0  ;;  %p169_p3 = pnand %p3994_p0, %p168_p2 }
   0x6   : > { %v5350_v0 = vld [vmem:[%s6090_s1] sm:$0xff] (!%p169_p3)   ;;  %p202_p4 = scmp.lt.s32.totalorder (!%p169_p3), %s5453_s12, 1  ;;  %v5352_v2 = vld [vmem:[%s6090_s1 + $0x8] sm:$0xff] (!%p169_p3)   ;;  %v5354_v4 = vld [vmem:[%s6090_s1 + $0x10] sm:$0xff] (!%p169_p3)  }
   0x7   : > { %172 = sbr.rel (%p169_p3) target bundleno = 542 (0x21e), region = 32  ;;  %v5351_v1 = vld [vmem:[%s6090_s1 + $0x100] sm:$0xff] (!%p169_p3)   ;;  %4621 = vmatprep.subr.bf16.mxu1 (!%p169_p3), %v5350_v0  ;;  %v5353_v3 = vld [vmem:[%s6090_s1 + $0x108] sm:$0xff] (!%p169_p3)   ;;  %v5355_v5 = vld [vmem:[%s6090_s1 + $0x110] sm:$0xff] (!%p169_p3)  }
   0x8   : > { %4813 = vmatprep.subr.bf16.mxu0 (!%p169_p3), %v5351_v1  ;;  %4622 = vmatpush3.bf16.msra.mxu1 (!%p169_p3), %v5350_v0  ;;  %v5356_v6 = vld [vmem:[%s6090_s1 + $0x18] sm:$0xff] (!%p169_p3)   ;;  %v5358_v8 = vld [vmem:[%s6090_s1 + $0x20] sm:$0xff] (!%p169_p3)   ;;  %v5360_v10 = vld [vmem:[%s6090_s1 + $0x28] sm:$0xff] (!%p169_p3)  }
   0x9   : > { %4814 = vmatpush3.bf16.msra.mxu0 (!%p169_p3), %v5351_v1  ;;  %4623 = vmatprep.subr.bf16.mxu1 (!%p169_p3), %v5352_v2  ;;  %v5357_v7 = vld [vmem:[%s6090_s1 + $0x118] sm:$0xff] (!%p169_p3)   ;;  %v5359_v9 = vld [vmem:[%s6090_s1 + $0x120] sm:$0xff] (!%p169_p3)   ;;  %v5361_v11 = vld [vmem:[%s6090_s1 + $0x128] sm:$0xff] (!%p169_p3)  }
   0xa   : > { %4815 = vmatprep.subr.bf16.mxu0 (!%p169_p3), %v5353_v3  ;;  %v5362_v26 = vld [vmem:[%s6090_s1 + $0x30] sm:$0xff] (!%p169_p3)   ;;  %v5364_v35 = vld [vmem:[%s6090_s1 + $0x38] sm:$0xff] (!%p169_p3)   ;;  %v5367_v41 = vld [vmem:[%s6090_s1 + $0x40] sm:$0xff] (!%p169_p3)  }
   0xb   : > { %v5363_v27 = vld [vmem:[%s6090_s1 + $0x130] sm:$0xff] (!%p169_p3)   ;;  %v5365_v39 = vld [vmem:[%s6090_s1 + $0x138] sm:$0xff] (!%p169_p3)   ;;  %v5368_v51 = vld [vmem:[%s6090_s1 + $0x140] sm:$0xff] (!%p169_p3)  }
   0xc   : > { %4624 = vmatpush3.bf16.msra.mxu1 (!%p169_p3), %v5352_v2  ;;  %v5369_v62 = vld [vmem:[%s6090_s1 + $0x148] sm:$0xff] (!%p169_p3)  }
   0xd   : > { %4816 = vmatpush3.bf16.msra.mxu0 (!%p169_p3), %v5353_v3  ;;  %4625 = vmatprep.subr.bf16.mxu1 (!%p169_p3), %v5354_v4  ;;  %v5371_v0 = vld [vmem:[%s6090_s1 + $0x48] sm:$0xff] (!%p169_p3)  }
   0xe   : > { %s6098_s12 = smov (!%p202_p4, %s5453_s12), 1  ;;  %4817 = vmatprep.subr.bf16.mxu0 %v5355_v5 }
   0xf   : > { %s5325_s5 = smul.u32 216, %s6098_s12  ;;  %s4233_s25 = sshll.u32 %s6098_s12, 7 }
  0x10   : > { %4626 = vmatpush3.bf16.msra.mxu1 %v5354_v4  ;;  %s6033_s28 = scalar_lea.vmem %s6092_s3, %s4233_s25 }
  0x11   : > { %4818 = vmatpush3.bf16.msra.mxu0 %v5355_v5  ;;  %4627 = vmatprep.subr.bf16.mxu1 %v5356_v6  ;;  %s5537_s16 = scalar_lea.vmem %s6089_s0, %s5325_s5  ;;  %v5375_v5 = vld [vmem:[%s6090_s1 + $0x50] sm:$0xff]  }
  0x12   : > { %4819 = vmatprep.subr.bf16.mxu0 %v5357_v7  ;;  %v4267_v12 = vld [vmem:[%s5537_s16] sm:$0xff]   ;;  %v5548_v14 = vld [vmem:[%s5537_s16 + $0xc] sm:$0xff]   ;;  %v228_v17 = vld [vmem:[%s5537_s16 + $0x14] sm:$0x1] }
  0x13   : > { %v5366_v13 = vld [vmem:[%s5537_s16] sm:$0xff]  ;;  %v4268_v15 = vunpack.c.l.bf16 %v4267_v12  ;;  %v4269_v16 = vunpack.c.h.bf16 %v4267_v12  ;;  %v280_v18 = vunpack.c.l.bf16 %v5548_v14  ;;  %v281_v19 = vunpack.c.h.bf16 %v5548_v14  ;;  %v4382_v21 = vld [vmem:[%s5537_s16 + $0x18] sm:$0xff]   ;;  %v234_v29 = vld [vmem:[%s5537_s16 + $0x2c] sm:$0x1] }
  0x14   : > { %4628 = vmatpush3.bf16.msra.mxu1 %v5356_v6  ;;  %4637 = vmatprep.mubr.bf16.mxu1 %v5366_v13  ;;  %v282_v20 = vunpack.c.l.bf16 %v228_v17  ;;  %v231_v22 = vld [vmem:[%s5537_s16 + $0x20] sm:$0x1]  ;;  %v4272_v23 = vunpack.c.l.bf16 %v4382_v21  ;;  %v4273_v24 = vunpack.c.h.bf16 %v4382_v21  ;;  %v5562_v28 = vld [vmem:[%s5537_s16 + $0x24] sm:$0xff]   ;;  %v288_v32 = vunpack.c.l.bf16 %v234_v29  ;;  %v4383_v33 = vld [vmem:[%s5537_s16 + $0x30] sm:$0xff]  }
  0x15   : > { %4820 = vmatpush3.bf16.msra.mxu0 %v5357_v7  ;;  %4629 = vmatprep.subr.bf16.mxu1 %v5358_v8  ;;  %331 = vst [vmem:[#allocation2] sm:$0xff] %v4268_v15  ;;  %332 = vst [vmem:[#allocation2 + $0x8] sm:$0xff] %v4269_v16  ;;  %v285_v25 = vunpack.c.l.bf16 %v231_v22  ;;  %v286_v30 = vunpack.c.l.bf16 %v5562_v28  ;;  %v287_v31 = vunpack.c.h.bf16 %v5562_v28  ;;  %v237_v34 = vld [vmem:[%s5537_s16 + $0x38] sm:$0x1]  ;;  %v4276_v36 = vunpack.c.l.bf16 %v4383_v33  ;;  %v5579_v42 = vld [vmem:[%s5537_s16 + $0x3c] sm:$0xff]  }
  0x16   : > { %4821 = vmatprep.subr.bf16.mxu0 %v5359_v9  ;;  %334 = vst [vmem:[#allocation2 + $0x18] sm:$0xff] %v280_v18  ;;  %335 = vst [vmem:[#allocation2 + $0x20] sm:$0xff] %v281_v19  ;;  %v4277_v37 = vunpack.c.h.bf16 %v4383_v33  ;;  %v291_v38 = vunpack.c.l.bf16 %v237_v34  ;;  %v240_v43 = vld [vmem:[%s5537_s16 + $0x44] sm:$0x1]  ;;  %v292_v45 = vunpack.c.l.bf16 %v5579_v42  ;;  %v293_v46 = vunpack.c.h.bf16 %v5579_v42  ;;  %v4384_v52 = vld [vmem:[%s5537_s16 + $0x48] sm:$0xff]  }
  0x17   : > { %336 = vst [vmem:[#allocation2 + $0x28] sm:$0x3] %v282_v20  ;;  %337 = vst [vmem:[#allocation2 + $0x30] sm:$0xff] %v4272_v23  ;;  %v294_v47 = vunpack.c.l.bf16 %v240_v43  ;;  %v243_v53 = vld [vmem:[%s5537_s16 + $0x50] sm:$0x1]  ;;  %v4280_v54 = vunpack.c.l.bf16 %v4384_v52  ;;  %v4281_v55 = vunpack.c.h.bf16 %v4384_v52  ;;  %v5595_v60 = vld [vmem:[%s5537_s16 + $0x18] sm:$0xff] }
  0x18   : > { %4630 = vmatpush3.bf16.msra.mxu1 %v5358_v8  ;;  %338 = vst [vmem:[#allocation2 + $0x38] sm:$0xff] %v4273_v24  ;;  %339 = vst [vmem:[#allocation2 + $0x40] sm:$0x3] %v285_v25  ;;  %v297_v56 = vunpack.c.l.bf16 %v243_v53  ;;  %v5598_v61 = vld [vmem:[%s5537_s16 + $0x54] sm:$0xff]   ;;  %v246_v1 = vld [vmem:[%s5537_s16 + $0x5c] sm:$0x1] }
  0x19   : > { %4822 = vmatpush3.bf16.msra.mxu0 %v5359_v9  ;;  %4631 = vmatprep.subr.bf16.mxu1 %v5360_v10  ;;  %340 = vst [vmem:[#allocation2 + $0x48] sm:$0xff] %v286_v30  ;;  %341 = vst [vmem:[#allocation2 + $0x50] sm:$0xff] %v287_v31  ;;  %v298_v2 = vunpack.c.l.bf16 %v5598_v61  ;;  %v299_v3 = vunpack.c.h.bf16 %v5598_v61  ;;  %v300_v6 = vunpack.c.l.bf16 %v246_v1  ;;  %v5372_v7 = vld [vmem:[%s6090_s1 + $0x150] sm:$0xff]   ;;  %v4385_v8 = vld [vmem:[%s5537_s16 + $0x60] sm:$0xff]  }
  0x1a   : > { %4823 = vmatprep.subr.bf16.mxu0 %v5361_v11  ;;  %342 = vst [vmem:[#allocation2 + $0x58] sm:$0x3] %v288_v32  ;;  %343 = vst [vmem:[#allocation2 + $0x60] sm:$0xff] %v4276_v36  ;;  %v249_v9 = vld [vmem:[%s5537_s16 + $0x68] sm:$0x1]  ;;  %v4284_v12 = vunpack.c.l.bf16 %v4385_v8  ;;  %v4285_v13 = vunpack.c.h.bf16 %v4385_v8  ;;  %v5626_v17 = vld [vmem:[%s5537_s16 + $0x30] sm:$0xff] }
  0x1b   : > { %344 = vst [vmem:[#allocation2 + $0x68] sm:$0xff] %v4277_v37  ;;  %345 = vst [vmem:[#allocation2 + $0x70] sm:$0x3] %v291_v38  ;;  %v5631_v19 = vld [vmem:[%s5537_s16 + $0x6c] sm:$0xff]   ;;  %v5373_v20 = vld [vmem:[%s6090_s1 + $0x158] sm:$0xff]  }
  0x1c   : > { %4632 = vmatpush3.bf16.msra.mxu1 %v5360_v10  ;;  %346 = vst [vmem:[#allocation2 + $0x78] sm:$0xff] %v292_v45  ;;  %347 = vst [vmem:[#allocation2 + $0x80] sm:$0xff] %v293_v46  ;;  %v304_v21 = vunpack.c.l.bf16 %v5631_v19  ;;  %v305_v22 = vunpack.c.h.bf16 %v5631_v19  ;;  %v5379_v23 = vld [vmem:[%s6090_s1 + $0x58] sm:$0xff]   ;;  %v5650_v33 = vld [vmem:[%s5537_s16 + $0x84] sm:$0xff]  }
  0x1d   : > { %4824 = vmatpush3.bf16.msra.mxu0 %v5361_v11  ;;  %4633 = vmatprep.subr.bf16.mxu1 %v5362_v26  ;;  %v1801_v40 = vld [vmem:[#allocation2 + $0x19] sm:$0xff]  ;;  %348 = vst [vmem:[#allocation2 + $0x88] sm:$0x3] %v294_v47  ;;  %349 = vst [vmem:[#allocation2 + $0x90] sm:$0xff] %v4280_v54  ;;  %v311_v36 = vunpack.c.h.bf16 %v5650_v33  ;;  %v5660_v38 = vld [vmem:[%s5537_s16 + $0x48] sm:$0xff] }
  0x1e   : > { %4825 = vmatprep.subr.bf16.mxu0 %v5363_v27  ;;  %v1802_v44 = vld [vmem:[#allocation2 + $0x21] sm:$0xff]  ;;  %350 = vst [vmem:[#allocation2 + $0x98] sm:$0xff] %v4281_v55  ;;  %351 = vst [vmem:[#allocation2 + $0xa0] sm:$0x3] %v297_v56  ;;  %v4386_v24 = vld [vmem:[%s5537_s16 + $0x78] sm:$0xff]  }
  0x1f   : > { %v5584_v48 = vpack.c.bf16 %v1802_v44, %v1801_v40  ;;  %v1803_v49 = vld [vmem:[#allocation2 + $0x31] sm:$0xff]  ;;  %v1804_v50 = vld [vmem:[#allocation2 + $0x39] sm:$0xff]  ;;  %352 = vst [vmem:[#allocation2 + $0xa8] sm:$0xff] %v298_v2  ;;  %353 = vst [vmem:[#allocation2 + $0xb0] sm:$0xff] %v299_v3  ;;  %v4288_v29 = vunpack.c.l.bf16 %v4386_v24  ;;  %v4289_v30 = vunpack.c.h.bf16 %v4386_v24 }
  0x20   : > { %4634 = vmatpush3.bf16.msra.mxu1 %v5362_v26  ;;  %v5592_v57 = vpack.c.bf16 %v1804_v50, %v1803_v49  ;;  %v1805_v58 = vld [vmem:[#allocation2 + $0x49] sm:$0xff]  ;;  %354 = vst [vmem:[#allocation2 + $0xb8] sm:$0x3] %v300_v6  ;;  %355 = vst [vmem:[#allocation2 + $0xc0] sm:$0xff] %v4284_v12  ;;  %v5383_v34 = vld [vmem:[%s6090_s1 + $0x60] sm:$0xff]  }
  0x21   : > { %4826 = vmatpush3.bf16.msra.mxu0 %v5363_v27  ;;  %4635 = vmatprep.subr.bf16.mxu1 %v5364_v35  ;;  %v1806_v59 = vld [vmem:[#allocation2 + $0x51] sm:$0xff]  ;;  %356 = vst [vmem:[#allocation2 + $0xc8] sm:$0xff] %v4285_v13  ;;  %358 = vst [vmem:[#allocation2 + $0xd8] sm:$0xff] %v304_v21  ;;  %v5376_v27 = vld [vmem:[%s6090_s1 + $0x160] sm:$0xff]  }
  0x22   : > { %4827 = vmatprep.subr.bf16.mxu0 %v5365_v39  ;;  %4829 = vmatprep.mubr.bf16.mxu0 %v5584_v48  ;;  %v5603_v63 = vpack.c.bf16 %v1806_v59, %v1805_v58  ;;  %v1807_v4 = vld [vmem:[#allocation2 + $0x61] sm:$0xff]  ;;  %v1808_v10 = vld [vmem:[#allocation2 + $0x69] sm:$0xff]  ;;  %359 = vst [vmem:[#allocation2 + $0xe0] sm:$0xff] %v305_v22  ;;  %361 = vst [vmem:[#allocation2 + $0xf0] sm:$0xff] %v4288_v29 }
  0x23   : > { %v1809_v11 = vld [vmem:[#allocation2 + $0x79] sm:$0xff]  ;;  %v5623_v16 = vpack.c.bf16 %v1808_v10, %v1807_v4  ;;  %362 = vst [vmem:[#allocation2 + $0xf8] sm:$0xff] %v4289_v30  ;;  %365 = vst [vmem:[#allocation2 + $0x110] sm:$0xff] %v311_v36  ;;  %v4387_v40 = vld [vmem:[%s5537_s16 + $0x90] sm:$0xff]  }
  0x24   : > { %4636 = vmatpush3.bf16.msra.mxu1 %v5364_v35  ;;  %v1810_v15 = vld [vmem:[#allocation2 + $0x81] sm:$0xff]  ;;  %v310_v35 = vunpack.c.l.bf16 %v5650_v33  ;;  %v4292_v44 = vunpack.c.l.bf16 %v4387_v40  ;;  %v4293_v45 = vunpack.c.h.bf16 %v4387_v40  ;;  %v5380_v49 = vld [vmem:[%s6090_s1 + $0x170] sm:$0xff]   ;;  %v5392_v8 = vld [vmem:[%s6090_s1 + $0x78] sm:$0xff]  }
  0x25   : > { %4828 = vmatpush3.bf16.msra.mxu0 %v5365_v39  ;;  %4669 = vmatprep.subr.bf16.mxu1 %v5367_v41  ;;  %v5628_v18 = vpack.c.bf16 %v1810_v15, %v1809_v11  ;;  %v1811_v25 = vld [vmem:[#allocation2 + $0x91] sm:$0xff]  ;;  %v1812_v26 = vld [vmem:[#allocation2 + $0x99] sm:$0xff]  ;;  %v5386_v43 = vld [vmem:[%s6090_s1 + $0x68] sm:$0xff]  }
  0x26   : > { %4861 = vmatprep.subr.bf16.mxu0 %v5368_v51  ;;  %v1813_v31 = vld [vmem:[#allocation2 + $0xa9] sm:$0xff]  ;;  %v5657_v37 = vpack.c.bf16 %v1812_v26, %v1811_v25  ;;  %364 = vst [vmem:[#allocation2 + $0x108] sm:$0xff] %v310_v35  ;;  %v5673_v46 = vld [vmem:[%s5537_s16 + $0x9c] sm:$0xff]   ;;  %367 = vst [vmem:[#allocation2 + $0x120] sm:$0xff] %v4292_v44 }
  0x27   : > { %4638 = vmatmul.mubr.bf16.vlgmr.msra.gmra.mrb[0].mxu1 %v5548_v14  ;;  %v303_v14 = vunpack.c.l.bf16 %v249_v9  ;;  %v1814_v32 = vld [vmem:[#allocation2 + $0xb1] sm:$0xff]  ;;  %368 = vst [vmem:[#allocation2 + $0x128] sm:$0xff] %v4293_v45  ;;  %v316_v50 = vunpack.c.l.bf16 %v5673_v46  ;;  %v2171_v53 = vld [vmem:[#allocation2 + $0x1a] sm:$0xff]  ;;  %v2172_v54 = vld [vmem:[#allocation2 + $0x22] sm:$0xff] }
  0x28   : > { %4830 = vmatmul.mubr.bf16.vlgmr.msra.gmra.mrb[0].mxu0 %v5592_v57  ;;  %4670 = vmatpush3.bf16.msra.mxu1 %v5367_v41  ;;  %v5662_v39 = vpack.c.bf16 %v1814_v32, %v1813_v31  ;;  %v5377_v41 = vld [vmem:[%s6090_s1 + $0x168] sm:$0xff]   ;;  %v5389_v56 = vld [vmem:[%s6090_s1 + $0x70] sm:$0xff]   ;;  %v5693_v1 = vld [vmem:[%s5537_s16 + $0x60] sm:$0xff]  ;;  %v5697_v4 = vpack.c.bf16 %v2172_v54, %v2171_v53 }
  0x29   : > { %4862 = vmatpush3.bf16.msra.mxu0 %v5368_v51  ;;  %4641 = vmatprep.mubr.bf16.mxu1 %v5595_v60  ;;  %357 = vst [vmem:[#allocation2 + $0xd0] sm:$0x3] %v303_v14  ;;  %v1815_v47 = vld [vmem:[#allocation2 + $0xc1] sm:$0xff]  ;;  %v317_v51 = vunpack.c.h.bf16 %v5673_v46  ;;  %370 = vst [vmem:[#allocation2 + $0x138] sm:$0xff] %v316_v50  ;;  %v252_v10 = vld [vmem:[%s5537_s16 + $0x74] sm:$0x1] }
  0x2a   : > { %4863 = vmatprep.subr.bf16.mxu0 %v5369_v62  ;;  %4833 = vmatprep.mubr.bf16.mxu0 %v5603_v63  ;;  %v4388_v55 = vld [vmem:[%s5537_s16 + $0xa8] sm:$0xff]   ;;  %v2174_v11 = vld [vmem:[#allocation2 + $0x3a] sm:$0xff]  ;;  %v306_v12 = vunpack.c.l.bf16 %v252_v10  ;;  %v2176_v21 = vld [vmem:[#allocation2 + $0x52] sm:$0xff] }
  0x2b   : > { %4671 = vmatprep.subr.bf16.mxu1 %v5371_v0  ;;  %371 = vst [vmem:[#allocation2 + $0x140] sm:$0xff] %v317_v51  ;;  %v4296_v58 = vunpack.c.l.bf16 %v4388_v55  ;;  %v4297_v59 = vunpack.c.h.bf16 %v4388_v55  ;;  %v225_v6 = vld [vmem:[%s5537_s16 + $0x8] sm:$0x1]  ;;  %v255_v13 = vld [vmem:[%s5537_s16 + $0x80] sm:$0x1]  ;;  %v5724_v26 = vld [vmem:[%s5537_s16 + $0x78] sm:$0xff] }
  0x2c   : > { %4672 = vmatpush3.bf16.msra.mxu1 %v5371_v0  ;;  %v279_v9 = vunpack.c.l.bf16 %v225_v6  ;;  %v5384_v14 = vld [vmem:[%s6090_s1 + $0x180] sm:$0xff]   ;;  %v309_v15 = vunpack.c.l.bf16 %v255_v13  ;;  %360 = vst [vmem:[#allocation2 + $0xe8] sm:$0x3] %v306_v12  ;;  %v258_v22 = vld [vmem:[%s5537_s16 + $0x8c] sm:$0x1]  ;;  %v2184_v6 = vld [vmem:[#allocation2 + $0xb2] sm:$0xff] }
  0x2d   : > { %4864 = vmatpush3.bf16.msra.mxu0 %v5369_v62  ;;  %4673 = vmatprep.subr.bf16.mxu1 %v5375_v5  ;;  %v5688_v62 = vld [vmem:[%s5537_s16 + $0xb4] sm:$0xff]   ;;  %373 = vst [vmem:[#allocation2 + $0x150] sm:$0xff] %v4296_v58  ;;  %374 = vst [vmem:[#allocation2 + $0x158] sm:$0xff] %v4297_v59  ;;  %v312_v24 = vunpack.c.l.bf16 %v258_v22  ;;  %v264_v31 = vld [vmem:[%s5537_s16 + $0xa4] sm:$0x1] }
  0x2e   : > { %4865 = vmatprep.subr.bf16.mxu0 %v5372_v7  ;;  %v322_v2 = vunpack.c.l.bf16 %v5688_v62  ;;  %v323_v3 = vunpack.c.h.bf16 %v5688_v62  ;;  %333 = vst [vmem:[#allocation2 + $0x10] sm:$0x3] %v279_v9  ;;  %363 = vst [vmem:[#allocation2 + $0x100] sm:$0x3] %v309_v15  ;;  %v5387_v32 = vld [vmem:[%s6090_s1 + $0x188] sm:$0xff]   ;;  %v4389_v50 = vld [vmem:[%s5537_s16 + $0xc0] sm:$0xff]  }
  0x2f   : > { %4642 = vmatmul.mubr.bf16.gmra.mrb[4].mxu1 %v5562_v28  ;;  %366 = vst [vmem:[#allocation2 + $0x118] sm:$0x3] %v312_v24  ;;  %v267_v35 = vld [vmem:[%s5537_s16 + $0xb0] sm:$0x1]  ;;  %v2177_v36 = vld [vmem:[#allocation2 + $0x62] sm:$0xff]  ;;  %v4300_v53 = vunpack.c.l.bf16 %v4389_v50  ;;  %v4301_v54 = vunpack.c.h.bf16 %v4389_v50  ;;  %v5393_v59 = vld [vmem:[%s6090_s1 + $0x198] sm:$0xff]  }
  0x30   : > { %4834 = vmatmul.mubr.bf16.gmra.mrb[4].mxu0 %v5623_v16  ;;  %4645 = vmatprep.mubr.bf16.mxu1 %v5626_v17  ;;  %v1816_v52 = vld [vmem:[#allocation2 + $0xc9] sm:$0xff]  ;;  %376 = vst [vmem:[#allocation2 + $0x168] sm:$0xff] %v322_v2  ;;  %377 = vst [vmem:[#allocation2 + $0x170] sm:$0xff] %v323_v3  ;;  %v321_v40 = vunpack.c.l.bf16 %v267_v35  ;;  %v270_v44 = vld [vmem:[%s5537_s16 + $0xbc] sm:$0x1] }
  0x31   : > { %4866 = vmatpush3.bf16.msra.mxu0 %v5372_v7  ;;  %4837 = vmatprep.mubr.bf16.mxu0 %v5628_v18  ;;  %v5690_v0 = vpack.c.bf16 %v1816_v52, %v1815_v47  ;;  %v2173_v7 = vld [vmem:[#allocation2 + $0x32] sm:$0xff]  ;;  %v2180_v45 = vld [vmem:[#allocation2 + $0x82] sm:$0xff]  ;;  %379 = vst [vmem:[#allocation2 + $0x180] sm:$0xff] %v4300_v53  ;;  %380 = vst [vmem:[#allocation2 + $0x188] sm:$0xff] %v4301_v54 }
  0x32   : > { %4867 = vmatprep.subr.bf16.mxu0 %v5373_v20  ;;  %4674 = vmatpush3.bf16.msra.mxu1 %v5375_v5  ;;  %v5381_v5 = vld [vmem:[%s6090_s1 + $0x178] sm:$0xff]   ;;  %v5721_v25 = vpack.c.bf16 %v2174_v11, %v2173_v7  ;;  %v5390_v47 = vld [vmem:[%s6090_s1 + $0x190] sm:$0xff]   ;;  %375 = vst [vmem:[#allocation2 + $0x160] sm:$0x3] %v321_v40  ;;  %v273_v55 = vld [vmem:[%s5537_s16 + $0xc8] sm:$0x1] }
  0x33   : > { %4675 = vmatprep.subr.bf16.mxu1 %v5379_v23  ;;  %v5747_v52 = vld [vmem:[%s5537_s16 + $0x90] sm:$0xff]  ;;  %v327_v58 = vunpack.c.l.bf16 %v273_v55  ;;  %v2182_v3 = vld [vmem:[#allocation2 + $0x9a] sm:$0xff]  ;;  %v5765_v9 = vld [vmem:[%s5537_s16 + $0xa8] sm:$0xff] }
  0x34   : > { %v2181_v2 = vld [vmem:[#allocation2 + $0x92] sm:$0xff]  ;;  %v5395_v7 = vld [vmem:[%s6090_s1 + $0x1a0] sm:$0xff]   ;;  %v5397_v11 = vld [vmem:[%s6090_s1 + $0x1a8] sm:$0xff]  }
  0x35   : > { %4868 = vmatpush3.bf16.msra.mxu0 %v5373_v20  ;;  %v2175_v20 = vld [vmem:[#allocation2 + $0x4a] sm:$0xff]  ;;  %381 = vst [vmem:[#allocation2 + $0x190] sm:$0x3] %v327_v58  ;;  %v2185_v12 = vld [vmem:[#allocation2 + $0xc2] sm:$0xff]  ;;  %v2195_v55 = vld [vmem:[#allocation2 + $0x13a] sm:$0xff] }
  0x36   : > { %4869 = vmatprep.subr.bf16.mxu0 %v5376_v27  ;;  %4676 = vmatpush3.bf16.msra.mxu1 %v5379_v23  ;;  %v5719_v23 = vld [vmem:[%s6090_s1 + $0x80] sm:$0xff]   ;;  %v5727_v29 = vpack.c.bf16 %v2176_v21, %v2175_v20  ;;  %v2186_v13 = vld [vmem:[#allocation2 + $0xca] sm:$0xff] }
  0x37   : > { %4646 = vmatmul.mubr.bf16.gmra.mrb[8].mxu1 %v5579_v42  ;;  %4677 = vmatprep.subr.bf16.mxu1 %v5383_v34  ;;  %v691_v15 = vld [vmem:[#allocation2 + $0x9] sm:$0xff]  ;;  %v2187_v20 = vld [vmem:[#allocation2 + $0xda] sm:$0xff]  ;;  %v5779_v24 = vpack.c.bf16 %v2186_v13, %v2185_v12 }
  0x38   : > { %4838 = vmatmul.mubr.bf16.gmra.mrb[8].mxu0 %v5657_v37  ;;  %4649 = vmatprep.mubr.bf16.mxu1 %v5660_v38  ;;  %v2188_v21 = vld [vmem:[#allocation2 + $0xe2] sm:$0xff]  ;;  %v5399_v22 = vld [vmem:[%s6090_s1 + $0x1b0] sm:$0xff]  }
  0x39   : > { %4870 = vmatpush3.bf16.msra.mxu0 %v5376_v27  ;;  %4841 = vmatprep.mubr.bf16.mxu0 %v5662_v39  ;;  %v261_v27 = vld [vmem:[%s5537_s16 + $0x98] sm:$0x1]  ;;  %v2191_v35 = vld [vmem:[#allocation2 + $0x10a] sm:$0xff]  ;;  %v5792_v40 = vld [vmem:[%s6090_s1 + $0x1c0] sm:$0xff]  }
  0x3a   : > { %4871 = vmatprep.subr.bf16.mxu0 %v5377_v41  ;;  %4678 = vmatpush3.bf16.msra.mxu1 %v5383_v34  ;;  %v315_v30 = vunpack.c.l.bf16 %v261_v27  ;;  %v318_v34 = vunpack.c.l.bf16 %v264_v31  ;;  %v5401_v31 = vld [vmem:[%s6090_s1 + $0x1b8] sm:$0xff]   ;;  %v2193_v50 = vld [vmem:[#allocation2 + $0x122] sm:$0xff]  ;;  %v5398_v54 = vld [vmem:[%s6090_s1 + $0x90] sm:$0xff]  }
  0x3b   : > { %4679 = vmatprep.subr.bf16.mxu1 %v5386_v43  ;;  %v5406_v13 = vld [vmem:[%s6090_s1 + $0xb0] sm:$0xff]  }
  0x3c   : > { %369 = vst [vmem:[#allocation2 + $0x130] sm:$0x3] %v315_v30  ;;  %372 = vst [vmem:[#allocation2 + $0x148] sm:$0x3] %v318_v34  ;;  %v5781_v30 = vpack.c.bf16 %v2188_v21, %v2187_v20  ;;  %v2190_v34 = vld [vmem:[#allocation2 + $0xfa] sm:$0xff]  ;;  %v2202_v12 = vld [vmem:[#allocation2 + $0x18a] sm:$0xff] }
  0x3d   : > { %4872 = vmatpush3.bf16.msra.mxu0 %v5377_v41  ;;  %v2178_v41 = vld [vmem:[#allocation2 + $0x6a] sm:$0xff]  ;;  %v709_v21 = vld [vmem:[#allocation2 + $0xe1] sm:$0xff] }
  0x3e   : > { %4873 = vmatprep.subr.bf16.mxu0 %v5380_v49  ;;  %4680 = vmatpush3.bf16.msra.mxu1 %v5386_v43  ;;  %v2179_v43 = vld [vmem:[#allocation2 + $0x7a] sm:$0xff]  ;;  %v5744_v51 = vpack.c.bf16 %v2178_v41, %v2177_v36  ;;  %v2192_v36 = vld [vmem:[#allocation2 + $0x112] sm:$0xff] }
  0x3f   : > { %4650 = vmatmul.mubr.bf16.gmra.mrb[12].mxu1 %v5598_v61  ;;  %4681 = vmatprep.subr.bf16.mxu1 %v5389_v56 }
  0x40   : > { %4842 = vmatmul.mubr.bf16.gmra.mrb[12].mxu0 %v5690_v0  ;;  %4653 = vmatprep.mubr.bf16.mxu1 %v5693_v1 }
  0x41   : > { %4874 = vmatpush3.bf16.msra.mxu0 %v5380_v49  ;;  %4877 = vmatprep.mubr.bf16.mxu0 %v5697_v4  ;;  %v324_v49 = vunpack.c.l.bf16 %v270_v44  ;;  %v5799_v44 = vpack.c.bf16 %v2192_v36, %v2191_v35  ;;  %v714_v35 = vld [vmem:[#allocation2 + $0x121] sm:$0xff] }
  0x42   : > { %4875 = vmatprep.subr.bf16.mxu0 %v5381_v5  ;;  %4682 = vmatpush3.bf16.msra.mxu1 %v5389_v56  ;;  %v5750_v56 = vpack.c.bf16 %v2180_v45, %v2179_v43  ;;  %v5797_v43 = vld [vmem:[%s5537_s16 + $0xcc] sm:$0xff]  }
  0x43   : > { %4683 = vmatprep.subr.bf16.mxu1 %v5392_v8  ;;  %378 = vst [vmem:[#allocation2 + $0x178] sm:$0x3] %v324_v49  ;;  %v328_v45 = vunpack.c.l.bf16 %v5797_v43  ;;  %v5396_v49 = vld [vmem:[%s6090_s1 + $0x88] sm:$0xff]  }
  0x44   : > { %v2194_v53 = vld [vmem:[#allocation2 + $0x12a] sm:$0xff]  ;;  %v2196_v58 = vld [vmem:[#allocation2 + $0x142] sm:$0xff] }
  0x45   : > { %4876 = vmatpush3.bf16.msra.mxu0 %v5381_v5  ;;  %v2183_v5 = vld [vmem:[#allocation2 + $0xaa] sm:$0xff]  ;;  %382 = vst [vmem:[#allocation2 + $0x198] sm:$0xff] %v328_v45 }
  0x46   : > { %4909 = vmatprep.subr.bf16.mxu0 %v5384_v14  ;;  %4684 = vmatpush3.bf16.msra.mxu1 %v5392_v8  ;;  %v5762_v8 = vpack.c.bf16 %v2182_v3, %v2181_v2  ;;  %v5767_v10 = vpack.c.bf16 %v2184_v6, %v2183_v5  ;;  %v2198_v2 = vld [vmem:[#allocation2 + $0x15a] sm:$0xff]  ;;  %v2199_v3 = vld [vmem:[#allocation2 + $0x16a] sm:$0xff] }
  0x47   : > { %4654 = vmatmul.mubr.bf16.gmra.mrb[16].mxu1 %v5631_v19  ;;  %4717 = vmatprep.subr.bf16.mxu1 %v5719_v23  ;;  %v5402_v6 = vld [vmem:[%s6090_s1 + $0xa0] sm:$0xff]   ;;  %v715_v36 = vld [vmem:[#allocation2 + $0x129] sm:$0xff] }
  0x48   : > { %4878 = vmatmul.mubr.bf16.vlgmr.msra.gmra.mrb[0].mxu0 %v5721_v25  ;;  %4657 = vmatprep.mubr.bf16.mxu1 %v5724_v26  ;;  %v5407_v45 = vld [vmem:[%s6090_s1 + $0x1d0] sm:$0xff]  }
  0x49   : > { %4910 = vmatpush3.bf16.msra.mxu0 %v5384_v14  ;;  %4881 = vmatprep.mubr.bf16.mxu0 %v5727_v29  ;;  %v690_v14 = vld [vmem:[#allocation2 + $0x1] sm:$0xff] }
  0x4a   : > { %4911 = vmatprep.subr.bf16.mxu0 %v5387_v32  ;;  %v722_v27 = vpack.c.bf16 %v691_v15, %v690_v14  ;;  %v2200_v5 = vld [vmem:[#allocation2 + $0x172] sm:$0xff] }
  0x4b   : > { %v276_v14 = vld [vmem:[%s5537_s16 + $0xd4] sm:$0x1] }
  0x4c   : > { %v330_v20 = vunpack.c.l.bf16 %v276_v14  ;;  %v5422_v14 = vld [vmem:[%s6090_s1 + $0x208] sm:$0xff]  }
  0x4d   : > { %4912 = vmatpush3.bf16.msra.mxu0 %v5387_v32  ;;  %v2189_v32 = vld [vmem:[#allocation2 + $0xf2] sm:$0xff] }
  0x4e   : > { %4913 = vmatprep.subr.bf16.mxu0 %v5390_v47  ;;  %v5794_v41 = vpack.c.bf16 %v2190_v34, %v2189_v32  ;;  %384 = vst [vmem:[#allocation2 + $0x1a8] sm:$0x3] %v330_v20  ;;  %v2921_v20 = vld [vmem:[#allocation2 + $0x99] sm:$0xff] }
  0x4f   : > { %4658 = vmatmul.mubr.bf16.gmra.mrb[20].mxu1 %v5650_v33 }
  0x50   : > { %4882 = vmatmul.mubr.bf16.gmra.mrb[4].mxu0 %v5744_v51  ;;  %4661 = vmatprep.mubr.bf16.mxu1 %v5747_v52 }
  0x51   : > { %4885 = vmatprep.mubr.bf16.mxu0 %v5750_v56  ;;  %4914 = vmatpush3.bf16.msra.mxu0 %v5390_v47  ;;  %v329_v47 = vunpack.c.h.bf16 %v5797_v43 }
  0x52   : > { %4915 = vmatprep.subr.bf16.mxu0 %v5393_v59 }
  0x53   : > { %383 = vst [vmem:[#allocation2 + $0x1a0] sm:$0xff] %v329_v47 }
  0x55   : > { %4916 = vmatpush3.bf16.msra.mxu0 %v5393_v59  ;;  %v5817_v59 = vpack.c.bf16 %v2196_v58, %v2195_v55 }
  0x56   : > { %4917 = vmatprep.subr.bf16.mxu0 %v5395_v7 }
  0x57   : > { %4662 = vmatmul.mubr.bf16.gmra.mrb[24].mxu1 %v5673_v46 }
  0x58   : > { %4886 = vmatmul.mubr.bf16.gmra.mrb[8].mxu0 %v5762_v8  ;;  %4665 = vmatprep.mubr.bf16.mxu1 %v5765_v9 }
  0x59   : > { %4889 = vmatprep.mubr.bf16.mxu0 %v5767_v10  ;;  %4918 = vmatpush3.bf16.msra.mxu0 %v5395_v7 }
  0x5a   : > { %4919 = vmatprep.subr.bf16.mxu0 %v5397_v11 }
  0x5d   : > { %4920 = vmatpush3.bf16.msra.mxu0 %v5397_v11  ;;  %v2201_v11 = vld [vmem:[#allocation2 + $0x182] sm:$0xff] }
  0x5e   : > { %4921 = vmatprep.subr.bf16.mxu0 %v5399_v22  ;;  %v2218_v15 = vpack.c.bf16 %v2202_v12, %v2201_v11  ;;  %v2917_v11 = vld [vmem:[#allocation2 + $0x69] sm:$0xff] }
  0x5f   : > { %4666 = vmatmul.mubr.bf16.gmra.mrb[28].mxu1 %v5688_v62 }
  0x60   : > { %4890 = vmatmul.mubr.bf16.gmra.mrb[12].mxu0 %v5779_v24  ;;  %4685 = vmatprep.mubr.bf16.mxu1 %v722_v27  ;;  %v711_v27 = vld [vmem:[#allocation2 + $0xf9] sm:$0xff] }
  0x61   : > { %4893 = vmatprep.mubr.bf16.mxu0 %v5781_v30  ;;  %4922 = vmatpush3.bf16.msra.mxu0 %v5399_v22  ;;  %v710_v22 = vld [vmem:[#allocation2 + $0xf1] sm:$0xff] }
  0x62   : > { %4923 = vmatprep.subr.bf16.mxu0 %v5401_v31  ;;  %v5857_v34 = vpack.c.bf16 %v711_v27, %v710_v22  ;;  %v2923_v22 = vld [vmem:[#allocation2 + $0xb1] sm:$0xff]  ;;  %v2924_v27 = vld [vmem:[#allocation2 + $0xc1] sm:$0xff] }
  0x65   : > { %4924 = vmatpush3.bf16.msra.mxu0 %v5401_v31  ;;  %v5853_v31 = vld [vmem:[%s6090_s1 + $0xc0] sm:$0xff]  }
  0x66   : > { %4957 = vmatprep.subr.bf16.mxu0 %v5792_v40 }
  0x67   : > { %4686 = vmatmul.mubr.bf16.vlgmr.msra.gmra.mrb[0].mxu1 %v5584_v48  ;;  %v5815_v48 = vpack.c.bf16 %v2194_v53, %v2193_v50  ;;  %v718_v50 = vld [vmem:[#allocation2 + $0x151] sm:$0xff]  ;;  %v719_v53 = vld [vmem:[#allocation2 + $0x159] sm:$0xff] }
  0x68   : > { %4894 = vmatmul.mubr.bf16.gmra.mrb[16].mxu0 %v5794_v41  ;;  %4718 = vmatpush3.bf16.msra.mxu1 %v5719_v23  ;;  %v2197_v23 = vld [vmem:[#allocation2 + $0x152] sm:$0xff]  ;;  %v5887_v58 = vpack.c.bf16 %v719_v53, %v718_v50 }
  0x69   : > { %4689 = vmatprep.mubr.bf16.mxu1 %v5592_v57  ;;  %4897 = vmatprep.mubr.bf16.mxu0 %v5799_v44  ;;  %v5400_v57 = vld [vmem:[%s6090_s1 + $0x98] sm:$0xff]   ;;  %v5829_v7 = vpack.c.bf16 %v2198_v2, %v2197_v23  ;;  %v1060_v23 = vld [vmem:[#allocation2 + $0x2] sm:$0xff]  ;;  %v1061_v2 = vld [vmem:[#allocation2 + $0xa] sm:$0xff] }
  0x6a   : > { %4719 = vmatprep.subr.bf16.mxu1 %v5396_v49 }
  0x6c   : > { %4720 = vmatpush3.bf16.msra.mxu1 %v5396_v49  ;;  %v5873_v49 = vpack.c.bf16 %v715_v36, %v714_v35  ;;  %v1432_v35 = vld [vmem:[#allocation2 + $0x20] sm:$0xff]  ;;  %v5429_v36 = vld [vmem:[%s6090_s1 + $0x230] sm:$0xff]  }
  0x6d   : > { %4721 = vmatprep.subr.bf16.mxu1 %v5398_v54 }
  0x6f   : > { %4690 = vmatmul.mubr.bf16.gmra.mrb[4].mxu1 %v5603_v63  ;;  %v5831_v63 = vpack.c.bf16 %v2200_v5, %v2199_v3  ;;  %v5415_v3 = vld [vmem:[%s6090_s1 + $0x1f0] sm:$0xff]  }
  0x70   : > { %4898 = vmatmul.mubr.bf16.gmra.mrb[20].mxu0 %v5815_v48  ;;  %4693 = vmatprep.mubr.bf16.mxu1 %v5623_v16  ;;  %v5404_v16 = vld [vmem:[%s6090_s1 + $0xa8] sm:$0xff]  }
  0x71   : > { %4901 = vmatprep.mubr.bf16.mxu0 %v5817_v59  ;;  %4722 = vmatpush3.bf16.msra.mxu1 %v5398_v54  ;;  %v5411_v54 = vld [vmem:[%s6090_s1 + $0x1e0] sm:$0xff]  }
  0x72   : > { %4723 = vmatprep.subr.bf16.mxu1 %v5400_v57 }
  0x75   : > { %4724 = vmatpush3.bf16.msra.mxu1 %v5400_v57  ;;  %v721_v57 = vld [vmem:[#allocation2 + $0x171] sm:$0xff] }
  0x76   : > { %4725 = vmatprep.subr.bf16.mxu1 %v5402_v6 }
  0x77   : > { %4694 = vmatmul.mubr.bf16.gmra.mrb[8].mxu1 %v5628_v18  ;;  %v5408_v18 = vld [vmem:[%s6090_s1 + $0xb8] sm:$0xff]  }
  0x78   : > { %4902 = vmatmul.mubr.bf16.gmra.mrb[24].mxu0 %v5829_v7  ;;  %4697 = vmatprep.mubr.bf16.mxu1 %v5657_v37  ;;  %v708_v37 = vld [vmem:[#allocation2 + $0xd9] sm:$0xff] }
  0x79   : > { %4905 = vmatprep.mubr.bf16.mxu0 %v5831_v63  ;;  %4726 = vmatpush3.bf16.msra.mxu1 %v5402_v6  ;;  %v5855_v32 = vpack.c.bf16 %v709_v21, %v708_v37  ;;  %v1092_v6 = vpack.c.bf16 %v1061_v2, %v1060_v23 }
  0x7a   : > { %4727 = vmatprep.subr.bf16.mxu1 %v5404_v16 }
  0x7d   : > { %4728 = vmatpush3.bf16.msra.mxu1 %v5404_v16  ;;  %v5412_v16 = vld [vmem:[%s6090_s1 + $0xc8] sm:$0xff]  }
  0x7e   : > { %4729 = vmatprep.subr.bf16.mxu1 %v5406_v13 }
  0x7f   : > { %4698 = vmatmul.mubr.bf16.gmra.mrb[12].mxu1 %v5662_v39  ;;  %v5405_v39 = vld [vmem:[%s6090_s1 + $0x1c8] sm:$0xff]  }
  0x80   : > { %4906 = vmatmul.mubr.bf16.gmra.mrb[28].mxu0 %v2218_v15  ;;  %4701 = vmatprep.mubr.bf16.mxu1 %v5690_v0  ;;  %v713_v0 = vld [vmem:[#allocation2 + $0x111] sm:$0xff] }
  0x81   : > { %4925 = vmatprep.mubr.bf16.mxu0 %v5595_v60  ;;  %4730 = vmatpush3.bf16.msra.mxu1 %v5406_v13  ;;  %v712_v60 = vld [vmem:[#allocation2 + $0x109] sm:$0xff]  ;;  %v2920_v15 = vld [vmem:[#allocation2 + $0x91] sm:$0xff] }
  0x82   : > { %4731 = vmatprep.subr.bf16.mxu1 %v5408_v18  ;;  %v5871_v47 = vpack.c.bf16 %v713_v0, %v712_v60  ;;  %v2948_v21 = vpack.c.bf16 %v2921_v20, %v2920_v15  ;;  %v5437_v20 = vld [vmem:[%s6090_s1 + $0x130] sm:$0xff]  }
  0x85   : > { %4732 = vmatpush3.bf16.msra.mxu1 %v5408_v18  ;;  %v5424_v18 = vld [vmem:[%s6090_s1 + $0x210] sm:$0xff]  }
  0x86   : > { %4765 = vmatprep.subr.bf16.mxu1 %v5853_v31 }
  0x87   : > { %4702 = vmatmul.mubr.bf16.gmra.mrb[16].mxu1 %v5855_v32 }
  0x88   : > { %4926 = vmatmul.mubr.bf16.vlgmr.msra.gmra.mrb[0].mxu0 %v5562_v28  ;;  %4705 = vmatprep.mubr.bf16.mxu1 %v5857_v34  ;;  %v5409_v28 = vld [vmem:[%s6090_s1 + $0x1d8] sm:$0xff]  }
  0x89   : > { %4958 = vmatpush3.bf16.msra.mxu0 %v5792_v40  ;;  %4929 = vmatprep.mubr.bf16.mxu0 %v5626_v17  ;;  %v716_v17 = vld [vmem:[#allocation2 + $0x139] sm:$0xff]  ;;  %v717_v40 = vld [vmem:[#allocation2 + $0x141] sm:$0xff] }
  0x8a   : > { %4959 = vmatprep.subr.bf16.mxu0 %v5405_v39  ;;  %v5885_v55 = vpack.c.bf16 %v717_v40, %v716_v17  ;;  %v1435_v17 = vld [vmem:[#allocation2 + $0x48] sm:$0xff]  ;;  %v1436_v40 = vld [vmem:[#allocation2 + $0x50] sm:$0xff] }
  0x8b   : > { %v1465_v53 = vpack.c.bf16 %v1436_v40, %v1435_v17  ;;  %v3290_v17 = vld [vmem:[#allocation2 + $0x92] sm:$0xff]  ;;  %v3291_v40 = vld [vmem:[#allocation2 + $0x9a] sm:$0xff] }
  0x8d   : > { %4960 = vmatpush3.bf16.msra.mxu0 %v5405_v39  ;;  %v5427_v39 = vld [vmem:[%s6090_s1 + $0x220] sm:$0xff]  }
  0x8e   : > { %4961 = vmatprep.subr.bf16.mxu0 %v5407_v45 }
  0x8f   : > { %4706 = vmatmul.mubr.bf16.gmra.mrb[20].mxu1 %v5871_v47 }
  0x90   : > { %4930 = vmatmul.mubr.bf16.gmra.mrb[4].mxu0 %v5579_v42  ;;  %4709 = vmatprep.mubr.bf16.mxu1 %v5873_v49  ;;  %v5413_v42 = vld [vmem:[%s6090_s1 + $0x1e8] sm:$0xff]  }
  0x91   : > { %4933 = vmatprep.mubr.bf16.mxu0 %v5660_v38  ;;  %4962 = vmatpush3.bf16.msra.mxu0 %v5407_v45  ;;  %v720_v38 = vld [vmem:[#allocation2 + $0x169] sm:$0xff] }
  0x92   : > { %4963 = vmatprep.subr.bf16.mxu0 %v5409_v28  ;;  %v5899_v5 = vpack.c.bf16 %v721_v57, %v720_v38  ;;  %v1440_v38 = vld [vmem:[#allocation2 + $0x80] sm:$0xff]  ;;  %v5432_v57 = vld [vmem:[%s6090_s1 + $0x108] sm:$0xff]  }
  0x95   : > { %4964 = vmatpush3.bf16.msra.mxu0 %v5409_v28  ;;  %v5430_v28 = vld [vmem:[%s6090_s1 + $0x238] sm:$0xff]  }
  0x96   : > { %4965 = vmatprep.subr.bf16.mxu0 %v5411_v54 }
  0x97   : > { %4710 = vmatmul.mubr.bf16.gmra.mrb[24].mxu1 %v5885_v55 }
  0x98   : > { %4934 = vmatmul.mubr.bf16.gmra.mrb[8].mxu0 %v5598_v61  ;;  %4713 = vmatprep.mubr.bf16.mxu1 %v5887_v58  ;;  %v5418_v61 = vld [vmem:[%s6090_s1 + $0x1f8] sm:$0xff]  }
  0x99   : > { %4937 = vmatprep.mubr.bf16.mxu0 %v5693_v1  ;;  %4966 = vmatpush3.bf16.msra.mxu0 %v5411_v54  ;;  %v5420_v1 = vld [vmem:[%s6090_s1 + $0x200] sm:$0xff]  }
  0x9a   : > { %4967 = vmatprep.subr.bf16.mxu0 %v5413_v42  ;;  %v1437_v54 = vld [vmem:[#allocation2 + $0x60] sm:$0xff] }
  0x9d   : > { %4968 = vmatpush3.bf16.msra.mxu0 %v5413_v42  ;;  %v1439_v42 = vld [vmem:[#allocation2 + $0x78] sm:$0xff] }
  0x9e   : > { %4969 = vmatprep.subr.bf16.mxu0 %v5415_v3  ;;  %v1467_v2 = vpack.c.bf16 %v1440_v38, %v1439_v42  ;;  %v1457_v42 = vld [vmem:[#allocation2 + $0x150] sm:$0xff]  ;;  %v1458_v38 = vld [vmem:[#allocation2 + $0x158] sm:$0xff] }
  0x9f   : > { %4714 = vmatmul.mubr.bf16.gmra.mrb[28].mxu1 %v5899_v5 }
  0xa0   : > { %4938 = vmatmul.mubr.bf16.gmra.mrb[12].mxu0 %v5631_v19  ;;  %4733 = vmatprep.mubr.bf16.mxu1 %v1092_v6  ;;  %v5414_v19 = vld [vmem:[%s6090_s1 + $0xd0] sm:$0xff]  }
  0xa1   : > { %4941 = vmatprep.mubr.bf16.mxu0 %v5724_v26  ;;  %4970 = vmatpush3.bf16.msra.mxu0 %v5415_v3  ;;  %v5421_v26 = vld [vmem:[%s6090_s1 + $0xe8] sm:$0xff]   ;;  %v5433_v3 = vld [vmem:[%s6090_s1 + $0x110] sm:$0xff]  }
  0xa2   : > { %4971 = vmatprep.subr.bf16.mxu0 %v5418_v61  ;;  %v1441_v6 = vld [vmem:[#allocation2 + $0x90] sm:$0xff] }
  0xa5   : > { %4972 = vmatpush3.bf16.msra.mxu0 %v5418_v61  ;;  %v1442_v61 = vld [vmem:[#allocation2 + $0x98] sm:$0xff] }
  0xa6   : > { %5005 = vmatprep.subr.bf16.mxu0 %v5420_v1 }
  0xa7   : > { %4734 = vmatmul.mubr.bf16.vlgmr.msra.gmra.mrb[0].mxu1 %v5697_v4  ;;  %v5417_v4 = vld [vmem:[%s6090_s1 + $0xd8] sm:$0xff]  }
  0xa8   : > { %4942 = vmatmul.mubr.bf16.gmra.mrb[16].mxu0 %v5650_v33  ;;  %4766 = vmatpush3.bf16.msra.mxu1 %v5853_v31  ;;  %v5419_v33 = vld [vmem:[%s6090_s1 + $0xe0] sm:$0xff]   ;;  %v2925_v31 = vld [vmem:[#allocation2 + $0xc9] sm:$0xff] }
  0xa9   : > { %4737 = vmatprep.mubr.bf16.mxu1 %v5721_v25  ;;  %4945 = vmatprep.mubr.bf16.mxu0 %v5747_v52  ;;  %v5932_v25 = vld [vmem:[%s5537_s16 + $0xc0] sm:$0xff]  ;;  %v2950_v0 = vpack.c.bf16 %v2925_v31, %v2924_v27  ;;  %v3287_v31 = vld [vmem:[#allocation2 + $0x6a] sm:$0xff] }
  0xaa   : > { %4767 = vmatprep.subr.bf16.mxu1 %v5412_v16  ;;  %v3286_v27 = vld [vmem:[#allocation2 + $0x62] sm:$0xff] }
  0xac   : > { %4768 = vmatpush3.bf16.msra.mxu1 %v5412_v16  ;;  %v1444_v16 = vld [vmem:[#allocation2 + $0xb0] sm:$0xff] }
  0xad   : > { %4769 = vmatprep.subr.bf16.mxu1 %v5414_v19 }
  0xaf   : > { %4738 = vmatmul.mubr.bf16.gmra.mrb[4].mxu1 %v5727_v29  ;;  %v2913_v29 = vld [vmem:[#allocation2 + $0x39] sm:$0xff] }
  0xb0   : > { %4946 = vmatmul.mubr.bf16.gmra.mrb[20].mxu0 %v5673_v46  ;;  %4741 = vmatprep.mubr.bf16.mxu1 %v5744_v51  ;;  %v2912_v46 = vld [vmem:[#allocation2 + $0x31] sm:$0xff] }
  0xb1   : > { %4949 = vmatprep.mubr.bf16.mxu0 %v5765_v9  ;;  %4770 = vmatpush3.bf16.msra.mxu1 %v5414_v19  ;;  %v5423_v51 = vld [vmem:[%s6090_s1 + $0xf0] sm:$0xff]   ;;  %v2944_v52 = vpack.c.bf16 %v2913_v29, %v2912_v46  ;;  %v2916_v9 = vld [vmem:[#allocation2 + $0x61] sm:$0xff] }
  0xb2   : > { %4771 = vmatprep.subr.bf16.mxu1 %v5417_v4  ;;  %v2946_v13 = vpack.c.bf16 %v2917_v11, %v2916_v9  ;;  %v2940_v19 = vld [vmem:[#allocation2 + $0x181] sm:$0xff]  ;;  %v1447_v9 = vld [vmem:[#allocation2 + $0xd8] sm:$0xff] }
  0xb3   : > { %v1448_v11 = vld [vmem:[#allocation2 + $0xe0] sm:$0xff] }
  0xb5   : > { %4772 = vmatpush3.bf16.msra.mxu1 %v5417_v4  ;;  %v2941_v4 = vld [vmem:[#allocation2 + $0x189] sm:$0xff] }
  0xb6   : > { %4773 = vmatprep.subr.bf16.mxu1 %v5419_v33  ;;  %v5996_v29 = vpack.c.bf16 %v2941_v4, %v2940_v19 }
  0xb7   : > { %4742 = vmatmul.mubr.bf16.gmra.mrb[8].mxu1 %v5750_v56  ;;  %v5425_v56 = vld [vmem:[%s6090_s1 + $0xf8] sm:$0xff]  }
  0xb8   : > { %4950 = vmatmul.mubr.bf16.gmra.mrb[24].mxu0 %v5688_v62  ;;  %4745 = vmatprep.mubr.bf16.mxu1 %v5762_v8  ;;  %v2914_v62 = vld [vmem:[#allocation2 + $0x49] sm:$0xff]  ;;  %v2915_v8 = vld [vmem:[#allocation2 + $0x51] sm:$0xff] }
  0xb9   : > { %4953 = vmatprep.mubr.bf16.mxu0 %v5932_v25  ;;  %4774 = vmatpush3.bf16.msra.mxu1 %v5419_v33  ;;  %v2945_v12 = vpack.c.bf16 %v2915_v8, %v2914_v62  ;;  %v5434_v33 = vld [vmem:[%s6090_s1 + $0x118] sm:$0xff]   ;;  %v2943_v8 = vld [vmem:[#allocation2 + $0x1a1] sm:$0xff] }
  0xba   : > { %4775 = vmatprep.subr.bf16.mxu1 %v5421_v26  ;;  %v2942_v62 = vld [vmem:[#allocation2 + $0x199] sm:$0xff] }
  0xbd   : > { %4776 = vmatpush3.bf16.msra.mxu1 %v5421_v26  ;;  %v1468_v26 = vpack.c.bf16 %v1442_v61, %v1441_v6  ;;  %v3294_v6 = vld [vmem:[#allocation2 + $0xc2] sm:$0xff]  ;;  %v3295_v61 = vld [vmem:[#allocation2 + $0xca] sm:$0xff] }
  0xbe   : > { %4777 = vmatprep.subr.bf16.mxu1 %v5423_v51  ;;  %v3320_v4 = vpack.c.bf16 %v3295_v61, %v3294_v6 }
  0xbf   : > { %4746 = vmatmul.mubr.bf16.gmra.mrb[12].mxu1 %v5767_v10  ;;  %v5431_v10 = vld [vmem:[%s6090_s1 + $0x100] sm:$0xff]  }
  0xc0   : > { %4954 = vmatmul.mubr.bf16.gmra.mrb[28].mxu0 %v5797_v43  ;;  %4749 = vmatprep.mubr.bf16.mxu1 %v5779_v24  ;;  %v2918_v24 = vld [vmem:[#allocation2 + $0x79] sm:$0xff]  ;;  %v2919_v43 = vld [vmem:[#allocation2 + $0x81] sm:$0xff] }
  0xc1   : > { %4973 = vmatprep.mubr.bf16.mxu0 %v2944_v52  ;;  %4778 = vmatpush3.bf16.msra.mxu1 %v5423_v51  ;;  %v2947_v37 = vpack.c.bf16 %v2919_v43, %v2918_v24  ;;  %v5435_v51 = vld [vmem:[%s6090_s1 + $0x120] sm:$0xff]   ;;  %v2959_v24 = vpack.c.bf16 %v2943_v8, %v2942_v62  ;;  %v1471_v43 = vpack.c.bf16 %v1448_v11, %v1447_v9  ;;  %v3300_v62 = vld [vmem:[#allocation2 + $0x10a] sm:$0xff]  ;;  %v3301_v8 = vld [vmem:[#allocation2 + $0x112] sm:$0xff] }
  0xc2   : > { %4779 = vmatprep.subr.bf16.mxu1 %v5425_v56  ;;  %v1445_v52 = vld [vmem:[#allocation2 + $0xc0] sm:$0xff]  ;;  %v3303_v11 = vld [vmem:[#allocation2 + $0x12a] sm:$0xff] }
  0xc3   : > { %v3302_v9 = vld [vmem:[#allocation2 + $0x122] sm:$0xff] }
  0xc5   : > { %4780 = vmatpush3.bf16.msra.mxu1 %v5425_v56  ;;  %v1446_v56 = vld [vmem:[#allocation2 + $0xc8] sm:$0xff] }
  0xc6   : > { %5053 = vmatprep.subr.bf16.mxu1 %v5431_v10 }
  0xc7   : > { %4750 = vmatmul.mubr.bf16.gmra.mrb[16].mxu1 %v5781_v30  ;;  %v5426_v30 = vld [vmem:[%s6090_s1 + $0x218] sm:$0xff]  }
  0xc8   : > { %4974 = vmatmul.mubr.bf16.vlgmr.msra.gmra.mrb[0].mxu0 %v2945_v12  ;;  %4753 = vmatprep.mubr.bf16.mxu1 %v5794_v41  ;;  %v2922_v41 = vld [vmem:[#allocation2 + $0xa9] sm:$0xff]  ;;  %v3282_v12 = vld [vmem:[#allocation2 + $0x32] sm:$0xff] }
  0xc9   : > { %5006 = vmatpush3.bf16.msra.mxu0 %v5420_v1  ;;  %4977 = vmatprep.mubr.bf16.mxu0 %v2946_v13  ;;  %v2949_v60 = vpack.c.bf16 %v2923_v22, %v2922_v41  ;;  %v1443_v1 = vld [vmem:[#allocation2 + $0xa8] sm:$0xff]  ;;  %v3283_v13 = vld [vmem:[#allocation2 + $0x3a] sm:$0xff]  ;;  %v1452_v22 = vld [vmem:[#allocation2 + $0x110] sm:$0xff] }
  0xca   : > { %5007 = vmatprep.subr.bf16.mxu0 %v5422_v14  ;;  %v1469_v46 = vpack.c.bf16 %v1444_v16, %v1443_v1  ;;  %v3314_v15 = vpack.c.bf16 %v3283_v13, %v3282_v12  ;;  %v1451_v41 = vld [vmem:[#allocation2 + $0x108] sm:$0xff]  ;;  %v1476_v1 = vpack.c.bf16 %v1458_v38, %v1457_v42  ;;  %v3323_v12 = vpack.c.bf16 %v3301_v8, %v3300_v62 }
  0xcb   : > { %v3324_v13 = vpack.c.bf16 %v3303_v11, %v3302_v9 }
  0xcd   : > { %5008 = vmatpush3.bf16.msra.mxu0 %v5422_v14  ;;  %v5436_v14 = vld [vmem:[%s6090_s1 + $0x128] sm:$0xff]  }
  0xce   : > { %5009 = vmatprep.subr.bf16.mxu0 %v5424_v18 }
  0xcf   : > { %4754 = vmatmul.mubr.bf16.gmra.mrb[20].mxu1 %v5799_v44  ;;  %v5428_v44 = vld [vmem:[%s6090_s1 + $0x228] sm:$0xff]  }
  0xd0   : > { %4978 = vmatmul.mubr.bf16.gmra.mrb[4].mxu0 %v2947_v37  ;;  %4757 = vmatprep.mubr.bf16.mxu1 %v5815_v48  ;;  %v1431_v48 = vld [vmem:[#allocation2 + $0x18] sm:$0xff] }
  0xd1   : > { %4981 = vmatprep.mubr.bf16.mxu0 %v2948_v21  ;;  %5010 = vmatpush3.bf16.msra.mxu0 %v5424_v18  ;;  %v1463_v45 = vpack.c.bf16 %v1432_v35, %v1431_v48  ;;  %v1449_v18 = vld [vmem:[#allocation2 + $0xf0] sm:$0xff]  ;;  %v1450_v37 = vld [vmem:[#allocation2 + $0xf8] sm:$0xff]  ;;  %v3316_v48 = vpack.c.bf16 %v3287_v31, %v3286_v27  ;;  %v1453_v35 = vld [vmem:[#allocation2 + $0x120] sm:$0xff] }
  0xd2   : > { %5011 = vmatprep.subr.bf16.mxu0 %v5426_v30  ;;  %v3284_v21 = vld [vmem:[#allocation2 + $0x4a] sm:$0xff] }
  0xd5   : > { %5012 = vmatpush3.bf16.msra.mxu0 %v5426_v30  ;;  %v3285_v30 = vld [vmem:[#allocation2 + $0x52] sm:$0xff] }
  0xd6   : > { %5013 = vmatprep.subr.bf16.mxu0 %v5427_v39 }
  0xd7   : > { %4758 = vmatmul.mubr.bf16.gmra.mrb[24].mxu1 %v5817_v59  ;;  %v1433_v59 = vld [vmem:[#allocation2 + $0x30] sm:$0xff] }
  0xd8   : > { %4982 = vmatmul.mubr.bf16.gmra.mrb[8].mxu0 %v2949_v60  ;;  %4761 = vmatprep.mubr.bf16.mxu1 %v5829_v7  ;;  %v1434_v7 = vld [vmem:[#allocation2 + $0x38] sm:$0xff]  ;;  %v1472_v60 = vpack.c.bf16 %v1450_v37, %v1449_v18  ;;  %v3310_v18 = vld [vmem:[#allocation2 + $0x182] sm:$0xff] }
  0xd9   : > { %4985 = vmatprep.mubr.bf16.mxu0 %v2950_v0  ;;  %5014 = vmatpush3.bf16.msra.mxu0 %v5427_v39  ;;  %v1464_v50 = vpack.c.bf16 %v1434_v7, %v1433_v59  ;;  %v5438_v39 = vld [vmem:[%s6090_s1 + $0x138] sm:$0xff]   ;;  %v3315_v0 = vpack.c.bf16 %v3285_v30, %v3284_v21  ;;  %v1456_v7 = vld [vmem:[#allocation2 + $0x140] sm:$0xff] }
  0xda   : > { %5015 = vmatprep.subr.bf16.mxu0 %v5428_v44  ;;  %v1455_v59 = vld [vmem:[#allocation2 + $0x138] sm:$0xff]  ;;  %v3313_v30 = vld [vmem:[#allocation2 + $0x1a2] sm:$0xff] }
  0xdd   : > { %5016 = vmatpush3.bf16.msra.mxu0 %v5428_v44  ;;  %v1473_v44 = vpack.c.bf16 %v1452_v22, %v1451_v41 }
  0xde   : > { %5017 = vmatprep.subr.bf16.mxu0 %v5429_v36 }
  0xdf   : > { %4762 = vmatmul.mubr.bf16.gmra.mrb[28].mxu1 %v5831_v63  ;;  %v1438_v63 = vld [vmem:[#allocation2 + $0x68] sm:$0xff] }
  0xe0   : > { %4986 = vmatmul.mubr.bf16.gmra.mrb[12].mxu0 %v5855_v32  ;;  %4781 = vmatprep.mubr.bf16.mxu1 %v1463_v45  ;;  %v1466_v23 = vpack.c.bf16 %v1438_v63, %v1437_v54  ;;  %v3288_v45 = vld [vmem:[#allocation2 + $0x7a] sm:$0xff]  ;;  %v1475_v54 = vpack.c.bf16 %v1456_v7, %v1455_v59  ;;  %v3318_v63 = vpack.c.bf16 %v3291_v40, %v3290_v17 }
  0xe1   : > { %4989 = vmatprep.mubr.bf16.mxu0 %v5857_v34  ;;  %5018 = vmatpush3.bf16.msra.mxu0 %v5429_v36  ;;  %v1454_v36 = vld [vmem:[#allocation2 + $0x128] sm:$0xff]  ;;  %v6024_v17 = vld [vmem:[%s6091_s2] ss:$0 sm:$0xff] }
  0xe2   : > { %5019 = vmatprep.subr.bf16.mxu0 %v5430_v28 }
  0xe5   : > { %5020 = vmatpush3.bf16.msra.mxu0 %v5430_v28  ;;  %v3289_v28 = vld [vmem:[#allocation2 + $0x82] sm:$0xff] }
  0xe7   : > { %4782 = vmatmul.mubr.bf16.vlgmr.msra.gmra.mrb[0].mxu1 %v1464_v50  ;;  %v1474_v50 = vpack.c.bf16 %v1454_v36, %v1453_v35 }
  0xe8   : > { %4990 = vmatmul.mubr.bf16.gmra.mrb[16].mxu0 %v5871_v47  ;;  %5061 = vmatpush3.bf16.msra.mxu1 %v5431_v10  ;;  %v1470_v10 = vpack.c.bf16 %v1446_v56, %v1445_v52 }
  0xe9   : > { %4785 = vmatprep.mubr.bf16.mxu1 %v1465_v53  ;;  %4993 = vmatprep.mubr.bf16.mxu0 %v5873_v49  ;;  %v3317_v53 = vpack.c.bf16 %v3289_v28, %v3288_v45 }
  0xea   : > { %5054 = vmatprep.subr.bf16.mxu1 %v5432_v57 }
  0xec   : > { %5062 = vmatpush3.bf16.msra.mxu1 %v5432_v57  ;;  %v3292_v57 = vld [vmem:[#allocation2 + $0xaa] sm:$0xff] }
  0xed   : > { %5055 = vmatprep.subr.bf16.mxu1 %v5433_v3 }
  0xef   : > { %4786 = vmatmul.mubr.bf16.gmra.mrb[4].mxu1 %v1466_v23  ;;  %v3293_v23 = vld [vmem:[#allocation2 + $0xb2] sm:$0xff] }
  0xf0   : > { %4994 = vmatmul.mubr.bf16.gmra.mrb[20].mxu0 %v5885_v55  ;;  %4789 = vmatprep.mubr.bf16.mxu1 %v1467_v2  ;;  %v1459_v2 = vld [vmem:[#allocation2 + $0x168] sm:$0xff]  ;;  %v3319_v16 = vpack.c.bf16 %v3293_v23, %v3292_v57 }
  0xf1   : > { %4997 = vmatprep.mubr.bf16.mxu0 %v5887_v58  ;;  %5063 = vmatpush3.bf16.msra.mxu1 %v5433_v3  ;;  %v1460_v3 = vld [vmem:[#allocation2 + $0x170] sm:$0xff] }
  0xf2   : > { %5056 = vmatprep.subr.bf16.mxu1 %v5434_v33  ;;  %v1477_v19 = vpack.c.bf16 %v1460_v3, %v1459_v2 }
  0xf5   : > { %5064 = vmatpush3.bf16.msra.mxu1 %v5434_v33  ;;  %v3296_v33 = vld [vmem:[#allocation2 + $0xda] sm:$0xff] }
  0xf6   : > { %5057 = vmatprep.subr.bf16.mxu1 %v5435_v51 }
  0xf7   : > { %4790 = vmatmul.mubr.bf16.gmra.mrb[8].mxu1 %v1468_v26  ;;  %v3297_v26 = vld [vmem:[#allocation2 + $0xe2] sm:$0xff] }
  0xf8   : > { %4998 = vmatmul.mubr.bf16.gmra.mrb[24].mxu0 %v5899_v5  ;;  %4793 = vmatprep.mubr.bf16.mxu1 %v1469_v46  ;;  %v3298_v46 = vld [vmem:[#allocation2 + $0xf2] sm:$0xff]  ;;  %v3321_v52 = vpack.c.bf16 %v3297_v26, %v3296_v33 }
  0xf9   : > { %5001 = vmatprep.mubr.bf16.mxu0 %v5996_v29  ;;  %5065 = vmatpush3.bf16.msra.mxu1 %v5435_v51  ;;  %v3299_v51 = vld [vmem:[#allocation2 + $0xfa] sm:$0xff] }
  0xfa   : > { %5058 = vmatprep.subr.bf16.mxu1 %v5436_v14  ;;  %v3322_v56 = vpack.c.bf16 %v3299_v51, %v3298_v46 }
  0xfd   : > { %5066 = vmatpush3.bf16.msra.mxu1 %v5436_v14  ;;  %v3304_v14 = vld [vmem:[#allocation2 + $0x13a] sm:$0xff] }
  0xfe   : > { %5059 = vmatprep.subr.bf16.mxu1 %v5437_v20 }
  0xff   : > { %4794 = vmatmul.mubr.bf16.gmra.mrb[12].mxu1 %v1470_v10  ;;  %v3305_v10 = vld [vmem:[#allocation2 + $0x142] sm:$0xff] }
 0x100   : > { %5002 = vmatmul.mubr.bf16.gmra.mrb[28].mxu0 %v2959_v24  ;;  %4797 = vmatprep.mubr.bf16.mxu1 %v1471_v43  ;;  %v3306_v24 = vld [vmem:[#allocation2 + $0x152] sm:$0xff]  ;;  %v3325_v43 = vpack.c.bf16 %v3305_v10, %v3304_v14 }
 0x101   : > { %5021 = vmatprep.mubr.bf16.mxu0 %v3314_v15  ;;  %5067 = vmatpush3.bf16.msra.mxu1 %v5437_v20  ;;  %v3309_v20 = vld [vmem:[#allocation2 + $0x172] sm:$0xff] }
 0x102   : > { %5060 = vmatprep.subr.bf16.mxu1 %v5438_v39 }
 0x105   : > { %5068 = vmatpush3.bf16.msra.mxu1 %v5438_v39 }
 0x107   : > { %4798 = vmatmul.mubr.bf16.gmra.mrb[16].mxu1 %v1472_v60 }
 0x108   : > { %5022 = vmatmul.mubr.bf16.vlgmr.msra.gmra.mrb[0].mxu0 %v3315_v0  ;;  %4801 = vmatprep.mubr.bf16.mxu1 %v1473_v44 }
 0x109   : > { %5025 = vmatprep.mubr.bf16.mxu0 %v3316_v48 }
 0x10f   : > { %4802 = vmatmul.mubr.bf16.gmra.mrb[20].mxu1 %v1474_v50 }
 0x110   : > { %5026 = vmatmul.mubr.bf16.gmra.mrb[4].mxu0 %v3317_v53  ;;  %4805 = vmatprep.mubr.bf16.mxu1 %v1475_v54 }
 0x111   : > { %5029 = vmatprep.mubr.bf16.mxu0 %v3318_v63 }
 0x117   : > { %4806 = vmatmul.mubr.bf16.gmra.mrb[24].mxu1 %v1476_v1 }
 0x118   : > { %5030 = vmatmul.mubr.bf16.gmra.mrb[8].mxu0 %v3319_v16  ;;  %4809 = vmatprep.mubr.bf16.mxu1 %v1477_v19 }
 0x119   : > { %5033 = vmatprep.mubr.bf16.mxu0 %v3320_v4 }
 0x11f   : > { %4810 = vmatmul.mubr.bf16.gmra.mrb[28].mxu1 %v5932_v25  ;;  %v3307_v25 = vld [vmem:[#allocation2 + $0x15a] sm:$0xff] }
 0x120   : > { %5034 = vmatmul.mubr.bf16.gmra.mrb[12].mxu0 %v3321_v52  ;;  %4845 = vmatprep.mubr.bf16.mxu1 %v5855_v32  ;;  %v3326_v15 = vpack.c.bf16 %v3307_v25, %v3306_v24  ;;  %v3308_v32 = vld [vmem:[#allocation2 + $0x16a] sm:$0xff] }
 0x121   : > { %5037 = vmatprep.mubr.bf16.mxu0 %v3322_v56  ;;  %v3327_v37 = vpack.c.bf16 %v3309_v20, %v3308_v32 }
 0x127   : > { %4846 = vmatmul.mubr.bf16.vlgmr.msra.gmra.mrb[16].mxu1 %v5857_v34  ;;  %v3311_v34 = vld [vmem:[#allocation2 + $0x18a] sm:$0xff] }
 0x128   : > { %5038 = vmatmul.mubr.bf16.gmra.mrb[16].mxu0 %v3323_v12  ;;  %4849 = vmatprep.mubr.bf16.mxu1 %v5871_v47  ;;  %v3328_v21 = vpack.c.bf16 %v3311_v34, %v3310_v18  ;;  %v3312_v47 = vld [vmem:[#allocation2 + $0x19a] sm:$0xff] }
 0x129   : > { %5041 = vmatprep.mubr.bf16.mxu0 %v3324_v13  ;;  %v3329_v41 = vpack.c.bf16 %v3313_v30, %v3312_v47 }
 0x12f   : > { %4850 = vmatmul.mubr.bf16.gmra.mrb[20].mxu1 %v5873_v49 }
 0x130   : > { %5042 = vmatmul.mubr.bf16.gmra.mrb[20].mxu0 %v3325_v43  ;;  %4853 = vmatprep.mubr.bf16.mxu1 %v5885_v55 }
 0x131   : > { %5045 = vmatprep.mubr.bf16.mxu0 %v3326_v15 }
 0x137   : > { %4854 = vmatmul.mubr.bf16.gmra.mrb[24].mxu1 %v5887_v58 }
 0x138   : > { %5046 = vmatmul.mubr.bf16.gmra.mrb[24].mxu0 %v3327_v37  ;;  %4857 = vmatprep.mubr.bf16.mxu1 %v5899_v5 }
 0x139   : > { %5049 = vmatprep.mubr.bf16.mxu0 %v3328_v21 }
 0x13f   : > { %4858 = vmatmul.mubr.bf16.gmra.mrb[28].mxu1 %v5996_v29 }
 0x140   : > { %5050 = vmatmul.mubr.bf16.gmra.mrb[28].mxu0 %v3329_v41 }
 0x1ba   : > { %v4783_v49 = vpop.f32.mrb[0].mxu1 }
 0x1bb   : > { %v1578_v55 = vpop.f32.mrb[1].mxu1 }
 0x1bc   : > { %v4784_v22 = vpop.f32.mrb[2].mxu1 }
 0x1bd   : > { %v1581_v27 = vpop.f32.mrb[3].mxu1 }
 0x1c2   : > { %v4787_v31 = vpop.f32.mrb[4].mxu1 }
 0x1c3   : > { %v1594_v39 = vpop.f32.mrb[5].mxu1 }
 0x1c4   : > { %v4788_v60 = vpop.f32.mrb[6].mxu1 }
 0x1c5   : > { %v1597_v0 = vpop.f32.mrb[7].mxu1 }
 0x1ca   : > { %v4791_v58 = vpop.f32.mrb[8].mxu1 }
 0x1cb   : > { %v1610_v44 = vpop.f32.mrb[9].mxu1 }
 0x1cc   : > { %v4792_v48 = vpop.f32.mrb[10].mxu1 }
 0x1cd   : > { %v1613_v5 = vpop.f32.mrb[11].mxu1 }
 0x1d2   : > { %v4795_v35 = vpop.f32.mrb[12].mxu1 }
 0x1d3   : > { %v1626_v36 = vpop.f32.mrb[13].mxu1 }
 0x1d4   : > { %v4796_v45 = vpop.f32.mrb[14].mxu1 }
 0x1d5   : > { %v1629_v28 = vpop.f32.mrb[15].mxu1 }
 0x1db   : > { %v5023_v59 = vpop.f32.mrb[0].mxu0 }
 0x1dc   : > { %v5069_v29 = vadd.f32 %v5023_v59, %v4783_v49  ;;  %v3429_v7 = vpop.f32.mrb[1].mxu0 }
 0x1dd   : > { %v5070_v40 = vadd.f32 %v3429_v7, %v1578_v55  ;;  %v5024_v50 = vpop.f32.mrb[2].mxu0 }
 0x1de   : > { %v5071_v53 = vadd.f32 %v5024_v50, %v4784_v22  ;;  %v3432_v54 = vpop.f32.mrb[3].mxu0  ;;  %v3693_v42 = vadd.f32 %v5069_v29, %v6024_v17 }
 0x1df   : > { %v5072_v63 = vadd.f32 %v3432_v54, %v1581_v27  ;;  %v3691_v57 = vadd.f32 %v5070_v40, %v6024_v17 }
 0x1e0   : > { %v3694_v38 = vadd.f32 %v5071_v53, %v6024_v17 }
 0x1e1   : > { %v3692_v23 = vadd.f32 %v5072_v63, %v6024_v17 }
 0x1e2   : > { %v4310_v2 = vpack.c.bf16 %v3694_v38, %v3693_v42 }
 0x1e3   : > { %v4305_v3 = vpack.c.bf16 %v3692_v23, %v3691_v57  ;;  %v5027_v6 = vpop.f32.mrb[4].mxu0 }
 0x1e4   : > { %4390 = vst [vmem:[%s6033_s28 + $0x8] sm:$0xff] %v4310_v2   ;;  %v5073_v61 = vadd.f32 %v5027_v6, %v4787_v31  ;;  %v3445_v1 = vpop.f32.mrb[5].mxu0 }
 0x1e5   : > { %4306 = vst [vmem:[%s6033_s28] sm:$0xff] %v4305_v3   ;;  %v5074_v16 = vadd.f32 %v3445_v1, %v1594_v39  ;;  %v5028_v19 = vpop.f32.mrb[6].mxu0 }
 0x1e6   : > { %v5075_v4 = vadd.f32 %v5028_v19, %v4788_v60  ;;  %v3448_v33 = vpop.f32.mrb[7].mxu0  ;;  %v3697_v46 = vadd.f32 %v5073_v61, %v6024_v17 }
 0x1e7   : > { %v5076_v26 = vadd.f32 %v3448_v33, %v1597_v0  ;;  %v3695_v52 = vadd.f32 %v5074_v16, %v6024_v17 }
 0x1e8   : > { %v3698_v51 = vadd.f32 %v5075_v4, %v6024_v17 }
 0x1e9   : > { %v3696_v56 = vadd.f32 %v5076_v26, %v6024_v17 }
 0x1ea   : > { %v4320_v62 = vpack.c.bf16 %v3698_v51, %v3697_v46 }
 0x1eb   : > { %v4315_v8 = vpack.c.bf16 %v3696_v56, %v3695_v52  ;;  %v5031_v9 = vpop.f32.mrb[8].mxu0 }
 0x1ec   : > { %4392 = vst [vmem:[%s6033_s28 + $0x18] sm:$0xff] %v4320_v62   ;;  %v5077_v11 = vadd.f32 %v5031_v9, %v4791_v58  ;;  %v3461_v12 = vpop.f32.mrb[9].mxu0 }
 0x1ed   : > { %4391 = vst [vmem:[%s6033_s28 + $0x10] sm:$0xff] %v4315_v8   ;;  %v5078_v13 = vadd.f32 %v3461_v12, %v1610_v44  ;;  %v5032_v14 = vpop.f32.mrb[10].mxu0 }
 0x1ee   : > { %v5079_v10 = vadd.f32 %v5032_v14, %v4792_v48  ;;  %v3464_v24 = vpop.f32.mrb[11].mxu0  ;;  %v3701_v43 = vadd.f32 %v5077_v11, %v6024_v17 }
 0x1ef   : > { %v5080_v25 = vadd.f32 %v3464_v24, %v1613_v5  ;;  %v3699_v32 = vadd.f32 %v5078_v13, %v6024_v17 }
 0x1f0   : > { %v3702_v15 = vadd.f32 %v5079_v10, %v6024_v17 }
 0x1f1   : > { %v3700_v20 = vadd.f32 %v5080_v25, %v6024_v17 }
 0x1f2   : > { %v4330_v18 = vpack.c.bf16 %v3702_v15, %v3701_v43 }
 0x1f3   : > { %v4325_v34 = vpack.c.bf16 %v3700_v20, %v3699_v32  ;;  %v5035_v37 = vpop.f32.mrb[12].mxu0 }
 0x1f4   : > { %4394 = vst [vmem:[%s6033_s28 + $0x28] sm:$0xff] %v4330_v18   ;;  %v5081_v21 = vadd.f32 %v5035_v37, %v4795_v35  ;;  %v3477_v47 = vpop.f32.mrb[13].mxu0 }
 0x1f5   : > { %4393 = vst [vmem:[%s6033_s28 + $0x20] sm:$0xff] %v4325_v34   ;;  %v5082_v30 = vadd.f32 %v3477_v47, %v1626_v36  ;;  %v5036_v41 = vpop.f32.mrb[14].mxu0 }
 0x1f6   : > { %v5083_v49 = vadd.f32 %v5036_v41, %v4796_v45  ;;  %v3480_v55 = vpop.f32.mrb[15].mxu0  ;;  %v3705_v27 = vadd.f32 %v5081_v21, %v6024_v17 }
 0x1f7   : > { %v5084_v22 = vadd.f32 %v3480_v55, %v1629_v28  ;;  %v3703_v39 = vadd.f32 %v5082_v30, %v6024_v17 }
 0x1f8   : > { %v3706_v31 = vadd.f32 %v5083_v49, %v6024_v17 }
 0x1f9   : > { %v3704_v60 = vadd.f32 %v5084_v22, %v6024_v17 }
 0x1fa   : > { %v4340_v0 = vpack.c.bf16 %v3706_v31, %v3705_v27  ;;  %v4847_v58 = vpop.f32.mrb[16].mxu1 }
 0x1fb   : > { %v4335_v44 = vpack.c.bf16 %v3704_v60, %v3703_v39  ;;  %v5039_v48 = vpop.f32.mrb[16].mxu0  ;;  %v2012_v5 = vpop.f32.mrb[17].mxu1 }
 0x1fc   : > { %4396 = vst [vmem:[%s6033_s28 + $0x38] sm:$0xff] %v4340_v0   ;;  %v5085_v35 = vadd.f32 %v5039_v48, %v4847_v58  ;;  %v3493_v36 = vpop.f32.mrb[17].mxu0  ;;  %v4848_v45 = vpop.f32.mrb[18].mxu1 }
 0x1fd   : > { %4395 = vst [vmem:[%s6033_s28 + $0x30] sm:$0xff] %v4335_v44   ;;  %v5086_v28 = vadd.f32 %v3493_v36, %v2012_v5  ;;  %v5040_v59 = vpop.f32.mrb[18].mxu0  ;;  %v2015_v29 = vpop.f32.mrb[19].mxu1 }
 0x1fe   : > { %v5087_v7 = vadd.f32 %v5040_v59, %v4848_v45  ;;  %v3496_v40 = vpop.f32.mrb[19].mxu0  ;;  %v3709_v53 = vadd.f32 %v5085_v35, %v6024_v17 }
 0x1ff   : > { %v5088_v50 = vadd.f32 %v3496_v40, %v2015_v29  ;;  %v3707_v63 = vadd.f32 %v5086_v28, %v6024_v17 }
 0x200   : > { %v3710_v54 = vadd.f32 %v5087_v7, %v6024_v17 }
 0x201   : > { %v3708_v42 = vadd.f32 %v5088_v50, %v6024_v17 }
 0x202   : > { %v4350_v38 = vpack.c.bf16 %v3710_v54, %v3709_v53  ;;  %v4851_v57 = vpop.f32.mrb[20].mxu1 }
 0x203   : > { %v4345_v23 = vpack.c.bf16 %v3708_v42, %v3707_v63  ;;  %v5043_v2 = vpop.f32.mrb[20].mxu0  ;;  %v2028_v3 = vpop.f32.mrb[21].mxu1 }
 0x204   : > { %4398 = vst [vmem:[%s6033_s28 + $0x48] sm:$0xff] %v4350_v38   ;;  %v5089_v6 = vadd.f32 %v5043_v2, %v4851_v57  ;;  %v3509_v61 = vpop.f32.mrb[21].mxu0  ;;  %v4852_v1 = vpop.f32.mrb[22].mxu1 }
 0x205   : > { %4397 = vst [vmem:[%s6033_s28 + $0x40] sm:$0xff] %v4345_v23   ;;  %v5090_v16 = vadd.f32 %v3509_v61, %v2028_v3  ;;  %v5044_v19 = vpop.f32.mrb[22].mxu0  ;;  %v2031_v4 = vpop.f32.mrb[23].mxu1 }
 0x206   : > { %v5091_v33 = vadd.f32 %v5044_v19, %v4852_v1  ;;  %v3512_v26 = vpop.f32.mrb[23].mxu0  ;;  %v3713_v51 = vadd.f32 %v5089_v6, %v6024_v17 }
 0x207   : > { %v5092_v46 = vadd.f32 %v3512_v26, %v2031_v4  ;;  %v3711_v56 = vadd.f32 %v5090_v16, %v6024_v17 }
 0x208   : > { %v3714_v52 = vadd.f32 %v5091_v33, %v6024_v17 }
 0x209   : > { %v3712_v62 = vadd.f32 %v5092_v46, %v6024_v17 }
 0x20a   : > { %v4360_v8 = vpack.c.bf16 %v3714_v52, %v3713_v51  ;;  %v4855_v9 = vpop.f32.mrb[24].mxu1 }
 0x20b   : > { %v4355_v11 = vpack.c.bf16 %v3712_v62, %v3711_v56  ;;  %v5047_v12 = vpop.f32.mrb[24].mxu0  ;;  %v2044_v13 = vpop.f32.mrb[25].mxu1 }
 0x20c   : > { %4400 = vst [vmem:[%s6033_s28 + $0x58] sm:$0xff] %v4360_v8   ;;  %v5093_v14 = vadd.f32 %v5047_v12, %v4855_v9  ;;  %v3525_v10 = vpop.f32.mrb[25].mxu0  ;;  %v4856_v24 = vpop.f32.mrb[26].mxu1 }
 0x20d   : > { %4399 = vst [vmem:[%s6033_s28 + $0x50] sm:$0xff] %v4355_v11   ;;  %v5094_v25 = vadd.f32 %v3525_v10, %v2044_v13  ;;  %v5048_v43 = vpop.f32.mrb[26].mxu0  ;;  %v2047_v15 = vpop.f32.mrb[27].mxu1 }
 0x20e   : > { %v5095_v32 = vadd.f32 %v5048_v43, %v4856_v24  ;;  %v3528_v20 = vpop.f32.mrb[27].mxu0  ;;  %v3717_v34 = vadd.f32 %v5093_v14, %v6024_v17 }
 0x20f   : > { %v5096_v18 = vadd.f32 %v3528_v20, %v2047_v15  ;;  %v3715_v21 = vadd.f32 %v5094_v25, %v6024_v17 }
 0x210   : > { %v3718_v37 = vadd.f32 %v5095_v32, %v6024_v17 }
 0x211   : > { %v3716_v47 = vadd.f32 %v5096_v18, %v6024_v17 }
 0x212   : > { %v4370_v30 = vpack.c.bf16 %v3718_v37, %v3717_v34  ;;  %v4859_v41 = vpop.f32.mrb[28].mxu1 }
 0x213   : > { %v4365_v49 = vpack.c.bf16 %v3716_v47, %v3715_v21  ;;  %v5051_v55 = vpop.f32.mrb[28].mxu0  ;;  %v2060_v22 = vpop.f32.mrb[29].mxu1 }
 0x214   : > { %4402 = vst [vmem:[%s6033_s28 + $0x68] sm:$0xff] %v4370_v30   ;;  %v5097_v27 = vadd.f32 %v5051_v55, %v4859_v41  ;;  %v3541_v31 = vpop.f32.mrb[29].mxu0  ;;  %v4860_v39 = vpop.f32.mrb[30].mxu1 }
 0x215   : > { %4401 = vst [vmem:[%s6033_s28 + $0x60] sm:$0xff] %v4365_v49   ;;  %v5098_v60 = vadd.f32 %v3541_v31, %v2060_v22  ;;  %v5052_v0 = vpop.f32.mrb[30].mxu0  ;;  %v2063_v58 = vpop.f32.mrb[31].mxu1 }
 0x216   : > { %v5099_v44 = vadd.f32 %v5052_v0, %v4860_v39  ;;  %v3544_v48 = vpop.f32.mrb[31].mxu0  ;;  %v3721_v35 = vadd.f32 %v5097_v27, %v6024_v17 }
 0x217   : > { %v5100_v5 = vadd.f32 %v3544_v48, %v2063_v58  ;;  %v3719_v45 = vadd.f32 %v5098_v60, %v6024_v17 }
 0x218   : > { %v3722_v36 = vadd.f32 %v5099_v44, %v6024_v17 }
 0x219   : > { %v3720_v28 = vadd.f32 %v5100_v5, %v6024_v17 }
 0x21a   : > { %v4380_v59 = vpack.c.bf16 %v3722_v36, %v3721_v35 }
 0x21b   : > { %v4375_v29 = vpack.c.bf16 %v3720_v28, %v3719_v45 }
 0x21c   : > { %4404 = vst [vmem:[%s6033_s28 + $0x78] sm:$0xff] %v4380_v59  }
 0x21d   : > { %4403 = vst [vmem:[%s6033_s28 + $0x70] sm:$0xff] %v4375_v29  }
 0x21e PF: > { %s13_s14 = sadd.s32 1, %s5461_s14   ;;  %s6093_s12 = smov %s5457_s13 }
 0x21f   : > { %p10_p5 = scmp.ge.s32.totalorder %s13_s14, 4   ;;  %s6094_s13 = smov %s6096_s15 }
 0x221   :  { %12 = sbr.rel (!%p10_p5) target bundleno = 2 (0x2), region = 78 }

// kernel: _lambda_.11
= control target key start
LH: loop header
LB: loop body
LE: loop exit
PB: predicated region body
PF: predicated region fallthrough
CT: control target
= control target key end

     0   :  { %s5528_s12 = smov 0   ;;  %s5530_s13 = smov 0   ;;  %s6232_s0 = inlined_call_operand.vmem [shape: bf16[2,1,18,18,128], index: 0, kind: input, shape index: {}]   ;;  %s6233_s1 = inlined_call_operand.vmem [shape: bf16[9,128,128], index: 1, kind: input, shape index: {}]   ;;  %s6234_s2 = inlined_call_operand.vmem [shape: f32[1,128], index: 2, kind: input, shape index: {}]   ;;  %s6235_s3 = inlined_call_operand.vmem [shape: bf16[2,256,128], index: 3, kind: output, shape index: {}]  }
   0x1   :  { %s5532_s14 = smov 0  }
   0x2 LB: > { %s25_s15 = sadd.s32 1, %s5502_s13  ;;  %p4048_p0 = scmp.ge.s32.totalorder %s5506_s14, 1  ;;  %s5506_s14 = sphi %s5532_s14, %s13_s14   ;;  %s5502_s13 = sphi %s5530_s13, %s6237_s13   ;;  %s5498_s12 = sphi %s5528_s12, %s6236_s12  }
   0x3   : > { %p27_p1 = scmp.ge.s32.totalorder %s25_s15, 2  ;;  %p168_p2 = scmp.lt.s32.totalorder %s5506_s14, 3 }
   0x5   : > { %s6239_s15 = smov (%p27_p1, %s25_s15), 0  ;;  %p169_p3 = pnand %p4048_p0, %p168_p2 }
   0x6   : > { %v5404_v0 = vld [vmem:[%s6233_s1] sm:$0xff] (!%p169_p3)   ;;  %p202_p4 = scmp.lt.s32.totalorder (!%p169_p3), %s5498_s12, 1  ;;  %v5406_v2 = vld [vmem:[%s6233_s1 + $0x8] sm:$0xff] (!%p169_p3)   ;;  %v5408_v4 = vld [vmem:[%s6233_s1 + $0x10] sm:$0xff] (!%p169_p3)  }
   0x7   : > { %172 = sbr.rel (%p169_p3) target bundleno = 542 (0x21e), region = 32  ;;  %v5405_v1 = vld [vmem:[%s6233_s1 + $0x100] sm:$0xff] (!%p169_p3)   ;;  %4675 = vmatprep.subr.bf16.mxu1 (!%p169_p3), %v5404_v0  ;;  %v5407_v3 = vld [vmem:[%s6233_s1 + $0x108] sm:$0xff] (!%p169_p3)   ;;  %v5409_v5 = vld [vmem:[%s6233_s1 + $0x110] sm:$0xff] (!%p169_p3)  }
   0x8   : > { %4867 = vmatprep.subr.bf16.mxu0 (!%p169_p3), %v5405_v1  ;;  %4676 = vmatpush3.bf16.msra.mxu1 (!%p169_p3), %v5404_v0  ;;  %v5410_v6 = vld [vmem:[%s6233_s1 + $0x18] sm:$0xff] (!%p169_p3)   ;;  %v5412_v8 = vld [vmem:[%s6233_s1 + $0x20] sm:$0xff] (!%p169_p3)   ;;  %v5414_v10 = vld [vmem:[%s6233_s1 + $0x28] sm:$0xff] (!%p169_p3)  }
   0x9   : > { %4868 = vmatpush3.bf16.msra.mxu0 (!%p169_p3), %v5405_v1  ;;  %4677 = vmatprep.subr.bf16.mxu1 (!%p169_p3), %v5406_v2  ;;  %v5411_v7 = vld [vmem:[%s6233_s1 + $0x118] sm:$0xff] (!%p169_p3)   ;;  %v5413_v9 = vld [vmem:[%s6233_s1 + $0x120] sm:$0xff] (!%p169_p3)   ;;  %v5415_v14 = vld [vmem:[%s6233_s1 + $0x128] sm:$0xff] (!%p169_p3)  }
   0xa   : > { %4869 = vmatprep.subr.bf16.mxu0 (!%p169_p3), %v5407_v3  ;;  %v5416_v26 = vld [vmem:[%s6233_s1 + $0x30] sm:$0xff] (!%p169_p3)   ;;  %v5418_v35 = vld [vmem:[%s6233_s1 + $0x38] sm:$0xff] (!%p169_p3)   ;;  %v5420_v55 = vld [vmem:[%s6233_s1 + $0x40] sm:$0xff] (!%p169_p3)  }
   0xb   : > { %v5417_v31 = vld [vmem:[%s6233_s1 + $0x130] sm:$0xff] (!%p169_p3)   ;;  %v5419_v44 = vld [vmem:[%s6233_s1 + $0x138] sm:$0xff] (!%p169_p3)   ;;  %v5421_v0 = vld [vmem:[%s6233_s1 + $0x140] sm:$0xff] (!%p169_p3)  }
   0xc   : > { %4678 = vmatpush3.bf16.msra.mxu1 (!%p169_p3), %v5406_v2 }
   0xd   : > { %4870 = vmatpush3.bf16.msra.mxu0 (!%p169_p3), %v5407_v3  ;;  %4679 = vmatprep.subr.bf16.mxu1 (!%p169_p3), %v5408_v4 }
   0xe   : > { %s6241_s12 = smov (!%p202_p4, %s5498_s12), 1  ;;  %4871 = vmatprep.subr.bf16.mxu0 %v5409_v5 }
   0xf   : > { %s5379_s5 = smul.u32 216, %s6241_s12  ;;  %s4287_s24 = sshll.u32 %s6241_s12, 7 }
  0x10   : > { %4680 = vmatpush3.bf16.msra.mxu1 %v5408_v4  ;;  %s6176_s27 = scalar_lea.vmem %s6235_s3, %s4287_s24 }
  0x11   : > { %4872 = vmatpush3.bf16.msra.mxu0 %v5409_v5  ;;  %4681 = vmatprep.subr.bf16.mxu1 %v5410_v6  ;;  %s5582_s16 = scalar_lea.vmem %s6232_s0, %s5379_s5 }
  0x12   : > { %4873 = vmatprep.subr.bf16.mxu0 %v5411_v7  ;;  %v4321_v11 = vld [vmem:[%s5582_s16] sm:$0xff]   ;;  %v226_v12 = vld [vmem:[%s5582_s16 + $0xc] sm:$0xff]   ;;  %v228_v13 = vld [vmem:[%s5582_s16 + $0x14] sm:$0x1] }
  0x13   : > { %v4322_v15 = vunpack.c.l.bf16 %v4321_v11  ;;  %v4323_v16 = vunpack.c.h.bf16 %v4321_v11  ;;  %v280_v17 = vunpack.c.l.bf16 %v226_v12  ;;  %v281_v18 = vunpack.c.h.bf16 %v226_v12  ;;  %v4436_v20 = vld [vmem:[%s5582_s16 + $0x18] sm:$0xff]   ;;  %v231_v21 = vld [vmem:[%s5582_s16 + $0x20] sm:$0x1]  ;;  %v232_v33 = vld [vmem:[%s5582_s16 + $0x24] sm:$0xff]  }
  0x14   : > { %4682 = vmatpush3.bf16.msra.mxu1 %v5410_v6  ;;  %v282_v19 = vunpack.c.l.bf16 %v228_v13  ;;  %v4326_v28 = vunpack.c.l.bf16 %v4436_v20  ;;  %v4327_v29 = vunpack.c.h.bf16 %v4436_v20  ;;  %v285_v30 = vunpack.c.l.bf16 %v231_v21  ;;  %v234_v34 = vld [vmem:[%s5582_s16 + $0x2c] sm:$0x1]  ;;  %v4437_v42 = vld [vmem:[%s5582_s16 + $0x30] sm:$0xff]   ;;  %v237_v43 = vld [vmem:[%s5582_s16 + $0x38] sm:$0x1] }
  0x15   : > { %4874 = vmatpush3.bf16.msra.mxu0 %v5411_v7  ;;  %4683 = vmatprep.subr.bf16.mxu1 %v5412_v8  ;;  %v331_v22 = vmax.f32 %v4322_v15, 0.0  ;;  %v332_v23 = vmax.f32 %v4323_v16, 0.0  ;;  %v5595_v24 = vmax.f32 %v280_v17, 0.0  ;;  %v5597_v25 = vmax.f32 %v281_v18, 0.0  ;;  %v238_v53 = vld [vmem:[%s5582_s16 + $0x3c] sm:$0xff]   ;;  %v4438_v61 = vld [vmem:[%s5582_s16 + $0x48] sm:$0xff]  }
  0x16   : > { %4875 = vmatprep.subr.bf16.mxu0 %v5413_v9  ;;  %v336_v27 = vmax.f32 %v282_v19, 0.0  ;;  %v5612_v36 = vmax.f32 %v4326_v28, 0.0  ;;  %v5614_v37 = vmax.f32 %v4327_v29, 0.0  ;;  %v339_v38 = vmax.f32 %v285_v30, 0.0  ;;  %v240_v54 = vld [vmem:[%s5582_s16 + $0x44] sm:$0x1] }
  0x17   : > { %385 = vst [vmem:[#allocation2] sm:$0xff] %v331_v22  ;;  %386 = vst [vmem:[#allocation2 + $0x8] sm:$0xff] %v332_v23  ;;  %v471_v32 = vpack.c.bf16 %v332_v23, %v331_v22  ;;  %v286_v39 = vunpack.c.l.bf16 %v232_v33  ;;  %v287_v40 = vunpack.c.h.bf16 %v232_v33  ;;  %v288_v41 = vunpack.c.l.bf16 %v234_v34  ;;  %v243_v62 = vld [vmem:[%s5582_s16 + $0x50] sm:$0x1]  ;;  %v5422_v11 = vld [vmem:[%s6233_s1 + $0x148] sm:$0xff]  }
  0x18   : > { %4684 = vmatpush3.bf16.msra.mxu1 %v5412_v8  ;;  %388 = vst [vmem:[#allocation2 + $0x18] sm:$0xff] %v5595_v24  ;;  %389 = vst [vmem:[#allocation2 + $0x20] sm:$0xff] %v5597_v25  ;;  %v4330_v46 = vunpack.c.l.bf16 %v4437_v42  ;;  %v4331_v47 = vunpack.c.h.bf16 %v4437_v42  ;;  %v291_v50 = vunpack.c.l.bf16 %v237_v43  ;;  %v292_v57 = vunpack.c.l.bf16 %v238_v53  ;;  %v244_v17 = vld [vmem:[%s5582_s16 + $0x54] sm:$0xff]   ;;  %v246_v18 = vld [vmem:[%s5582_s16 + $0x5c] sm:$0x1] }
  0x19   : > { %4876 = vmatpush3.bf16.msra.mxu0 %v5413_v9  ;;  %4685 = vmatprep.subr.bf16.mxu1 %v5414_v10  ;;  %390 = vst [vmem:[#allocation2 + $0x28] sm:$0x3] %v336_v27  ;;  %391 = vst [vmem:[#allocation2 + $0x30] sm:$0xff] %v5612_v36  ;;  %v5623_v45 = vmax.f32 %v286_v39, 0.0  ;;  %v5625_v48 = vmax.f32 %v287_v40, 0.0  ;;  %v342_v49 = vmax.f32 %v288_v41, 0.0  ;;  %v293_v58 = vunpack.c.h.bf16 %v238_v53 }
  0x1a   : > { %4877 = vmatprep.subr.bf16.mxu0 %v5415_v14  ;;  %4691 = vmatprep.mubr.bf16.mxu1 %v471_v32  ;;  %392 = vst [vmem:[#allocation2 + $0x38] sm:$0xff] %v5614_v37  ;;  %393 = vst [vmem:[#allocation2 + $0x40] sm:$0x3] %v339_v38  ;;  %v5628_v51 = vmax.f32 %v4330_v46, 0.0  ;;  %v5630_v52 = vmax.f32 %v4331_v47, 0.0  ;;  %v345_v56 = vmax.f32 %v291_v50, 0.0  ;;  %v294_v60 = vunpack.c.l.bf16 %v240_v54 }
  0x1b   : > { %394 = vst [vmem:[#allocation2 + $0x48] sm:$0xff] %v5623_v45  ;;  %395 = vst [vmem:[#allocation2 + $0x50] sm:$0xff] %v5625_v48  ;;  %v5645_v1 = vmax.f32 %v292_v57, 0.0  ;;  %v5647_v2 = vmax.f32 %v293_v58, 0.0  ;;  %v4334_v3 = vunpack.c.l.bf16 %v4438_v61  ;;  %v4335_v4 = vunpack.c.h.bf16 %v4438_v61  ;;  %v5423_v19 = vld [vmem:[%s6233_s1 + $0x48] sm:$0xff]   ;;  %v4439_v23 = vld [vmem:[%s5582_s16 + $0x60] sm:$0xff]  }
  0x1c   : > { %4686 = vmatpush3.bf16.msra.mxu1 %v5414_v10  ;;  %396 = vst [vmem:[#allocation2 + $0x58] sm:$0x3] %v342_v49  ;;  %397 = vst [vmem:[#allocation2 + $0x60] sm:$0xff] %v5628_v51  ;;  %v472_v6 = vpack.c.bf16 %v5597_v25, %v5595_v24  ;;  %v348_v7 = vmax.f32 %v294_v60, 0.0  ;;  %v297_v8 = vunpack.c.l.bf16 %v243_v62  ;;  %v5667_v15 = vpack.c.bf16 %v5614_v37, %v5612_v36  ;;  %v249_v28 = vld [vmem:[%s5582_s16 + $0x68] sm:$0x1] }
  0x1d   : > { %4878 = vmatpush3.bf16.msra.mxu0 %v5415_v14  ;;  %4687 = vmatprep.subr.bf16.mxu1 %v5416_v26  ;;  %398 = vst [vmem:[#allocation2 + $0x68] sm:$0xff] %v5630_v52  ;;  %399 = vst [vmem:[#allocation2 + $0x70] sm:$0x3] %v345_v56  ;;  %v5658_v12 = vmax.f32 %v4334_v3, 0.0  ;;  %v5660_v13 = vmax.f32 %v4335_v4, 0.0  ;;  %v298_v20 = vunpack.c.l.bf16 %v244_v17  ;;  %v299_v21 = vunpack.c.h.bf16 %v244_v17  ;;  %v5426_v30 = vld [vmem:[%s6233_s1 + $0x50] sm:$0xff]  }
  0x1e   : > { %4879 = vmatprep.subr.bf16.mxu0 %v5417_v31  ;;  %400 = vst [vmem:[#allocation2 + $0x78] sm:$0xff] %v5645_v1  ;;  %401 = vst [vmem:[#allocation2 + $0x80] sm:$0xff] %v5647_v2  ;;  %v351_v16 = vmax.f32 %v297_v8, 0.0  ;;  %v300_v22 = vunpack.c.l.bf16 %v246_v18  ;;  %v4339_v27 = vunpack.c.h.bf16 %v4439_v23  ;;  %v303_v36 = vunpack.c.l.bf16 %v249_v28  ;;  %v5424_v39 = vld [vmem:[%s6233_s1 + $0x150] sm:$0xff]   ;;  %v5425_v50 = vld [vmem:[%s6233_s1 + $0x158] sm:$0xff]  }
  0x1f   : > { %v1855_v59 = vld [vmem:[#allocation2 + $0x19] sm:$0xff]  ;;  %402 = vst [vmem:[#allocation2 + $0x88] sm:$0x3] %v348_v7  ;;  %403 = vst [vmem:[#allocation2 + $0x90] sm:$0xff] %v5658_v12  ;;  %v5686_v32 = vmax.f32 %v299_v21, 0.0  ;;  %v5701_v40 = vpack.c.bf16 %v5625_v48, %v5623_v45  ;;  %v250_v47 = vld [vmem:[%s5582_s16 + $0x6c] sm:$0xff]   ;;  %v5736_v61 = vpack.c.bf16 %v5647_v2, %v5645_v1  ;;  %v5750_v1 = vpack.c.bf16 %v5660_v13, %v5658_v12 }
  0x20   : > { %4688 = vmatpush3.bf16.msra.mxu1 %v5416_v26  ;;  %v1856_v63 = vld [vmem:[#allocation2 + $0x21] sm:$0xff]  ;;  %404 = vst [vmem:[#allocation2 + $0x98] sm:$0xff] %v5660_v13  ;;  %405 = vst [vmem:[#allocation2 + $0xa0] sm:$0x3] %v351_v16  ;;  %v4338_v26 = vunpack.c.l.bf16 %v4439_v23  ;;  %v354_v33 = vmax.f32 %v300_v22, 0.0  ;;  %v5691_v38 = vmax.f32 %v4339_v27, 0.0  ;;  %v304_v48 = vunpack.c.l.bf16 %v250_v47 }
  0x21   : > { %4880 = vmatpush3.bf16.msra.mxu0 %v5417_v31  ;;  %4689 = vmatprep.subr.bf16.mxu1 %v5418_v35  ;;  %v5649_v5 = vpack.c.bf16 %v1856_v63, %v1855_v59  ;;  %v1857_v9 = vld [vmem:[#allocation2 + $0x31] sm:$0xff]  ;;  %v1858_v10 = vld [vmem:[#allocation2 + $0x39] sm:$0xff]  ;;  %v5684_v31 = vmax.f32 %v298_v20, 0.0  ;;  %407 = vst [vmem:[#allocation2 + $0xb0] sm:$0xff] %v5686_v32  ;;  %v357_v42 = vmax.f32 %v303_v36, 0.0  ;;  %v305_v49 = vunpack.c.h.bf16 %v250_v47  ;;  %v256_v63 = vld [vmem:[%s5582_s16 + $0x84] sm:$0xff]  }
  0x22   : > { %4881 = vmatprep.subr.bf16.mxu0 %v5419_v44  ;;  %v5663_v14 = vpack.c.bf16 %v1858_v10, %v1857_v9  ;;  %v1859_v24 = vld [vmem:[#allocation2 + $0x49] sm:$0xff]  ;;  %v5689_v37 = vmax.f32 %v4338_v26, 0.0  ;;  %408 = vst [vmem:[#allocation2 + $0xb8] sm:$0x3] %v354_v33  ;;  %410 = vst [vmem:[#allocation2 + $0xc8] sm:$0xff] %v5691_v38  ;;  %v5427_v54 = vld [vmem:[%s6233_s1 + $0x160] sm:$0xff]   ;;  %v311_v7 = vunpack.c.h.bf16 %v256_v63 }
  0x23   : > { %4883 = vmatprep.mubr.bf16.mxu0 %v5649_v5  ;;  %v1860_v25 = vld [vmem:[#allocation2 + $0x51] sm:$0xff]  ;;  %406 = vst [vmem:[#allocation2 + $0xa8] sm:$0xff] %v5684_v31  ;;  %411 = vst [vmem:[#allocation2 + $0xd0] sm:$0x3] %v357_v42  ;;  %v5723_v53 = vmax.f32 %v305_v49, 0.0  ;;  %v5428_v16 = vld [vmem:[%s6233_s1 + $0x168] sm:$0xff]  }
  0x24   : > { %4690 = vmatpush3.bf16.msra.mxu1 %v5418_v35  ;;  %v5679_v29 = vpack.c.bf16 %v1860_v25, %v1859_v24  ;;  %v1861_v34 = vld [vmem:[#allocation2 + $0x61] sm:$0xff]  ;;  %v1862_v35 = vld [vmem:[#allocation2 + $0x69] sm:$0xff]  ;;  %409 = vst [vmem:[#allocation2 + $0xc0] sm:$0xff] %v5689_v37  ;;  %v5758_v10 = vmax.f32 %v311_v7, 0.0  ;;  %v268_v36 = vld [vmem:[%s5582_s16 + $0xb4] sm:$0xff]  }
  0x25   : > { %4882 = vmatpush3.bf16.msra.mxu0 %v5419_v44  ;;  %4723 = vmatprep.subr.bf16.mxu1 %v5420_v55  ;;  %v1863_v41 = vld [vmem:[#allocation2 + $0x79] sm:$0xff]  ;;  %v5705_v43 = vpack.c.bf16 %v1862_v35, %v1861_v34  ;;  %v5709_v44 = vpack.c.bf16 %v5630_v52, %v5628_v51  ;;  %v5721_v52 = vmax.f32 %v304_v48, 0.0  ;;  %413 = vst [vmem:[#allocation2 + $0xe0] sm:$0xff] %v5723_v53  ;;  %v5434_v18 = vld [vmem:[%s6233_s1 + $0x68] sm:$0xff]   ;;  %v5430_v22 = vld [vmem:[%s6233_s1 + $0x170] sm:$0xff]   ;;  %v322_v42 = vunpack.c.l.bf16 %v268_v36 }
  0x26   : > { %4915 = vmatprep.subr.bf16.mxu0 %v5421_v0  ;;  %v1864_v46 = vld [vmem:[#allocation2 + $0x81] sm:$0xff]  ;;  %v5429_v51 = vld [vmem:[%s6233_s1 + $0x58] sm:$0xff]   ;;  %419 = vst [vmem:[#allocation2 + $0x110] sm:$0xff] %v5758_v10  ;;  %v5802_v48 = vpack.c.bf16 %v5691_v38, %v5689_v37  ;;  %v252_v38 = vld [vmem:[%s5582_s16 + $0x74] sm:$0x1] }
  0x27   : > { %4692 = vmatmul.mubr.bf16.vlgmr.msra.gmra.mrb[0].mxu1 %v472_v6  ;;  %v5712_v45 = vpack.c.bf16 %v1864_v46, %v1863_v41  ;;  %v1865_v56 = vld [vmem:[#allocation2 + $0x91] sm:$0xff]  ;;  %v1866_v57 = vld [vmem:[#allocation2 + $0x99] sm:$0xff]  ;;  %412 = vst [vmem:[#allocation2 + $0xd8] sm:$0xff] %v5721_v52  ;;  %v310_v6 = vunpack.c.l.bf16 %v256_v63  ;;  %v4442_v28 = vld [vmem:[%s5582_s16 + $0xa8] sm:$0xff]   ;;  %v323_v46 = vunpack.c.h.bf16 %v268_v36 }
  0x28   : > { %4884 = vmatmul.mubr.bf16.vlgmr.msra.gmra.mrb[0].mxu0 %v5663_v14  ;;  %4724 = vmatpush3.bf16.msra.mxu1 %v5420_v55  ;;  %v4440_v55 = vld [vmem:[%s5582_s16 + $0x78] sm:$0xff]   ;;  %v5746_v8 = vpack.c.bf16 %v1866_v57, %v1865_v56  ;;  %v2226_v33 = vld [vmem:[#allocation2 + $0x22] sm:$0xff]  ;;  %v4350_v34 = vunpack.c.l.bf16 %v4442_v28  ;;  %v4351_v35 = vunpack.c.h.bf16 %v4442_v28  ;;  %v5436_v41 = vld [vmem:[%s6233_s1 + $0x70] sm:$0xff]  }
  0x29   : > { %4916 = vmatpush3.bf16.msra.mxu0 %v5421_v0  ;;  %4695 = vmatprep.mubr.bf16.mxu1 %v5667_v15  ;;  %v4342_v59 = vunpack.c.l.bf16 %v4440_v55  ;;  %v4343_v60 = vunpack.c.h.bf16 %v4440_v55  ;;  %v1868_v62 = vld [vmem:[#allocation2 + $0xb1] sm:$0xff]  ;;  %v5432_v0 = vld [vmem:[%s6233_s1 + $0x60] sm:$0xff]   ;;  %v5756_v9 = vmax.f32 %v310_v6, 0.0  ;;  %v225_v37 = vld [vmem:[%s5582_s16 + $0x8] sm:$0x1] }
  0x2a   : > { %4917 = vmatprep.subr.bf16.mxu0 %v5422_v11  ;;  %4887 = vmatprep.mubr.bf16.mxu0 %v5679_v29  ;;  %v1867_v58 = vld [vmem:[#allocation2 + $0xa9] sm:$0xff]  ;;  %v262_v17 = vld [vmem:[%s5582_s16 + $0x9c] sm:$0xff]   ;;  %v2227_v55 = vld [vmem:[#allocation2 + $0x32] sm:$0xff] }
  0x2b   : > { %4725 = vmatprep.subr.bf16.mxu1 %v5423_v19  ;;  %v5742_v3 = vmax.f32 %v4342_v59, 0.0  ;;  %v5744_v4 = vmax.f32 %v4343_v60, 0.0  ;;  %v5752_v2 = vpack.c.bf16 %v1868_v62, %v1867_v58  ;;  %418 = vst [vmem:[#allocation2 + $0x108] sm:$0xff] %v5756_v9  ;;  %v317_v20 = vunpack.c.h.bf16 %v262_v17  ;;  %v1869_v21 = vld [vmem:[#allocation2 + $0xc1] sm:$0xff]  ;;  %v1870_v25 = vld [vmem:[#allocation2 + $0xc9] sm:$0xff]  ;;  %v5438_v57 = vld [vmem:[%s6233_s1 + $0x78] sm:$0xff]  }
  0x2c   : > { %4726 = vmatpush3.bf16.msra.mxu1 %v5423_v19  ;;  %v316_v19 = vunpack.c.l.bf16 %v262_v17  ;;  %v5798_v47 = vpack.c.bf16 %v1870_v25, %v1869_v21  ;;  %v2228_v56 = vld [vmem:[#allocation2 + $0x3a] sm:$0xff]  ;;  %v279_v58 = vunpack.c.l.bf16 %v225_v37  ;;  %v306_v59 = vunpack.c.l.bf16 %v252_v38  ;;  %v2229_v63 = vld [vmem:[#allocation2 + $0x4a] sm:$0xff]  ;;  %v264_v25 = vld [vmem:[%s5582_s16 + $0xa4] sm:$0x1] }
  0x2d   : > { %4918 = vmatpush3.bf16.msra.mxu0 %v5422_v11  ;;  %4727 = vmatprep.subr.bf16.mxu1 %v5426_v30  ;;  %415 = vst [vmem:[#allocation2 + $0xf0] sm:$0xff] %v5742_v3  ;;  %416 = vst [vmem:[#allocation2 + $0xf8] sm:$0xff] %v5744_v4  ;;  %v4441_v11 = vld [vmem:[%s5582_s16 + $0x90] sm:$0xff]   ;;  %v5783_v27 = vmax.f32 %v317_v20, 0.0  ;;  %v5433_v60 = vld [vmem:[%s6233_s1 + $0x180] sm:$0xff]   ;;  %v5845_v20 = vpack.c.bf16 %v2228_v56, %v2227_v55  ;;  %v5849_v21 = vpack.c.bf16 %v5744_v4, %v5742_v3 }
  0x2e   : > { %4919 = vmatprep.subr.bf16.mxu0 %v5424_v39  ;;  %v4346_v12 = vunpack.c.l.bf16 %v4441_v11  ;;  %v4347_v13 = vunpack.c.h.bf16 %v4441_v11  ;;  %v5781_v26 = vmax.f32 %v316_v19, 0.0  ;;  %v255_v62 = vld [vmem:[%s5582_s16 + $0x80] sm:$0x1]  ;;  %v333_v6 = vmax.f32 %v279_v58, 0.0  ;;  %v261_v19 = vld [vmem:[%s5582_s16 + $0x98] sm:$0x1] }
  0x2f   : > { %4696 = vmatmul.mubr.bf16.gmra.mrb[4].mxu1 %v5701_v40  ;;  %425 = vst [vmem:[#allocation2 + $0x140] sm:$0xff] %v5783_v27  ;;  %v360_v7 = vmax.f32 %v306_v59, 0.0  ;;  %v309_v11 = vunpack.c.l.bf16 %v255_v62  ;;  %v5435_v28 = vld [vmem:[%s6233_s1 + $0x188] sm:$0xff]   ;;  %v5437_v38 = vld [vmem:[%s6233_s1 + $0x190] sm:$0xff]   ;;  %v4443_v55 = vld [vmem:[%s5582_s16 + $0xc0] sm:$0xff]   ;;  %v5870_v56 = vpack.c.bf16 %v5758_v10, %v5756_v9 }
  0x30   : > { %4888 = vmatmul.mubr.bf16.gmra.mrb[4].mxu0 %v5705_v43  ;;  %4699 = vmatprep.mubr.bf16.mxu1 %v5709_v44  ;;  %v5776_v23 = vmax.f32 %v4346_v12, 0.0  ;;  %v5778_v24 = vmax.f32 %v4347_v13, 0.0  ;;  %424 = vst [vmem:[#allocation2 + $0x138] sm:$0xff] %v5781_v26  ;;  %v5837_v12 = vpack.c.bf16 %v5723_v53, %v5721_v52  ;;  %387 = vst [vmem:[#allocation2 + $0x10] sm:$0x3] %v333_v6  ;;  %v5842_v13 = vld [vmem:[%s6233_s1 + $0x80] sm:$0xff]   ;;  %v315_v52 = vunpack.c.l.bf16 %v261_v19 }
  0x31   : > { %4920 = vmatpush3.bf16.msra.mxu0 %v5424_v39  ;;  %4891 = vmatprep.mubr.bf16.mxu0 %v5712_v45  ;;  %v5791_v39 = vpack.c.bf16 %v5686_v32, %v5684_v31  ;;  %v5804_v31 = vmax.f32 %v4350_v34, 0.0  ;;  %v5806_v32 = vmax.f32 %v4351_v35, 0.0  ;;  %414 = vst [vmem:[#allocation2 + $0xe8] sm:$0x3] %v360_v7  ;;  %v363_v17 = vmax.f32 %v309_v11, 0.0  ;;  %v2231_v4 = vld [vmem:[#allocation2 + $0x62] sm:$0xff] }
  0x32   : > { %4921 = vmatprep.subr.bf16.mxu0 %v5425_v50  ;;  %4728 = vmatpush3.bf16.msra.mxu1 %v5426_v30  ;;  %v2225_v30 = vld [vmem:[#allocation2 + $0x1a] sm:$0xff]  ;;  %421 = vst [vmem:[#allocation2 + $0x120] sm:$0xff] %v5776_v23  ;;  %422 = vst [vmem:[#allocation2 + $0x128] sm:$0xff] %v5778_v24  ;;  %v267_v34 = vld [vmem:[%s5582_s16 + $0xb0] sm:$0x1]  ;;  %v4354_v58 = vunpack.c.l.bf16 %v4443_v55  ;;  %v5877_v62 = vpack.c.bf16 %v5778_v24, %v5776_v23 }
  0x33   : > { %4729 = vmatprep.subr.bf16.mxu1 %v5429_v51  ;;  %v5808_v49 = vpack.c.bf16 %v2226_v33, %v2225_v30  ;;  %427 = vst [vmem:[#allocation2 + $0x150] sm:$0xff] %v5804_v31  ;;  %428 = vst [vmem:[#allocation2 + $0x158] sm:$0xff] %v5806_v32  ;;  %v369_v30 = vmax.f32 %v315_v52, 0.0  ;;  %v318_v33 = vunpack.c.l.bf16 %v264_v25  ;;  %v321_v3 = vunpack.c.l.bf16 %v267_v34  ;;  %v2232_v35 = vld [vmem:[#allocation2 + $0x6a] sm:$0xff]  ;;  %v2234_v37 = vld [vmem:[#allocation2 + $0x82] sm:$0xff] }
  0x34   : > { %417 = vst [vmem:[#allocation2 + $0x100] sm:$0x3] %v363_v17  ;;  %v273_v59 = vld [vmem:[%s5582_s16 + $0xc8] sm:$0x1]  ;;  %v379_v7 = vmax.f32 %v4354_v58, 0.0  ;;  %v5439_v9 = vld [vmem:[%s6233_s1 + $0x198] sm:$0xff]   ;;  %v5895_v52 = vpack.c.bf16 %v5783_v27, %v5781_v26  ;;  %v5901_v25 = vpack.c.bf16 %v5806_v32, %v5804_v31 }
  0x35   : > { %4922 = vmatpush3.bf16.msra.mxu0 %v5425_v50  ;;  %v5810_v50 = vmax.f32 %v322_v42, 0.0  ;;  %423 = vst [vmem:[#allocation2 + $0x130] sm:$0x3] %v369_v30  ;;  %v372_v36 = vmax.f32 %v318_v33, 0.0  ;;  %v2233_v42 = vld [vmem:[#allocation2 + $0x7a] sm:$0xff]  ;;  %v2235_v23 = vld [vmem:[#allocation2 + $0x92] sm:$0xff] }
  0x36   : > { %4923 = vmatprep.subr.bf16.mxu0 %v5427_v54  ;;  %4730 = vmatpush3.bf16.msra.mxu1 %v5429_v51  ;;  %v5812_v51 = vmax.f32 %v323_v46, 0.0  ;;  %v375_v46 = vmax.f32 %v321_v3, 0.0  ;;  %v5879_v6 = vpack.c.bf16 %v2234_v37, %v2233_v42  ;;  %433 = vst [vmem:[#allocation2 + $0x180] sm:$0xff] %v379_v7  ;;  %v2237_v17 = vld [vmem:[#allocation2 + $0xaa] sm:$0xff]  ;;  %v5441_v19 = vld [vmem:[%s6233_s1 + $0x1a0] sm:$0xff]   ;;  %v5447_v42 = vld [vmem:[%s6233_s1 + $0x1b8] sm:$0xff]  }
  0x37   : > { %4700 = vmatmul.mubr.bf16.gmra.mrb[8].mxu1 %v5736_v61  ;;  %4731 = vmatprep.subr.bf16.mxu1 %v5432_v0  ;;  %430 = vst [vmem:[#allocation2 + $0x168] sm:$0xff] %v5810_v50  ;;  %426 = vst [vmem:[#allocation2 + $0x148] sm:$0x3] %v372_v36  ;;  %v5443_v30 = vld [vmem:[%s6233_s1 + $0x1a8] sm:$0xff]   ;;  %v2241_v34 = vld [vmem:[#allocation2 + $0xda] sm:$0xff] }
  0x38   : > { %4892 = vmatmul.mubr.bf16.gmra.mrb[8].mxu0 %v5746_v8  ;;  %4703 = vmatprep.mubr.bf16.mxu1 %v5750_v1  ;;  %431 = vst [vmem:[#allocation2 + $0x170] sm:$0xff] %v5812_v51  ;;  %429 = vst [vmem:[#allocation2 + $0x160] sm:$0x3] %v375_v46  ;;  %v2239_v33 = vld [vmem:[#allocation2 + $0xc2] sm:$0xff]  ;;  %v2240_v26 = vld [vmem:[#allocation2 + $0xca] sm:$0xff] }
  0x39   : > { %4924 = vmatpush3.bf16.msra.mxu0 %v5427_v54  ;;  %4895 = vmatprep.mubr.bf16.mxu0 %v5752_v2  ;;  %v5431_v54 = vld [vmem:[%s6233_s1 + $0x178] sm:$0xff]   ;;  %v744_v27 = vld [vmem:[#allocation2 + $0x1] sm:$0xff]  ;;  %v745_v31 = vld [vmem:[#allocation2 + $0x9] sm:$0xff] }
  0x3a   : > { %4925 = vmatprep.subr.bf16.mxu0 %v5428_v16  ;;  %4732 = vmatpush3.bf16.msra.mxu1 %v5432_v0  ;;  %v2230_v0 = vld [vmem:[#allocation2 + $0x52] sm:$0xff]  ;;  %v2242_v3 = vld [vmem:[#allocation2 + $0xe2] sm:$0xff]  ;;  %v776_v36 = vpack.c.bf16 %v745_v31, %v744_v27 }
  0x3b   : > { %4733 = vmatprep.subr.bf16.mxu1 %v5434_v18  ;;  %v5851_v53 = vpack.c.bf16 %v2230_v0, %v2229_v63  ;;  %v4355_v63 = vunpack.c.h.bf16 %v4443_v55  ;;  %v327_v0 = vunpack.c.l.bf16 %v273_v59  ;;  %v5445_v32 = vld [vmem:[%s6233_s1 + $0x1b0] sm:$0xff]   ;;  %v5932_v37 = vld [vmem:[%s6233_s1 + $0x1c0] sm:$0xff]  }
  0x3c   : > { %v2243_v46 = vld [vmem:[#allocation2 + $0xf2] sm:$0xff] }
  0x3d   : > { %4926 = vmatpush3.bf16.msra.mxu0 %v5428_v16  ;;  %v258_v16 = vld [vmem:[%s5582_s16 + $0x8c] sm:$0x1]  ;;  %v380_v10 = vmax.f32 %v4355_v63, 0.0  ;;  %v381_v11 = vmax.f32 %v327_v0, 0.0 }
  0x3e   : > { %4927 = vmatprep.subr.bf16.mxu0 %v5430_v22  ;;  %4734 = vmatpush3.bf16.msra.mxu1 %v5434_v18  ;;  %v312_v18 = vunpack.c.l.bf16 %v258_v16  ;;  %v2236_v16 = vld [vmem:[#allocation2 + $0x9a] sm:$0xff]  ;;  %v5442_v63 = vld [vmem:[%s6233_s1 + $0x88] sm:$0xff]  }
  0x3f   : > { %4704 = vmatmul.mubr.bf16.gmra.mrb[12].mxu1 %v5791_v39  ;;  %4735 = vmatprep.subr.bf16.mxu1 %v5436_v41  ;;  %434 = vst [vmem:[#allocation2 + $0x188] sm:$0xff] %v380_v10  ;;  %435 = vst [vmem:[#allocation2 + $0x190] sm:$0x3] %v381_v11  ;;  %v5887_v24 = vpack.c.bf16 %v380_v10, %v379_v7  ;;  %v2249_v10 = vld [vmem:[#allocation2 + $0x13a] sm:$0xff] }
  0x40   : > { %4896 = vmatmul.mubr.bf16.gmra.mrb[12].mxu0 %v5798_v47  ;;  %4707 = vmatprep.mubr.bf16.mxu1 %v5802_v48 }
  0x41   : > { %4928 = vmatpush3.bf16.msra.mxu0 %v5430_v22  ;;  %4931 = vmatprep.mubr.bf16.mxu0 %v5808_v49  ;;  %v366_v22 = vmax.f32 %v312_v18, 0.0  ;;  %v2238_v18 = vld [vmem:[#allocation2 + $0xb2] sm:$0xff] }
  0x42   : > { %4929 = vmatprep.subr.bf16.mxu0 %v5431_v54  ;;  %4736 = vmatpush3.bf16.msra.mxu1 %v5436_v41  ;;  %v270_v41 = vld [vmem:[%s5582_s16 + $0xbc] sm:$0x1] }
  0x43   : > { %4737 = vmatprep.subr.bf16.mxu1 %v5438_v57  ;;  %420 = vst [vmem:[#allocation2 + $0x118] sm:$0x3] %v366_v22  ;;  %v5897_v22 = vpack.c.bf16 %v2236_v16, %v2235_v23  ;;  %v2248_v23 = vld [vmem:[#allocation2 + $0x12a] sm:$0xff] }
  0x45   : > { %4930 = vmatpush3.bf16.msra.mxu0 %v5431_v54  ;;  %v324_v54 = vunpack.c.l.bf16 %v270_v41  ;;  %v5921_v41 = vpack.c.bf16 %v2242_v3, %v2241_v34  ;;  %v276_v3 = vld [vmem:[%s5582_s16 + $0xd4] sm:$0x1] }
  0x46   : > { %4963 = vmatprep.subr.bf16.mxu0 %v5433_v60  ;;  %4738 = vmatpush3.bf16.msra.mxu1 %v5438_v57  ;;  %v2255_v34 = vld [vmem:[#allocation2 + $0x182] sm:$0xff]  ;;  %v2256_v31 = vld [vmem:[#allocation2 + $0x18a] sm:$0xff] }
  0x47   : > { %4708 = vmatmul.mubr.bf16.gmra.mrb[16].mxu1 %v5837_v12  ;;  %4771 = vmatprep.subr.bf16.mxu1 %v5842_v13  ;;  %v378_v57 = vmax.f32 %v324_v54, 0.0 }
  0x48   : > { %4932 = vmatmul.mubr.bf16.vlgmr.msra.gmra.mrb[0].mxu0 %v5845_v20  ;;  %4711 = vmatprep.mubr.bf16.mxu1 %v5849_v21 }
  0x49   : > { %4964 = vmatpush3.bf16.msra.mxu0 %v5433_v60  ;;  %4935 = vmatprep.mubr.bf16.mxu0 %v5851_v53  ;;  %v5873_v60 = vpack.c.bf16 %v2232_v35, %v2231_v4  ;;  %432 = vst [vmem:[#allocation2 + $0x178] sm:$0x3] %v378_v57  ;;  %v5917_v4 = vpack.c.bf16 %v5812_v51, %v5810_v50  ;;  %v2244_v50 = vld [vmem:[#allocation2 + $0xfa] sm:$0xff]  ;;  %v2245_v51 = vld [vmem:[#allocation2 + $0x10a] sm:$0xff] }
  0x4a   : > { %4965 = vmatprep.subr.bf16.mxu0 %v5435_v28  ;;  %v5919_v35 = vpack.c.bf16 %v2240_v26, %v2239_v33  ;;  %v2246_v54 = vld [vmem:[#allocation2 + $0x112] sm:$0xff]  ;;  %v5935_v55 = vpack.c.bf16 %v2244_v50, %v2243_v46  ;;  %v5448_v26 = vld [vmem:[%s6233_s1 + $0xa0] sm:$0xff]  }
  0x4b   : > { %v5937_v59 = vpack.c.bf16 %v2246_v54, %v2245_v51  ;;  %v763_v50 = vld [vmem:[#allocation2 + $0xe1] sm:$0xff]  ;;  %v764_v51 = vld [vmem:[#allocation2 + $0xf1] sm:$0xff]  ;;  %v765_v54 = vld [vmem:[#allocation2 + $0xf9] sm:$0xff] }
  0x4d   : > { %4966 = vmatpush3.bf16.msra.mxu0 %v5435_v28  ;;  %v5903_v28 = vpack.c.bf16 %v2238_v18, %v2237_v17  ;;  %v5446_v18 = vld [vmem:[%s6233_s1 + $0x98] sm:$0xff]  }
  0x4e   : > { %4967 = vmatprep.subr.bf16.mxu0 %v5437_v38 }
  0x4f   : > { %4712 = vmatmul.mubr.bf16.gmra.mrb[20].mxu1 %v5870_v56 }
  0x50   : > { %4936 = vmatmul.mubr.bf16.gmra.mrb[4].mxu0 %v5873_v60  ;;  %4715 = vmatprep.mubr.bf16.mxu1 %v5877_v62  ;;  %v2254_v33 = vld [vmem:[#allocation2 + $0x172] sm:$0xff] }
  0x51   : > { %4939 = vmatprep.mubr.bf16.mxu0 %v5879_v6  ;;  %4968 = vmatpush3.bf16.msra.mxu0 %v5437_v38  ;;  %v274_v38 = vld [vmem:[%s5582_s16 + $0xcc] sm:$0xff]  }
  0x52   : > { %4969 = vmatprep.subr.bf16.mxu0 %v5439_v9  ;;  %v328_v57 = vunpack.c.l.bf16 %v274_v38  ;;  %v329_v58 = vunpack.c.h.bf16 %v274_v38  ;;  %v5997_v38 = vld [vmem:[%s6233_s1 + $0xc0] sm:$0xff]  }
  0x54   : > { %v5943_v0 = vmax.f32 %v328_v57, 0.0  ;;  %v5945_v7 = vmax.f32 %v329_v58, 0.0  ;;  %v767_v58 = vld [vmem:[#allocation2 + $0x111] sm:$0xff] }
  0x55   : > { %4970 = vmatpush3.bf16.msra.mxu0 %v5439_v9  ;;  %v2247_v9 = vld [vmem:[#allocation2 + $0x122] sm:$0xff] }
  0x56   : > { %4971 = vmatprep.subr.bf16.mxu0 %v5441_v19  ;;  %436 = vst [vmem:[#allocation2 + $0x198] sm:$0xff] %v5943_v0  ;;  %437 = vst [vmem:[#allocation2 + $0x1a0] sm:$0xff] %v5945_v7  ;;  %v2643_v11 = vpack.c.bf16 %v5945_v7, %v5943_v0  ;;  %v5959_v16 = vpack.c.bf16 %v2248_v23, %v2247_v9  ;;  %v769_v9 = vld [vmem:[#allocation2 + $0x129] sm:$0xff]  ;;  %v5476_v0 = vld [vmem:[%s6233_s1 + $0x100] sm:$0xff]  }
  0x57   : > { %4716 = vmatmul.mubr.bf16.gmra.mrb[24].mxu1 %v5895_v52  ;;  %v2973_v7 = vld [vmem:[#allocation2 + $0x81] sm:$0xff] }
  0x58   : > { %4940 = vmatmul.mubr.bf16.gmra.mrb[8].mxu0 %v5897_v22  ;;  %4719 = vmatprep.mubr.bf16.mxu1 %v5901_v25 }
  0x59   : > { %4943 = vmatprep.mubr.bf16.mxu0 %v5903_v28  ;;  %4972 = vmatpush3.bf16.msra.mxu0 %v5441_v19  ;;  %v2252_v19 = vld [vmem:[#allocation2 + $0x15a] sm:$0xff] }
  0x5a   : > { %4973 = vmatprep.subr.bf16.mxu0 %v5443_v30 }
  0x5d   : > { %4974 = vmatpush3.bf16.msra.mxu0 %v5443_v30  ;;  %v2253_v30 = vld [vmem:[#allocation2 + $0x16a] sm:$0xff] }
  0x5e   : > { %4975 = vmatprep.subr.bf16.mxu0 %v5445_v32 }
  0x5f   : > { %4720 = vmatmul.mubr.bf16.gmra.mrb[28].mxu1 %v5917_v4 }
  0x60   : > { %4944 = vmatmul.mubr.bf16.gmra.mrb[12].mxu0 %v5919_v35  ;;  %4739 = vmatprep.mubr.bf16.mxu1 %v776_v36  ;;  %v330_v36 = vunpack.c.l.bf16 %v276_v3  ;;  %v5458_v3 = vld [vmem:[%s6233_s1 + $0xc8] sm:$0xff]  }
  0x61   : > { %4947 = vmatprep.mubr.bf16.mxu0 %v5921_v41  ;;  %4976 = vmatpush3.bf16.msra.mxu0 %v5445_v32  ;;  %v5452_v32 = vld [vmem:[%s6233_s1 + $0xb0] sm:$0xff]  }
  0x62   : > { %4977 = vmatprep.subr.bf16.mxu0 %v5447_v42  ;;  %v384_v46 = vmax.f32 %v330_v36, 0.0 }
  0x64   : > { %438 = vst [vmem:[#allocation2 + $0x1a8] sm:$0x3] %v384_v46  ;;  %v2975_v46 = vld [vmem:[#allocation2 + $0x99] sm:$0xff] }
  0x65   : > { %4978 = vmatpush3.bf16.msra.mxu0 %v5447_v42  ;;  %v2272_v42 = vpack.c.bf16 %v2256_v31, %v2255_v34  ;;  %v5461_v34 = vld [vmem:[%s6233_s1 + $0x1f0] sm:$0xff]  }
  0x66   : > { %5011 = vmatprep.subr.bf16.mxu0 %v5932_v37 }
  0x67   : > { %4740 = vmatmul.mubr.bf16.vlgmr.msra.gmra.mrb[0].mxu1 %v5649_v5  ;;  %v5444_v5 = vld [vmem:[%s6233_s1 + $0x90] sm:$0xff]  }
  0x68   : > { %4948 = vmatmul.mubr.bf16.gmra.mrb[16].mxu0 %v5935_v55  ;;  %4772 = vmatpush3.bf16.msra.mxu1 %v5842_v13  ;;  %v2250_v13 = vld [vmem:[#allocation2 + $0x142] sm:$0xff] }
  0x69   : > { %4743 = vmatprep.mubr.bf16.mxu1 %v5663_v14  ;;  %4951 = vmatprep.mubr.bf16.mxu0 %v5937_v59  ;;  %v5961_v17 = vpack.c.bf16 %v2250_v13, %v2249_v10  ;;  %v2251_v14 = vld [vmem:[#allocation2 + $0x152] sm:$0xff] }
  0x6a   : > { %4773 = vmatprep.subr.bf16.mxu1 %v5442_v63  ;;  %v5973_v27 = vpack.c.bf16 %v2252_v19, %v2251_v14  ;;  %v5453_v10 = vld [vmem:[%s6233_s1 + $0x1d0] sm:$0xff]   ;;  %v5457_v14 = vld [vmem:[%s6233_s1 + $0x1e0] sm:$0xff]  }
  0x6b   : > { %v772_v13 = vld [vmem:[#allocation2 + $0x151] sm:$0xff] }
  0x6c   : > { %4774 = vmatpush3.bf16.msra.mxu1 %v5442_v63  ;;  %v768_v63 = vld [vmem:[#allocation2 + $0x121] sm:$0xff] }
  0x6d   : > { %4775 = vmatprep.subr.bf16.mxu1 %v5444_v5 }
  0x6f   : > { %4744 = vmatmul.mubr.bf16.gmra.mrb[4].mxu1 %v5679_v29  ;;  %v5975_v29 = vpack.c.bf16 %v2254_v33, %v2253_v30  ;;  %v775_v33 = vld [vmem:[#allocation2 + $0x171] sm:$0xff] }
  0x70   : > { %4952 = vmatmul.mubr.bf16.gmra.mrb[20].mxu0 %v5959_v16  ;;  %4747 = vmatprep.mubr.bf16.mxu1 %v5705_v43  ;;  %v5450_v43 = vld [vmem:[%s6233_s1 + $0xa8] sm:$0xff]  }
  0x71   : > { %4955 = vmatprep.mubr.bf16.mxu0 %v5961_v17  ;;  %4776 = vmatpush3.bf16.msra.mxu1 %v5444_v5  ;;  %v6017_v5 = vpack.c.bf16 %v769_v9, %v768_v63  ;;  %v1486_v63 = vld [vmem:[#allocation2 + $0x20] sm:$0xff]  ;;  %v5474_v9 = vld [vmem:[%s6233_s1 + $0x230] sm:$0xff]  }
  0x72   : > { %4777 = vmatprep.subr.bf16.mxu1 %v5446_v18 }
  0x75   : > { %4778 = vmatpush3.bf16.msra.mxu1 %v5446_v18  ;;  %v773_v18 = vld [vmem:[#allocation2 + $0x159] sm:$0xff] }
  0x76   : > { %4779 = vmatprep.subr.bf16.mxu1 %v5448_v26  ;;  %v6031_v30 = vpack.c.bf16 %v773_v18, %v772_v13 }
  0x77   : > { %4748 = vmatmul.mubr.bf16.gmra.mrb[8].mxu1 %v5712_v45  ;;  %v5454_v45 = vld [vmem:[%s6233_s1 + $0xb8] sm:$0xff]  }
  0x78   : > { %4956 = vmatmul.mubr.bf16.gmra.mrb[24].mxu0 %v5973_v27  ;;  %4751 = vmatprep.mubr.bf16.mxu1 %v5746_v8  ;;  %v762_v8 = vld [vmem:[#allocation2 + $0xd9] sm:$0xff] }
  0x79   : > { %4959 = vmatprep.mubr.bf16.mxu0 %v5975_v29  ;;  %4780 = vmatpush3.bf16.msra.mxu1 %v5448_v26  ;;  %v5999_v57 = vpack.c.bf16 %v763_v50, %v762_v8  ;;  %v1114_v26 = vld [vmem:[#allocation2 + $0x2] sm:$0xff] }
  0x7a   : > { %4781 = vmatprep.subr.bf16.mxu1 %v5450_v43 }
  0x7d   : > { %4782 = vmatpush3.bf16.msra.mxu1 %v5450_v43  ;;  %v1115_v43 = vld [vmem:[#allocation2 + $0xa] sm:$0xff] }
  0x7e   : > { %4783 = vmatprep.subr.bf16.mxu1 %v5452_v32 }
  0x7f   : > { %4752 = vmatmul.mubr.bf16.gmra.mrb[12].mxu1 %v5752_v2  ;;  %v6001_v2 = vpack.c.bf16 %v765_v54, %v764_v51  ;;  %v2977_v51 = vld [vmem:[#allocation2 + $0xb1] sm:$0xff]  ;;  %v2978_v54 = vld [vmem:[#allocation2 + $0xc1] sm:$0xff] }
  0x80   : > { %4960 = vmatmul.mubr.bf16.gmra.mrb[28].mxu0 %v2272_v42  ;;  %4755 = vmatprep.mubr.bf16.mxu1 %v5798_v47  ;;  %v5451_v47 = vld [vmem:[%s6233_s1 + $0x1c8] sm:$0xff]  }
  0x81   : > { %4979 = vmatprep.mubr.bf16.mxu0 %v5667_v15  ;;  %4784 = vmatpush3.bf16.msra.mxu1 %v5452_v32  ;;  %v766_v15 = vld [vmem:[#allocation2 + $0x109] sm:$0xff]  ;;  %v1146_v32 = vpack.c.bf16 %v1115_v43, %v1114_v26 }
  0x82   : > { %4785 = vmatprep.subr.bf16.mxu1 %v5454_v45  ;;  %v6015_v23 = vpack.c.bf16 %v767_v58, %v766_v15 }
  0x85   : > { %4786 = vmatpush3.bf16.msra.mxu1 %v5454_v45  ;;  %v5469_v45 = vld [vmem:[%s6233_s1 + $0x210] sm:$0xff]  }
  0x86   : > { %4819 = vmatprep.subr.bf16.mxu1 %v5997_v38 }
  0x87   : > { %4756 = vmatmul.mubr.bf16.gmra.mrb[16].mxu1 %v5999_v57 }
  0x88   : > { %4980 = vmatmul.mubr.bf16.vlgmr.msra.gmra.mrb[0].mxu0 %v5701_v40  ;;  %4759 = vmatprep.mubr.bf16.mxu1 %v6001_v2  ;;  %v5455_v40 = vld [vmem:[%s6233_s1 + $0x1d8] sm:$0xff]  }
  0x89   : > { %5012 = vmatpush3.bf16.msra.mxu0 %v5932_v37  ;;  %4983 = vmatprep.mubr.bf16.mxu0 %v5709_v44  ;;  %v770_v44 = vld [vmem:[#allocation2 + $0x139] sm:$0xff]  ;;  %v771_v37 = vld [vmem:[#allocation2 + $0x141] sm:$0xff] }
  0x8a   : > { %5013 = vmatprep.subr.bf16.mxu0 %v5451_v47  ;;  %v6029_v19 = vpack.c.bf16 %v771_v37, %v770_v44  ;;  %v1489_v44 = vld [vmem:[#allocation2 + $0x48] sm:$0xff]  ;;  %v1490_v37 = vld [vmem:[#allocation2 + $0x50] sm:$0xff] }
  0x8b   : > { %v1519_v18 = vpack.c.bf16 %v1490_v37, %v1489_v44  ;;  %v3344_v44 = vld [vmem:[#allocation2 + $0x92] sm:$0xff]  ;;  %v3345_v37 = vld [vmem:[#allocation2 + $0x9a] sm:$0xff] }
  0x8d   : > { %5014 = vmatpush3.bf16.msra.mxu0 %v5451_v47  ;;  %v5472_v47 = vld [vmem:[%s6233_s1 + $0x220] sm:$0xff]  }
  0x8e   : > { %5015 = vmatprep.subr.bf16.mxu0 %v5453_v10 }
  0x8f   : > { %4760 = vmatmul.mubr.bf16.gmra.mrb[20].mxu1 %v6015_v23 }
  0x90   : > { %4984 = vmatmul.mubr.bf16.gmra.mrb[4].mxu0 %v5736_v61  ;;  %4763 = vmatprep.mubr.bf16.mxu1 %v6017_v5  ;;  %v5459_v61 = vld [vmem:[%s6233_s1 + $0x1e8] sm:$0xff]  }
  0x91   : > { %4987 = vmatprep.mubr.bf16.mxu0 %v5750_v1  ;;  %5016 = vmatpush3.bf16.msra.mxu0 %v5453_v10  ;;  %v774_v1 = vld [vmem:[#allocation2 + $0x169] sm:$0xff] }
  0x92   : > { %5017 = vmatprep.subr.bf16.mxu0 %v5455_v40  ;;  %v6043_v31 = vpack.c.bf16 %v775_v33, %v774_v1  ;;  %v1494_v1 = vld [vmem:[#allocation2 + $0x80] sm:$0xff]  ;;  %v5477_v33 = vld [vmem:[%s6233_s1 + $0x108] sm:$0xff]  }
  0x95   : > { %5018 = vmatpush3.bf16.msra.mxu0 %v5455_v40  ;;  %v5475_v40 = vld [vmem:[%s6233_s1 + $0x238] sm:$0xff]  }
  0x96   : > { %5019 = vmatprep.subr.bf16.mxu0 %v5457_v14 }
  0x97   : > { %4764 = vmatmul.mubr.bf16.gmra.mrb[24].mxu1 %v6029_v19 }
  0x98   : > { %4988 = vmatmul.mubr.bf16.gmra.mrb[8].mxu0 %v5791_v39  ;;  %4767 = vmatprep.mubr.bf16.mxu1 %v6031_v30  ;;  %v5463_v39 = vld [vmem:[%s6233_s1 + $0x1f8] sm:$0xff]  }
  0x99   : > { %4991 = vmatprep.mubr.bf16.mxu0 %v5802_v48  ;;  %5020 = vmatpush3.bf16.msra.mxu0 %v5457_v14  ;;  %v5465_v48 = vld [vmem:[%s6233_s1 + $0x200] sm:$0xff]  }
  0x9a   : > { %5021 = vmatprep.subr.bf16.mxu0 %v5459_v61  ;;  %v1491_v14 = vld [vmem:[#allocation2 + $0x60] sm:$0xff] }
  0x9d   : > { %5022 = vmatpush3.bf16.msra.mxu0 %v5459_v61  ;;  %v1493_v61 = vld [vmem:[#allocation2 + $0x78] sm:$0xff] }
  0x9e   : > { %5023 = vmatprep.subr.bf16.mxu0 %v5461_v34  ;;  %v1521_v43 = vpack.c.bf16 %v1494_v1, %v1493_v61  ;;  %v1511_v61 = vld [vmem:[#allocation2 + $0x150] sm:$0xff]  ;;  %v1512_v1 = vld [vmem:[#allocation2 + $0x158] sm:$0xff] }
  0x9f   : > { %4768 = vmatmul.mubr.bf16.gmra.mrb[28].mxu1 %v6043_v31 }
  0xa0   : > { %4992 = vmatmul.mubr.bf16.gmra.mrb[12].mxu0 %v5837_v12  ;;  %4787 = vmatprep.mubr.bf16.mxu1 %v1146_v32  ;;  %v5460_v12 = vld [vmem:[%s6233_s1 + $0xd0] sm:$0xff]  }
  0xa1   : > { %4995 = vmatprep.mubr.bf16.mxu0 %v5849_v21  ;;  %5024 = vmatpush3.bf16.msra.mxu0 %v5461_v34  ;;  %v5462_v21 = vld [vmem:[%s6233_s1 + $0xd8] sm:$0xff]   ;;  %v5478_v34 = vld [vmem:[%s6233_s1 + $0x110] sm:$0xff]  }
  0xa2   : > { %5025 = vmatprep.subr.bf16.mxu0 %v5463_v39  ;;  %v1495_v32 = vld [vmem:[#allocation2 + $0x90] sm:$0xff] }
  0xa5   : > { %5026 = vmatpush3.bf16.msra.mxu0 %v5463_v39  ;;  %v1496_v39 = vld [vmem:[#allocation2 + $0x98] sm:$0xff] }
  0xa6   : > { %5059 = vmatprep.subr.bf16.mxu0 %v5465_v48 }
  0xa7   : > { %4788 = vmatmul.mubr.bf16.vlgmr.msra.gmra.mrb[0].mxu1 %v5808_v49  ;;  %v5464_v49 = vld [vmem:[%s6233_s1 + $0xe0] sm:$0xff]  }
  0xa8   : > { %4996 = vmatmul.mubr.bf16.gmra.mrb[16].mxu0 %v5870_v56  ;;  %4820 = vmatpush3.bf16.msra.mxu1 %v5997_v38  ;;  %v2967_v56 = vld [vmem:[#allocation2 + $0x39] sm:$0xff]  ;;  %v2979_v38 = vld [vmem:[#allocation2 + $0xc9] sm:$0xff] }
  0xa9   : > { %4791 = vmatprep.mubr.bf16.mxu1 %v5845_v20  ;;  %4999 = vmatprep.mubr.bf16.mxu0 %v5877_v62  ;;  %v5466_v20 = vld [vmem:[%s6233_s1 + $0xe8] sm:$0xff]   ;;  %v3004_v58 = vpack.c.bf16 %v2979_v38, %v2978_v54 }
  0xaa   : > { %4821 = vmatprep.subr.bf16.mxu1 %v5458_v3  ;;  %v3340_v54 = vld [vmem:[#allocation2 + $0x62] sm:$0xff]  ;;  %v3341_v38 = vld [vmem:[#allocation2 + $0x6a] sm:$0xff] }
  0xac   : > { %4822 = vmatpush3.bf16.msra.mxu1 %v5458_v3  ;;  %v1498_v3 = vld [vmem:[#allocation2 + $0xb0] sm:$0xff] }
  0xad   : > { %4823 = vmatprep.subr.bf16.mxu1 %v5460_v12 }
  0xaf   : > { %4792 = vmatmul.mubr.bf16.gmra.mrb[4].mxu1 %v5851_v53  ;;  %v2966_v53 = vld [vmem:[#allocation2 + $0x31] sm:$0xff] }
  0xb0   : > { %5000 = vmatmul.mubr.bf16.gmra.mrb[20].mxu0 %v5895_v52  ;;  %4795 = vmatprep.mubr.bf16.mxu1 %v5873_v60  ;;  %v5468_v60 = vld [vmem:[%s6233_s1 + $0xf0] sm:$0xff]   ;;  %v2998_v62 = vpack.c.bf16 %v2967_v56, %v2966_v53 }
  0xb1   : > { %5003 = vmatprep.mubr.bf16.mxu0 %v5901_v25  ;;  %4824 = vmatpush3.bf16.msra.mxu1 %v5460_v12  ;;  %v2968_v52 = vld [vmem:[#allocation2 + $0x49] sm:$0xff]  ;;  %v2970_v25 = vld [vmem:[#allocation2 + $0x61] sm:$0xff] }
  0xb2   : > { %4825 = vmatprep.subr.bf16.mxu1 %v5462_v21  ;;  %v2994_v12 = vld [vmem:[#allocation2 + $0x181] sm:$0xff] }
  0xb5   : > { %4826 = vmatpush3.bf16.msra.mxu1 %v5462_v21  ;;  %v2995_v21 = vld [vmem:[#allocation2 + $0x189] sm:$0xff] }
  0xb6   : > { %4827 = vmatprep.subr.bf16.mxu1 %v5464_v49  ;;  %v6139_v56 = vpack.c.bf16 %v2995_v21, %v2994_v12 }
  0xb7   : > { %4796 = vmatmul.mubr.bf16.gmra.mrb[8].mxu1 %v5879_v6  ;;  %v5470_v6 = vld [vmem:[%s6233_s1 + $0xf8] sm:$0xff]  }
  0xb8   : > { %5004 = vmatmul.mubr.bf16.gmra.mrb[24].mxu0 %v5917_v4  ;;  %4799 = vmatprep.mubr.bf16.mxu1 %v5897_v22  ;;  %v2969_v22 = vld [vmem:[#allocation2 + $0x51] sm:$0xff]  ;;  %v2971_v4 = vld [vmem:[#allocation2 + $0x69] sm:$0xff] }
  0xb9   : > { %5007 = vmatprep.mubr.bf16.mxu0 %v5887_v24  ;;  %4828 = vmatpush3.bf16.msra.mxu1 %v5464_v49  ;;  %v2999_v36 = vpack.c.bf16 %v2969_v22, %v2968_v52  ;;  %v3000_v42 = vpack.c.bf16 %v2971_v4, %v2970_v25  ;;  %v5479_v49 = vld [vmem:[%s6233_s1 + $0x118] sm:$0xff]   ;;  %v2997_v22 = vld [vmem:[#allocation2 + $0x1a1] sm:$0xff] }
  0xba   : > { %4829 = vmatprep.subr.bf16.mxu1 %v5466_v20  ;;  %v2996_v52 = vld [vmem:[#allocation2 + $0x199] sm:$0xff] }
  0xbb   : > { %v1501_v25 = vld [vmem:[#allocation2 + $0xd8] sm:$0xff]  ;;  %v1502_v4 = vld [vmem:[#allocation2 + $0xe0] sm:$0xff] }
  0xbd   : > { %4830 = vmatpush3.bf16.msra.mxu1 %v5466_v20  ;;  %v1522_v20 = vpack.c.bf16 %v1496_v39, %v1495_v32  ;;  %v3348_v32 = vld [vmem:[#allocation2 + $0xc2] sm:$0xff]  ;;  %v3349_v39 = vld [vmem:[#allocation2 + $0xca] sm:$0xff] }
  0xbe   : > { %4831 = vmatprep.subr.bf16.mxu1 %v5468_v60  ;;  %v3374_v21 = vpack.c.bf16 %v3349_v39, %v3348_v32 }
  0xbf   : > { %4800 = vmatmul.mubr.bf16.gmra.mrb[12].mxu1 %v5903_v28  ;;  %v5467_v28 = vld [vmem:[%s6233_s1 + $0x208] sm:$0xff]  }
  0xc0   : > { %5008 = vmatmul.mubr.bf16.gmra.mrb[28].mxu0 %v2643_v11  ;;  %4803 = vmatprep.mubr.bf16.mxu1 %v5919_v35  ;;  %v2972_v35 = vld [vmem:[#allocation2 + $0x79] sm:$0xff]  ;;  %v2974_v11 = vld [vmem:[#allocation2 + $0x91] sm:$0xff] }
  0xc1   : > { %5027 = vmatprep.mubr.bf16.mxu0 %v2998_v62  ;;  %4832 = vmatpush3.bf16.msra.mxu1 %v5468_v60  ;;  %v3001_v8 = vpack.c.bf16 %v2973_v7, %v2972_v35  ;;  %v3002_v50 = vpack.c.bf16 %v2975_v46, %v2974_v11  ;;  %v5480_v60 = vld [vmem:[%s6233_s1 + $0x120] sm:$0xff]   ;;  %v3013_v35 = vpack.c.bf16 %v2997_v22, %v2996_v52  ;;  %v5482_v46 = vld [vmem:[%s6233_s1 + $0x130] sm:$0xff]  }
  0xc2   : > { %4833 = vmatprep.subr.bf16.mxu1 %v5470_v6  ;;  %v1499_v62 = vld [vmem:[#allocation2 + $0xc0] sm:$0xff]  ;;  %v1525_v7 = vpack.c.bf16 %v1502_v4, %v1501_v25  ;;  %v3354_v52 = vld [vmem:[#allocation2 + $0x10a] sm:$0xff]  ;;  %v3355_v22 = vld [vmem:[#allocation2 + $0x112] sm:$0xff] }
  0xc3   : > { %v3356_v25 = vld [vmem:[#allocation2 + $0x122] sm:$0xff]  ;;  %v3357_v4 = vld [vmem:[#allocation2 + $0x12a] sm:$0xff] }
  0xc5   : > { %4834 = vmatpush3.bf16.msra.mxu1 %v5470_v6  ;;  %v1500_v6 = vld [vmem:[#allocation2 + $0xc8] sm:$0xff] }
  0xc6   : > { %5107 = vmatprep.subr.bf16.mxu1 %v5476_v0 }
  0xc7   : > { %4804 = vmatmul.mubr.bf16.gmra.mrb[16].mxu1 %v5921_v41  ;;  %v5471_v41 = vld [vmem:[%s6233_s1 + $0x218] sm:$0xff]  }
  0xc8   : > { %5028 = vmatmul.mubr.bf16.vlgmr.msra.gmra.mrb[0].mxu0 %v2999_v36  ;;  %4807 = vmatprep.mubr.bf16.mxu1 %v5935_v55  ;;  %v2976_v55 = vld [vmem:[#allocation2 + $0xa9] sm:$0xff]  ;;  %v3336_v36 = vld [vmem:[#allocation2 + $0x32] sm:$0xff] }
  0xc9   : > { %5060 = vmatpush3.bf16.msra.mxu0 %v5465_v48  ;;  %5031 = vmatprep.mubr.bf16.mxu0 %v3000_v42  ;;  %v3003_v15 = vpack.c.bf16 %v2977_v51, %v2976_v55  ;;  %v1497_v48 = vld [vmem:[#allocation2 + $0xa8] sm:$0xff]  ;;  %v3337_v42 = vld [vmem:[#allocation2 + $0x3a] sm:$0xff]  ;;  %v1506_v51 = vld [vmem:[#allocation2 + $0x110] sm:$0xff] }
  0xca   : > { %5061 = vmatprep.subr.bf16.mxu0 %v5467_v28  ;;  %v1523_v53 = vpack.c.bf16 %v1498_v3, %v1497_v48  ;;  %v3368_v11 = vpack.c.bf16 %v3337_v42, %v3336_v36  ;;  %v1505_v55 = vld [vmem:[#allocation2 + $0x108] sm:$0xff]  ;;  %v1530_v48 = vpack.c.bf16 %v1512_v1, %v1511_v61  ;;  %v3377_v36 = vpack.c.bf16 %v3355_v22, %v3354_v52 }
  0xcb   : > { %v3378_v42 = vpack.c.bf16 %v3357_v4, %v3356_v25 }
  0xcd   : > { %5062 = vmatpush3.bf16.msra.mxu0 %v5467_v28  ;;  %v5481_v28 = vld [vmem:[%s6233_s1 + $0x128] sm:$0xff]  }
  0xce   : > { %5063 = vmatprep.subr.bf16.mxu0 %v5469_v45 }
  0xcf   : > { %4808 = vmatmul.mubr.bf16.gmra.mrb[20].mxu1 %v5937_v59  ;;  %v5473_v59 = vld [vmem:[%s6233_s1 + $0x228] sm:$0xff]  }
  0xd0   : > { %5032 = vmatmul.mubr.bf16.gmra.mrb[4].mxu0 %v3001_v8  ;;  %4811 = vmatprep.mubr.bf16.mxu1 %v5959_v16  ;;  %v1485_v16 = vld [vmem:[#allocation2 + $0x18] sm:$0xff] }
  0xd1   : > { %5035 = vmatprep.mubr.bf16.mxu0 %v3002_v50  ;;  %5064 = vmatpush3.bf16.msra.mxu0 %v5469_v45  ;;  %v1517_v10 = vpack.c.bf16 %v1486_v63, %v1485_v16  ;;  %v1503_v45 = vld [vmem:[#allocation2 + $0xf0] sm:$0xff]  ;;  %v1504_v8 = vld [vmem:[#allocation2 + $0xf8] sm:$0xff]  ;;  %v3370_v16 = vpack.c.bf16 %v3341_v38, %v3340_v54  ;;  %v1507_v63 = vld [vmem:[#allocation2 + $0x120] sm:$0xff] }
  0xd2   : > { %5065 = vmatprep.subr.bf16.mxu0 %v5471_v41  ;;  %v3338_v50 = vld [vmem:[#allocation2 + $0x4a] sm:$0xff] }
  0xd5   : > { %5066 = vmatpush3.bf16.msra.mxu0 %v5471_v41  ;;  %v3339_v41 = vld [vmem:[#allocation2 + $0x52] sm:$0xff] }
  0xd6   : > { %5067 = vmatprep.subr.bf16.mxu0 %v5472_v47 }
  0xd7   : > { %4812 = vmatmul.mubr.bf16.gmra.mrb[24].mxu1 %v5961_v17  ;;  %v1487_v17 = vld [vmem:[#allocation2 + $0x30] sm:$0xff] }
  0xd8   : > { %5036 = vmatmul.mubr.bf16.gmra.mrb[8].mxu0 %v3003_v15  ;;  %4815 = vmatprep.mubr.bf16.mxu1 %v5973_v27  ;;  %v1488_v27 = vld [vmem:[#allocation2 + $0x38] sm:$0xff]  ;;  %v1526_v15 = vpack.c.bf16 %v1504_v8, %v1503_v45  ;;  %v3364_v45 = vld [vmem:[#allocation2 + $0x182] sm:$0xff] }
  0xd9   : > { %5039 = vmatprep.mubr.bf16.mxu0 %v3004_v58  ;;  %5068 = vmatpush3.bf16.msra.mxu0 %v5472_v47  ;;  %v1518_v13 = vpack.c.bf16 %v1488_v27, %v1487_v17  ;;  %v5483_v47 = vld [vmem:[%s6233_s1 + $0x138] sm:$0xff]   ;;  %v3369_v58 = vpack.c.bf16 %v3339_v41, %v3338_v50  ;;  %v1510_v27 = vld [vmem:[#allocation2 + $0x140] sm:$0xff] }
  0xda   : > { %5069 = vmatprep.subr.bf16.mxu0 %v5473_v59  ;;  %v1509_v17 = vld [vmem:[#allocation2 + $0x138] sm:$0xff]  ;;  %v3367_v41 = vld [vmem:[#allocation2 + $0x1a2] sm:$0xff] }
  0xdd   : > { %5070 = vmatpush3.bf16.msra.mxu0 %v5473_v59  ;;  %v1527_v59 = vpack.c.bf16 %v1506_v51, %v1505_v55 }
  0xde   : > { %5071 = vmatprep.subr.bf16.mxu0 %v5474_v9 }
  0xdf   : > { %4816 = vmatmul.mubr.bf16.gmra.mrb[28].mxu1 %v5975_v29  ;;  %v1492_v29 = vld [vmem:[#allocation2 + $0x68] sm:$0xff] }
  0xe0   : > { %5040 = vmatmul.mubr.bf16.gmra.mrb[12].mxu0 %v5999_v57  ;;  %4835 = vmatprep.mubr.bf16.mxu1 %v1517_v10  ;;  %v1520_v26 = vpack.c.bf16 %v1492_v29, %v1491_v14  ;;  %v3342_v10 = vld [vmem:[#allocation2 + $0x7a] sm:$0xff]  ;;  %v1529_v14 = vpack.c.bf16 %v1510_v27, %v1509_v17  ;;  %v3372_v29 = vpack.c.bf16 %v3345_v37, %v3344_v44 }
  0xe1   : > { %5043 = vmatprep.mubr.bf16.mxu0 %v6001_v2  ;;  %5072 = vmatpush3.bf16.msra.mxu0 %v5474_v9  ;;  %v1508_v9 = vld [vmem:[#allocation2 + $0x128] sm:$0xff]  ;;  %v6167_v44 = vld [vmem:[%s6234_s2] ss:$0 sm:$0xff] }
  0xe2   : > { %5073 = vmatprep.subr.bf16.mxu0 %v5475_v40 }
  0xe5   : > { %5074 = vmatpush3.bf16.msra.mxu0 %v5475_v40  ;;  %v3343_v40 = vld [vmem:[#allocation2 + $0x82] sm:$0xff] }
  0xe7   : > { %4836 = vmatmul.mubr.bf16.vlgmr.msra.gmra.mrb[0].mxu1 %v1518_v13  ;;  %v1528_v13 = vpack.c.bf16 %v1508_v9, %v1507_v63 }
  0xe8   : > { %5044 = vmatmul.mubr.bf16.gmra.mrb[16].mxu0 %v6015_v23  ;;  %5115 = vmatpush3.bf16.msra.mxu1 %v5476_v0  ;;  %v1524_v0 = vpack.c.bf16 %v1500_v6, %v1499_v62 }
  0xe9   : > { %4839 = vmatprep.mubr.bf16.mxu1 %v1519_v18  ;;  %5047 = vmatprep.mubr.bf16.mxu0 %v6017_v5  ;;  %v3371_v18 = vpack.c.bf16 %v3343_v40, %v3342_v10 }
  0xea   : > { %5108 = vmatprep.subr.bf16.mxu1 %v5477_v33 }
  0xec   : > { %5116 = vmatpush3.bf16.msra.mxu1 %v5477_v33  ;;  %v3346_v33 = vld [vmem:[#allocation2 + $0xaa] sm:$0xff] }
  0xed   : > { %5109 = vmatprep.subr.bf16.mxu1 %v5478_v34 }
  0xef   : > { %4840 = vmatmul.mubr.bf16.gmra.mrb[4].mxu1 %v1520_v26  ;;  %v3347_v26 = vld [vmem:[#allocation2 + $0xb2] sm:$0xff] }
  0xf0   : > { %5048 = vmatmul.mubr.bf16.gmra.mrb[20].mxu0 %v6029_v19  ;;  %4843 = vmatprep.mubr.bf16.mxu1 %v1521_v43  ;;  %v1513_v43 = vld [vmem:[#allocation2 + $0x168] sm:$0xff]  ;;  %v3373_v3 = vpack.c.bf16 %v3347_v26, %v3346_v33 }
  0xf1   : > { %5051 = vmatprep.mubr.bf16.mxu0 %v6031_v30  ;;  %5117 = vmatpush3.bf16.msra.mxu1 %v5478_v34  ;;  %v1514_v34 = vld [vmem:[#allocation2 + $0x170] sm:$0xff] }
  0xf2   : > { %5110 = vmatprep.subr.bf16.mxu1 %v5479_v49  ;;  %v1531_v12 = vpack.c.bf16 %v1514_v34, %v1513_v43 }
  0xf5   : > { %5118 = vmatpush3.bf16.msra.mxu1 %v5479_v49  ;;  %v3350_v49 = vld [vmem:[#allocation2 + $0xda] sm:$0xff] }
  0xf6   : > { %5111 = vmatprep.subr.bf16.mxu1 %v5480_v60 }
  0xf7   : > { %4844 = vmatmul.mubr.bf16.gmra.mrb[8].mxu1 %v1522_v20  ;;  %v3351_v20 = vld [vmem:[#allocation2 + $0xe2] sm:$0xff] }
  0xf8   : > { %5052 = vmatmul.mubr.bf16.gmra.mrb[24].mxu0 %v6043_v31  ;;  %4847 = vmatprep.mubr.bf16.mxu1 %v1523_v53  ;;  %v3352_v53 = vld [vmem:[#allocation2 + $0xf2] sm:$0xff]  ;;  %v3375_v62 = vpack.c.bf16 %v3351_v20, %v3350_v49 }
  0xf9   : > { %5055 = vmatprep.mubr.bf16.mxu0 %v6139_v56  ;;  %5119 = vmatpush3.bf16.msra.mxu1 %v5480_v60  ;;  %v3353_v60 = vld [vmem:[#allocation2 + $0xfa] sm:$0xff] }
  0xfa   : > { %5112 = vmatprep.subr.bf16.mxu1 %v5481_v28  ;;  %v3376_v6 = vpack.c.bf16 %v3353_v60, %v3352_v53 }
  0xfd   : > { %5120 = vmatpush3.bf16.msra.mxu1 %v5481_v28  ;;  %v3358_v28 = vld [vmem:[#allocation2 + $0x13a] sm:$0xff] }
  0xfe   : > { %5113 = vmatprep.subr.bf16.mxu1 %v5482_v46 }
  0xff   : > { %4848 = vmatmul.mubr.bf16.gmra.mrb[12].mxu1 %v1524_v0  ;;  %v3359_v0 = vld [vmem:[#allocation2 + $0x142] sm:$0xff] }
 0x100   : > { %5056 = vmatmul.mubr.bf16.gmra.mrb[28].mxu0 %v3013_v35  ;;  %4851 = vmatprep.mubr.bf16.mxu1 %v1525_v7  ;;  %v3360_v35 = vld [vmem:[#allocation2 + $0x152] sm:$0xff]  ;;  %v3379_v7 = vpack.c.bf16 %v3359_v0, %v3358_v28 }
 0x101   : > { %5075 = vmatprep.mubr.bf16.mxu0 %v3368_v11  ;;  %5121 = vmatpush3.bf16.msra.mxu1 %v5482_v46  ;;  %v3363_v46 = vld [vmem:[#allocation2 + $0x172] sm:$0xff] }
 0x102   : > { %5114 = vmatprep.subr.bf16.mxu1 %v5483_v47 }
 0x105   : > { %5122 = vmatpush3.bf16.msra.mxu1 %v5483_v47 }
 0x107   : > { %4852 = vmatmul.mubr.bf16.gmra.mrb[16].mxu1 %v1526_v15 }
 0x108   : > { %5076 = vmatmul.mubr.bf16.vlgmr.msra.gmra.mrb[0].mxu0 %v3369_v58  ;;  %4855 = vmatprep.mubr.bf16.mxu1 %v1527_v59 }
 0x109   : > { %5079 = vmatprep.mubr.bf16.mxu0 %v3370_v16 }
 0x10f   : > { %4856 = vmatmul.mubr.bf16.gmra.mrb[20].mxu1 %v1528_v13 }
 0x110   : > { %5080 = vmatmul.mubr.bf16.gmra.mrb[4].mxu0 %v3371_v18  ;;  %4859 = vmatprep.mubr.bf16.mxu1 %v1529_v14 }
 0x111   : > { %5083 = vmatprep.mubr.bf16.mxu0 %v3372_v29 }
 0x117   : > { %4860 = vmatmul.mubr.bf16.gmra.mrb[24].mxu1 %v1530_v48 }
 0x118   : > { %5084 = vmatmul.mubr.bf16.gmra.mrb[8].mxu0 %v3373_v3  ;;  %4863 = vmatprep.mubr.bf16.mxu1 %v1531_v12 }
 0x119   : > { %5087 = vmatprep.mubr.bf16.mxu0 %v3374_v21 }
 0x11f   : > { %4864 = vmatmul.mubr.bf16.gmra.mrb[28].mxu1 %v5887_v24  ;;  %v3361_v24 = vld [vmem:[#allocation2 + $0x15a] sm:$0xff] }
 0x120   : > { %5088 = vmatmul.mubr.bf16.gmra.mrb[12].mxu0 %v3375_v62  ;;  %4899 = vmatprep.mubr.bf16.mxu1 %v5999_v57  ;;  %v3380_v11 = vpack.c.bf16 %v3361_v24, %v3360_v35  ;;  %v3362_v57 = vld [vmem:[#allocation2 + $0x16a] sm:$0xff] }
 0x121   : > { %5091 = vmatprep.mubr.bf16.mxu0 %v3376_v6  ;;  %v3381_v8 = vpack.c.bf16 %v3363_v46, %v3362_v57 }
 0x127   : > { %4900 = vmatmul.mubr.bf16.vlgmr.msra.gmra.mrb[16].mxu1 %v6001_v2  ;;  %v3365_v2 = vld [vmem:[#allocation2 + $0x18a] sm:$0xff] }
 0x128   : > { %5092 = vmatmul.mubr.bf16.gmra.mrb[16].mxu0 %v3377_v36  ;;  %4903 = vmatprep.mubr.bf16.mxu1 %v6015_v23  ;;  %v3382_v50 = vpack.c.bf16 %v3365_v2, %v3364_v45  ;;  %v3366_v23 = vld [vmem:[#allocation2 + $0x19a] sm:$0xff] }
 0x129   : > { %5095 = vmatprep.mubr.bf16.mxu0 %v3378_v42  ;;  %v3383_v55 = vpack.c.bf16 %v3367_v41, %v3366_v23 }
 0x12f   : > { %4904 = vmatmul.mubr.bf16.gmra.mrb[20].mxu1 %v6017_v5 }
 0x130   : > { %5096 = vmatmul.mubr.bf16.gmra.mrb[20].mxu0 %v3379_v7  ;;  %4907 = vmatprep.mubr.bf16.mxu1 %v6029_v19 }
 0x131   : > { %5099 = vmatprep.mubr.bf16.mxu0 %v3380_v11 }
 0x137   : > { %4908 = vmatmul.mubr.bf16.gmra.mrb[24].mxu1 %v6031_v30 }
 0x138   : > { %5100 = vmatmul.mubr.bf16.gmra.mrb[24].mxu0 %v3381_v8  ;;  %4911 = vmatprep.mubr.bf16.mxu1 %v6043_v31 }
 0x139   : > { %5103 = vmatprep.mubr.bf16.mxu0 %v3382_v50 }
 0x13f   : > { %4912 = vmatmul.mubr.bf16.gmra.mrb[28].mxu1 %v6139_v56 }
 0x140   : > { %5104 = vmatmul.mubr.bf16.gmra.mrb[28].mxu0 %v3383_v55 }
 0x1ba   : > { %v4837_v5 = vpop.f32.mrb[0].mxu1 }
 0x1bb   : > { %v1632_v19 = vpop.f32.mrb[1].mxu1 }
 0x1bc   : > { %v4838_v51 = vpop.f32.mrb[2].mxu1 }
 0x1bd   : > { %v1635_v54 = vpop.f32.mrb[3].mxu1 }
 0x1c2   : > { %v4841_v38 = vpop.f32.mrb[4].mxu1 }
 0x1c3   : > { %v1648_v47 = vpop.f32.mrb[5].mxu1 }
 0x1c4   : > { %v4842_v15 = vpop.f32.mrb[6].mxu1 }
 0x1c5   : > { %v1651_v58 = vpop.f32.mrb[7].mxu1 }
 0x1ca   : > { %v4845_v30 = vpop.f32.mrb[8].mxu1 }
 0x1cb   : > { %v1664_v59 = vpop.f32.mrb[9].mxu1 }
 0x1cc   : > { %v4846_v16 = vpop.f32.mrb[10].mxu1 }
 0x1cd   : > { %v1667_v31 = vpop.f32.mrb[11].mxu1 }
 0x1d2   : > { %v4849_v63 = vpop.f32.mrb[12].mxu1 }
 0x1d3   : > { %v1680_v9 = vpop.f32.mrb[13].mxu1 }
 0x1d4   : > { %v4850_v10 = vpop.f32.mrb[14].mxu1 }
 0x1d5   : > { %v1683_v40 = vpop.f32.mrb[15].mxu1 }
 0x1db   : > { %v5077_v17 = vpop.f32.mrb[0].mxu0 }
 0x1dc   : > { %v5123_v56 = vadd.f32 %v5077_v17, %v4837_v5  ;;  %v3483_v27 = vpop.f32.mrb[1].mxu0 }
 0x1dd   : > { %v5124_v37 = vadd.f32 %v3483_v27, %v1632_v19  ;;  %v5078_v13 = vpop.f32.mrb[2].mxu0 }
 0x1de   : > { %v5125_v18 = vadd.f32 %v5078_v13, %v4838_v51  ;;  %v3486_v14 = vpop.f32.mrb[3].mxu0  ;;  %v3747_v61 = vadd.f32 %v5123_v56, %v6167_v44 }
 0x1df   : > { %v5126_v29 = vadd.f32 %v3486_v14, %v1635_v54  ;;  %v3745_v33 = vadd.f32 %v5124_v37, %v6167_v44 }
 0x1e0   : > { %v3748_v1 = vadd.f32 %v5125_v18, %v6167_v44 }
 0x1e1   : > { %v3746_v26 = vadd.f32 %v5126_v29, %v6167_v44 }
 0x1e2   : > { %v4364_v43 = vpack.c.bf16 %v3748_v1, %v3747_v61 }
 0x1e3   : > { %v4359_v34 = vpack.c.bf16 %v3746_v26, %v3745_v33  ;;  %v5081_v32 = vpop.f32.mrb[4].mxu0 }
 0x1e4   : > { %4444 = vst [vmem:[%s6176_s27 + $0x8] sm:$0xff] %v4364_v43   ;;  %v5127_v39 = vadd.f32 %v5081_v32, %v4841_v38  ;;  %v3499_v48 = vpop.f32.mrb[5].mxu0 }
 0x1e5   : > { %4360 = vst [vmem:[%s6176_s27] sm:$0xff] %v4359_v34   ;;  %v5128_v3 = vadd.f32 %v3499_v48, %v1648_v47  ;;  %v5082_v12 = vpop.f32.mrb[6].mxu0 }
 0x1e6   : > { %v5129_v21 = vadd.f32 %v5082_v12, %v4842_v15  ;;  %v3502_v49 = vpop.f32.mrb[7].mxu0  ;;  %v3751_v53 = vadd.f32 %v5127_v39, %v6167_v44 }
 0x1e7   : > { %v5130_v20 = vadd.f32 %v3502_v49, %v1651_v58  ;;  %v3749_v62 = vadd.f32 %v5128_v3, %v6167_v44 }
 0x1e8   : > { %v3752_v60 = vadd.f32 %v5129_v21, %v6167_v44 }
 0x1e9   : > { %v3750_v6 = vadd.f32 %v5130_v20, %v6167_v44 }
 0x1ea   : > { %v4374_v52 = vpack.c.bf16 %v3752_v60, %v3751_v53 }
 0x1eb   : > { %v4369_v22 = vpack.c.bf16 %v3750_v6, %v3749_v62  ;;  %v5085_v25 = vpop.f32.mrb[8].mxu0 }
 0x1ec   : > { %4446 = vst [vmem:[%s6176_s27 + $0x18] sm:$0xff] %v4374_v52   ;;  %v5131_v4 = vadd.f32 %v5085_v25, %v4845_v30  ;;  %v3515_v36 = vpop.f32.mrb[9].mxu0 }
 0x1ed   : > { %4445 = vst [vmem:[%s6176_s27 + $0x10] sm:$0xff] %v4369_v22   ;;  %v5132_v42 = vadd.f32 %v3515_v36, %v1664_v59  ;;  %v5086_v28 = vpop.f32.mrb[10].mxu0 }
 0x1ee   : > { %v5133_v0 = vadd.f32 %v5086_v28, %v4846_v16  ;;  %v3518_v35 = vpop.f32.mrb[11].mxu0  ;;  %v3755_v7 = vadd.f32 %v5131_v4, %v6167_v44 }
 0x1ef   : > { %v5134_v24 = vadd.f32 %v3518_v35, %v1667_v31  ;;  %v3753_v57 = vadd.f32 %v5132_v42, %v6167_v44 }
 0x1f0   : > { %v3756_v11 = vadd.f32 %v5133_v0, %v6167_v44 }
 0x1f1   : > { %v3754_v46 = vadd.f32 %v5134_v24, %v6167_v44 }
 0x1f2   : > { %v4384_v45 = vpack.c.bf16 %v3756_v11, %v3755_v7 }
 0x1f3   : > { %v4379_v2 = vpack.c.bf16 %v3754_v46, %v3753_v57  ;;  %v5089_v8 = vpop.f32.mrb[12].mxu0 }
 0x1f4   : > { %4448 = vst [vmem:[%s6176_s27 + $0x28] sm:$0xff] %v4384_v45   ;;  %v5135_v50 = vadd.f32 %v5089_v8, %v4849_v63  ;;  %v3531_v23 = vpop.f32.mrb[13].mxu0 }
 0x1f5   : > { %4447 = vst [vmem:[%s6176_s27 + $0x20] sm:$0xff] %v4379_v2   ;;  %v5136_v41 = vadd.f32 %v3531_v23, %v1680_v9  ;;  %v5090_v55 = vpop.f32.mrb[14].mxu0 }
 0x1f6   : > { %v5137_v5 = vadd.f32 %v5090_v55, %v4850_v10  ;;  %v3534_v19 = vpop.f32.mrb[15].mxu0  ;;  %v3759_v54 = vadd.f32 %v5135_v50, %v6167_v44 }
 0x1f7   : > { %v5138_v51 = vadd.f32 %v3534_v19, %v1683_v40  ;;  %v3757_v47 = vadd.f32 %v5136_v41, %v6167_v44 }
 0x1f8   : > { %v3760_v38 = vadd.f32 %v5137_v5, %v6167_v44 }
 0x1f9   : > { %v3758_v15 = vadd.f32 %v5138_v51, %v6167_v44 }
 0x1fa   : > { %v4394_v58 = vpack.c.bf16 %v3760_v38, %v3759_v54  ;;  %v4901_v30 = vpop.f32.mrb[16].mxu1 }
 0x1fb   : > { %v4389_v59 = vpack.c.bf16 %v3758_v15, %v3757_v47  ;;  %v5093_v16 = vpop.f32.mrb[16].mxu0  ;;  %v2066_v31 = vpop.f32.mrb[17].mxu1 }
 0x1fc   : > { %4450 = vst [vmem:[%s6176_s27 + $0x38] sm:$0xff] %v4394_v58   ;;  %v5139_v63 = vadd.f32 %v5093_v16, %v4901_v30  ;;  %v3547_v9 = vpop.f32.mrb[17].mxu0  ;;  %v4902_v10 = vpop.f32.mrb[18].mxu1 }
 0x1fd   : > { %4449 = vst [vmem:[%s6176_s27 + $0x30] sm:$0xff] %v4389_v59   ;;  %v5140_v40 = vadd.f32 %v3547_v9, %v2066_v31  ;;  %v5094_v17 = vpop.f32.mrb[18].mxu0  ;;  %v2069_v56 = vpop.f32.mrb[19].mxu1 }
 0x1fe   : > { %v5141_v27 = vadd.f32 %v5094_v17, %v4902_v10  ;;  %v3550_v37 = vpop.f32.mrb[19].mxu0  ;;  %v3763_v18 = vadd.f32 %v5139_v63, %v6167_v44 }
 0x1ff   : > { %v5142_v13 = vadd.f32 %v3550_v37, %v2069_v56  ;;  %v3761_v29 = vadd.f32 %v5140_v40, %v6167_v44 }
 0x200   : > { %v3764_v14 = vadd.f32 %v5141_v27, %v6167_v44 }
 0x201   : > { %v3762_v61 = vadd.f32 %v5142_v13, %v6167_v44 }
 0x202   : > { %v4404_v1 = vpack.c.bf16 %v3764_v14, %v3763_v18  ;;  %v4905_v33 = vpop.f32.mrb[20].mxu1 }
 0x203   : > { %v4399_v26 = vpack.c.bf16 %v3762_v61, %v3761_v29  ;;  %v5097_v43 = vpop.f32.mrb[20].mxu0  ;;  %v2082_v34 = vpop.f32.mrb[21].mxu1 }
 0x204   : > { %4452 = vst [vmem:[%s6176_s27 + $0x48] sm:$0xff] %v4404_v1   ;;  %v5143_v32 = vadd.f32 %v5097_v43, %v4905_v33  ;;  %v3563_v39 = vpop.f32.mrb[21].mxu0  ;;  %v4906_v48 = vpop.f32.mrb[22].mxu1 }
 0x205   : > { %4451 = vst [vmem:[%s6176_s27 + $0x40] sm:$0xff] %v4399_v26   ;;  %v5144_v3 = vadd.f32 %v3563_v39, %v2082_v34  ;;  %v5098_v12 = vpop.f32.mrb[22].mxu0  ;;  %v2085_v21 = vpop.f32.mrb[23].mxu1 }
 0x206   : > { %v5145_v49 = vadd.f32 %v5098_v12, %v4906_v48  ;;  %v3566_v20 = vpop.f32.mrb[23].mxu0  ;;  %v3767_v60 = vadd.f32 %v5143_v32, %v6167_v44 }
 0x207   : > { %v5146_v53 = vadd.f32 %v3566_v20, %v2085_v21  ;;  %v3765_v6 = vadd.f32 %v5144_v3, %v6167_v44 }
 0x208   : > { %v3768_v62 = vadd.f32 %v5145_v49, %v6167_v44 }
 0x209   : > { %v3766_v52 = vadd.f32 %v5146_v53, %v6167_v44 }
 0x20a   : > { %v4414_v22 = vpack.c.bf16 %v3768_v62, %v3767_v60  ;;  %v4909_v25 = vpop.f32.mrb[24].mxu1 }
 0x20b   : > { %v4409_v4 = vpack.c.bf16 %v3766_v52, %v3765_v6  ;;  %v5101_v36 = vpop.f32.mrb[24].mxu0  ;;  %v2098_v42 = vpop.f32.mrb[25].mxu1 }
 0x20c   : > { %4454 = vst [vmem:[%s6176_s27 + $0x58] sm:$0xff] %v4414_v22   ;;  %v5147_v28 = vadd.f32 %v5101_v36, %v4909_v25  ;;  %v3579_v0 = vpop.f32.mrb[25].mxu0  ;;  %v4910_v35 = vpop.f32.mrb[26].mxu1 }
 0x20d   : > { %4453 = vst [vmem:[%s6176_s27 + $0x50] sm:$0xff] %v4409_v4   ;;  %v5148_v24 = vadd.f32 %v3579_v0, %v2098_v42  ;;  %v5102_v7 = vpop.f32.mrb[26].mxu0  ;;  %v2101_v11 = vpop.f32.mrb[27].mxu1 }
 0x20e   : > { %v5149_v57 = vadd.f32 %v5102_v7, %v4910_v35  ;;  %v3582_v46 = vpop.f32.mrb[27].mxu0  ;;  %v3771_v2 = vadd.f32 %v5147_v28, %v6167_v44 }
 0x20f   : > { %v5150_v45 = vadd.f32 %v3582_v46, %v2101_v11  ;;  %v3769_v50 = vadd.f32 %v5148_v24, %v6167_v44 }
 0x210   : > { %v3772_v8 = vadd.f32 %v5149_v57, %v6167_v44 }
 0x211   : > { %v3770_v23 = vadd.f32 %v5150_v45, %v6167_v44 }
 0x212   : > { %v4424_v41 = vpack.c.bf16 %v3772_v8, %v3771_v2  ;;  %v4913_v55 = vpop.f32.mrb[28].mxu1 }
 0x213   : > { %v4419_v5 = vpack.c.bf16 %v3770_v23, %v3769_v50  ;;  %v5105_v19 = vpop.f32.mrb[28].mxu0  ;;  %v2114_v51 = vpop.f32.mrb[29].mxu1 }
 0x214   : > { %4456 = vst [vmem:[%s6176_s27 + $0x68] sm:$0xff] %v4424_v41   ;;  %v5151_v54 = vadd.f32 %v5105_v19, %v4913_v55  ;;  %v3595_v38 = vpop.f32.mrb[29].mxu0  ;;  %v4914_v47 = vpop.f32.mrb[30].mxu1 }
 0x215   : > { %4455 = vst [vmem:[%s6176_s27 + $0x60] sm:$0xff] %v4419_v5   ;;  %v5152_v15 = vadd.f32 %v3595_v38, %v2114_v51  ;;  %v5106_v58 = vpop.f32.mrb[30].mxu0  ;;  %v2117_v30 = vpop.f32.mrb[31].mxu1 }
 0x216   : > { %v5153_v59 = vadd.f32 %v5106_v58, %v4914_v47  ;;  %v3598_v16 = vpop.f32.mrb[31].mxu0  ;;  %v3775_v63 = vadd.f32 %v5151_v54, %v6167_v44 }
 0x217   : > { %v5154_v31 = vadd.f32 %v3598_v16, %v2117_v30  ;;  %v3773_v10 = vadd.f32 %v5152_v15, %v6167_v44 }
 0x218   : > { %v3776_v9 = vadd.f32 %v5153_v59, %v6167_v44 }
 0x219   : > { %v3774_v40 = vadd.f32 %v5154_v31, %v6167_v44 }
 0x21a   : > { %v4434_v17 = vpack.c.bf16 %v3776_v9, %v3775_v63 }
 0x21b   : > { %v4429_v56 = vpack.c.bf16 %v3774_v40, %v3773_v10 }
 0x21c   : > { %4458 = vst [vmem:[%s6176_s27 + $0x78] sm:$0xff] %v4434_v17  }
 0x21d   : > { %4457 = vst [vmem:[%s6176_s27 + $0x70] sm:$0xff] %v4429_v56  }
 0x21e PF: > { %s13_s14 = sadd.s32 1, %s5506_s14   ;;  %s6236_s12 = smov %s5502_s13 }
 0x21f   : > { %p10_p5 = scmp.ge.s32.totalorder %s13_s14, 4   ;;  %s6237_s13 = smov %s6239_s15 }
 0x221   :  { %12 = sbr.rel (!%p10_p5) target bundleno = 2 (0x2), region = 78 }

// kernel: _lambda_.17
= control target key start
LH: loop header
LB: loop body
LE: loop exit
PB: predicated region body
PF: predicated region fallthrough
CT: control target
= control target key end

     0   :  { %s722_s12 = smov 0   ;;  %s724_s13 = smov 0   ;;  %s786_s0 = inlined_call_operand.vmem [shape: bf16[2,4,4,8,128], index: 0, kind: input, shape index: {}]   ;;  %s787_s1 = inlined_call_operand.vmem [shape: bf16[1,128,128], index: 1, kind: input, shape index: {}]   ;;  %s788_s2 = inlined_call_operand.vmem [shape: f32[1,128], index: 2, kind: input, shape index: {}]   ;;  %s789_s3 = inlined_call_operand.vmem [shape: bf16[2,32,128], index: 3, kind: output, shape index: {}]  }
   0x1   :  { %s726_s14 = smov 0  }
   0x2 LB: > { %s25_s15 = sadd.s32 1, %s696_s13  ;;  %p540_p0 = scmp.ge.s32.totalorder %s700_s14, 1  ;;  %s700_s14 = sphi %s726_s14, %s13_s14   ;;  %s696_s13 = sphi %s724_s13, %s791_s13   ;;  %s692_s12 = sphi %s722_s12, %s790_s12  }
   0x3   : > { %p27_p1 = scmp.ge.s32.totalorder %s25_s15, 2  ;;  %p168_p2 = scmp.lt.s32.totalorder %s700_s14, 3 }
   0x5   : > { %s793_s15 = smov (%p27_p1, %s25_s15), 0  ;;  %p169_p3 = pnand %p540_p0, %p168_p2 }
   0x6   : > { %v670_v0 = vld [vmem:[%s787_s1] sm:$0xff] (!%p169_p3)   ;;  %p202_p4 = scmp.lt.s32.totalorder (!%p169_p3), %s692_s12, 1  ;;  %v671_v1 = vld [vmem:[%s787_s1 + $0x8] sm:$0xff] (!%p169_p3)   ;;  %v672_v2 = vld [vmem:[%s787_s1 + $0x10] sm:$0xff] (!%p169_p3)  }
   0x7   : > { %172 = sbr.rel (%p169_p3) target bundleno = 259 (0x103), region = 32  ;;  %626 = vmatprep.subr.bf16.mxu0 (!%p169_p3), %v670_v0  ;;  %v673_v3 = vld [vmem:[%s787_s1 + $0x18] sm:$0xff] (!%p169_p3)   ;;  %v674_v5 = vld [vmem:[%s787_s1 + $0x20] sm:$0xff] (!%p169_p3)   ;;  %v675_v6 = vld [vmem:[%s787_s1 + $0x28] sm:$0xff] (!%p169_p3)  }
   0x8   : > { %627 = vmatpush3.bf16.msra.mxu0 (!%p169_p3), %v670_v0  ;;  %v676_v7 = vld [vmem:[%s787_s1 + $0x30] sm:$0xff] (!%p169_p3)   ;;  %v677_v8 = vld [vmem:[%s787_s1 + $0x38] sm:$0xff] (!%p169_p3)   ;;  %v553_v11 = vld [vmem:[%s788_s2] ss:$0 sm:$0xff] (!%p169_p3) }
   0x9   : > { %628 = vmatprep.subr.bf16.mxu0 (!%p169_p3), %v671_v1 }
   0xc   : > { %629 = vmatpush3.bf16.msra.mxu0 (!%p169_p3), %v671_v1 }
   0xd   : > { %630 = vmatprep.subr.bf16.mxu0 (!%p169_p3), %v672_v2 }
   0xe   : > { %s795_s12 = smov (!%p202_p4, %s692_s12), 1 }
   0xf   : > { %s560_s22 = sshll.u32 %s795_s12, 6  ;;  %s561_s11 = sshll.u32 %s795_s12, 4 }
  0x10   : > { %s206_s25 = scalar_lea.vmem %s786_s0, %s560_s22  ;;  %631 = vmatpush3.bf16.msra.mxu0 %v672_v2  ;;  %s221_s18 = scalar_lea.vmem %s789_s3, %s561_s11 }
  0x11   : > { %v567_v4 = vld [vmem:[%s206_s25] sm:$0xff]   ;;  %632 = vmatprep.subr.bf16.mxu0 %v673_v3  ;;  %v608_v9 = vld [vmem:[%s206_s25 + $0x8] sm:$0xff]  }
  0x12   : > { %642 = vmatprep.mubr.bf16.mxu0 %v567_v4 }
  0x14   : > { %633 = vmatpush3.bf16.msra.mxu0 %v673_v3 }
  0x15   : > { %634 = vmatprep.subr.bf16.mxu0 %v674_v5 }
  0x18   : > { %635 = vmatpush3.bf16.msra.mxu0 %v674_v5 }
  0x19   : > { %636 = vmatprep.subr.bf16.mxu0 %v675_v6 }
  0x1c   : > { %637 = vmatpush3.bf16.msra.mxu0 %v675_v6 }
  0x1d   : > { %638 = vmatprep.subr.bf16.mxu0 %v676_v7 }
  0x20   : > { %639 = vmatpush3.bf16.msra.mxu0 %v676_v7 }
  0x21   : > { %640 = vmatprep.subr.bf16.mxu0 %v677_v8 }
  0x24   : > { %641 = vmatpush3.bf16.msra.mxu0 %v677_v8 }
  0x27   : > { %643 = vmatmul.mubr.bf16.vlgmr.msra.gmra.mrb[0].mxu0 %v608_v9 }
  0xfa   : > { %v644_v10 = vpop.f32.mrb[0].mxu0 }
  0xfb   : > { %v375_v12 = vpop.f32.mrb[1].mxu0  ;;  %v407_v14 = vadd.f32 %v644_v10, %v553_v11 }
  0xfc   : > { %v645_v13 = vpop.f32.mrb[2].mxu0  ;;  %v405_v17 = vadd.f32 %v553_v11, %v375_v12 }
  0xfd   : > { %v408_v15 = vadd.f32 %v645_v13, %v553_v11  ;;  %v378_v16 = vpop.f32.mrb[3].mxu0 }
  0xfe   : > { %v406_v18 = vadd.f32 %v553_v11, %v378_v16 }
  0xff   : > { %v606_v19 = vpack.c.bf16 %v408_v15, %v407_v14 }
 0x100   : > { %v601_v20 = vpack.c.bf16 %v406_v18, %v405_v17 }
 0x101   : > { %615 = vst [vmem:[%s221_s18 + $0x8] sm:$0xff] %v606_v19  }
 0x102   : > { %602 = vst [vmem:[%s221_s18] sm:$0xff] %v601_v20  }
 0x103 PF: > { %s13_s14 = sadd.s32 1, %s700_s14   ;;  %s790_s12 = smov %s696_s13 }
 0x104   : > { %p10_p5 = scmp.ge.s32.totalorder %s13_s14, 4   ;;  %s791_s13 = smov %s793_s15 }
 0x106   :  { %12 = sbr.rel (!%p10_p5) target bundleno = 2 (0x2), region = 68 }

// kernel: _lambda_.15
= control target key start
LH: loop header
LB: loop body
LE: loop exit
PB: predicated region body
PF: predicated region fallthrough
CT: control target
= control target key end

     0   :  { %s3102_s15 = smov 0   ;;  %s3104_s16 = smov 0   ;;  %s3542_s0 = inlined_call_operand.vmem [shape: bf16[2,4,9,9,128], index: 0, kind: input, shape index: {}]   ;;  %s3543_s1 = inlined_call_operand.vmem [shape: bf16[9,128,128], index: 1, kind: input, shape index: {}]   ;;  %s3544_s2 = inlined_call_operand.vmem [shape: f32[1,128], index: 2, kind: input, shape index: {}]   ;;  %s3545_s3 = inlined_call_operand.vmem [shape: bf16[2,64,128], index: 3, kind: input, shape index: {}]   ;;  %s3546_s4 = inlined_call_operand.vmem [shape: bf16[2,64,128], index: 4, kind: output, shape index: {}]  }
   0x1   :  { %s3106_s17 = smov 0  }
   0x2 LB: > { %s26_s18 = sadd.s32 1, %s3071_s16  ;;  %p2283_p0 = scmp.ge.s32.totalorder %s3075_s17, 1  ;;  %s3075_s17 = sphi %s3106_s17, %s14_s17   ;;  %s3071_s16 = sphi %s3104_s16, %s3548_s16   ;;  %s3067_s15 = sphi %s3102_s15, %s3547_s15  }
   0x3   : > { %p28_p1 = scmp.ge.s32.totalorder %s26_s18, 2  ;;  %p208_p2 = scmp.lt.s32.totalorder %s3075_s17, 3 }
   0x5   : > { %s3550_s18 = smov (%p28_p1, %s26_s18), 0  ;;  %p209_p3 = pnand %p2283_p0, %p208_p2 }
   0x6   : > { %v2981_v0 = vld [vmem:[%s3543_s1] sm:$0xff] (!%p209_p3)   ;;  %p252_p4 = scmp.lt.s32.totalorder (!%p209_p3), %s3067_s15, 1  ;;  %v2983_v2 = vld [vmem:[%s3543_s1 + $0x8] sm:$0xff] (!%p209_p3)   ;;  %v2985_v4 = vld [vmem:[%s3543_s1 + $0x10] sm:$0xff] (!%p209_p3)  }
   0x7   : > { %212 = sbr.rel (%p209_p3) target bundleno = 394 (0x18a), region = 36  ;;  %v2982_v1 = vld [vmem:[%s3543_s1 + $0x100] sm:$0xff] (!%p209_p3)   ;;  %2660 = vmatprep.subr.bf16.mxu1 (!%p209_p3), %v2981_v0  ;;  %v2984_v3 = vld [vmem:[%s3543_s1 + $0x108] sm:$0xff] (!%p209_p3)   ;;  %v2986_v5 = vld [vmem:[%s3543_s1 + $0x110] sm:$0xff] (!%p209_p3)  }
   0x8   : > { %2756 = vmatprep.subr.bf16.mxu0 (!%p209_p3), %v2982_v1  ;;  %2661 = vmatpush3.bf16.msra.mxu1 (!%p209_p3), %v2981_v0  ;;  %v2987_v6 = vld [vmem:[%s3543_s1 + $0x18] sm:$0xff] (!%p209_p3)   ;;  %v2989_v8 = vld [vmem:[%s3543_s1 + $0x20] sm:$0xff] (!%p209_p3)   ;;  %v2991_v10 = vld [vmem:[%s3543_s1 + $0x28] sm:$0xff] (!%p209_p3)  }
   0x9   : > { %2757 = vmatpush3.bf16.msra.mxu0 (!%p209_p3), %v2982_v1  ;;  %2662 = vmatprep.subr.bf16.mxu1 (!%p209_p3), %v2983_v2  ;;  %v2988_v7 = vld [vmem:[%s3543_s1 + $0x118] sm:$0xff] (!%p209_p3)   ;;  %v2990_v9 = vld [vmem:[%s3543_s1 + $0x120] sm:$0xff] (!%p209_p3)   ;;  %v2992_v11 = vld [vmem:[%s3543_s1 + $0x128] sm:$0xff] (!%p209_p3)  }
   0xa   : > { %2758 = vmatprep.subr.bf16.mxu0 (!%p209_p3), %v2984_v3  ;;  %v2993_v13 = vld [vmem:[%s3543_s1 + $0x30] sm:$0xff] (!%p209_p3)   ;;  %v2995_v17 = vld [vmem:[%s3543_s1 + $0x38] sm:$0xff] (!%p209_p3)   ;;  %v2997_v22 = vld [vmem:[%s3543_s1 + $0x40] sm:$0xff] (!%p209_p3)  }
   0xb   : > { %v2994_v16 = vld [vmem:[%s3543_s1 + $0x130] sm:$0xff] (!%p209_p3)   ;;  %v2996_v18 = vld [vmem:[%s3543_s1 + $0x138] sm:$0xff] (!%p209_p3)   ;;  %v2998_v23 = vld [vmem:[%s3543_s1 + $0x140] sm:$0xff] (!%p209_p3)  }
   0xc   : > { %2663 = vmatpush3.bf16.msra.mxu1 (!%p209_p3), %v2983_v2  ;;  %v2999_v39 = vld [vmem:[%s3543_s1 + $0x48] sm:$0xff] (!%p209_p3)   ;;  %v3001_v44 = vld [vmem:[%s3543_s1 + $0x50] sm:$0xff] (!%p209_p3)   ;;  %v3003_v50 = vld [vmem:[%s3543_s1 + $0x58] sm:$0xff] (!%p209_p3)  }
   0xd   : > { %2759 = vmatpush3.bf16.msra.mxu0 (!%p209_p3), %v2984_v3  ;;  %2664 = vmatprep.subr.bf16.mxu1 (!%p209_p3), %v2985_v4  ;;  %v3000_v43 = vld [vmem:[%s3543_s1 + $0x148] sm:$0xff] (!%p209_p3)   ;;  %v3002_v45 = vld [vmem:[%s3543_s1 + $0x150] sm:$0xff] (!%p209_p3)   ;;  %v3004_v51 = vld [vmem:[%s3543_s1 + $0x158] sm:$0xff] (!%p209_p3)  }
   0xe   : > { %s3552_s15 = smov (!%p252_p4, %s3067_s15), 1  ;;  %2760 = vmatprep.subr.bf16.mxu0 %v2986_v5 }
   0xf   : > { %s2956_s9 = smul.u32 288, %s3552_s15  ;;  %s2500_s12 = sshll.u32 %s3552_s15, 5 }
  0x10   : > { %2665 = vmatpush3.bf16.msra.mxu1 %v2985_v4  ;;  %v3005_v4 = vld [vmem:[%s3543_s1 + $0x60] sm:$0xff]   ;;  %s271_s19 = scalar_lea.vmem %s3545_s3, %s2500_s12  ;;  %s279_s25 = scalar_lea.vmem %s3546_s4, %s2500_s12 }
  0x11   : > { %2761 = vmatpush3.bf16.msra.mxu0 %v2986_v5  ;;  %2666 = vmatprep.subr.bf16.mxu1 %v2987_v6  ;;  %s3156_s20 = scalar_lea.vmem %s3542_s0, %s2956_s9 }
  0x12   : > { %2762 = vmatprep.subr.bf16.mxu0 %v2988_v7  ;;  %v281_v12 = vld [vmem:[%s3156_s20] ss:$8 sps:$4 sm:$0xff]   ;;  %v285_v24 = vld [vmem:[%s3156_s20 + $0x10] ss:$8 sps:$4 sm:$0xff]  }
  0x13   : > { %v353_v14 = vunpack.c.l.bf16 %v281_v12  ;;  %v355_v15 = vunpack.c.h.bf16 %v281_v12  ;;  %v335_v21 = vld [vmem:[%s3156_s20 + $0xd8] ss:$8 sps:$4 sm:$0xff]   ;;  %v339_v27 = vld [vmem:[%s3156_s20 + $0xe8] ss:$8 sps:$4 sm:$0xff]   ;;  %v357_v29 = vunpack.c.l.bf16 %v285_v24  ;;  %v359_v30 = vunpack.c.h.bf16 %v285_v24 }
  0x14   : > { %2667 = vmatpush3.bf16.msra.mxu1 %v2987_v6  ;;  %v407_v26 = vunpack.c.l.bf16 %v335_v21  ;;  %v409_v28 = vunpack.c.h.bf16 %v335_v21  ;;  %v411_v31 = vunpack.c.l.bf16 %v339_v27  ;;  %v413_v33 = vunpack.c.h.bf16 %v339_v27  ;;  %v289_v46 = vld [vmem:[%s3156_s20 + $0x20] ss:$8 sps:$4 sm:$0xff]   ;;  %v293_v56 = vld [vmem:[%s3156_s20 + $0x30] ss:$8 sps:$4 sm:$0xff]  }
  0x15   : > { %2763 = vmatpush3.bf16.msra.mxu0 %v2988_v7  ;;  %2668 = vmatprep.subr.bf16.mxu1 %v2989_v8  ;;  %v425_v19 = vmax.f32 %v353_v14, 0.0  ;;  %v3177_v20 = vmax.f32 %v355_v15, 0.0  ;;  %v3190_v35 = vmax.f32 %v357_v29, 0.0  ;;  %v3192_v36 = vmax.f32 %v359_v30, 0.0  ;;  %v343_v49 = vld [vmem:[%s3156_s20 + $0xf8] ss:$8 sps:$4 sm:$0xff]  }
  0x16   : > { %2764 = vmatprep.subr.bf16.mxu0 %v2990_v9  ;;  %v479_v32 = vmax.f32 %v407_v26, 0.0  ;;  %v481_v34 = vmax.f32 %v409_v28, 0.0  ;;  %v483_v37 = vmax.f32 %v411_v31, 0.0  ;;  %v485_v38 = vmax.f32 %v413_v33, 0.0  ;;  %v347_v59 = vld [vmem:[%s3156_s20 + $0x108] ss:$8 sps:$4 sm:$0xff]  }
  0x17   : > { %497 = vst [vmem:[#allocation2] sm:$0xff] %v425_v19  ;;  %499 = vst [vmem:[#allocation2 + $0x10] sm:$0xff] %v3177_v20  ;;  %v577_v25 = vpack.c.bf16 %v3177_v20, %v425_v19  ;;  %v578_v41 = vpack.c.bf16 %v3192_v36, %v3190_v35  ;;  %v361_v47 = vunpack.c.l.bf16 %v289_v46  ;;  %v363_v48 = vunpack.c.h.bf16 %v289_v46  ;;  %v299_v3 = vld [vmem:[%s3156_s20 + $0x48] ss:$8 sps:$4 sm:$0xff]   ;;  %v322_v31 = vld [vmem:[%s3156_s20 + $0xa4] sm:$0x1] }
  0x18   : > { %2669 = vmatpush3.bf16.msra.mxu1 %v2989_v8  ;;  %v1227_v40 = vpack.c.bf16 %v481_v34, %v479_v32  ;;  %501 = vst [vmem:[#allocation2 + $0x20] sm:$0xff] %v3190_v35  ;;  %503 = vst [vmem:[#allocation2 + $0x30] sm:$0xff] %v3192_v36  ;;  %v1228_v42 = vpack.c.bf16 %v485_v38, %v483_v37  ;;  %v415_v54 = vunpack.c.l.bf16 %v343_v49  ;;  %v417_v55 = vunpack.c.h.bf16 %v343_v49  ;;  %v317_v12 = vld [vmem:[%s3156_s20 + $0x90] ss:$8 sps:$4 sm:$0xff]   ;;  %v3007_v14 = vld [vmem:[%s3543_s1 + $0x68] sm:$0xff]  }
  0x19   : > { %2765 = vmatpush3.bf16.msra.mxu0 %v2990_v9  ;;  %2670 = vmatprep.subr.bf16.mxu1 %v2991_v10  ;;  %v3218_v52 = vmax.f32 %v361_v47, 0.0  ;;  %v3220_v53 = vmax.f32 %v363_v48, 0.0  ;;  %v365_v57 = vunpack.c.l.bf16 %v293_v56  ;;  %v367_v58 = vunpack.c.h.bf16 %v293_v56  ;;  %v3006_v9 = vld [vmem:[%s3543_s1 + $0x160] sm:$0xff]   ;;  %v3008_v21 = vld [vmem:[%s3543_s1 + $0x168] sm:$0xff]   ;;  %v3010_v49 = vld [vmem:[%s3543_s1 + $0x170] sm:$0xff]  }
  0x1a   : > { %2766 = vmatprep.subr.bf16.mxu0 %v2992_v11  ;;  %2676 = vmatprep.mubr.bf16.mxu1 %v577_v25  ;;  %v487_v61 = vmax.f32 %v415_v54, 0.0  ;;  %v489_v62 = vmax.f32 %v417_v55, 0.0  ;;  %v419_v63 = vunpack.c.l.bf16 %v347_v59  ;;  %v421_v2 = vunpack.c.h.bf16 %v347_v59  ;;  %v303_v25 = vld [vmem:[%s3156_s20 + $0x58] ss:$8 sps:$4 sm:$0xff]   ;;  %v324_v32 = vld [vmem:[%s3156_s20 + $0xac] sm:$0x1] }
  0x1b   : > { %2772 = vmatprep.mubr.bf16.mxu0 %v1227_v40  ;;  %505 = vst [vmem:[#allocation2 + $0x40] sm:$0xff] %v3218_v52  ;;  %507 = vst [vmem:[#allocation2 + $0x50] sm:$0xff] %v3220_v53  ;;  %v579_v60 = vpack.c.bf16 %v3220_v53, %v3218_v52  ;;  %v3228_v0 = vmax.f32 %v365_v57, 0.0  ;;  %v3230_v1 = vmax.f32 %v367_v58, 0.0  ;;  %v371_v7 = vunpack.c.l.bf16 %v299_v3  ;;  %v321_v26 = vld [vmem:[%s3156_s20 + $0xa0] ss:$8 sps:$4 sm:$0xff]  }
  0x1c   : > { %2671 = vmatpush3.bf16.msra.mxu1 %v2991_v10  ;;  %v1229_v5 = vpack.c.bf16 %v489_v62, %v487_v61  ;;  %v491_v6 = vmax.f32 %v419_v63, 0.0  ;;  %v373_v8 = vunpack.c.h.bf16 %v299_v3  ;;  %v375_v30 = vunpack.c.l.bf16 %v303_v25  ;;  %v3012_v54 = vld [vmem:[%s3543_s1 + $0x178] sm:$0xff]   ;;  %v3013_v57 = vld [vmem:[%s3543_s1 + $0x80] sm:$0xff]  }
  0x1d   : > { %2767 = vmatpush3.bf16.msra.mxu0 %v2992_v11  ;;  %2672 = vmatprep.subr.bf16.mxu1 %v2993_v13  ;;  %509 = vst [vmem:[#allocation2 + $0x60] sm:$0xff] %v3228_v0  ;;  %511 = vst [vmem:[#allocation2 + $0x70] sm:$0xff] %v3230_v1  ;;  %v580_v10 = vpack.c.bf16 %v3230_v1, %v3228_v0  ;;  %v493_v11 = vmax.f32 %v421_v2, 0.0  ;;  %v443_v15 = vmax.f32 %v371_v7, 0.0  ;;  %v377_v37 = vunpack.c.h.bf16 %v303_v25  ;;  %v3014_v59 = vld [vmem:[%s3543_s1 + $0x180] sm:$0xff]  }
  0x1e   : > { %2768 = vmatprep.subr.bf16.mxu0 %v2994_v16  ;;  %v393_v38 = vunpack.c.l.bf16 %v321_v26  ;;  %v394_v40 = vunpack.c.l.bf16 %v322_v31  ;;  %v326_v7 = vld [vmem:[%s3156_s20 + $0xb4] sm:$0x1] }
  0x20   : > { %2673 = vmatpush3.bf16.msra.mxu1 %v2993_v13  ;;  %v318_v13 = vld [vmem:[%s3156_s20 + $0x94] sm:$0x1]  ;;  %v466_v46 = vmax.f32 %v394_v40, 0.0 }
  0x21   : > { %2769 = vmatpush3.bf16.msra.mxu0 %v2994_v16  ;;  %2674 = vmatprep.subr.bf16.mxu1 %v2995_v17  ;;  %v3248_v16 = vmax.f32 %v373_v8, 0.0  ;;  %v390_v19 = vunpack.c.l.bf16 %v318_v13  ;;  %v3016_v13 = vld [vmem:[%s3543_s1 + $0x188] sm:$0xff]  }
  0x22   : > { %2770 = vmatprep.subr.bf16.mxu0 %v2996_v18  ;;  %538 = vst [vmem:[#allocation2 + $0x148] sm:$0x1] %v466_v46  ;;  %v3018_v46 = vld [vmem:[%s3543_s1 + $0x190] sm:$0xff]  }
  0x23   : > { %v727_v27 = vpack.c.bf16 %v3248_v16, %v443_v15  ;;  %v462_v29 = vmax.f32 %v390_v19, 0.0 }
  0x24   : > { %2675 = vmatpush3.bf16.msra.mxu1 %v2995_v17  ;;  %v320_v17 = vld [vmem:[%s3156_s20 + $0x9c] sm:$0x1] }
  0x25   : > { %2771 = vmatpush3.bf16.msra.mxu0 %v2996_v18  ;;  %2684 = vmatprep.subr.bf16.mxu1 %v2997_v22  ;;  %v389_v18 = vunpack.c.l.bf16 %v317_v12  ;;  %v392_v24 = vunpack.c.l.bf16 %v320_v17  ;;  %534 = vst [vmem:[#allocation2 + $0x128] sm:$0x1] %v462_v29  ;;  %v311_v17 = vld [vmem:[%s3156_s20 + $0x78] ss:$8 sps:$4 sm:$0xff]   ;;  %v332_v29 = vld [vmem:[%s3156_s20 + $0xcc] sm:$0x1] }
  0x26   : > { %2780 = vmatprep.subr.bf16.mxu0 %v2998_v23 }
  0x27   : > { %2677 = vmatmul.mubr.bf16.vlgmr.msra.gmra.mrb[0].mxu1 %v578_v41  ;;  %v3257_v28 = vmax.f32 %v389_v18, 0.0  ;;  %v464_v34 = vmax.f32 %v392_v24, 0.0  ;;  %v395_v41 = vunpack.c.h.bf16 %v321_v26  ;;  %v330_v24 = vld [vmem:[%s3156_s20 + $0xc4] sm:$0x1] }
  0x28   : > { %2685 = vmatpush3.bf16.msra.mxu1 %v2997_v22  ;;  %2773 = vmatmul.mubr.bf16.vlgmr.msra.gmra.mrb[0].mxu0 %v1228_v42  ;;  %v1230_v22 = vpack.c.bf16 %v493_v11, %v491_v6  ;;  %v396_v42 = vunpack.c.l.bf16 %v324_v32  ;;  %v325_v6 = vld [vmem:[%s3156_s20 + $0xb0] ss:$8 sps:$4 sm:$0xff]   ;;  %v402_v32 = vunpack.c.l.bf16 %v330_v24  ;;  %v3024_v24 = vld [vmem:[%s3543_s1 + $0x1a8] sm:$0xff]  }
  0x29   : > { %2781 = vmatpush3.bf16.msra.mxu0 %v2998_v23  ;;  %2686 = vmatprep.subr.bf16.mxu1 %v2999_v39  ;;  %v391_v23 = vunpack.c.h.bf16 %v317_v12  ;;  %533 = vst [vmem:[#allocation2 + $0x120] sm:$0xff] %v3257_v28  ;;  %536 = vst [vmem:[#allocation2 + $0x138] sm:$0x1] %v464_v34  ;;  %v3274_v47 = vmax.f32 %v395_v41, 0.0  ;;  %v397_v11 = vunpack.c.l.bf16 %v325_v6  ;;  %v398_v12 = vunpack.c.l.bf16 %v326_v7 }
  0x2a   : > { %2782 = vmatprep.subr.bf16.mxu0 %v3000_v43  ;;  %2680 = vmatprep.mubr.bf16.mxu1 %v579_v60  ;;  %v468_v48 = vmax.f32 %v396_v42, 0.0  ;;  %v307_v60 = vld [vmem:[%s3156_s20 + $0x68] ss:$8 sps:$4 sm:$0xff]  }
  0x2b   : > { %2776 = vmatprep.mubr.bf16.mxu0 %v1229_v5  ;;  %v3261_v33 = vmax.f32 %v391_v23, 0.0  ;;  %539 = vst [vmem:[#allocation2 + $0x150] sm:$0xff] %v3274_v47  ;;  %v379_v63 = vunpack.c.l.bf16 %v307_v60  ;;  %v381_v2 = vunpack.c.h.bf16 %v307_v60  ;;  %v3015_v5 = vld [vmem:[%s3543_s1 + $0x88] sm:$0xff]   ;;  %v3314_v19 = vmax.f32 %v397_v11, 0.0  ;;  %v286_v60 = vld [vmem:[%s3156_s20 + $0x14] sm:$0x1] }
  0x2c   : > { %2687 = vmatpush3.bf16.msra.mxu1 %v2999_v39  ;;  %v3264_v39 = vmax.f32 %v375_v30, 0.0  ;;  %540 = vst [vmem:[#allocation2 + $0x158] sm:$0x1] %v468_v48  ;;  %v329_v23 = vld [vmem:[%s3156_s20 + $0xc0] ss:$8 sps:$4 sm:$0xff]   ;;  %v474_v48 = vmax.f32 %v402_v32, 0.0 }
  0x2d   : > { %2783 = vmatpush3.bf16.msra.mxu0 %v3000_v43  ;;  %2688 = vmatprep.subr.bf16.mxu1 %v3001_v44  ;;  %535 = vst [vmem:[#allocation2 + $0x130] sm:$0xff] %v3261_v33  ;;  %v3267_v43 = vmax.f32 %v377_v37, 0.0  ;;  %v3303_v8 = vmax.f32 %v379_v63, 0.0  ;;  %v401_v30 = vunpack.c.l.bf16 %v329_v23  ;;  %541 = vst [vmem:[#allocation2 + $0x160] sm:$0xff] %v3314_v19  ;;  %v403_v34 = vunpack.c.h.bf16 %v329_v23  ;;  %v3023_v23 = vld [vmem:[%s3543_s1 + $0xa8] sm:$0xff]  }
  0x2e   : > { %2784 = vmatprep.subr.bf16.mxu0 %v3002_v45  ;;  %v404_v37 = vunpack.c.l.bf16 %v332_v29  ;;  %546 = vst [vmem:[#allocation2 + $0x188] sm:$0x1] %v474_v48  ;;  %v3026_v29 = vld [vmem:[%s3543_s1 + $0x1b0] sm:$0xff]   ;;  %v292_v32 = vld [vmem:[%s3156_s20 + $0x2c] sm:$0x1] }
  0x2f   : > { %2681 = vmatmul.mubr.bf16.gmra.mrb[4].mxu1 %v580_v10  ;;  %v728_v3 = vpack.c.bf16 %v3267_v43, %v3264_v39  ;;  %v328_v10 = vld [vmem:[%s3156_s20 + $0xbc] sm:$0x1]  ;;  %v3330_v41 = vmax.f32 %v401_v30, 0.0  ;;  %v1728_v42 = vpack.c.bf16 %v3303_v8, %v3267_v43  ;;  %v290_v30 = vld [vmem:[%s3156_s20 + $0x24] sm:$0x1] }
  0x30   : > { %2689 = vmatpush3.bf16.msra.mxu1 %v3001_v44  ;;  %2777 = vmatmul.mubr.bf16.gmra.mrb[4].mxu0 %v1230_v22  ;;  %v3269_v44 = vmax.f32 %v393_v38, 0.0  ;;  %v1385_v55 = vld [vmem:[#allocation2 + $0x121] sm:$0xff]  ;;  %v400_v15 = vunpack.c.l.bf16 %v328_v10  ;;  %v383_v22 = vunpack.c.l.bf16 %v311_v17  ;;  %v3017_v38 = vld [vmem:[%s3543_s1 + $0x90] sm:$0xff]  }
  0x31   : > { %2785 = vmatpush3.bf16.msra.mxu0 %v3002_v45  ;;  %2690 = vmatprep.subr.bf16.mxu1 %v3003_v50  ;;  %v3009_v45 = vld [vmem:[%s3543_s1 + $0x70] sm:$0xff]   ;;  %545 = vst [vmem:[#allocation2 + $0x180] sm:$0xff] %v3330_v41 }
  0x32   : > { %2786 = vmatprep.subr.bf16.mxu0 %v3004_v51  ;;  %2700 = vmatprep.mubr.bf16.mxu1 %v727_v27  ;;  %537 = vst [vmem:[#allocation2 + $0x140] sm:$0xff] %v3269_v44  ;;  %v472_v26 = vmax.f32 %v400_v15, 0.0  ;;  %v385_v27 = vunpack.c.h.bf16 %v311_v17  ;;  %v3322_v31 = vmax.f32 %v383_v22, 0.0  ;;  %v3022_v15 = vld [vmem:[%s3543_s1 + $0x1a0] sm:$0xff]  }
  0x33   : > { %v1388_v62 = vld [vmem:[#allocation2 + $0x151] sm:$0xff] }
  0x34   : > { %2691 = vmatpush3.bf16.msra.mxu1 %v3003_v50  ;;  %v1061_v50 = vpack.c.bf16 %v3274_v47, %v3269_v44  ;;  %v1386_v56 = vld [vmem:[#allocation2 + $0x131] sm:$0xff]  ;;  %544 = vst [vmem:[#allocation2 + $0x178] sm:$0x1] %v472_v26  ;;  %v3328_v40 = vmax.f32 %v385_v27, 0.0 }
  0x35   : > { %2787 = vmatpush3.bf16.msra.mxu0 %v3004_v51  ;;  %2692 = vmatprep.subr.bf16.mxu1 %v3005_v4  ;;  %v3011_v51 = vld [vmem:[%s3543_s1 + $0x78] sm:$0xff]   ;;  %v1393_v58 = vpack.c.bf16 %v1386_v56, %v1385_v55  ;;  %v3025_v27 = vld [vmem:[%s3543_s1 + $0xb0] sm:$0xff]  }
  0x36   : > { %2788 = vmatprep.subr.bf16.mxu0 %v3006_v9  ;;  %v730_v56 = vpack.c.bf16 %v3328_v40, %v3322_v31  ;;  %v3048_v44 = vld [vmem:[%s3543_s1 + $0x218] sm:$0xff]  }
  0x37   : > { %2796 = vmatprep.mubr.bf16.mxu0 %v1393_v58 }
  0x38   : > { %2693 = vmatpush3.bf16.msra.mxu1 %v3005_v4  ;;  %v1391_v17 = vld [vmem:[#allocation2 + $0x181] sm:$0xff] }
  0x39   : > { %2789 = vmatpush3.bf16.msra.mxu0 %v3006_v9  ;;  %2694 = vmatprep.subr.bf16.mxu1 %v3007_v14  ;;  %v1387_v61 = vld [vmem:[#allocation2 + $0x141] sm:$0xff]  ;;  %v3305_v9 = vmax.f32 %v381_v2, 0.0  ;;  %v288_v2 = vld [vmem:[%s3156_s20 + $0x1c] sm:$0x1] }
  0x3a   : > { %2790 = vmatprep.subr.bf16.mxu0 %v3008_v21  ;;  %v1394_v4 = vpack.c.bf16 %v1388_v62, %v1387_v61  ;;  %v3019_v62 = vld [vmem:[%s3543_s1 + $0x98] sm:$0xff]  }
  0x3b   : > { %v729_v18 = vpack.c.bf16 %v3305_v9, %v3303_v8  ;;  %v1729_v55 = vpack.c.bf16 %v3322_v31, %v3305_v9  ;;  %v3049_v8 = vld [vmem:[%s3543_s1 + $0x220] sm:$0xff]   ;;  %v3050_v9 = vld [vmem:[%s3543_s1 + $0x228] sm:$0xff]  }
  0x3c   : > { %2695 = vmatpush3.bf16.msra.mxu1 %v3007_v14  ;;  %v399_v14 = vunpack.c.h.bf16 %v325_v6  ;;  %v360_v6 = vunpack.c.l.bf16 %v288_v2 }
  0x3d   : > { %2791 = vmatpush3.bf16.msra.mxu0 %v3008_v21  ;;  %2696 = vmatprep.subr.bf16.mxu1 %v3009_v45  ;;  %v470_v21 = vmax.f32 %v398_v12, 0.0 }
  0x3e   : > { %2792 = vmatprep.subr.bf16.mxu0 %v3010_v49  ;;  %v3318_v25 = vmax.f32 %v399_v14, 0.0  ;;  %v432_v12 = vmax.f32 %v360_v6, 0.0 }
  0x3f   : > { %542 = vst [vmem:[#allocation2 + $0x168] sm:$0x1] %v470_v21  ;;  %v1560_v21 = vpack.c.bf16 %v3190_v35, %v3177_v20 }
  0x40   : > { %2697 = vmatpush3.bf16.msra.mxu1 %v3009_v45  ;;  %543 = vst [vmem:[#allocation2 + $0x170] sm:$0xff] %v3318_v25  ;;  %v1062_v45 = vpack.c.bf16 %v3318_v25, %v3314_v19  ;;  %504 = vst [vmem:[#allocation2 + $0x38] sm:$0x1] %v432_v12  ;;  %v1561_v12 = vpack.c.bf16 %v3218_v52, %v3192_v36  ;;  %v1562_v52 = vpack.c.bf16 %v3228_v0, %v3220_v53  ;;  %v3051_v19 = vld [vmem:[%s3543_s1 + $0x230] sm:$0xff]   ;;  %v3052_v25 = vld [vmem:[%s3543_s1 + $0x238] sm:$0xff]  }
  0x41   : > { %2793 = vmatpush3.bf16.msra.mxu0 %v3010_v49  ;;  %2698 = vmatprep.subr.bf16.mxu1 %v3011_v51  ;;  %v3339_v49 = vmax.f32 %v403_v34, 0.0  ;;  %v294_v34 = vld [vmem:[%s3156_s20 + $0x34] sm:$0x1] }
  0x42   : > { %2794 = vmatprep.subr.bf16.mxu0 %v3012_v54  ;;  %v366_v48 = vunpack.c.l.bf16 %v294_v34  ;;  %v3038_v34 = vld [vmem:[%s3543_s1 + $0x1e0] sm:$0xff]  }
  0x43   : > { %547 = vst [vmem:[#allocation2 + $0x190] sm:$0xff] %v3339_v49  ;;  %v1063_v61 = vpack.c.bf16 %v3339_v49, %v3330_v41 }
  0x44   : > { %2699 = vmatpush3.bf16.msra.mxu1 %v3011_v51  ;;  %v476_v51 = vmax.f32 %v404_v37, 0.0  ;;  %v362_v37 = vunpack.c.l.bf16 %v290_v30  ;;  %v1060_v30 = vpack.c.bf16 %v3261_v33, %v3257_v28  ;;  %v3040_v28 = vld [vmem:[%s3543_s1 + $0x1e8] sm:$0xff]   ;;  %v3041_v33 = vld [vmem:[%s3543_s1 + $0xf0] sm:$0xff]  }
  0x45   : > { %2795 = vmatpush3.bf16.msra.mxu0 %v3012_v54  ;;  %2708 = vmatprep.subr.bf16.mxu1 %v3013_v57  ;;  %v282_v54 = vld [vmem:[%s3156_s20 + $0x4] sm:$0x1] }
  0x46   : > { %2804 = vmatprep.subr.bf16.mxu0 %v3014_v59  ;;  %v354_v58 = vunpack.c.l.bf16 %v282_v54  ;;  %548 = vst [vmem:[#allocation2 + $0x198] sm:$0x1] %v476_v51  ;;  %v1389_v7 = vld [vmem:[#allocation2 + $0x161] sm:$0xff] }
  0x47   : > { %2701 = vmatmul.mubr.bf16.vlgmr.msra.gmra.mrb[0].mxu1 %v728_v3  ;;  %v358_v3 = vunpack.c.l.bf16 %v286_v60  ;;  %v1390_v11 = vld [vmem:[#allocation2 + $0x171] sm:$0xff]  ;;  %v297_v54 = vld [vmem:[%s3156_s20 + $0x40] ss:$72 sps:$4 sm:$0xff]  }
  0x48   : > { %2709 = vmatpush3.bf16.msra.mxu1 %v3013_v57  ;;  %2797 = vmatmul.mubr.bf16.vlgmr.msra.gmra.mrb[0].mxu0 %v1394_v4  ;;  %v284_v57 = vld [vmem:[%s3156_s20 + $0xc] sm:$0x1]  ;;  %v426_v63 = vmax.f32 %v354_v58, 0.0  ;;  %v3020_v4 = vld [vmem:[%s3543_s1 + $0x198] sm:$0xff]   ;;  %v1395_v14 = vpack.c.bf16 %v1390_v11, %v1389_v7  ;;  %v369_v60 = vunpack.c.l.bf16 %v297_v54  ;;  %v387_v2 = vunpack.c.h.bf16 %v297_v54  ;;  %v3029_v7 = vld [vmem:[%s3543_s1 + $0xc0] sm:$0xff]  }
  0x49   : > { %2805 = vmatpush3.bf16.msra.mxu0 %v3014_v59  ;;  %2710 = vmatprep.subr.bf16.mxu1 %v3015_v5  ;;  %v356_v59 = vunpack.c.l.bf16 %v284_v57  ;;  %v430_v10 = vmax.f32 %v358_v3, 0.0  ;;  %v434_v57 = vmax.f32 %v362_v37, 0.0  ;;  %v3043_v37 = vld [vmem:[%s3543_s1 + $0xf8] sm:$0xff]  }
  0x4a   : > { %2806 = vmatprep.subr.bf16.mxu0 %v3016_v13  ;;  %2704 = vmatprep.mubr.bf16.mxu1 %v729_v18  ;;  %498 = vst [vmem:[#allocation2 + $0x8] sm:$0x1] %v426_v63  ;;  %v3397_v6 = vmax.f32 %v387_v2, 0.0 }
  0x4b   : > { %502 = vst [vmem:[#allocation2 + $0x28] sm:$0x1] %v430_v10  ;;  %2800 = vmatprep.mubr.bf16.mxu0 %v1395_v14  ;;  %506 = vst [vmem:[#allocation2 + $0x48] sm:$0x1] %v434_v57  ;;  %v3030_v10 = vld [vmem:[%s3543_s1 + $0x1c0] sm:$0xff]   ;;  %v3032_v14 = vld [vmem:[%s3543_s1 + $0x1c8] sm:$0xff]  }
  0x4c   : > { %2711 = vmatpush3.bf16.msra.mxu1 %v3015_v5  ;;  %v428_v5 = vmax.f32 %v356_v59, 0.0  ;;  %v438_v59 = vmax.f32 %v366_v48, 0.0  ;;  %v3046_v48 = vld [vmem:[%s3543_s1 + $0x208] sm:$0xff]   ;;  %v1730_v43 = vpack.c.bf16 %v3397_v6, %v3328_v40  ;;  %v2511_v6 = vld [vmem:[%s271_s19] sm:$0xff]  }
  0x4d   : > { %2807 = vmatpush3.bf16.msra.mxu0 %v3016_v13  ;;  %2712 = vmatprep.subr.bf16.mxu1 %v3017_v38  ;;  %v3021_v13 = vld [vmem:[%s3543_s1 + $0xa0] sm:$0xff]   ;;  %v1392_v18 = vld [vmem:[#allocation2 + $0x191] sm:$0xff] }
  0x4e   : > { %2808 = vmatprep.subr.bf16.mxu0 %v3018_v46  ;;  %500 = vst [vmem:[#allocation2 + $0x18] sm:$0x1] %v428_v5  ;;  %v1396_v22 = vpack.c.bf16 %v1392_v18, %v1391_v17  ;;  %510 = vst [vmem:[#allocation2 + $0x68] sm:$0x1] %v438_v59  ;;  %v3395_v5 = vld [vmem:[#allocation2 + $0x31] sm:$0xff] }
  0x4f   : > { %2705 = vmatmul.mubr.bf16.gmra.mrb[4].mxu1 %v730_v56  ;;  %v3027_v56 = vld [vmem:[%s3543_s1 + $0xb8] sm:$0xff]  }
  0x50   : > { %2713 = vmatpush3.bf16.msra.mxu1 %v3017_v38  ;;  %2801 = vmatmul.mubr.bf16.gmra.mrb[4].mxu0 %v1396_v22  ;;  %v364_v38 = vunpack.c.l.bf16 %v292_v32  ;;  %v3033_v22 = vld [vmem:[%s3543_s1 + $0xd0] sm:$0xff]   ;;  %v3037_v32 = vld [vmem:[%s3543_s1 + $0xe0] sm:$0xff]  }
  0x51   : > { %2809 = vmatpush3.bf16.msra.mxu0 %v3018_v46  ;;  %2714 = vmatprep.subr.bf16.mxu1 %v3019_v62  ;;  %v885_v26 = vld [vmem:[#allocation2 + $0x1] sm:$0xff]  ;;  %v296_v46 = vld [vmem:[%s3156_s20 + $0x3c] sm:$0x1] }
  0x52   : > { %2810 = vmatprep.subr.bf16.mxu0 %v3020_v4  ;;  %2820 = vmatprep.mubr.bf16.mxu0 %v1560_v21  ;;  %v368_v51 = vunpack.c.l.bf16 %v296_v46  ;;  %v436_v58 = vmax.f32 %v364_v38, 0.0  ;;  %v3393_v3 = vld [vmem:[#allocation2 + $0x21] sm:$0xff]  ;;  %v3044_v38 = vld [vmem:[%s3543_s1 + $0x1f8] sm:$0xff]  }
  0x53   : > { %v894_v11 = vpack.c.bf16 %v3395_v5, %v3393_v3  ;;  %v3045_v46 = vld [vmem:[%s3543_s1 + $0x200] sm:$0xff]  }
  0x54   : > { %2715 = vmatpush3.bf16.msra.mxu1 %v3019_v62  ;;  %v3028_v62 = vld [vmem:[%s3543_s1 + $0x1b8] sm:$0xff]   ;;  %v440_v63 = vmax.f32 %v368_v51, 0.0  ;;  %508 = vst [vmem:[#allocation2 + $0x58] sm:$0x1] %v436_v58  ;;  %v3047_v51 = vld [vmem:[%s3543_s1 + $0x210] sm:$0xff]  }
  0x55   : > { %2811 = vmatpush3.bf16.msra.mxu0 %v3020_v4  ;;  %2716 = vmatprep.subr.bf16.mxu1 %v3021_v13  ;;  %v3373_v20 = vld [vmem:[#allocation2 + $0x11] sm:$0xff]  ;;  %v441_v4 = vmax.f32 %v369_v60, 0.0  ;;  %v3423_v18 = vld [vmem:[#allocation2 + $0x61] sm:$0xff] }
  0x56   : > { %2812 = vmatprep.subr.bf16.mxu0 %v3022_v15  ;;  %v893_v35 = vpack.c.bf16 %v3373_v20, %v885_v26  ;;  %512 = vst [vmem:[#allocation2 + $0x78] sm:$0x1] %v440_v63  ;;  %v1893_v47 = vpack.c.bf16 %v3393_v3, %v3373_v20 }
  0x57   : > { %513 = vst [vmem:[#allocation2 + $0x80] sm:$0xff] %v441_v4  ;;  %v1563_v26 = vpack.c.bf16 %v441_v4, %v3230_v1  ;;  %v1727_v1 = vpack.c.bf16 %v3264_v39, %v3248_v16  ;;  %v3039_v16 = vld [vmem:[%s3543_s1 + $0xe8] sm:$0xff]   ;;  %v3042_v39 = vld [vmem:[%s3543_s1 + $0x1f0] sm:$0xff]  }
  0x58   : > { %2717 = vmatpush3.bf16.msra.mxu1 %v3021_v13  ;;  %2724 = vmatprep.mubr.bf16.mxu1 %v893_v35  ;;  %v3031_v13 = vld [vmem:[%s3543_s1 + $0xc8] sm:$0xff]  }
  0x59   : > { %2813 = vmatpush3.bf16.msra.mxu0 %v3022_v15  ;;  %2718 = vmatprep.subr.bf16.mxu1 %v3023_v23  ;;  %v3415_v15 = vld [vmem:[#allocation2 + $0x41] sm:$0xff] }
  0x5a   : > { %2814 = vmatprep.subr.bf16.mxu0 %v3024_v24  ;;  %v1894_v41 = vpack.c.bf16 %v3415_v15, %v3395_v5  ;;  %v2546_v4 = vld [vmem:[%s271_s19 + $0x8] sm:$0xff]   ;;  %v2548_v5 = vld [vmem:[%s271_s19 + $0x18] sm:$0xff]  }
  0x5b   : > { %v3417_v17 = vld [vmem:[#allocation2 + $0x51] sm:$0xff] }
  0x5c   : > { %2719 = vmatpush3.bf16.msra.mxu1 %v3023_v23  ;;  %v895_v36 = vpack.c.bf16 %v3417_v17, %v3415_v15  ;;  %v298_v23 = vld [vmem:[%s3156_s20 + $0x44] sm:$0x1]  ;;  %v2525_v15 = vunpack.c.h.bf16 %v2548_v5 }
  0x5d   : > { %2815 = vmatpush3.bf16.msra.mxu0 %v3024_v24  ;;  %2720 = vmatprep.subr.bf16.mxu1 %v3025_v27  ;;  %v3425_v21 = vld [vmem:[#allocation2 + $0x71] sm:$0xff]  ;;  %v370_v53 = vunpack.c.l.bf16 %v298_v23 }
  0x5e   : > { %2816 = vmatprep.subr.bf16.mxu0 %v3026_v29  ;;  %v3034_v24 = vld [vmem:[%s3543_s1 + $0x1d0] sm:$0xff]   ;;  %v896_v0 = vpack.c.bf16 %v3425_v21, %v3423_v18 }
  0x5f   : > { %v442_v35 = vmax.f32 %v370_v53, 0.0 }
  0x60   : > { %2721 = vmatpush3.bf16.msra.mxu1 %v3025_v27  ;;  %v3035_v27 = vld [vmem:[%s3543_s1 + $0xd8] sm:$0xff]  }
  0x61   : > { %2817 = vmatpush3.bf16.msra.mxu0 %v3026_v29  ;;  %2722 = vmatprep.subr.bf16.mxu1 %v3027_v56  ;;  %v3036_v29 = vld [vmem:[%s3543_s1 + $0x1d8] sm:$0xff]   ;;  %514 = vst [vmem:[#allocation2 + $0x88] sm:$0x1] %v442_v35 }
  0x62   : > { %2818 = vmatprep.subr.bf16.mxu0 %v3028_v62 }
  0x64   : > { %2723 = vmatpush3.bf16.msra.mxu1 %v3027_v56 }
  0x65   : > { %2819 = vmatpush3.bf16.msra.mxu0 %v3028_v62  ;;  %2732 = vmatprep.subr.bf16.mxu1 %v3029_v7 }
  0x66   : > { %2828 = vmatprep.subr.bf16.mxu0 %v3030_v10 }
  0x67   : > { %2725 = vmatmul.mubr.bf16.vlgmr.msra.gmra.mrb[0].mxu1 %v894_v11  ;;  %v2524_v11 = vunpack.c.l.bf16 %v2548_v5 }
  0x68   : > { %2733 = vmatpush3.bf16.msra.mxu1 %v3029_v7  ;;  %2821 = vmatmul.mubr.bf16.vlgmr.msra.gmra.mrb[0].mxu0 %v1561_v12  ;;  %v1892_v31 = vld [vmem:[#allocation2 + $0x81] sm:$0xff]  ;;  %v2547_v7 = vld [vmem:[%s271_s19 + $0x10] sm:$0xff]   ;;  %v2512_v12 = vunpack.c.l.bf16 %v2511_v6 }
  0x69   : > { %2829 = vmatpush3.bf16.msra.mxu0 %v3030_v10  ;;  %2734 = vmatprep.subr.bf16.mxu1 %v3031_v13  ;;  %v1896_v40 = vpack.c.bf16 %v1892_v31, %v3425_v21  ;;  %v2516_v10 = vunpack.c.l.bf16 %v2546_v4  ;;  %v2096_v21 = vmul.f32 0.70710677, %v2524_v11 }
  0x6a   : > { %2830 = vmatprep.subr.bf16.mxu0 %v3032_v14  ;;  %2728 = vmatprep.mubr.bf16.mxu1 %v895_v36  ;;  %v2521_v36 = vunpack.c.h.bf16 %v2547_v7 }
  0x6b   : > { %2824 = vmatprep.mubr.bf16.mxu0 %v1562_v52  ;;  %v2092_v52 = vmul.f32 0.70710677, %v2516_v10 }
  0x6c   : > { %2735 = vmatpush3.bf16.msra.mxu1 %v3031_v13  ;;  %v2520_v13 = vunpack.c.l.bf16 %v2547_v7 }
  0x6d   : > { %2831 = vmatpush3.bf16.msra.mxu0 %v3032_v14  ;;  %2736 = vmatprep.subr.bf16.mxu1 %v3033_v22  ;;  %v2517_v14 = vunpack.c.h.bf16 %v2546_v4 }
  0x6e   : > { %2832 = vmatprep.subr.bf16.mxu0 %v3034_v24 }
  0x6f   : > { %2729 = vmatmul.mubr.bf16.gmra.mrb[4].mxu1 %v896_v0  ;;  %v2094_v0 = vmul.f32 0.70710677, %v2520_v13 }
  0x70   : > { %2737 = vmatpush3.bf16.msra.mxu1 %v3033_v22  ;;  %2825 = vmatmul.mubr.bf16.gmra.mrb[4].mxu0 %v1563_v26  ;;  %v2513_v26 = vunpack.c.h.bf16 %v2511_v6 }
  0x71   : > { %2833 = vmatpush3.bf16.msra.mxu0 %v3034_v24  ;;  %2738 = vmatprep.subr.bf16.mxu1 %v3035_v27  ;;  %v2090_v24 = vmul.f32 0.70710677, %v2512_v12 }
  0x72   : > { %2834 = vmatprep.subr.bf16.mxu0 %v3036_v29  ;;  %2748 = vmatprep.mubr.bf16.mxu1 %v1060_v30  ;;  %v2093_v30 = vmul.f32 0.70710677, %v2517_v14 }
  0x73   : > { %2844 = vmatprep.mubr.bf16.mxu0 %v1727_v1 }
  0x74   : > { %2739 = vmatpush3.bf16.msra.mxu1 %v3035_v27 }
  0x75   : > { %2835 = vmatpush3.bf16.msra.mxu0 %v3036_v29  ;;  %2740 = vmatprep.subr.bf16.mxu1 %v3037_v32 }
  0x76   : > { %2836 = vmatprep.subr.bf16.mxu0 %v3038_v34 }
  0x78   : > { %2741 = vmatpush3.bf16.msra.mxu1 %v3037_v32  ;;  %v2097_v32 = vmul.f32 0.70710677, %v2525_v15 }
  0x79   : > { %2837 = vmatpush3.bf16.msra.mxu0 %v3038_v34  ;;  %2742 = vmatprep.subr.bf16.mxu1 %v3039_v16 }
  0x7a   : > { %2838 = vmatprep.subr.bf16.mxu0 %v3040_v28 }
  0x7c   : > { %2743 = vmatpush3.bf16.msra.mxu1 %v3039_v16 }
  0x7d   : > { %2839 = vmatpush3.bf16.msra.mxu0 %v3040_v28  ;;  %2744 = vmatprep.subr.bf16.mxu1 %v3041_v33 }
  0x7e   : > { %2840 = vmatprep.subr.bf16.mxu0 %v3042_v39 }
  0x80   : > { %2745 = vmatpush3.bf16.msra.mxu1 %v3041_v33 }
  0x81   : > { %2841 = vmatpush3.bf16.msra.mxu0 %v3042_v39  ;;  %2746 = vmatprep.subr.bf16.mxu1 %v3043_v37 }
  0x82   : > { %2842 = vmatprep.subr.bf16.mxu0 %v3044_v38 }
  0x84   : > { %2747 = vmatpush3.bf16.msra.mxu1 %v3043_v37  ;;  %v2095_v37 = vmul.f32 0.70710677, %v2521_v36 }
  0x85   : > { %2843 = vmatpush3.bf16.msra.mxu0 %v3044_v38  ;;  %2876 = vmatprep.subr.bf16.mxu1 %v3045_v46 }
  0x86   : > { %2852 = vmatprep.subr.bf16.mxu0 %v3045_v46 }
  0x87   : > { %2749 = vmatmul.mubr.bf16.vlgmr.msra.gmra.mrb[0].mxu1 %v1061_v50  ;;  %v1895_v50 = vpack.c.bf16 %v3423_v18, %v3417_v17  ;;  %v2489_v17 = vld [vmem:[%s3544_s2] ss:$0 sm:$0xff] }
  0x88   : > { %2845 = vmatmul.mubr.bf16.vlgmr.msra.gmra.mrb[0].mxu0 %v1728_v42  ;;  %2884 = vmatpush3.bf16.msra.mxu1 %v3045_v46 }
  0x89   : > { %2853 = vmatpush3.bf16.msra.mxu0 %v3045_v46  ;;  %2877 = vmatprep.subr.bf16.mxu1 %v3046_v48 }
  0x8a   : > { %2854 = vmatprep.subr.bf16.mxu0 %v3046_v48  ;;  %2752 = vmatprep.mubr.bf16.mxu1 %v1062_v45 }
  0x8b   : > { %2848 = vmatprep.mubr.bf16.mxu0 %v1729_v55 }
  0x8c   : > { %2885 = vmatpush3.bf16.msra.mxu1 %v3046_v48 }
  0x8d   : > { %2855 = vmatpush3.bf16.msra.mxu0 %v3046_v48  ;;  %2878 = vmatprep.subr.bf16.mxu1 %v3047_v51 }
  0x8e   : > { %2856 = vmatprep.subr.bf16.mxu0 %v3047_v51 }
  0x8f   : > { %2753 = vmatmul.mubr.bf16.gmra.mrb[4].mxu1 %v1063_v61 }
  0x90   : > { %2849 = vmatmul.mubr.bf16.gmra.mrb[4].mxu0 %v1730_v43  ;;  %2886 = vmatpush3.bf16.msra.mxu1 %v3047_v51 }
  0x91   : > { %2857 = vmatpush3.bf16.msra.mxu0 %v3047_v51  ;;  %2879 = vmatprep.subr.bf16.mxu1 %v3048_v44 }
  0x92   : > { %2858 = vmatprep.subr.bf16.mxu0 %v3048_v44  ;;  %2868 = vmatprep.mubr.bf16.mxu0 %v1893_v47 }
  0x93   : > { %2872 = vmatprep.mubr.bf16.mxu1 %v1895_v50 }
  0x94   : > { %2887 = vmatpush3.bf16.msra.mxu1 %v3048_v44 }
  0x95   : > { %2859 = vmatpush3.bf16.msra.mxu0 %v3048_v44  ;;  %2880 = vmatprep.subr.bf16.mxu1 %v3049_v8 }
  0x96   : > { %2860 = vmatprep.subr.bf16.mxu0 %v3049_v8 }
  0x98   : > { %2888 = vmatpush3.bf16.msra.mxu1 %v3049_v8 }
  0x99   : > { %2861 = vmatpush3.bf16.msra.mxu0 %v3049_v8  ;;  %2881 = vmatprep.subr.bf16.mxu1 %v3050_v9 }
  0x9a   : > { %2862 = vmatprep.subr.bf16.mxu0 %v3050_v9 }
  0x9c   : > { %2889 = vmatpush3.bf16.msra.mxu1 %v3050_v9 }
  0x9d   : > { %2863 = vmatpush3.bf16.msra.mxu0 %v3050_v9  ;;  %2882 = vmatprep.subr.bf16.mxu1 %v3051_v19 }
  0x9e   : > { %2864 = vmatprep.subr.bf16.mxu0 %v3051_v19 }
  0xa0   : > { %2890 = vmatpush3.bf16.msra.mxu1 %v3051_v19 }
  0xa1   : > { %2865 = vmatpush3.bf16.msra.mxu0 %v3051_v19  ;;  %2883 = vmatprep.subr.bf16.mxu1 %v3052_v25 }
  0xa2   : > { %2866 = vmatprep.subr.bf16.mxu0 %v3052_v25 }
  0xa4   : > { %2891 = vmatpush3.bf16.msra.mxu1 %v3052_v25 }
  0xa5   : > { %2867 = vmatpush3.bf16.msra.mxu0 %v3052_v25 }
  0xa7   : > { %2873 = vmatmul.mubr.bf16.vlgmr.msra.gmra.mrb[8].mxu1 %v1896_v40 }
  0xa8   : > { %2869 = vmatmul.mubr.bf16.vlgmr.msra.gmra.mrb[0].mxu0 %v1894_v41 }
 0x15a   : > { %v2750_v42 = vpop.f32.mrb[0].mxu1 }
 0x15b   : > { %v1163_v45 = vpop.f32.mrb[1].mxu1 }
 0x15c   : > { %v2751_v49 = vpop.f32.mrb[2].mxu1 }
 0x15d   : > { %v1166_v55 = vpop.f32.mrb[3].mxu1 }
 0x162   : > { %v2754_v61 = vpop.f32.mrb[4].mxu1 }
 0x163   : > { %v2850_v20 = vpop.f32.mrb[4].mxu0  ;;  %v1179_v54 = vpop.f32.mrb[5].mxu1 }
 0x164   : > { %v2896_v56 = vadd.f32 %v2850_v20, %v2754_v61  ;;  %v1846_v57 = vpop.f32.mrb[5].mxu0  ;;  %v2755_v58 = vpop.f32.mrb[6].mxu1 }
 0x165   : > { %v2898_v59 = vadd.f32 %v1846_v57, %v1179_v54  ;;  %v2851_v60 = vpop.f32.mrb[6].mxu0  ;;  %v1182_v62 = vpop.f32.mrb[7].mxu1 }
 0x166   : > { %v2900_v63 = vadd.f32 %v2851_v60, %v2755_v58  ;;  %v1849_v2 = vpop.f32.mrb[7].mxu0 }
 0x167   : > { %v2902_v3 = vadd.f32 %v1849_v2, %v1182_v62 }
 0x17a   : > { %v2874_v18 = vpop.f32.mrb[8].mxu1 }
 0x17b   : > { %v2870_v22 = vpop.f32.mrb[0].mxu0  ;;  %v2897_v23 = vadd.f32 %v2896_v56, %v2874_v18  ;;  %v2012_v53 = vpop.f32.mrb[9].mxu1 }
 0x17c   : > { %v2892_v35 = vadd.f32 %v2870_v22, %v2750_v42  ;;  %v1996_v27 = vpop.f32.mrb[1].mxu0  ;;  %v2899_v29 = vadd.f32 %v2898_v59, %v2012_v53  ;;  %v2875_v1 = vpop.f32.mrb[10].mxu1 }
 0x17d   : > { %v2072_v34 = vadd.f32 %v2897_v23, %v2489_v17  ;;  %v2893_v16 = vadd.f32 %v1996_v27, %v1163_v45  ;;  %v2871_v28 = vpop.f32.mrb[2].mxu0  ;;  %v2901_v33 = vadd.f32 %v2900_v63, %v2875_v1  ;;  %v2015_v39 = vpop.f32.mrb[11].mxu1  ;;  %v2091_v45 = vmul.f32 0.70710677, %v2513_v26 }
 0x17e   : > { %v2068_v38 = vadd.f32 %v2892_v35, %v2489_v17  ;;  %v2070_v46 = vadd.f32 %v2899_v29, %v2489_v17  ;;  %v2894_v48 = vadd.f32 %v2871_v28, %v2751_v49  ;;  %v1999_v51 = vpop.f32.mrb[3].mxu0  ;;  %v2903_v43 = vadd.f32 %v2902_v3, %v2015_v39 }
 0x17f   : > { %v2104_v44 = vmul.f32 0.70710677, %v2072_v34  ;;  %v2066_v47 = vadd.f32 %v2893_v16, %v2489_v17  ;;  %v2073_v50 = vadd.f32 %v2901_v33, %v2489_v17  ;;  %v2895_v8 = vadd.f32 %v1999_v51, %v1166_v55 }
 0x180   : > { %v2100_v9 = vmul.f32 0.70710677, %v2068_v38  ;;  %v2102_v19 = vmul.f32 0.70710677, %v2070_v46  ;;  %v2069_v25 = vadd.f32 %v2894_v48, %v2489_v17  ;;  %v2071_v31 = vadd.f32 %v2903_v43, %v2489_v17 }
 0x181   : > { %v2098_v40 = vmul.f32 0.70710677, %v2066_v47  ;;  %v2105_v41 = vmul.f32 0.70710677, %v2073_v50  ;;  %v2067_v42 = vadd.f32 %v2895_v8, %v2489_v17  ;;  %v2112_v54 = vadd.f32 %v2104_v44, %v2096_v21 }
 0x182   : > { %v2101_v61 = vmul.f32 0.70710677, %v2069_v25  ;;  %v2103_v20 = vmul.f32 0.70710677, %v2071_v31  ;;  %v2108_v57 = vadd.f32 %v2100_v9, %v2092_v52  ;;  %v2110_v58 = vadd.f32 %v2102_v19, %v2094_v0 }
 0x183   : > { %v2113_v56 = vadd.f32 %v2105_v41, %v2097_v32  ;;  %v2099_v49 = vmul.f32 0.70710677, %v2067_v42  ;;  %v2106_v60 = vadd.f32 %v2098_v40, %v2090_v24 }
 0x184   : > { %v2109_v55 = vadd.f32 %v2101_v61, %v2093_v30  ;;  %v2111_v59 = vadd.f32 %v2103_v20, %v2095_v37 }
 0x185   : > { %v2544_v62 = vpack.c.bf16 %v2113_v56, %v2112_v54  ;;  %v2107_v63 = vadd.f32 %v2099_v49, %v2091_v45 }
 0x186   : > { %v2534_v2 = vpack.c.bf16 %v2109_v55, %v2108_v57  ;;  %v2539_v3 = vpack.c.bf16 %v2111_v59, %v2110_v58 }
 0x187   : > { %2551 = vst [vmem:[%s279_s25 + $0x18] sm:$0xff] %v2544_v62   ;;  %v2529_v4 = vpack.c.bf16 %v2107_v63, %v2106_v60 }
 0x188   : > { %2549 = vst [vmem:[%s279_s25 + $0x8] sm:$0xff] %v2534_v2   ;;  %2550 = vst [vmem:[%s279_s25 + $0x10] sm:$0xff] %v2539_v3  }
 0x189   : > { %2530 = vst [vmem:[%s279_s25] sm:$0xff] %v2529_v4  }
 0x18a PF: > { %s14_s17 = sadd.s32 1, %s3075_s17   ;;  %s3547_s15 = smov %s3071_s16 }
 0x18b   : > { %p11_p5 = scmp.ge.s32.totalorder %s14_s17, 4   ;;  %s3548_s16 = smov %s3550_s18 }
 0x18d   :  { %13 = sbr.rel (!%p11_p5) target bundleno = 2 (0x2), region = 88 }

// kernel: _lambda_.19
= control target key start
LH: loop header
LB: loop body
LE: loop exit
PB: predicated region body
PF: predicated region fallthrough
CT: control target
= control target key end

     0   :  { %v366_v0 = vmov 0.0|0.0   ;;  %vm367_vm0 = vmmov 0   ;;  %v368_v4 = vmov 0.0   ;;  %vm157_vm1 = vcmask 1041409   ;;  %s519_s1 = inlined_call_operand.vmem [shape: f32[128,128], index: 1, kind: input, shape index: {}]   ;;  %s520_s0 = inlined_call_operand.vmem [shape: bf16[8,16,128], index: 0, kind: input, shape index: {}]   ;;  %s521_s2 = inlined_call_operand.vmem [shape: f32[1,128], index: 2, kind: input, shape index: {}]   ;;  %s522_s3 = inlined_call_operand.vmem [shape: f32[8,128], index: 3, kind: output, shape index: {}]  }
   0x1   :  { %339 = vmatprep.subr.bf16.mxu0 %v366_v0  ;;  %v126_v1 = vld [vmem:[%s519_s1] sm:$0xff]  ;;  %v127_v2 = vld [vmem:[%s519_s1 + $0x8] sm:$0xff]  ;;  %v128_v3 = vld [vmem:[%s519_s1 + $0x10] sm:$0xff]  ;;  %336 = vmatprep.mubr.msk.f32.mxu0 %vm367_vm0, %v368_v4  ;;  %vm159_vm2 = vcmask 1042434   ;;  %vm161_vm3 = vcmask 1043459   ;;  %vm163_vm4 = vcmask 1044484  }
   0x2   :  { %v340_v5 = vpack.c.bf16 %v127_v2, %v126_v1  ;;  %v129_v6 = vld [vmem:[%s519_s1 + $0x18] sm:$0xff]  ;;  %v130_v7 = vld [vmem:[%s519_s1 + $0x20] sm:$0xff]  ;;  %v131_v8 = vld [vmem:[%s519_s1 + $0x28] sm:$0xff]  ;;  %vm165_vm5 = vcmask 1045509   ;;  %vm167_vm6 = vcmask 1046534   ;;  %vm169_vm7 = vcmask 1047559  }
   0x3   :  { %v411_v9 = vld [vmem:[%s519_s1 + $0x30] sm:$0xff]  ;;  %v416_v10 = vld [vmem:[%s519_s1 + $0x38] sm:$0xff]  ;;  %v421_v11 = vld [vmem:[%s519_s1 + $0x40] sm:$0xff]  ;;  %v343_v12 = vpack.c.bf16 %v129_v6, %v128_v3  ;;  %v346_v16 = vpack.c.bf16 %v131_v8, %v130_v7 }
   0x4   :  { %341 = vmatpush3.bf16.msra.mxu0 %v340_v5  ;;  %v426_v13 = vld [vmem:[%s519_s1 + $0x48] sm:$0xff]  ;;  %v431_v14 = vld [vmem:[%s519_s1 + $0x50] sm:$0xff]  ;;  %v436_v15 = vld [vmem:[%s519_s1 + $0x58] sm:$0xff]  ;;  %v349_v20 = vpack.c.bf16 %v416_v10, %v411_v9 }
   0x5   :  { %342 = vmatprep.subr.bf16.mxu0 %v366_v0  ;;  %v442_v17 = vld [vmem:[%s519_s1 + $0x60] sm:$0xff]  ;;  %v447_v18 = vld [vmem:[%s519_s1 + $0x68] sm:$0xff]  ;;  %v452_v19 = vld [vmem:[%s519_s1 + $0x70] sm:$0xff]  ;;  %v352_v21 = vpack.c.bf16 %v426_v13, %v421_v11  ;;  %v355_v22 = vpack.c.bf16 %v436_v15, %v431_v14 }
   0x6   :  { %v358_v23 = vpack.c.bf16 %v447_v18, %v442_v17  ;;  %v465_v24 = vld [vmem:[%s519_s1 + $0x78] sm:$0xff]  ;;  %v249_v25 = vld [vmem:[%s520_s0] sm:$0xff]   ;;  %v280_v26 = vld [vmem:[%s520_s0 + $0x8] sm:$0xff]  }
   0x7   :  { %v361_v27 = vpack.c.bf16 %v465_v24, %v452_v19  ;;  %v250_v28 = vunpack.c.l.bf16 %v249_v25  ;;  %v251_v29 = vunpack.c.h.bf16 %v249_v25  ;;  %v254_v30 = vunpack.c.l.bf16 %v280_v26  ;;  %v281_v31 = vld [vmem:[%s520_s0 + $0x10] sm:$0xff]   ;;  %v282_v32 = vld [vmem:[%s520_s0 + $0x18] sm:$0xff]   ;;  %v283_v33 = vld [vmem:[%s520_s0 + $0x20] sm:$0xff]  }
   0x8   :  { %344 = vmatpush3.bf16.msra.mxu0 %v343_v12  ;;  %v255_v34 = vunpack.c.h.bf16 %v280_v26  ;;  %v258_v35 = vunpack.c.l.bf16 %v281_v31  ;;  %v259_v36 = vunpack.c.h.bf16 %v281_v31  ;;  %v262_v37 = vunpack.c.l.bf16 %v282_v32  ;;  %v284_v38 = vld [vmem:[%s520_s0 + $0x28] sm:$0xff]   ;;  %v285_v39 = vld [vmem:[%s520_s0 + $0x30] sm:$0xff]   ;;  %v286_v40 = vld [vmem:[%s520_s0 + $0x38] sm:$0xff]  }
   0x9   :  { %345 = vmatprep.subr.bf16.mxu0 %v366_v0  ;;  %v263_v41 = vunpack.c.h.bf16 %v282_v32  ;;  %v266_v42 = vunpack.c.l.bf16 %v283_v33  ;;  %v267_v43 = vunpack.c.h.bf16 %v283_v33  ;;  %v270_v44 = vunpack.c.l.bf16 %v284_v38 }
   0xa   :  { %v271_v45 = vunpack.c.h.bf16 %v284_v38  ;;  %v274_v46 = vunpack.c.l.bf16 %v285_v39  ;;  %v275_v47 = vunpack.c.h.bf16 %v285_v39  ;;  %v278_v48 = vunpack.c.l.bf16 %v286_v40 }
   0xb   :  { %v279_v49 = vunpack.c.h.bf16 %v286_v40  ;;  %v46_v50 = vmax.f32 %v250_v28, 0.0  ;;  %v47_v51 = vmax.f32 %v251_v29, 0.0  ;;  %v48_v52 = vmax.f32 %v254_v30, 0.0 }
   0xc   :  { %347 = vmatpush3.bf16.msra.mxu0 %v346_v16  ;;  %v49_v53 = vmax.f32 %v255_v34, 0.0  ;;  %v50_v54 = vmax.f32 %v258_v35, 0.0  ;;  %v51_v55 = vmax.f32 %v259_v36, 0.0  ;;  %v52_v56 = vmax.f32 %v262_v37, 0.0 }
   0xd   :  { %348 = vmatprep.subr.bf16.mxu0 %v366_v0  ;;  %v53_v57 = vmax.f32 %v263_v41, 0.0  ;;  %v54_v58 = vmax.f32 %v266_v42, 0.0  ;;  %v55_v59 = vmax.f32 %v267_v43, 0.0  ;;  %v56_v60 = vmax.f32 %v270_v44, 0.0 }
   0xe   :  { %v57_v61 = vmax.f32 %v271_v45, 0.0  ;;  %v58_v62 = vmax.f32 %v274_v46, 0.0  ;;  %v59_v63 = vmax.f32 %v275_v47, 0.0  ;;  %v60_v1 = vmax.f32 %v278_v48, 0.0 }
   0xf   :  { %v61_v2 = vmax.f32 %v279_v49, 0.0  ;;  %v62_v3 = vadd.f32 %v47_v51, %v46_v50  ;;  %v69_v4 = vadd.f32 %v49_v53, %v48_v52  ;;  %v76_v5 = vadd.f32 %v51_v55, %v50_v54 }
  0x10   :  { %350 = vmatpush3.bf16.msra.mxu0 %v349_v20  ;;  %v83_v6 = vadd.f32 %v53_v57, %v52_v56  ;;  %v90_v7 = vadd.f32 %v55_v59, %v54_v58  ;;  %v97_v8 = vadd.f32 %v57_v61, %v56_v60  ;;  %v104_v9 = vadd.f32 %v59_v63, %v58_v62 }
  0x11   :  { %351 = vmatprep.subr.bf16.mxu0 %v366_v0  ;;  %v63_v10 = vrot.slane %v62_v3, 4  ;;  %v70_v12 = vrot.slane %v69_v4, 4  ;;  %v77_v16 = vrot.slane %v76_v5, 4  ;;  %v111_v25 = vadd.f32 %v61_v2, %v60_v1 }
  0x12   :  { %v84_v26 = vrot.slane %v83_v6, 4  ;;  %v91_v28 = vrot.slane %v90_v7, 4  ;;  %v98_v29 = vrot.slane %v97_v8, 4  ;;  %v105_v30 = vrot.slane %v104_v9, 4 }
  0x13   :  { %v64_v31 = vadd.f32 %v63_v10, %v62_v3  ;;  %v71_v32 = vadd.f32 %v70_v12, %v69_v4  ;;  %v78_v33 = vadd.f32 %v77_v16, %v76_v5  ;;  %v112_v34 = vrot.slane %v111_v25, 4 }
  0x14   :  { %353 = vmatpush3.bf16.msra.mxu0 %v352_v21  ;;  %v85_v20 = vadd.f32 %v84_v26, %v83_v6  ;;  %v92_v35 = vadd.f32 %v91_v28, %v90_v7  ;;  %v99_v36 = vadd.f32 %v98_v29, %v97_v8  ;;  %v106_v37 = vadd.f32 %v105_v30, %v104_v9 }
  0x15   :  { %354 = vmatprep.subr.bf16.mxu0 %v366_v0  ;;  %v65_v38 = vrot.slane %v64_v31, 2  ;;  %v72_v39 = vrot.slane %v71_v32, 2  ;;  %v79_v40 = vrot.slane %v78_v33, 2  ;;  %v113_v41 = vadd.f32 %v112_v34, %v111_v25  ;;  %v247_v25 = vld [vmem:[%s521_s2] ss:$0 sm:$0xff] }
  0x16   :  { %v86_v42 = vrot.slane %v85_v20, 2  ;;  %v93_v43 = vrot.slane %v92_v35, 2  ;;  %v100_v44 = vrot.slane %v99_v36, 2  ;;  %v107_v45 = vrot.slane %v106_v37, 2 }
  0x17   :  { %v66_v46 = vadd.f32 %v65_v38, %v64_v31  ;;  %v73_v47 = vadd.f32 %v72_v39, %v71_v32  ;;  %v80_v11 = vadd.f32 %v79_v40, %v78_v33  ;;  %v114_v13 = vrot.slane %v113_v41, 2 }
  0x18   :  { %356 = vmatpush3.bf16.msra.mxu0 %v355_v22  ;;  %v87_v21 = vadd.f32 %v86_v42, %v85_v20  ;;  %v94_v48 = vadd.f32 %v93_v43, %v92_v35  ;;  %v101_v49 = vadd.f32 %v100_v44, %v99_v36  ;;  %v108_v50 = vadd.f32 %v107_v45, %v106_v37 }
  0x19   :  { %357 = vmatprep.subr.bf16.mxu0 %v366_v0  ;;  %v67_v51 = vrot.slane %v66_v46, 1  ;;  %v74_v52 = vrot.slane %v73_v47, 1  ;;  %v81_v53 = vrot.slane %v80_v11, 1  ;;  %v115_v54 = vadd.f32 %v114_v13, %v113_v41 }
  0x1a   :  { %v88_v55 = vrot.slane %v87_v21, 1  ;;  %v95_v56 = vrot.slane %v94_v48, 1  ;;  %v102_v57 = vrot.slane %v101_v49, 1  ;;  %v109_v58 = vrot.slane %v108_v50, 1 }
  0x1b   :  { %v68_v59 = vadd.f32 %v67_v51, %v66_v46  ;;  %v75_v60 = vadd.f32 %v74_v52, %v73_v47  ;;  %v82_v61 = vadd.f32 %v81_v53, %v80_v11  ;;  %v116_v62 = vrot.slane %v115_v54, 1 }
  0x1c   :  { %359 = vmatpush3.bf16.msra.mxu0 %v358_v23  ;;  %v89_v14 = vadd.f32 %v88_v55, %v87_v21  ;;  %v96_v15 = vadd.f32 %v95_v56, %v94_v48  ;;  %v103_v22 = vadd.f32 %v102_v57, %v101_v49  ;;  %v110_v63 = vadd.f32 %v109_v58, %v108_v50 }
  0x1d   :  { %360 = vmatprep.subr.bf16.mxu0 %v366_v0  ;;  %v117_v1 = vadd.f32 %v116_v62, %v115_v54  ;;  %v118_v2 = vmul.f32 0.0625, %v68_v59  ;;  %v119_v3 = vmul.f32 0.0625, %v75_v60  ;;  %v120_v4 = vmul.f32 0.0625, %v82_v61 }
  0x1e   :  { %v121_v5 = vmul.f32 0.0625, %v89_v14  ;;  %v122_v6 = vmul.f32 0.0625, %v96_v15  ;;  %v123_v7 = vmul.f32 0.0625, %v103_v22  ;;  %v124_v17 = vmul.f32 0.0625, %v110_v63 }
  0x1f   :  { %v158_v8 = vsel %vm157_vm1, %v119_v3, %v118_v2  ;;  %v125_v0 = vmul.f32 0.0625, %v117_v1 }
  0x20   :  { %362 = vmatpush3.bf16.msra.mxu0 %v361_v27  ;;  %v160_v18 = vsel %vm159_vm2, %v120_v4, %v158_v8 }
  0x21   :  { %v162_v23 = vsel %vm161_vm3, %v121_v5, %v160_v18 }
  0x22   :  { %v164_v9 = vsel %vm163_vm4, %v122_v6, %v162_v23 }
  0x23   :  { %v166_v10 = vsel %vm165_vm5, %v123_v7, %v164_v9 }
  0x24   :  { %v168_v12 = vsel %vm167_vm6, %v124_v17, %v166_v10 }
  0x25   :  { %v170_v16 = vsel %vm169_vm7, %v125_v0, %v168_v12 }
  0x26   :  { %337 = vmatmul.mubr.f32.vlgmr.msra.gmra.mrb[0].mxu0 %v170_v16 }
  0xf9   :  { %v238_v26 = vpop.f32.mrb[0].mxu0 }
  0xfa   :  { %v239_v19 = vadd.f32 %v247_v25, %v238_v26  ;;  %v338_v24 = vpop.f32.mrb[1].mxu0 }
  0xfc   :  { %242 = vst [vmem:[%s522_s3] sm:$0xff] %v239_v19 }

// kernel: _lambda_.16
= control target key start
LH: loop header
LB: loop body
LE: loop exit
PB: predicated region body
PF: predicated region fallthrough
CT: control target
= control target key end

     0   :  { %s2748_s12 = smov 0   ;;  %s2750_s13 = smov 0   ;;  %s3168_s0 = inlined_call_operand.vmem [shape: bf16[2,1,10,10,128], index: 0, kind: input, shape index: {}]   ;;  %s3169_s1 = inlined_call_operand.vmem [shape: bf16[9,128,128], index: 1, kind: input, shape index: {}]   ;;  %s3170_s2 = inlined_call_operand.vmem [shape: f32[1,128], index: 2, kind: input, shape index: {}]   ;;  %s3171_s3 = inlined_call_operand.vmem [shape: bf16[2,64,128], index: 3, kind: output, shape index: {}]  }
   0x1   :  { %s2752_s14 = smov 0  }
   0x2 LB: > { %s25_s15 = sadd.s32 1, %s2722_s13  ;;  %p1956_p0 = scmp.ge.s32.totalorder %s2726_s14, 1  ;;  %s2726_s14 = sphi %s2752_s14, %s13_s14   ;;  %s2722_s13 = sphi %s2750_s13, %s3173_s13   ;;  %s2718_s12 = sphi %s2748_s12, %s3172_s12  }
   0x3   : > { %p27_p1 = scmp.ge.s32.totalorder %s25_s15, 2  ;;  %p168_p2 = scmp.lt.s32.totalorder %s2726_s14, 3 }
   0x5   : > { %s3175_s15 = smov (%p27_p1, %s25_s15), 0  ;;  %p169_p3 = pnand %p1956_p0, %p168_p2 }
   0x6   : > { %v2632_v0 = vld [vmem:[%s3169_s1] sm:$0xff] (!%p169_p3)   ;;  %p202_p4 = scmp.lt.s32.totalorder (!%p169_p3), %s2718_s12, 1  ;;  %v2634_v2 = vld [vmem:[%s3169_s1 + $0x8] sm:$0xff] (!%p169_p3)   ;;  %v2636_v4 = vld [vmem:[%s3169_s1 + $0x10] sm:$0xff] (!%p169_p3)  }
   0x7   : > { %172 = sbr.rel (%p169_p3) target bundleno = 391 (0x187), region = 32  ;;  %v2633_v1 = vld [vmem:[%s3169_s1 + $0x100] sm:$0xff] (!%p169_p3)   ;;  %2311 = vmatprep.subr.bf16.mxu1 (!%p169_p3), %v2632_v0  ;;  %v2635_v3 = vld [vmem:[%s3169_s1 + $0x108] sm:$0xff] (!%p169_p3)   ;;  %v2637_v5 = vld [vmem:[%s3169_s1 + $0x110] sm:$0xff] (!%p169_p3)  }
   0x8   : > { %2407 = vmatprep.subr.bf16.mxu0 (!%p169_p3), %v2633_v1  ;;  %2312 = vmatpush3.bf16.msra.mxu1 (!%p169_p3), %v2632_v0  ;;  %v2638_v6 = vld [vmem:[%s3169_s1 + $0x18] sm:$0xff] (!%p169_p3)   ;;  %v2640_v8 = vld [vmem:[%s3169_s1 + $0x20] sm:$0xff] (!%p169_p3)   ;;  %v2642_v10 = vld [vmem:[%s3169_s1 + $0x28] sm:$0xff] (!%p169_p3)  }
   0x9   : > { %2408 = vmatpush3.bf16.msra.mxu0 (!%p169_p3), %v2633_v1  ;;  %2313 = vmatprep.subr.bf16.mxu1 (!%p169_p3), %v2634_v2  ;;  %v2639_v7 = vld [vmem:[%s3169_s1 + $0x118] sm:$0xff] (!%p169_p3)   ;;  %v2641_v9 = vld [vmem:[%s3169_s1 + $0x120] sm:$0xff] (!%p169_p3)   ;;  %v2643_v12 = vld [vmem:[%s3169_s1 + $0x128] sm:$0xff] (!%p169_p3)  }
   0xa   : > { %2409 = vmatprep.subr.bf16.mxu0 (!%p169_p3), %v2635_v3  ;;  %v2644_v25 = vld [vmem:[%s3169_s1 + $0x30] sm:$0xff] (!%p169_p3)   ;;  %v2646_v39 = vld [vmem:[%s3169_s1 + $0x38] sm:$0xff] (!%p169_p3)   ;;  %v2648_v46 = vld [vmem:[%s3169_s1 + $0x40] sm:$0xff] (!%p169_p3)  }
   0xb   : > { %v2645_v31 = vld [vmem:[%s3169_s1 + $0x130] sm:$0xff] (!%p169_p3)   ;;  %v2647_v42 = vld [vmem:[%s3169_s1 + $0x138] sm:$0xff] (!%p169_p3)   ;;  %v2649_v48 = vld [vmem:[%s3169_s1 + $0x140] sm:$0xff] (!%p169_p3)  }
   0xc   : > { %2314 = vmatpush3.bf16.msra.mxu1 (!%p169_p3), %v2634_v2  ;;  %v2650_v54 = vld [vmem:[%s3169_s1 + $0x48] sm:$0xff] (!%p169_p3)  }
   0xd   : > { %2410 = vmatpush3.bf16.msra.mxu0 (!%p169_p3), %v2635_v3  ;;  %2315 = vmatprep.subr.bf16.mxu1 (!%p169_p3), %v2636_v4  ;;  %v2651_v61 = vld [vmem:[%s3169_s1 + $0x148] sm:$0xff] (!%p169_p3)  }
   0xe   : > { %s3177_s12 = smov (!%p202_p4, %s2718_s12), 1  ;;  %2411 = vmatprep.subr.bf16.mxu0 %v2637_v5 }
   0xf   : > { %s2607_s5 = smul.u32 80, %s3177_s12  ;;  %s2171_s30 = sshll.u32 %s3177_s12, 5 }
  0x10   : > { %2316 = vmatpush3.bf16.msra.mxu1 %v2636_v4  ;;  %v2652_v4 = vld [vmem:[%s3169_s1 + $0x50] sm:$0xff]   ;;  %s221_s6 = scalar_lea.vmem %s3171_s3, %s2171_s30 }
  0x11   : > { %2412 = vmatpush3.bf16.msra.mxu0 %v2637_v5  ;;  %2317 = vmatprep.subr.bf16.mxu1 %v2638_v6  ;;  %s2802_s16 = scalar_lea.vmem %s3168_s0, %s2607_s5 }
  0x12   : > { %2413 = vmatprep.subr.bf16.mxu0 %v2639_v7  ;;  %v223_v11 = vld [vmem:[%s2802_s16] ss:$8 sps:$4 sm:$0xff]   ;;  %v226_v15 = vld [vmem:[%s2802_s16 + $0xc] sm:$0x1]  ;;  %v227_v16 = vld [vmem:[%s2802_s16 + $0x10] ss:$8 sps:$4 sm:$0xff]  }
  0x13   : > { %v243_v13 = vunpack.c.l.bf16 %v223_v11  ;;  %v245_v14 = vunpack.c.h.bf16 %v223_v11  ;;  %v228_v17 = vld [vmem:[%s2802_s16 + $0x14] sm:$0x1]  ;;  %v246_v18 = vunpack.c.l.bf16 %v226_v15  ;;  %v247_v19 = vunpack.c.l.bf16 %v227_v16  ;;  %v230_v24 = vld [vmem:[%s2802_s16 + $0x1c] sm:$0x1]  ;;  %v231_v29 = vld [vmem:[%s2802_s16 + $0x20] ss:$8 sps:$4 sm:$0xff]  }
  0x14   : > { %2318 = vmatpush3.bf16.msra.mxu1 %v2638_v6  ;;  %v249_v20 = vunpack.c.h.bf16 %v227_v16  ;;  %v248_v23 = vunpack.c.l.bf16 %v228_v17  ;;  %v250_v30 = vunpack.c.l.bf16 %v230_v24  ;;  %v232_v34 = vld [vmem:[%s2802_s16 + $0x24] sm:$0x1]  ;;  %v251_v35 = vunpack.c.l.bf16 %v231_v29  ;;  %v234_v55 = vld [vmem:[%s2802_s16 + $0x2c] sm:$0x1]  ;;  %v235_v57 = vld [vmem:[%s2802_s16 + $0x30] ss:$8 sps:$4 sm:$0xff]  }
  0x15   : > { %2414 = vmatpush3.bf16.msra.mxu0 %v2639_v7  ;;  %2319 = vmatprep.subr.bf16.mxu1 %v2640_v8  ;;  %v263_v21 = vmax.f32 %v243_v13, 0.0  ;;  %v2814_v22 = vmax.f32 %v245_v14, 0.0  ;;  %v266_v26 = vmax.f32 %v246_v18, 0.0  ;;  %v2820_v27 = vmax.f32 %v247_v19, 0.0  ;;  %v236_v58 = vld [vmem:[%s2802_s16 + $0x34] sm:$0x1] }
  0x16   : > { %2415 = vmatprep.subr.bf16.mxu0 %v2641_v9  ;;  %v2822_v28 = vmax.f32 %v249_v20, 0.0  ;;  %v268_v33 = vmax.f32 %v248_v23, 0.0  ;;  %v252_v36 = vunpack.c.l.bf16 %v232_v34  ;;  %v270_v37 = vmax.f32 %v250_v30, 0.0  ;;  %v238_v2 = vld [vmem:[%s2802_s16 + $0x3c] sm:$0x1]  ;;  %v2653_v13 = vld [vmem:[%s3169_s1 + $0x150] sm:$0xff]  }
  0x17   : > { %283 = vst [vmem:[#allocation2] sm:$0xff] %v263_v21  ;;  %285 = vst [vmem:[#allocation2 + $0x10] sm:$0xff] %v2814_v22  ;;  %v311_v32 = vpack.c.bf16 %v2814_v22, %v263_v21  ;;  %v793_v38 = vpack.c.bf16 %v2820_v27, %v2814_v22  ;;  %v2838_v40 = vmax.f32 %v251_v35, 0.0  ;;  %v253_v41 = vunpack.c.h.bf16 %v231_v29  ;;  %v239_v3 = vld [vmem:[%s2802_s16 + $0x40] ss:$8 sps:$4 sm:$0xff]   ;;  %v2654_v21 = vld [vmem:[%s3169_s1 + $0x58] sm:$0xff]  }
  0x18   : > { %2320 = vmatpush3.bf16.msra.mxu1 %v2640_v8  ;;  %286 = vst [vmem:[#allocation2 + $0x18] sm:$0x3] %v266_v26  ;;  %287 = vst [vmem:[#allocation2 + $0x20] sm:$0xff] %v2820_v27  ;;  %v272_v43 = vmax.f32 %v252_v36, 0.0  ;;  %v2861_v50 = vpack.c.bf16 %v2822_v28, %v2820_v27  ;;  %v254_v59 = vunpack.c.l.bf16 %v234_v55  ;;  %v255_v62 = vunpack.c.l.bf16 %v235_v57  ;;  %v240_v8 = vld [vmem:[%s2802_s16 + $0x44] sm:$0x1] }
  0x19   : > { %2416 = vmatpush3.bf16.msra.mxu0 %v2641_v9  ;;  %2321 = vmatprep.subr.bf16.mxu1 %v2642_v10  ;;  %289 = vst [vmem:[#allocation2 + $0x30] sm:$0xff] %v2822_v28  ;;  %288 = vst [vmem:[#allocation2 + $0x28] sm:$0x3] %v268_v33  ;;  %v794_v44 = vpack.c.bf16 %v2838_v40, %v2822_v28  ;;  %v2846_v45 = vmax.f32 %v253_v41, 0.0  ;;  %v256_v63 = vunpack.c.l.bf16 %v236_v58  ;;  %v257_v0 = vunpack.c.h.bf16 %v235_v57  ;;  %v224_v16 = vld [vmem:[%s2802_s16 + $0x4] sm:$0x1] }
  0x1a   : > { %2417 = vmatprep.subr.bf16.mxu0 %v2643_v12  ;;  %2327 = vmatprep.mubr.bf16.mxu1 %v311_v32  ;;  %290 = vst [vmem:[#allocation2 + $0x38] sm:$0x3] %v270_v37  ;;  %291 = vst [vmem:[#allocation2 + $0x40] sm:$0xff] %v2838_v40  ;;  %v274_v1 = vmax.f32 %v254_v59, 0.0  ;;  %v2891_v5 = vmax.f32 %v255_v62, 0.0  ;;  %v258_v9 = vunpack.c.l.bf16 %v238_v2  ;;  %v260_v11 = vunpack.c.l.bf16 %v240_v8  ;;  %v2655_v26 = vld [vmem:[%s3169_s1 + $0x158] sm:$0xff]  }
  0x1b   : > { %292 = vst [vmem:[#allocation2 + $0x48] sm:$0x3] %v272_v43  ;;  %293 = vst [vmem:[#allocation2 + $0x50] sm:$0xff] %v2846_v45  ;;  %v2869_v53 = vpack.c.bf16 %v2846_v45, %v2838_v40  ;;  %v276_v6 = vmax.f32 %v256_v63, 0.0  ;;  %v2893_v7 = vmax.f32 %v257_v0, 0.0  ;;  %v244_v20 = vunpack.c.l.bf16 %v224_v16  ;;  %v2656_v30 = vld [vmem:[%s3169_s1 + $0x60] sm:$0xff]  }
  0x1c   : > { %2322 = vmatpush3.bf16.msra.mxu1 %v2642_v10  ;;  %294 = vst [vmem:[#allocation2 + $0x58] sm:$0x3] %v274_v1  ;;  %v259_v10 = vunpack.c.l.bf16 %v239_v3  ;;  %295 = vst [vmem:[#allocation2 + $0x60] sm:$0xff] %v2891_v5  ;;  %v278_v15 = vmax.f32 %v258_v9, 0.0  ;;  %v795_v17 = vpack.c.bf16 %v2891_v5, %v2846_v45  ;;  %v280_v19 = vmax.f32 %v260_v11, 0.0  ;;  %v2657_v35 = vld [vmem:[%s3169_s1 + $0x160] sm:$0xff]  }
  0x1d   : > { %2418 = vmatpush3.bf16.msra.mxu0 %v2643_v12  ;;  %2323 = vmatprep.subr.bf16.mxu1 %v2644_v25  ;;  %v261_v12 = vunpack.c.h.bf16 %v239_v3  ;;  %296 = vst [vmem:[#allocation2 + $0x68] sm:$0x3] %v276_v6  ;;  %297 = vst [vmem:[#allocation2 + $0x70] sm:$0xff] %v2893_v7  ;;  %v2903_v14 = vpack.c.bf16 %v2893_v7, %v2891_v5  ;;  %v264_v24 = vmax.f32 %v244_v20, 0.0  ;;  %v2661_v55 = vld [vmem:[%s3169_s1 + $0x170] sm:$0xff]   ;;  %v2662_v57 = vld [vmem:[%s3169_s1 + $0x78] sm:$0xff]  }
  0x1e   : > { %2419 = vmatprep.subr.bf16.mxu0 %v2645_v31  ;;  %v2908_v18 = vmax.f32 %v259_v10, 0.0  ;;  %298 = vst [vmem:[#allocation2 + $0x78] sm:$0x3] %v278_v15  ;;  %300 = vst [vmem:[#allocation2 + $0x88] sm:$0x3] %v280_v19  ;;  %v2664_v58 = vld [vmem:[%s3169_s1 + $0x80] sm:$0xff]  }
  0x1f   : > { %v2851_v47 = vld [vmem:[#allocation2 + $0x11] sm:$0xff]  ;;  %v2913_v23 = vmax.f32 %v261_v12, 0.0  ;;  %284 = vst [vmem:[#allocation2 + $0x8] sm:$0x3] %v264_v24  ;;  %v2666_v3 = vld [vmem:[%s3169_s1 + $0x88] sm:$0xff]   ;;  %v2672_v16 = vld [vmem:[%s3169_s1 + $0xa0] sm:$0xff]  }
  0x20   : > { %2324 = vmatpush3.bf16.msra.mxu1 %v2644_v25  ;;  %v2857_v49 = vld [vmem:[#allocation2 + $0x21] sm:$0xff]  ;;  %299 = vst [vmem:[#allocation2 + $0x80] sm:$0xff] %v2908_v18  ;;  %v796_v25 = vpack.c.bf16 %v2908_v18, %v2893_v7  ;;  %v2928_v32 = vld [vmem:[#allocation2 + $0x12] sm:$0xff]  ;;  %v242_v19 = vld [vmem:[%s2802_s16 + $0x4c] sm:$0x1] }
  0x21   : > { %2420 = vmatpush3.bf16.msra.mxu0 %v2645_v31  ;;  %2325 = vmatprep.subr.bf16.mxu1 %v2646_v39  ;;  %v959_v51 = vpack.c.bf16 %v2857_v49, %v2851_v47  ;;  %v2865_v52 = vld [vmem:[#allocation2 + $0x31] sm:$0xff]  ;;  %301 = vst [vmem:[#allocation2 + $0x90] sm:$0xff] %v2913_v23  ;;  %v1295_v29 = vpack.c.bf16 %v2913_v23, %v2908_v18  ;;  %v2932_v34 = vld [vmem:[#allocation2 + $0x22] sm:$0xff] }
  0x22   : > { %2421 = vmatprep.subr.bf16.mxu0 %v2647_v42  ;;  %v2875_v56 = vld [vmem:[#allocation2 + $0x41] sm:$0xff]  ;;  %v2965_v59 = vld [vmem:[#allocation2 + $0x32] sm:$0xff]  ;;  %v2976_v63 = vpack.c.bf16 %v2865_v52, %v2857_v49 }
  0x23   : > { %2423 = vmatprep.mubr.bf16.mxu0 %v959_v51  ;;  %v960_v60 = vpack.c.bf16 %v2875_v56, %v2865_v52  ;;  %v955_v31 = vld [vmem:[#allocation2 + $0x51] sm:$0xff]  ;;  %v2667_v49 = vld [vmem:[%s3169_s1 + $0x188] sm:$0xff]   ;;  %v2673_v20 = vld [vmem:[%s3169_s1 + $0x1a0] sm:$0xff]  }
  0x24   : > { %2326 = vmatpush3.bf16.msra.mxu1 %v2646_v39  ;;  %v2930_v33 = vld [vmem:[#allocation2 + $0x61] sm:$0xff]  ;;  %v2972_v62 = vld [vmem:[#allocation2 + $0x52] sm:$0xff]  ;;  %v2981_v1 = vpack.c.bf16 %v955_v31, %v2875_v56 }
  0x25   : > { %2422 = vmatpush3.bf16.msra.mxu0 %v2647_v42  ;;  %2335 = vmatprep.subr.bf16.mxu1 %v2648_v46  ;;  %v961_v36 = vpack.c.bf16 %v2930_v33, %v955_v31  ;;  %v957_v37 = vld [vmem:[#allocation2 + $0x71] sm:$0xff]  ;;  %v2658_v39 = vld [vmem:[%s3169_s1 + $0x68] sm:$0xff]   ;;  %v1125_v42 = vpack.c.bf16 %v2932_v34, %v2928_v32 }
  0x26   : > { %2431 = vmatprep.subr.bf16.mxu0 %v2649_v48  ;;  %v2978_v0 = vld [vmem:[#allocation2 + $0x62] sm:$0xff]  ;;  %v2668_v56 = vld [vmem:[%s3169_s1 + $0x90] sm:$0xff]   ;;  %v3006_v10 = vpack.c.bf16 %v957_v37, %v2930_v33  ;;  %v2670_v12 = vld [vmem:[%s3169_s1 + $0x98] sm:$0xff]  }
  0x27   : > { %2328 = vmatmul.mubr.bf16.vlgmr.msra.gmra.mrb[0].mxu1 %v2861_v50  ;;  %v2941_v41 = vld [vmem:[#allocation2 + $0x81] sm:$0xff]  ;;  %v1127_v52 = vpack.c.bf16 %v2978_v0, %v2972_v62  ;;  %v2669_v9 = vld [vmem:[%s3169_s1 + $0x190] sm:$0xff]   ;;  %v2671_v15 = vld [vmem:[%s3169_s1 + $0x198] sm:$0xff]  }
  0x28   : > { %2336 = vmatpush3.bf16.msra.mxu1 %v2648_v46  ;;  %2331 = vmatprep.mubr.bf16.mxu1 %v2869_v53  ;;  %v962_v43 = vpack.c.bf16 %v2941_v41, %v957_v37  ;;  %v2659_v46 = vld [vmem:[%s3169_s1 + $0x168] sm:$0xff]   ;;  %v2677_v31 = vld [vmem:[%s3169_s1 + $0x1b0] sm:$0xff]   ;;  %v2679_v33 = vld [vmem:[%s3169_s1 + $0x1b8] sm:$0xff]   ;;  %v3052_v37 = vpack.c.bf16 %v2965_v59, %v2932_v34 }
  0x29   : > { %2424 = vmatmul.mubr.bf16.vlgmr.msra.gmra.mrb[0].mxu0 %v960_v60  ;;  %2337 = vmatprep.subr.bf16.mxu1 %v2650_v54  ;;  %v2665_v60 = vld [vmem:[%s3169_s1 + $0x180] sm:$0xff]   ;;  %v2674_v24 = vld [vmem:[%s3169_s1 + $0xa8] sm:$0xff]   ;;  %v2684_v34 = vld [vmem:[%s3169_s1 + $0xd0] sm:$0xff]  }
  0x2a   : > { %2432 = vmatpush3.bf16.msra.mxu0 %v2649_v48  ;;  %2427 = vmatprep.mubr.bf16.mxu0 %v961_v36  ;;  %v452_v48 = vld [vmem:[#allocation2 + $0x1] sm:$0xff]  ;;  %v2693_v23 = vld [vmem:[%s3169_s1 + $0x1f0] sm:$0xff]   ;;  %v2699_v40 = vld [vmem:[%s3169_s1 + $0x218] sm:$0xff]  }
  0x2b   : > { %2433 = vmatprep.subr.bf16.mxu0 %v2651_v61  ;;  %v460_v51 = vpack.c.bf16 %v2851_v47, %v452_v48  ;;  %v2663_v47 = vld [vmem:[%s3169_s1 + $0x178] sm:$0xff]   ;;  %v618_v6 = vld [vmem:[#allocation2 + $0x2] sm:$0xff]  ;;  %v2702_v5 = vld [vmem:[%s3169_s1 + $0x230] sm:$0xff]  }
  0x2c   : > { %2338 = vmatpush3.bf16.msra.mxu1 %v2650_v54  ;;  %v2660_v54 = vld [vmem:[%s3169_s1 + $0x70] sm:$0xff]   ;;  %v3000_v8 = vld [vmem:[#allocation2 + $0x82] sm:$0xff]  ;;  %v626_v11 = vpack.c.bf16 %v2928_v32, %v618_v6  ;;  %v2678_v32 = vld [vmem:[%s3169_s1 + $0xb8] sm:$0xff]  }
  0x2d   : > { %2339 = vmatprep.subr.bf16.mxu1 %v2652_v4  ;;  %v2681_v36 = vld [vmem:[%s3169_s1 + $0x1c0] sm:$0xff]   ;;  %v2690_v22 = vld [vmem:[%s3169_s1 + $0xe8] sm:$0xff]   ;;  %v2703_v7 = vld [vmem:[%s3169_s1 + $0x238] sm:$0xff]  }
  0x2e   : > { %2434 = vmatpush3.bf16.msra.mxu0 %v2651_v61  ;;  %v2970_v61 = vld [vmem:[#allocation2 + $0x42] sm:$0xff] }
  0x2f   : > { %2435 = vmatprep.subr.bf16.mxu0 %v2653_v13  ;;  %2332 = vmatmul.mubr.bf16.gmra.mrb[4].mxu1 %v2903_v14  ;;  %v1126_v2 = vpack.c.bf16 %v2970_v61, %v2965_v59  ;;  %v2691_v27 = vld [vmem:[%s3169_s1 + $0x1e8] sm:$0xff]  }
  0x30   : > { %2340 = vmatpush3.bf16.msra.mxu1 %v2652_v4  ;;  %2351 = vmatprep.mubr.bf16.mxu1 %v460_v51  ;;  %v2998_v4 = vld [vmem:[#allocation2 + $0x72] sm:$0xff]  ;;  %v2688_v51 = vld [vmem:[%s3169_s1 + $0xe0] sm:$0xff]   ;;  %v2701_v45 = vld [vmem:[%s3169_s1 + $0x228] sm:$0xff]  }
  0x31   : > { %2341 = vmatprep.subr.bf16.mxu1 %v2654_v21  ;;  %2428 = vmatmul.mubr.bf16.gmra.mrb[4].mxu0 %v962_v43  ;;  %v2683_v43 = vld [vmem:[%s3169_s1 + $0x1c8] sm:$0xff]   ;;  %v629_v48 = vpack.c.bf16 %v2998_v4, %v2978_v0 }
  0x32   : > { %2436 = vmatpush3.bf16.msra.mxu0 %v2653_v13  ;;  %2447 = vmatprep.mubr.bf16.mxu0 %v1125_v42  ;;  %v1128_v13 = vpack.c.bf16 %v3000_v8, %v2998_v4  ;;  %v2682_v42 = vld [vmem:[%s3169_s1 + $0xc8] sm:$0xff]  }
  0x33   : > { %2437 = vmatprep.subr.bf16.mxu0 %v2655_v26 }
  0x34   : > { %2342 = vmatpush3.bf16.msra.mxu1 %v2654_v21  ;;  %v262_v21 = vunpack.c.l.bf16 %v242_v19 }
  0x35   : > { %2343 = vmatprep.subr.bf16.mxu1 %v2656_v30 }
  0x36   : > { %2438 = vmatpush3.bf16.msra.mxu0 %v2655_v26  ;;  %v282_v26 = vmax.f32 %v262_v21, 0.0 }
  0x37   : > { %2439 = vmatprep.subr.bf16.mxu0 %v2657_v35 }
  0x38   : > { %2344 = vmatpush3.bf16.msra.mxu1 %v2656_v30  ;;  %302 = vst [vmem:[#allocation2 + $0x98] sm:$0x3] %v282_v26  ;;  %v2676_v30 = vld [vmem:[%s3169_s1 + $0xb0] sm:$0xff]  }
  0x39   : > { %2345 = vmatprep.subr.bf16.mxu1 %v2658_v39 }
  0x3a   : > { %2440 = vmatpush3.bf16.msra.mxu0 %v2657_v35  ;;  %v2680_v35 = vld [vmem:[%s3169_s1 + $0xc0] sm:$0xff]  }
  0x3b   : > { %2441 = vmatprep.subr.bf16.mxu0 %v2659_v46 }
  0x3c   : > { %2346 = vmatpush3.bf16.msra.mxu1 %v2658_v39  ;;  %v3056_v39 = vpack.c.bf16 %v2972_v62, %v2970_v61 }
  0x3d   : > { %2347 = vmatprep.subr.bf16.mxu1 %v2660_v54 }
  0x3e   : > { %2442 = vmatpush3.bf16.msra.mxu0 %v2659_v46  ;;  %v2685_v46 = vld [vmem:[%s3169_s1 + $0x1d0] sm:$0xff]  }
  0x3f   : > { %2443 = vmatprep.subr.bf16.mxu0 %v2661_v55  ;;  %v1457_v59 = vld [vmem:[#allocation2 + $0x91] sm:$0xff] }
  0x40   : > { %2348 = vmatpush3.bf16.msra.mxu1 %v2660_v54  ;;  %v2689_v54 = vld [vmem:[%s3169_s1 + $0x1e0] sm:$0xff]   ;;  %v1461_v28 = vpack.c.bf16 %v1457_v59, %v2941_v41 }
  0x41   : > { %2349 = vmatprep.subr.bf16.mxu1 %v2662_v57 }
  0x42   : > { %2444 = vmatpush3.bf16.msra.mxu0 %v2661_v55  ;;  %v2695_v55 = vld [vmem:[%s3169_s1 + $0x1f8] sm:$0xff]  }
  0x43   : > { %2445 = vmatprep.subr.bf16.mxu0 %v2663_v47 }
  0x44   : > { %2350 = vmatpush3.bf16.msra.mxu1 %v2662_v57  ;;  %v2696_v57 = vld [vmem:[%s3169_s1 + $0x200] sm:$0xff]  }
  0x45   : > { %2359 = vmatprep.subr.bf16.mxu1 %v2664_v58 }
  0x46   : > { %2446 = vmatpush3.bf16.msra.mxu0 %v2663_v47  ;;  %v2697_v47 = vld [vmem:[%s3169_s1 + $0x208] sm:$0xff]  }
  0x47   : > { %2455 = vmatprep.subr.bf16.mxu0 %v2665_v60  ;;  %2352 = vmatmul.mubr.bf16.vlgmr.msra.gmra.mrb[0].mxu1 %v2976_v63 }
  0x48   : > { %2360 = vmatpush3.bf16.msra.mxu1 %v2664_v58  ;;  %2355 = vmatprep.mubr.bf16.mxu1 %v2981_v1  ;;  %v2698_v58 = vld [vmem:[%s3169_s1 + $0x210] sm:$0xff]  }
  0x49   : > { %2448 = vmatmul.mubr.bf16.vlgmr.msra.gmra.mrb[0].mxu0 %v1126_v2  ;;  %2361 = vmatprep.subr.bf16.mxu1 %v2666_v3 }
  0x4a   : > { %2456 = vmatpush3.bf16.msra.mxu0 %v2665_v60  ;;  %2451 = vmatprep.mubr.bf16.mxu0 %v1127_v52 }
  0x4b   : > { %2457 = vmatprep.subr.bf16.mxu0 %v2667_v49 }
  0x4c   : > { %2362 = vmatpush3.bf16.msra.mxu1 %v2666_v3 }
  0x4d   : > { %2363 = vmatprep.subr.bf16.mxu1 %v2668_v56 }
  0x4e   : > { %2458 = vmatpush3.bf16.msra.mxu0 %v2667_v49 }
  0x4f   : > { %2459 = vmatprep.subr.bf16.mxu0 %v2669_v9  ;;  %2356 = vmatmul.mubr.bf16.gmra.mrb[4].mxu1 %v3006_v10 }
  0x50   : > { %2364 = vmatpush3.bf16.msra.mxu1 %v2668_v56  ;;  %2375 = vmatprep.mubr.bf16.mxu1 %v626_v11 }
  0x51   : > { %2365 = vmatprep.subr.bf16.mxu1 %v2670_v12  ;;  %2452 = vmatmul.mubr.bf16.gmra.mrb[4].mxu0 %v1128_v13  ;;  %v2160_v13 = vld [vmem:[%s3170_s2] ss:$0 sm:$0xff] }
  0x52   : > { %2460 = vmatpush3.bf16.msra.mxu0 %v2669_v9  ;;  %2471 = vmatprep.mubr.bf16.mxu0 %v2861_v50  ;;  %v2675_v50 = vld [vmem:[%s3169_s1 + $0x1a8] sm:$0xff]  }
  0x53   : > { %2461 = vmatprep.subr.bf16.mxu0 %v2671_v15 }
  0x54   : > { %2366 = vmatpush3.bf16.msra.mxu1 %v2670_v12 }
  0x55   : > { %2367 = vmatprep.subr.bf16.mxu1 %v2672_v16 }
  0x56   : > { %2462 = vmatpush3.bf16.msra.mxu0 %v2671_v15 }
  0x57   : > { %2463 = vmatprep.subr.bf16.mxu0 %v2673_v20 }
  0x58   : > { %2368 = vmatpush3.bf16.msra.mxu1 %v2672_v16 }
  0x59   : > { %2369 = vmatprep.subr.bf16.mxu1 %v2674_v24 }
  0x5a   : > { %2464 = vmatpush3.bf16.msra.mxu0 %v2673_v20 }
  0x5b   : > { %2465 = vmatprep.subr.bf16.mxu0 %v2675_v50 }
  0x5c   : > { %2370 = vmatpush3.bf16.msra.mxu1 %v2674_v24 }
  0x5d   : > { %2371 = vmatprep.subr.bf16.mxu1 %v2676_v30 }
  0x5e   : > { %2466 = vmatpush3.bf16.msra.mxu0 %v2675_v50 }
  0x5f   : > { %2467 = vmatprep.subr.bf16.mxu0 %v2677_v31 }
  0x60   : > { %2372 = vmatpush3.bf16.msra.mxu1 %v2676_v30 }
  0x61   : > { %2373 = vmatprep.subr.bf16.mxu1 %v2678_v32 }
  0x62   : > { %2468 = vmatpush3.bf16.msra.mxu0 %v2677_v31 }
  0x63   : > { %2469 = vmatprep.subr.bf16.mxu0 %v2679_v33 }
  0x64   : > { %2374 = vmatpush3.bf16.msra.mxu1 %v2678_v32 }
  0x65   : > { %2383 = vmatprep.subr.bf16.mxu1 %v2680_v35 }
  0x66   : > { %2470 = vmatpush3.bf16.msra.mxu0 %v2679_v33 }
  0x67   : > { %2479 = vmatprep.subr.bf16.mxu0 %v2681_v36  ;;  %2376 = vmatmul.mubr.bf16.vlgmr.msra.gmra.mrb[0].mxu1 %v3052_v37 }
  0x68   : > { %2384 = vmatpush3.bf16.msra.mxu1 %v2680_v35  ;;  %2379 = vmatprep.mubr.bf16.mxu1 %v3056_v39 }
  0x69   : > { %2472 = vmatmul.mubr.bf16.vlgmr.msra.gmra.mrb[0].mxu0 %v2869_v53  ;;  %2385 = vmatprep.subr.bf16.mxu1 %v2682_v42  ;;  %v2686_v53 = vld [vmem:[%s3169_s1 + $0xd8] sm:$0xff]  }
  0x6a   : > { %2480 = vmatpush3.bf16.msra.mxu0 %v2681_v36  ;;  %2475 = vmatprep.mubr.bf16.mxu0 %v2903_v14  ;;  %v2687_v14 = vld [vmem:[%s3169_s1 + $0x1d8] sm:$0xff]  }
  0x6b   : > { %2481 = vmatprep.subr.bf16.mxu0 %v2683_v43 }
  0x6c   : > { %2386 = vmatpush3.bf16.msra.mxu1 %v2682_v42 }
  0x6d   : > { %2387 = vmatprep.subr.bf16.mxu1 %v2684_v34 }
  0x6e   : > { %2482 = vmatpush3.bf16.msra.mxu0 %v2683_v43 }
  0x6f   : > { %2483 = vmatprep.subr.bf16.mxu0 %v2685_v46  ;;  %2380 = vmatmul.mubr.bf16.gmra.mrb[4].mxu1 %v629_v48 }
  0x70   : > { %2388 = vmatpush3.bf16.msra.mxu1 %v2684_v34  ;;  %2399 = vmatprep.mubr.bf16.mxu1 %v793_v38  ;;  %v2692_v38 = vld [vmem:[%s3169_s1 + $0xf0] sm:$0xff]  }
  0x71   : > { %2389 = vmatprep.subr.bf16.mxu1 %v2686_v53  ;;  %2476 = vmatmul.mubr.bf16.gmra.mrb[4].mxu0 %v1295_v29  ;;  %v2694_v29 = vld [vmem:[%s3169_s1 + $0xf8] sm:$0xff]  }
  0x72   : > { %2484 = vmatpush3.bf16.msra.mxu0 %v2685_v46  ;;  %2495 = vmatprep.mubr.bf16.mxu0 %v2976_v63 }
  0x73   : > { %2485 = vmatprep.subr.bf16.mxu0 %v2687_v14 }
  0x74   : > { %2390 = vmatpush3.bf16.msra.mxu1 %v2686_v53 }
  0x75   : > { %2391 = vmatprep.subr.bf16.mxu1 %v2688_v51 }
  0x76   : > { %2486 = vmatpush3.bf16.msra.mxu0 %v2687_v14 }
  0x77   : > { %2487 = vmatprep.subr.bf16.mxu0 %v2689_v54 }
  0x78   : > { %2392 = vmatpush3.bf16.msra.mxu1 %v2688_v51 }
  0x79   : > { %2393 = vmatprep.subr.bf16.mxu1 %v2690_v22 }
  0x7a   : > { %2488 = vmatpush3.bf16.msra.mxu0 %v2689_v54 }
  0x7b   : > { %2489 = vmatprep.subr.bf16.mxu0 %v2691_v27 }
  0x7c   : > { %2394 = vmatpush3.bf16.msra.mxu1 %v2690_v22 }
  0x7d   : > { %2395 = vmatprep.subr.bf16.mxu1 %v2692_v38 }
  0x7e   : > { %2490 = vmatpush3.bf16.msra.mxu0 %v2691_v27 }
  0x7f   : > { %2491 = vmatprep.subr.bf16.mxu0 %v2693_v23 }
  0x80   : > { %2396 = vmatpush3.bf16.msra.mxu1 %v2692_v38 }
  0x81   : > { %2397 = vmatprep.subr.bf16.mxu1 %v2694_v29 }
  0x82   : > { %2492 = vmatpush3.bf16.msra.mxu0 %v2693_v23 }
  0x83   : > { %2493 = vmatprep.subr.bf16.mxu0 %v2695_v55 }
  0x84   : > { %2398 = vmatpush3.bf16.msra.mxu1 %v2694_v29 }
  0x85   : > { %2527 = vmatprep.subr.bf16.mxu1 %v2696_v57 }
  0x86   : > { %2494 = vmatpush3.bf16.msra.mxu0 %v2695_v55 }
  0x87   : > { %2400 = vmatmul.mubr.bf16.vlgmr.msra.gmra.mrb[0].mxu1 %v794_v44  ;;  %2503 = vmatprep.subr.bf16.mxu0 %v2696_v57  ;;  %v2700_v44 = vld [vmem:[%s3169_s1 + $0x220] sm:$0xff]  }
  0x88   : > { %2535 = vmatpush3.bf16.msra.mxu1 %v2696_v57  ;;  %2403 = vmatprep.mubr.bf16.mxu1 %v795_v17  ;;  %v1623_v17 = vld [vmem:[#allocation2 + $0x92] sm:$0xff] }
  0x89   : > { %2496 = vmatmul.mubr.bf16.vlgmr.msra.gmra.mrb[0].mxu0 %v2981_v1  ;;  %2528 = vmatprep.subr.bf16.mxu1 %v2697_v47  ;;  %v1627_v18 = vpack.c.bf16 %v1623_v17, %v3000_v8 }
  0x8a   : > { %2504 = vmatpush3.bf16.msra.mxu0 %v2696_v57  ;;  %2499 = vmatprep.mubr.bf16.mxu0 %v3006_v10 }
  0x8b   : > { %2505 = vmatprep.subr.bf16.mxu0 %v2697_v47 }
  0x8c   : > { %2536 = vmatpush3.bf16.msra.mxu1 %v2697_v47 }
  0x8d   : > { %2529 = vmatprep.subr.bf16.mxu1 %v2698_v58 }
  0x8e   : > { %2506 = vmatpush3.bf16.msra.mxu0 %v2697_v47 }
  0x8f   : > { %2404 = vmatmul.mubr.bf16.gmra.mrb[4].mxu1 %v796_v25  ;;  %2507 = vmatprep.subr.bf16.mxu0 %v2698_v58 }
  0x90   : > { %2537 = vmatpush3.bf16.msra.mxu1 %v2698_v58  ;;  %2523 = vmatprep.mubr.bf16.mxu1 %v629_v48 }
  0x91   : > { %2500 = vmatmul.mubr.bf16.gmra.mrb[4].mxu0 %v1461_v28  ;;  %2530 = vmatprep.subr.bf16.mxu1 %v2699_v40 }
  0x92   : > { %2508 = vmatpush3.bf16.msra.mxu0 %v2698_v58  ;;  %2519 = vmatprep.mubr.bf16.mxu0 %v3052_v37 }
  0x93   : > { %2509 = vmatprep.subr.bf16.mxu0 %v2699_v40 }
  0x94   : > { %2538 = vmatpush3.bf16.msra.mxu1 %v2699_v40 }
  0x95   : > { %2531 = vmatprep.subr.bf16.mxu1 %v2700_v44 }
  0x96   : > { %2510 = vmatpush3.bf16.msra.mxu0 %v2699_v40 }
  0x97   : > { %2511 = vmatprep.subr.bf16.mxu0 %v2700_v44 }
  0x98   : > { %2539 = vmatpush3.bf16.msra.mxu1 %v2700_v44 }
  0x99   : > { %2532 = vmatprep.subr.bf16.mxu1 %v2701_v45 }
  0x9a   : > { %2512 = vmatpush3.bf16.msra.mxu0 %v2700_v44 }
  0x9b   : > { %2513 = vmatprep.subr.bf16.mxu0 %v2701_v45 }
  0x9c   : > { %2540 = vmatpush3.bf16.msra.mxu1 %v2701_v45 }
  0x9d   : > { %2533 = vmatprep.subr.bf16.mxu1 %v2702_v5 }
  0x9e   : > { %2514 = vmatpush3.bf16.msra.mxu0 %v2701_v45 }
  0x9f   : > { %2515 = vmatprep.subr.bf16.mxu0 %v2702_v5 }
  0xa0   : > { %2541 = vmatpush3.bf16.msra.mxu1 %v2702_v5 }
  0xa1   : > { %2534 = vmatprep.subr.bf16.mxu1 %v2703_v7 }
  0xa2   : > { %2516 = vmatpush3.bf16.msra.mxu0 %v2702_v5 }
  0xa3   : > { %2517 = vmatprep.subr.bf16.mxu0 %v2703_v7 }
  0xa4   : > { %2542 = vmatpush3.bf16.msra.mxu1 %v2703_v7 }
  0xa6   : > { %2518 = vmatpush3.bf16.msra.mxu0 %v2703_v7 }
  0xa7   : > { %2524 = vmatmul.mubr.bf16.vlgmr.msra.gmra.mrb[8].mxu1 %v1627_v18 }
  0xa9   : > { %2520 = vmatmul.mubr.bf16.vlgmr.msra.gmra.mrb[0].mxu0 %v3056_v39 }
 0x15a   : > { %v2401_v25 = vpop.f32.mrb[0].mxu1 }
 0x15b   : > { %v896_v41 = vpop.f32.mrb[1].mxu1 }
 0x15c   : > { %v2402_v60 = vpop.f32.mrb[2].mxu1 }
 0x15d   : > { %v899_v61 = vpop.f32.mrb[3].mxu1 }
 0x162   : > { %v2405_v62 = vpop.f32.mrb[4].mxu1 }
 0x163   : > { %v912_v63 = vpop.f32.mrb[5].mxu1 }
 0x164   : > { %v2501_v0 = vpop.f32.mrb[4].mxu0  ;;  %v2406_v1 = vpop.f32.mrb[6].mxu1 }
 0x165   : > { %v2547_v2 = vadd.f32 %v2501_v0, %v2405_v62  ;;  %v1577_v3 = vpop.f32.mrb[5].mxu0  ;;  %v915_v49 = vpop.f32.mrb[7].mxu1 }
 0x166   : > { %v2549_v52 = vadd.f32 %v1577_v3, %v912_v63  ;;  %v2502_v56 = vpop.f32.mrb[6].mxu0 }
 0x167   : > { %v2551_v4 = vadd.f32 %v2502_v56, %v2406_v1  ;;  %v1580_v6 = vpop.f32.mrb[7].mxu0 }
 0x168   : > { %v2553_v8 = vadd.f32 %v1580_v6, %v915_v49 }
 0x17a   : > { %v2525_v9 = vpop.f32.mrb[8].mxu1 }
 0x17b   : > { %v2548_v10 = vadd.f32 %v2547_v2, %v2525_v9  ;;  %v1743_v11 = vpop.f32.mrb[9].mxu1 }
 0x17c   : > { %v2521_v12 = vpop.f32.mrb[0].mxu0  ;;  %v2550_v15 = vadd.f32 %v2549_v52, %v1743_v11  ;;  %v2526_v16 = vpop.f32.mrb[10].mxu1 }
 0x17d   : > { %v2543_v19 = vadd.f32 %v2521_v12, %v2401_v25  ;;  %v1727_v20 = vpop.f32.mrb[1].mxu0  ;;  %v2552_v21 = vadd.f32 %v2551_v4, %v2526_v16  ;;  %v1746_v24 = vpop.f32.mrb[11].mxu1  ;;  %v1803_v31 = vadd.f32 %v2548_v10, %v2160_v13 }
 0x17e   : > { %v2544_v26 = vadd.f32 %v1727_v20, %v896_v41  ;;  %v2522_v50 = vpop.f32.mrb[2].mxu0  ;;  %v2554_v30 = vadd.f32 %v2553_v8, %v1746_v24  ;;  %v1801_v36 = vadd.f32 %v2550_v15, %v2160_v13 }
 0x17f   : > { %v2545_v32 = vadd.f32 %v2522_v50, %v2402_v60  ;;  %v1804_v33 = vadd.f32 %v2552_v21, %v2160_v13  ;;  %v1730_v35 = vpop.f32.mrb[3].mxu0  ;;  %v1799_v42 = vadd.f32 %v2543_v19, %v2160_v13 }
 0x180   : > { %v2546_v37 = vadd.f32 %v1730_v35, %v899_v61  ;;  %v1802_v39 = vadd.f32 %v2554_v30, %v2160_v13  ;;  %v1797_v46 = vadd.f32 %v2544_v26, %v2160_v13 }
 0x181   : > { %v1800_v43 = vadd.f32 %v2545_v32, %v2160_v13  ;;  %v2198_v34 = vpack.c.bf16 %v1804_v33, %v1803_v31 }
 0x182   : > { %v1798_v48 = vadd.f32 %v2546_v37, %v2160_v13  ;;  %v2193_v53 = vpack.c.bf16 %v1802_v39, %v1801_v36 }
 0x183   : > { %v2188_v14 = vpack.c.bf16 %v1800_v43, %v1799_v42  ;;  %2202 = vst [vmem:[%s221_s6 + $0x18] sm:$0xff] %v2198_v34  }
 0x184   : > { %v2183_v51 = vpack.c.bf16 %v1798_v48, %v1797_v46  ;;  %2201 = vst [vmem:[%s221_s6 + $0x10] sm:$0xff] %v2193_v53  }
 0x185   : > { %2200 = vst [vmem:[%s221_s6 + $0x8] sm:$0xff] %v2188_v14  }
 0x186   : > { %2184 = vst [vmem:[%s221_s6] sm:$0xff] %v2183_v51  }
 0x187 PF: > { %s13_s14 = sadd.s32 1, %s2726_s14   ;;  %s3172_s12 = smov %s2722_s13 }
 0x188   : > { %p10_p5 = scmp.ge.s32.totalorder %s13_s14, 4   ;;  %s3173_s13 = smov %s3175_s15 }
 0x18a   :  { %12 = sbr.rel (!%p10_p5) target bundleno = 2 (0x2), region = 78 }

// kernel: _lambda_.18
= control target key start
LH: loop header
LB: loop body
LE: loop exit
PB: predicated region body
PF: predicated region fallthrough
CT: control target
= control target key end

     0   :  { %s2496_s15 = smov 0   ;;  %s2498_s16 = smov 0   ;;  %s2844_s0 = inlined_call_operand.vmem [shape: bf16[2,4,5,9,128], index: 0, kind: input, shape index: {}]   ;;  %s2845_s1 = inlined_call_operand.vmem [shape: bf16[9,128,128], index: 1, kind: input, shape index: {}]   ;;  %s2846_s2 = inlined_call_operand.vmem [shape: f32[1,128], index: 2, kind: input, shape index: {}]   ;;  %s2847_s3 = inlined_call_operand.vmem [shape: bf16[2,32,128], index: 3, kind: input, shape index: {}]   ;;  %s2848_s4 = inlined_call_operand.vmem [shape: bf16[2,32,128], index: 4, kind: output, shape index: {}]  }
   0x1   :  { %s2500_s17 = smov 0  }
   0x2 LB: > { %s26_s18 = sadd.s32 1, %s2465_s16  ;;  %p1809_p0 = scmp.ge.s32.totalorder %s2469_s17, 1  ;;  %s2469_s17 = sphi %s2500_s17, %s14_s17   ;;  %s2465_s16 = sphi %s2498_s16, %s2850_s16   ;;  %s2461_s15 = sphi %s2496_s15, %s2849_s15  }
   0x3   : > { %p28_p1 = scmp.ge.s32.totalorder %s26_s18, 2  ;;  %p208_p2 = scmp.lt.s32.totalorder %s2469_s17, 3 }
   0x5   : > { %s2852_s18 = smov (%p28_p1, %s26_s18), 0  ;;  %p209_p3 = pnand %p1809_p0, %p208_p2 }
   0x6   : > { %v2375_v0 = vld [vmem:[%s2845_s1] sm:$0xff] (!%p209_p3)   ;;  %p252_p4 = scmp.lt.s32.totalorder (!%p209_p3), %s2461_s15, 1  ;;  %v2377_v2 = vld [vmem:[%s2845_s1 + $0x8] sm:$0xff] (!%p209_p3)   ;;  %v2379_v4 = vld [vmem:[%s2845_s1 + $0x10] sm:$0xff] (!%p209_p3)  }
   0x7   : > { %212 = sbr.rel (%p209_p3) target bundleno = 394 (0x18a), region = 36  ;;  %v2376_v1 = vld [vmem:[%s2845_s1 + $0x100] sm:$0xff] (!%p209_p3)   ;;  %2138 = vmatprep.subr.bf16.mxu1 (!%p209_p3), %v2375_v0  ;;  %v2378_v3 = vld [vmem:[%s2845_s1 + $0x108] sm:$0xff] (!%p209_p3)   ;;  %v2380_v5 = vld [vmem:[%s2845_s1 + $0x110] sm:$0xff] (!%p209_p3)  }
   0x8   : > { %2218 = vmatprep.subr.bf16.mxu0 (!%p209_p3), %v2376_v1  ;;  %2139 = vmatpush3.bf16.msra.mxu1 (!%p209_p3), %v2375_v0  ;;  %v2381_v6 = vld [vmem:[%s2845_s1 + $0x18] sm:$0xff] (!%p209_p3)   ;;  %v2383_v8 = vld [vmem:[%s2845_s1 + $0x20] sm:$0xff] (!%p209_p3)   ;;  %v2385_v10 = vld [vmem:[%s2845_s1 + $0x28] sm:$0xff] (!%p209_p3)  }
   0x9   : > { %2219 = vmatpush3.bf16.msra.mxu0 (!%p209_p3), %v2376_v1  ;;  %2140 = vmatprep.subr.bf16.mxu1 (!%p209_p3), %v2377_v2  ;;  %v2382_v7 = vld [vmem:[%s2845_s1 + $0x118] sm:$0xff] (!%p209_p3)   ;;  %v2384_v9 = vld [vmem:[%s2845_s1 + $0x120] sm:$0xff] (!%p209_p3)   ;;  %v2386_v11 = vld [vmem:[%s2845_s1 + $0x128] sm:$0xff] (!%p209_p3)  }
   0xa   : > { %2220 = vmatprep.subr.bf16.mxu0 (!%p209_p3), %v2378_v3  ;;  %v2387_v15 = vld [vmem:[%s2845_s1 + $0x30] sm:$0xff] (!%p209_p3)   ;;  %v2389_v19 = vld [vmem:[%s2845_s1 + $0x38] sm:$0xff] (!%p209_p3)   ;;  %v2391_v31 = vld [vmem:[%s2845_s1 + $0x40] sm:$0xff] (!%p209_p3)  }
   0xb   : > { %v2388_v17 = vld [vmem:[%s2845_s1 + $0x130] sm:$0xff] (!%p209_p3)   ;;  %v2390_v21 = vld [vmem:[%s2845_s1 + $0x138] sm:$0xff] (!%p209_p3)   ;;  %v2392_v39 = vld [vmem:[%s2845_s1 + $0x140] sm:$0xff] (!%p209_p3)  }
   0xc   : > { %2141 = vmatpush3.bf16.msra.mxu1 (!%p209_p3), %v2377_v2  ;;  %v2393_v42 = vld [vmem:[%s2845_s1 + $0x48] sm:$0xff] (!%p209_p3)   ;;  %v2395_v44 = vld [vmem:[%s2845_s1 + $0x50] sm:$0xff] (!%p209_p3)   ;;  %v2397_v46 = vld [vmem:[%s2845_s1 + $0x58] sm:$0xff] (!%p209_p3)  }
   0xd   : > { %2221 = vmatpush3.bf16.msra.mxu0 (!%p209_p3), %v2378_v3  ;;  %2142 = vmatprep.subr.bf16.mxu1 (!%p209_p3), %v2379_v4  ;;  %v2394_v43 = vld [vmem:[%s2845_s1 + $0x148] sm:$0xff] (!%p209_p3)   ;;  %v2396_v45 = vld [vmem:[%s2845_s1 + $0x150] sm:$0xff] (!%p209_p3)   ;;  %v2398_v48 = vld [vmem:[%s2845_s1 + $0x158] sm:$0xff] (!%p209_p3)  }
   0xe   : > { %s2854_s15 = smov (!%p252_p4, %s2461_s15), 1  ;;  %2222 = vmatprep.subr.bf16.mxu0 %v2380_v5  ;;  %v2399_v61 = vld [vmem:[%s2845_s1 + $0x60] sm:$0xff]  }
   0xf   : > { %s2350_s9 = smul.u32 160, %s2854_s15  ;;  %v2400_v3 = vld [vmem:[%s2845_s1 + $0x160] sm:$0xff]   ;;  %s2022_s11 = sshll.u32 %s2854_s15, 4 }
  0x10   : > { %2143 = vmatpush3.bf16.msra.mxu1 %v2379_v4  ;;  %s271_s14 = scalar_lea.vmem %s2847_s3, %s2022_s11  ;;  %s279_s24 = scalar_lea.vmem %s2848_s4, %s2022_s11 }
  0x11   : > { %2223 = vmatpush3.bf16.msra.mxu0 %v2380_v5  ;;  %2144 = vmatprep.subr.bf16.mxu1 %v2381_v6  ;;  %s2550_s20 = scalar_lea.vmem %s2844_s0, %s2350_s9 }
  0x12   : > { %2224 = vmatprep.subr.bf16.mxu0 %v2382_v7  ;;  %v281_v12 = vld [vmem:[%s2550_s20] ss:$8 sps:$4 sm:$0xff]   ;;  %v285_v25 = vld [vmem:[%s2550_s20 + $0x10] ss:$8 sps:$4 sm:$0xff]   ;;  %v302_v52 = vld [vmem:[%s2550_s20 + $0x54] sm:$0x1] }
  0x13   : > { %v321_v13 = vunpack.c.l.bf16 %v281_v12  ;;  %v323_v14 = vunpack.c.h.bf16 %v281_v12  ;;  %v311_v20 = vld [vmem:[%s2550_s20 + $0x78] ss:$8 sps:$4 sm:$0xff]   ;;  %v315_v26 = vld [vmem:[%s2550_s20 + $0x88] ss:$8 sps:$4 sm:$0xff]   ;;  %v325_v27 = vunpack.c.l.bf16 %v285_v25  ;;  %v327_v28 = vunpack.c.h.bf16 %v285_v25  ;;  %v304_v53 = vld [vmem:[%s2550_s20 + $0x5c] sm:$0x1] }
  0x14   : > { %2145 = vmatpush3.bf16.msra.mxu1 %v2381_v6  ;;  %v351_v23 = vunpack.c.l.bf16 %v311_v20  ;;  %v353_v24 = vunpack.c.h.bf16 %v311_v20  ;;  %v355_v29 = vunpack.c.l.bf16 %v315_v26  ;;  %v357_v30 = vunpack.c.h.bf16 %v315_v26  ;;  %v291_v47 = vld [vmem:[%s2550_s20 + $0x28] ss:$8 sps:$4 sm:$0xff]   ;;  %v295_v60 = vld [vmem:[%s2550_s20 + $0x38] ss:$8 sps:$4 sm:$0xff]  }
  0x15   : > { %2225 = vmatpush3.bf16.msra.mxu0 %v2382_v7  ;;  %2146 = vmatprep.subr.bf16.mxu1 %v2383_v8  ;;  %v361_v16 = vmax.f32 %v321_v13, 0.0  ;;  %v2565_v18 = vmax.f32 %v323_v14, 0.0  ;;  %v2581_v34 = vmax.f32 %v325_v27, 0.0  ;;  %v2583_v35 = vmax.f32 %v327_v28, 0.0  ;;  %v301_v51 = vld [vmem:[%s2550_s20 + $0x50] ss:$8 sps:$4 sm:$0xff]  }
  0x16   : > { %2226 = vmatprep.subr.bf16.mxu0 %v2384_v9  ;;  %v391_v32 = vmax.f32 %v351_v23, 0.0  ;;  %v393_v33 = vmax.f32 %v353_v24, 0.0  ;;  %v395_v36 = vmax.f32 %v355_v29, 0.0  ;;  %v397_v37 = vmax.f32 %v357_v30, 0.0  ;;  %v305_v2 = vld [vmem:[%s2550_s20 + $0x60] ss:$8 sps:$4 sm:$0xff]  }
  0x17   : > { %401 = vst [vmem:[#allocation2] sm:$0xff] %v361_v16  ;;  %403 = vst [vmem:[#allocation2 + $0x10] sm:$0xff] %v2565_v18  ;;  %v445_v22 = vpack.c.bf16 %v2565_v18, %v361_v16  ;;  %v446_v40 = vpack.c.bf16 %v2583_v35, %v2581_v34  ;;  %v331_v49 = vunpack.c.l.bf16 %v291_v47  ;;  %v333_v50 = vunpack.c.h.bf16 %v291_v47  ;;  %v306_v7 = vld [vmem:[%s2550_s20 + $0x64] sm:$0x1]  ;;  %v2403_v23 = vld [vmem:[%s2845_s1 + $0x70] sm:$0xff]  }
  0x18   : > { %2147 = vmatpush3.bf16.msra.mxu1 %v2383_v8  ;;  %v967_v38 = vpack.c.bf16 %v393_v33, %v391_v32  ;;  %405 = vst [vmem:[#allocation2 + $0x20] sm:$0xff] %v2581_v34  ;;  %407 = vst [vmem:[#allocation2 + $0x30] sm:$0xff] %v2583_v35  ;;  %v968_v41 = vpack.c.bf16 %v397_v37, %v395_v36  ;;  %v341_v54 = vunpack.c.l.bf16 %v301_v51  ;;  %v342_v55 = vunpack.c.l.bf16 %v302_v52  ;;  %v308_v8 = vld [vmem:[%s2550_s20 + $0x6c] sm:$0x1]  ;;  %v2404_v24 = vld [vmem:[%s2845_s1 + $0x170] sm:$0xff]  }
  0x19   : > { %2227 = vmatpush3.bf16.msra.mxu0 %v2384_v9  ;;  %2148 = vmatprep.subr.bf16.mxu1 %v2385_v10  ;;  %v343_v56 = vunpack.c.h.bf16 %v301_v51  ;;  %v371_v57 = vmax.f32 %v331_v49, 0.0  ;;  %v2614_v58 = vmax.f32 %v333_v50, 0.0  ;;  %v344_v59 = vunpack.c.l.bf16 %v304_v53  ;;  %v2405_v28 = vld [vmem:[%s2845_s1 + $0x78] sm:$0xff]   ;;  %v2407_v30 = vld [vmem:[%s2845_s1 + $0x80] sm:$0xff]   ;;  %v284_v37 = vld [vmem:[%s2550_s20 + $0xc] sm:$0x1] }
  0x1a   : > { %2228 = vmatprep.subr.bf16.mxu0 %v2386_v11  ;;  %2154 = vmatprep.mubr.bf16.mxu1 %v445_v22  ;;  %v2620_v62 = vmax.f32 %v341_v54, 0.0  ;;  %v382_v63 = vmax.f32 %v342_v55, 0.0  ;;  %v335_v1 = vunpack.c.l.bf16 %v295_v60  ;;  %v337_v6 = vunpack.c.h.bf16 %v295_v60  ;;  %v2406_v29 = vld [vmem:[%s2845_s1 + $0x178] sm:$0xff]   ;;  %v282_v36 = vld [vmem:[%s2550_s20 + $0x4] sm:$0x1]  ;;  %v2410_v49 = vld [vmem:[%s2845_s1 + $0x188] sm:$0xff]  }
  0x1b   : > { %2234 = vmatprep.mubr.bf16.mxu0 %v967_v38  ;;  %v2622_v0 = vmax.f32 %v343_v56, 0.0  ;;  %v569_v4 = vpack.c.bf16 %v2614_v58, %v371_v57  ;;  %v384_v5 = vmax.f32 %v344_v59, 0.0  ;;  %v345_v9 = vunpack.c.l.bf16 %v305_v2  ;;  %v2411_v57 = vld [vmem:[%s2845_s1 + $0x90] sm:$0xff]   ;;  %v2413_v59 = vld [vmem:[%s2845_s1 + $0x98] sm:$0xff]  }
  0x1c   : > { %2149 = vmatpush3.bf16.msra.mxu1 %v2385_v10  ;;  %v2401_v10 = vld [vmem:[%s2845_s1 + $0x68] sm:$0xff]   ;;  %421 = vst [vmem:[#allocation2 + $0xa0] sm:$0xff] %v2620_v62  ;;  %422 = vst [vmem:[#allocation2 + $0xa8] sm:$0x1] %v382_v63  ;;  %v346_v12 = vunpack.c.l.bf16 %v306_v7  ;;  %v347_v13 = vunpack.c.h.bf16 %v305_v2  ;;  %v348_v14 = vunpack.c.l.bf16 %v308_v8  ;;  %v1232_v50 = vpack.c.bf16 %v2581_v34, %v2565_v18  ;;  %v2412_v34 = vld [vmem:[%s2845_s1 + $0x190] sm:$0xff]  }
  0x1d   : > { %2229 = vmatpush3.bf16.msra.mxu0 %v2386_v11  ;;  %2150 = vmatprep.subr.bf16.mxu1 %v2387_v15  ;;  %423 = vst [vmem:[#allocation2 + $0xb0] sm:$0xff] %v2622_v0  ;;  %v2636_v11 = vmax.f32 %v335_v1, 0.0  ;;  %424 = vst [vmem:[#allocation2 + $0xb8] sm:$0x1] %v384_v5  ;;  %v2640_v16 = vmax.f32 %v345_v9, 0.0  ;;  %v2414_v60 = vld [vmem:[%s2845_s1 + $0x198] sm:$0xff]  }
  0x1e   : > { %2230 = vmatprep.subr.bf16.mxu0 %v2388_v17  ;;  %v2645_v20 = vmax.f32 %v347_v13, 0.0  ;;  %v2415_v2 = vld [vmem:[%s2845_s1 + $0xa0] sm:$0xff]   ;;  %v2418_v5 = vld [vmem:[%s2845_s1 + $0x1a8] sm:$0xff]   ;;  %v2420_v7 = vld [vmem:[%s2845_s1 + $0x1b0] sm:$0xff]  }
  0x1f   : > { %425 = vst [vmem:[#allocation2 + $0xc0] sm:$0xff] %v2640_v16  ;;  %v2421_v8 = vld [vmem:[%s2845_s1 + $0xb8] sm:$0xff]   ;;  %v290_v9 = vld [vmem:[%s2550_s20 + $0x24] sm:$0x1] }
  0x20   : > { %2151 = vmatpush3.bf16.msra.mxu1 %v2387_v15  ;;  %v2638_v15 = vmax.f32 %v337_v6, 0.0  ;;  %427 = vst [vmem:[#allocation2 + $0xd0] sm:$0xff] %v2645_v20  ;;  %v835_v22 = vpack.c.bf16 %v2645_v20, %v2640_v16  ;;  %v2419_v6 = vld [vmem:[%s2845_s1 + $0xb0] sm:$0xff]   ;;  %v2443_v16 = vld [vmem:[%s2845_s1 + $0x220] sm:$0xff]   ;;  %v2444_v20 = vld [vmem:[%s2845_s1 + $0x228] sm:$0xff]  }
  0x21   : > { %2231 = vmatpush3.bf16.msra.mxu0 %v2388_v17  ;;  %2152 = vmatprep.subr.bf16.mxu1 %v2389_v19  ;;  %v2402_v17 = vld [vmem:[%s2845_s1 + $0x168] sm:$0xff]  }
  0x22   : > { %2232 = vmatprep.subr.bf16.mxu0 %v2390_v21  ;;  %v570_v38 = vpack.c.bf16 %v2638_v15, %v2636_v11 }
  0x23   : > { %v1095_v25 = vld [vmem:[#allocation2 + $0xa1] sm:$0xff] }
  0x24   : > { %2153 = vmatpush3.bf16.msra.mxu1 %v2389_v19  ;;  %v386_v19 = vmax.f32 %v346_v12, 0.0  ;;  %v1096_v26 = vld [vmem:[#allocation2 + $0xb1] sm:$0xff]  ;;  %v330_v12 = vunpack.c.l.bf16 %v290_v9 }
  0x25   : > { %2233 = vmatpush3.bf16.msra.mxu0 %v2390_v21  ;;  %2158 = vmatprep.subr.bf16.mxu1 %v2391_v31  ;;  %v388_v21 = vmax.f32 %v348_v14, 0.0  ;;  %v1099_v27 = vpack.c.bf16 %v1096_v26, %v1095_v25  ;;  %v2425_v25 = vld [vmem:[%s2845_s1 + $0xc8] sm:$0xff]  }
  0x26   : > { %2238 = vmatprep.subr.bf16.mxu0 %v2392_v39  ;;  %426 = vst [vmem:[#allocation2 + $0xc8] sm:$0x1] %v386_v19  ;;  %v2423_v19 = vld [vmem:[%s2845_s1 + $0xc0] sm:$0xff]   ;;  %v2426_v26 = vld [vmem:[%s2845_s1 + $0x1c8] sm:$0xff]  }
  0x27   : > { %2155 = vmatmul.mubr.bf16.vlgmr.msra.gmra.mrb[0].mxu1 %v446_v40  ;;  %428 = vst [vmem:[#allocation2 + $0xd8] sm:$0x1] %v388_v21  ;;  %v324_v40 = vunpack.c.l.bf16 %v284_v37  ;;  %v2424_v21 = vld [vmem:[%s2845_s1 + $0x1c0] sm:$0xff]   ;;  %v2438_v37 = vld [vmem:[%s2845_s1 + $0x1f8] sm:$0xff]  }
  0x28   : > { %2159 = vmatpush3.bf16.msra.mxu1 %v2391_v31  ;;  %2235 = vmatmul.mubr.bf16.vlgmr.msra.gmra.mrb[0].mxu0 %v968_v41  ;;  %v2408_v31 = vld [vmem:[%s2845_s1 + $0x180] sm:$0xff]  }
  0x29   : > { %2239 = vmatpush3.bf16.msra.mxu0 %v2392_v39  ;;  %2160 = vmatprep.subr.bf16.mxu1 %v2393_v42  ;;  %v322_v39 = vunpack.c.l.bf16 %v282_v36  ;;  %v2437_v36 = vld [vmem:[%s2845_s1 + $0xf8] sm:$0xff]  }
  0x2a   : > { %2240 = vmatprep.subr.bf16.mxu0 %v2394_v43  ;;  %2174 = vmatprep.mubr.bf16.mxu1 %v569_v4  ;;  %v2417_v4 = vld [vmem:[%s2845_s1 + $0xa8] sm:$0xff]  }
  0x2b   : > { %2254 = vmatprep.mubr.bf16.mxu0 %v1099_v27  ;;  %v834_v27 = vpack.c.bf16 %v2622_v0, %v2620_v62  ;;  %v2430_v62 = vld [vmem:[%s2845_s1 + $0x1d8] sm:$0xff]   ;;  %v2431_v0 = vld [vmem:[%s2845_s1 + $0xe0] sm:$0xff]  }
  0x2c   : > { %2161 = vmatpush3.bf16.msra.mxu1 %v2393_v42  ;;  %v2409_v42 = vld [vmem:[%s2845_s1 + $0x88] sm:$0xff]  }
  0x2d   : > { %2241 = vmatpush3.bf16.msra.mxu0 %v2394_v43  ;;  %2162 = vmatprep.subr.bf16.mxu1 %v2395_v44  ;;  %v1097_v32 = vld [vmem:[#allocation2 + $0xc1] sm:$0xff]  ;;  %v286_v43 = vld [vmem:[%s2550_s20 + $0x14] sm:$0x1] }
  0x2e   : > { %2242 = vmatprep.subr.bf16.mxu0 %v2396_v45  ;;  %v1098_v33 = vld [vmem:[#allocation2 + $0xd1] sm:$0xff]  ;;  %v326_v47 = vunpack.c.l.bf16 %v286_v43 }
  0x2f   : > { %v1100_v41 = vpack.c.bf16 %v1098_v33, %v1097_v32  ;;  %v2435_v32 = vld [vmem:[%s2845_s1 + $0xf0] sm:$0xff]   ;;  %v2446_v43 = vld [vmem:[%s2845_s1 + $0x238] sm:$0xff]  }
  0x30   : > { %2163 = vmatpush3.bf16.msra.mxu1 %v2395_v44  ;;  %v362_v44 = vmax.f32 %v322_v39, 0.0  ;;  %v366_v54 = vmax.f32 %v326_v47, 0.0  ;;  %v2436_v33 = vld [vmem:[%s2845_s1 + $0x1f0] sm:$0xff]  }
  0x31   : > { %2243 = vmatpush3.bf16.msra.mxu0 %v2396_v45  ;;  %2164 = vmatprep.subr.bf16.mxu1 %v2397_v46  ;;  %v364_v45 = vmax.f32 %v324_v40, 0.0 }
  0x32   : > { %2244 = vmatprep.subr.bf16.mxu0 %v2398_v48  ;;  %402 = vst [vmem:[#allocation2 + $0x8] sm:$0x1] %v362_v44  ;;  %406 = vst [vmem:[#allocation2 + $0x28] sm:$0x1] %v366_v54 }
  0x33   : > { %404 = vst [vmem:[#allocation2 + $0x18] sm:$0x1] %v364_v45 }
  0x34   : > { %2165 = vmatpush3.bf16.msra.mxu1 %v2397_v46  ;;  %v288_v46 = vld [vmem:[%s2550_s20 + $0x1c] sm:$0x1] }
  0x35   : > { %2245 = vmatpush3.bf16.msra.mxu0 %v2398_v48  ;;  %2166 = vmatprep.subr.bf16.mxu1 %v2399_v61  ;;  %v289_v48 = vld [vmem:[%s2550_s20 + $0x20] ss:$40 sps:$4 sm:$0xff]   ;;  %v328_v51 = vunpack.c.l.bf16 %v288_v46 }
  0x36   : > { %2246 = vmatprep.subr.bf16.mxu0 %v2400_v3  ;;  %v329_v52 = vunpack.c.l.bf16 %v289_v48  ;;  %v339_v53 = vunpack.c.h.bf16 %v289_v48 }
  0x37   : > { %v368_v55 = vmax.f32 %v328_v51, 0.0  ;;  %v2029_v51 = vld [vmem:[%s271_s14] sm:$0xff]  }
  0x38   : > { %2167 = vmatpush3.bf16.msra.mxu1 %v2399_v61  ;;  %v2684_v56 = vmax.f32 %v329_v52, 0.0  ;;  %v2689_v18 = vmax.f32 %v339_v53, 0.0  ;;  %v2015_v53 = vld [vmem:[%s2846_s2] ss:$0 sm:$0xff] }
  0x39   : > { %2247 = vmatpush3.bf16.msra.mxu0 %v2400_v3  ;;  %2168 = vmatprep.subr.bf16.mxu1 %v2401_v10  ;;  %408 = vst [vmem:[#allocation2 + $0x38] sm:$0x1] %v368_v55  ;;  %v697_v61 = vld [vmem:[#allocation2 + $0x1] sm:$0xff] }
  0x3a   : > { %2248 = vmatprep.subr.bf16.mxu0 %v2402_v17  ;;  %409 = vst [vmem:[#allocation2 + $0x40] sm:$0xff] %v2684_v56  ;;  %v2701_v63 = vld [vmem:[#allocation2 + $0x11] sm:$0xff]  ;;  %v2416_v3 = vld [vmem:[%s2845_s1 + $0x1a0] sm:$0xff]   ;;  %v1366_v39 = vpack.c.bf16 %v2689_v18, %v2638_v15 }
  0x3b   : > { %v701_v1 = vpack.c.bf16 %v2701_v63, %v697_v61  ;;  %v2729_v13 = vld [vmem:[#allocation2 + $0x21] sm:$0xff]  ;;  %v2441_v15 = vld [vmem:[%s2845_s1 + $0x210] sm:$0xff]  }
  0x3c   : > { %2169 = vmatpush3.bf16.msra.mxu1 %v2401_v10  ;;  %v2422_v10 = vld [vmem:[%s2845_s1 + $0x1b8] sm:$0xff]   ;;  %v1497_v40 = vpack.c.bf16 %v2729_v13, %v2701_v63 }
  0x3d   : > { %2249 = vmatpush3.bf16.msra.mxu0 %v2402_v17  ;;  %2170 = vmatprep.subr.bf16.mxu1 %v2403_v23  ;;  %v370_v17 = vmax.f32 %v330_v12, 0.0 }
  0x3e   : > { %2250 = vmatprep.subr.bf16.mxu0 %v2404_v24 }
  0x3f   : > { %410 = vst [vmem:[#allocation2 + $0x48] sm:$0x1] %v370_v17 }
  0x40   : > { %2171 = vmatpush3.bf16.msra.mxu1 %v2403_v23  ;;  %v2731_v14 = vld [vmem:[#allocation2 + $0x31] sm:$0xff] }
  0x41   : > { %2251 = vmatpush3.bf16.msra.mxu0 %v2404_v24  ;;  %2172 = vmatprep.subr.bf16.mxu1 %v2405_v28  ;;  %v702_v23 = vpack.c.bf16 %v2731_v14, %v2729_v13  ;;  %v1233_v24 = vpack.c.bf16 %v2684_v56, %v2583_v35  ;;  %v2427_v35 = vld [vmem:[%s2845_s1 + $0xd0] sm:$0xff]  }
  0x42   : > { %2252 = vmatprep.subr.bf16.mxu0 %v2406_v29 }
  0x44   : > { %2173 = vmatpush3.bf16.msra.mxu1 %v2405_v28  ;;  %v1365_v28 = vpack.c.bf16 %v2636_v11, %v2614_v58  ;;  %v2429_v58 = vld [vmem:[%s2845_s1 + $0xd8] sm:$0xff]   ;;  %v2432_v11 = vld [vmem:[%s2845_s1 + $0x1e0] sm:$0xff]  }
  0x45   : > { %2253 = vmatpush3.bf16.msra.mxu0 %v2406_v29  ;;  %2178 = vmatprep.subr.bf16.mxu1 %v2407_v30  ;;  %v2428_v29 = vld [vmem:[%s2845_s1 + $0x1d0] sm:$0xff]  }
  0x46   : > { %2258 = vmatprep.subr.bf16.mxu0 %v2408_v31  ;;  %v1496_v44 = vld [vmem:[#allocation2 + $0x41] sm:$0xff] }
  0x47   : > { %2175 = vmatmul.mubr.bf16.vlgmr.msra.gmra.mrb[0].mxu1 %v570_v38  ;;  %v2439_v38 = vld [vmem:[%s2845_s1 + $0x200] sm:$0xff]   ;;  %v1498_v45 = vpack.c.bf16 %v1496_v44, %v2731_v14 }
  0x48   : > { %2179 = vmatpush3.bf16.msra.mxu1 %v2407_v30  ;;  %2255 = vmatmul.mubr.bf16.vlgmr.msra.gmra.mrb[0].mxu0 %v1100_v41  ;;  %v2433_v30 = vld [vmem:[%s2845_s1 + $0xe8] sm:$0xff]  }
  0x49   : > { %2259 = vmatpush3.bf16.msra.mxu0 %v2408_v31  ;;  %2180 = vmatprep.subr.bf16.mxu1 %v2409_v42  ;;  %v2434_v31 = vld [vmem:[%s2845_s1 + $0x1e8] sm:$0xff]  }
  0x4a   : > { %2260 = vmatprep.subr.bf16.mxu0 %v2410_v49  ;;  %2274 = vmatprep.mubr.bf16.mxu0 %v1232_v50  ;;  %v2440_v41 = vld [vmem:[%s2845_s1 + $0x208] sm:$0xff]  }
  0x4b   : > { %2194 = vmatprep.mubr.bf16.mxu1 %v701_v1  ;;  %v2046_v50 = vld [vmem:[%s271_s14 + $0x8] sm:$0xff]  }
  0x4c   : > { %2181 = vmatpush3.bf16.msra.mxu1 %v2409_v42  ;;  %v2442_v42 = vld [vmem:[%s2845_s1 + $0x218] sm:$0xff]   ;;  %v2034_v55 = vunpack.c.l.bf16 %v2046_v50 }
  0x4d   : > { %2261 = vmatpush3.bf16.msra.mxu0 %v2410_v49  ;;  %2182 = vmatprep.subr.bf16.mxu1 %v2411_v57 }
  0x4e   : > { %2262 = vmatprep.subr.bf16.mxu0 %v2412_v34 }
  0x50   : > { %2183 = vmatpush3.bf16.msra.mxu1 %v2411_v57  ;;  %v2035_v57 = vunpack.c.h.bf16 %v2046_v50 }
  0x51   : > { %2263 = vmatpush3.bf16.msra.mxu0 %v2412_v34  ;;  %2184 = vmatprep.subr.bf16.mxu1 %v2413_v59  ;;  %v2030_v34 = vunpack.c.l.bf16 %v2029_v51 }
  0x52   : > { %2264 = vmatprep.subr.bf16.mxu0 %v2414_v60 }
  0x54   : > { %2185 = vmatpush3.bf16.msra.mxu1 %v2413_v59 }
  0x55   : > { %2265 = vmatpush3.bf16.msra.mxu0 %v2414_v60  ;;  %2186 = vmatprep.subr.bf16.mxu1 %v2415_v2  ;;  %v2031_v60 = vunpack.c.h.bf16 %v2029_v51 }
  0x56   : > { %2266 = vmatprep.subr.bf16.mxu0 %v2416_v3 }
  0x57   : > { %v1649_v12 = vmul.f32 0.70710677, %v2031_v60 }
  0x58   : > { %2187 = vmatpush3.bf16.msra.mxu1 %v2415_v2 }
  0x59   : > { %2267 = vmatpush3.bf16.msra.mxu0 %v2416_v3  ;;  %2188 = vmatprep.subr.bf16.mxu1 %v2417_v4 }
  0x5a   : > { %2268 = vmatprep.subr.bf16.mxu0 %v2418_v5 }
  0x5c   : > { %2189 = vmatpush3.bf16.msra.mxu1 %v2417_v4  ;;  %v1650_v4 = vmul.f32 0.70710677, %v2034_v55 }
  0x5d   : > { %2269 = vmatpush3.bf16.msra.mxu0 %v2418_v5  ;;  %2190 = vmatprep.subr.bf16.mxu1 %v2419_v6 }
  0x5e   : > { %2270 = vmatprep.subr.bf16.mxu0 %v2420_v7 }
  0x60   : > { %2191 = vmatpush3.bf16.msra.mxu1 %v2419_v6 }
  0x61   : > { %2271 = vmatpush3.bf16.msra.mxu0 %v2420_v7  ;;  %2192 = vmatprep.subr.bf16.mxu1 %v2421_v8  ;;  %v1651_v7 = vmul.f32 0.70710677, %v2035_v57 }
  0x62   : > { %2272 = vmatprep.subr.bf16.mxu0 %v2422_v10 }
  0x64   : > { %2193 = vmatpush3.bf16.msra.mxu1 %v2421_v8  ;;  %v1648_v8 = vmul.f32 0.70710677, %v2030_v34 }
  0x65   : > { %2273 = vmatpush3.bf16.msra.mxu0 %v2422_v10  ;;  %2198 = vmatprep.subr.bf16.mxu1 %v2423_v19 }
  0x66   : > { %2278 = vmatprep.subr.bf16.mxu0 %v2424_v21 }
  0x67   : > { %2195 = vmatmul.mubr.bf16.vlgmr.msra.gmra.mrb[0].mxu1 %v702_v23 }
  0x68   : > { %2199 = vmatpush3.bf16.msra.mxu1 %v2423_v19  ;;  %2275 = vmatmul.mubr.bf16.vlgmr.msra.gmra.mrb[0].mxu0 %v1233_v24 }
  0x69   : > { %2279 = vmatpush3.bf16.msra.mxu0 %v2424_v21  ;;  %2200 = vmatprep.subr.bf16.mxu1 %v2425_v25 }
  0x6a   : > { %2280 = vmatprep.subr.bf16.mxu0 %v2426_v26  ;;  %2214 = vmatprep.mubr.bf16.mxu1 %v834_v27 }
  0x6b   : > { %2294 = vmatprep.mubr.bf16.mxu0 %v1365_v28 }
  0x6c   : > { %2201 = vmatpush3.bf16.msra.mxu1 %v2425_v25 }
  0x6d   : > { %2281 = vmatpush3.bf16.msra.mxu0 %v2426_v26  ;;  %2202 = vmatprep.subr.bf16.mxu1 %v2427_v35 }
  0x6e   : > { %2282 = vmatprep.subr.bf16.mxu0 %v2428_v29 }
  0x70   : > { %2203 = vmatpush3.bf16.msra.mxu1 %v2427_v35 }
  0x71   : > { %2283 = vmatpush3.bf16.msra.mxu0 %v2428_v29  ;;  %2204 = vmatprep.subr.bf16.mxu1 %v2429_v58 }
  0x72   : > { %2284 = vmatprep.subr.bf16.mxu0 %v2430_v62 }
  0x74   : > { %2205 = vmatpush3.bf16.msra.mxu1 %v2429_v58 }
  0x75   : > { %2285 = vmatpush3.bf16.msra.mxu0 %v2430_v62  ;;  %2206 = vmatprep.subr.bf16.mxu1 %v2431_v0 }
  0x76   : > { %2286 = vmatprep.subr.bf16.mxu0 %v2432_v11 }
  0x78   : > { %2207 = vmatpush3.bf16.msra.mxu1 %v2431_v0 }
  0x79   : > { %2287 = vmatpush3.bf16.msra.mxu0 %v2432_v11  ;;  %2208 = vmatprep.subr.bf16.mxu1 %v2433_v30 }
  0x7a   : > { %2288 = vmatprep.subr.bf16.mxu0 %v2434_v31 }
  0x7c   : > { %2209 = vmatpush3.bf16.msra.mxu1 %v2433_v30 }
  0x7d   : > { %2289 = vmatpush3.bf16.msra.mxu0 %v2434_v31  ;;  %2210 = vmatprep.subr.bf16.mxu1 %v2435_v32 }
  0x7e   : > { %2290 = vmatprep.subr.bf16.mxu0 %v2436_v33 }
  0x80   : > { %2211 = vmatpush3.bf16.msra.mxu1 %v2435_v32 }
  0x81   : > { %2291 = vmatpush3.bf16.msra.mxu0 %v2436_v33  ;;  %2212 = vmatprep.subr.bf16.mxu1 %v2437_v36 }
  0x82   : > { %2292 = vmatprep.subr.bf16.mxu0 %v2438_v37 }
  0x84   : > { %2213 = vmatpush3.bf16.msra.mxu1 %v2437_v36 }
  0x85   : > { %2293 = vmatpush3.bf16.msra.mxu0 %v2438_v37 }
  0x86   : > { %2298 = vmatprep.subr.bf16.mxu0 %v2439_v38 }
  0x87   : > { %2215 = vmatmul.mubr.bf16.vlgmr.msra.gmra.mrb[0].mxu1 %v835_v22  ;;  %v2445_v22 = vld [vmem:[%s2845_s1 + $0x230] sm:$0xff]  }
  0x88   : > { %2295 = vmatmul.mubr.bf16.vlgmr.msra.gmra.mrb[0].mxu0 %v1366_v39 }
  0x89   : > { %2299 = vmatpush3.bf16.msra.mxu0 %v2439_v38  ;;  %2314 = vmatprep.mubr.bf16.mxu0 %v1497_v40 }
  0x8a   : > { %2300 = vmatprep.subr.bf16.mxu0 %v2440_v41 }
  0x8d   : > { %2301 = vmatpush3.bf16.msra.mxu0 %v2440_v41 }
  0x8e   : > { %2302 = vmatprep.subr.bf16.mxu0 %v2441_v15 }
  0x91   : > { %2303 = vmatpush3.bf16.msra.mxu0 %v2441_v15 }
  0x92   : > { %2304 = vmatprep.subr.bf16.mxu0 %v2442_v42 }
  0x95   : > { %2305 = vmatpush3.bf16.msra.mxu0 %v2442_v42 }
  0x96   : > { %2306 = vmatprep.subr.bf16.mxu0 %v2443_v16 }
  0x99   : > { %2307 = vmatpush3.bf16.msra.mxu0 %v2443_v16 }
  0x9a   : > { %2308 = vmatprep.subr.bf16.mxu0 %v2444_v20 }
  0x9d   : > { %2309 = vmatpush3.bf16.msra.mxu0 %v2444_v20 }
  0x9e   : > { %2310 = vmatprep.subr.bf16.mxu0 %v2445_v22 }
  0xa1   : > { %2311 = vmatpush3.bf16.msra.mxu0 %v2445_v22 }
  0xa2   : > { %2312 = vmatprep.subr.bf16.mxu0 %v2446_v43 }
  0xa5   : > { %2313 = vmatpush3.bf16.msra.mxu0 %v2446_v43 }
  0xa8   : > { %2315 = vmatmul.mubr.bf16.vlgmr.msra.gmra.mrb[0].mxu0 %v1498_v45 }
 0x15a   : > { %v2216_v46 = vpop.f32.mrb[0].mxu1 }
 0x15b   : > { %v935_v47 = vpop.f32.mrb[1].mxu1 }
 0x15c   : > { %v2217_v48 = vpop.f32.mrb[2].mxu1 }
 0x15d   : > { %v938_v49 = vpop.f32.mrb[3].mxu1 }
 0x17b   : > { %v2316_v52 = vpop.f32.mrb[0].mxu0 }
 0x17c   : > { %v2318_v54 = vadd.f32 %v2316_v52, %v2216_v46  ;;  %v1598_v56 = vpop.f32.mrb[1].mxu0 }
 0x17d   : > { %v2319_v18 = vadd.f32 %v1598_v56, %v935_v47  ;;  %v2317_v59 = vpop.f32.mrb[2].mxu0 }
 0x17e   : > { %v1638_v61 = vadd.f32 %v2318_v54, %v2015_v53  ;;  %v2320_v63 = vadd.f32 %v2317_v59, %v2217_v48  ;;  %v1601_v1 = vpop.f32.mrb[3].mxu0 }
 0x17f   : > { %v1636_v2 = vadd.f32 %v2319_v18, %v2015_v53  ;;  %v2321_v3 = vadd.f32 %v1601_v1, %v938_v49 }
 0x180   : > { %v1654_v5 = vmul.f32 0.70710677, %v1638_v61  ;;  %v1639_v6 = vadd.f32 %v2320_v63, %v2015_v53 }
 0x181   : > { %v1652_v9 = vmul.f32 0.70710677, %v1636_v2  ;;  %v1637_v10 = vadd.f32 %v2321_v3, %v2015_v53 }
 0x182   : > { %v1655_v13 = vmul.f32 0.70710677, %v1639_v6  ;;  %v1658_v17 = vadd.f32 %v1654_v5, %v1650_v4 }
 0x183   : > { %v1653_v14 = vmul.f32 0.70710677, %v1637_v10  ;;  %v1656_v21 = vadd.f32 %v1652_v9, %v1648_v8 }
 0x184   : > { %v1659_v19 = vadd.f32 %v1655_v13, %v1651_v7 }
 0x185   : > { %v1657_v23 = vadd.f32 %v1653_v14, %v1649_v12 }
 0x186   : > { %v2044_v24 = vpack.c.bf16 %v1659_v19, %v1658_v17 }
 0x187   : > { %v2039_v25 = vpack.c.bf16 %v1657_v23, %v1656_v21 }
 0x188   : > { %2047 = vst [vmem:[%s279_s24 + $0x8] sm:$0xff] %v2044_v24  }
 0x189   : > { %2040 = vst [vmem:[%s279_s24] sm:$0xff] %v2039_v25  }
 0x18a PF: > { %s14_s17 = sadd.s32 1, %s2469_s17   ;;  %s2849_s15 = smov %s2465_s16 }
 0x18b   : > { %p11_p5 = scmp.ge.s32.totalorder %s14_s17, 4   ;;  %s2850_s16 = smov %s2852_s18 }
 0x18d   :  { %13 = sbr.rel (!%p11_p5) target bundleno = 2 (0x2), region = 88 }

</bundles_post_ra>
